<compile_context>
chip_gen: v5e
topology: v5e:2x2
jax: 0.10.0
libtpu: 0.0.40
codegen_flags: <defaults>
</compile_context>

<pallas_src>
import functools

import jax
import jax.numpy as jnp
from jax.experimental import pallas as pl
from jax.experimental.pallas import tpu as pltpu


# --------------------------- fused conv3x3+ReLU + maxpool2x2 ------------------------

def _down_fused_kernel(xa_ref, xb_ref, w_ref, b_ref,
                       down_ref, pool_ref, idx_ref,
                       r0_ref, r1_ref, *, tile_h, width):
    TH, W = tile_h, width
    Wo = W // 2
    Cin = xa_ref.shape[3]
    Cout = w_ref.shape[2]
    i = pl.program_id(1)                                    # row-tile index

    # ---- halo assembly: TH padded rows of this tile + first 2 rows of the next ----
    # xa_ref: (1, TH, W+2, Cin), xb_ref: (1, 8, W+2, Cin)  (channels-last, padded)
    xfull = jnp.concatenate([xa_ref[0], xb_ref[0]], axis=0)  # (TH + 8, W + 2, Cin)

    # ---- implicit-GEMM conv: 9 shifted (TH*W, Cin) @ (Cin, Cout) dots (f32 acc) ----
    acc = jnp.zeros((TH * W, Cout), jnp.float32)
    for k in range(9):
        kh, kw = divmod(k, 3)
        patch = xfull[kh:kh + TH, kw:kw + W, :].reshape(TH * W, Cin)
        acc = acc + jnp.dot(patch, w_ref[k], preferred_element_type=jnp.float32)

    act = jnp.maximum(acc + b_ref[...], 0.0)                 # bias + ReLU
    a3 = act.reshape(TH, W, Cout)                            # (TH, W, Cout) tile view

    # ---- fused epilogue: NCHW `down` stores + 2x2 maxpool with flat argmax --------
    ow_iota = jax.lax.broadcasted_iota(jnp.int32, (Cout, Wo), 1)   # hoisted
    for oh in range(TH // 2):
        t0 = a3[2 * oh]                                      # (W, Cout)
        t1 = a3[2 * oh + 1]
        down_ref[0, :, 2 * oh, :] = t0.T                     # direct NCHW write
        down_ref[0, :, 2 * oh + 1, :] = t1.T

        # de-interleave even/odd columns with strided sublane reads via scratch
        r0_ref[...] = t0
        r1_ref[...] = t1
        v00 = r0_ref[pl.ds(0, Wo, 2), :]                     # (Wo, Cout)
        v01 = r0_ref[pl.ds(1, Wo, 2), :]
        v10 = r1_ref[pl.ds(0, Wo, 2), :]
        v11 = r1_ref[pl.ds(1, Wo, 2), :]

        # PyTorch tie-break: first max in window order (0,0),(0,1),(1,0),(1,1)
        best_v = v00
        best_o = jnp.zeros((Wo, Cout), jnp.float32)
        for v, off in ((v01, 1.0), (v10, float(W)), (v11, float(W + 1))):
            take = v > best_v                                # strict > : first max wins
            best_v = jnp.where(take, v, best_v)
            best_o = jnp.where(take, off, best_o)

        # flat index (PyTorch): (2*oh_global + r) * W + (2*ow + c)
        base = (i * TH + 2 * oh) * W + 2 * ow_iota           # (Cout, Wo) int32
        pool_ref[0, :, oh, :] = best_v.T
        idx_ref[0, :, oh, :] = base + best_o.T.astype(jnp.int32)


def down_forward(x, w, b, *, tile_h=16):
    """x: (N, Cin, H, W) f32; w: (Cout, Cin, 3, 3); b: (Cout,).

    Returns (outputs, down, indices, unpooled_shape) with PyTorch NCHW semantics.
    """
    N, Cin, H, W = x.shape
    Cout = w.shape[0]
    assert tile_h % 16 == 0, "tile_h must keep pooled row blocks 8-aligned"
    assert H % tile_h == 0 and W % 8 == 0, "H must divide tile_h; W must be 8-aligned"
    Ho, Wo = H // 2, W // 2
    grid_h = H // tile_h

    # Glue (cheap, input-sized only): NCHW -> channels-last + conv padding.  Rows get
    # 1 top + 7 bottom zero rows so the 8-row halo block (next tile) is always in-bounds.
    xt = jnp.transpose(x, (0, 2, 3, 1))                       # (N, H, W, Cin)
    xpad = jnp.pad(xt, ((0, 0), (1, 7), (1, 1), (0, 0)))      # (N, H+8, W+2, Cin)
    Hp, Wp = H + 8, W + 2

    # weights as (k, Cin, Cout) with k = kh*3 + kw (matches in-kernel tap order)
    w9 = jnp.transpose(w, (2, 3, 1, 0)).reshape(9, Cin, Cout)
    b2 = b.reshape(1, Cout)

    kernel = functools.partial(_down_fused_kernel, tile_h=tile_h, width=W)

    down, pooled, indices = pl.pallas_call(
        kernel,
        out_shape=(jax.ShapeDtypeStruct((N, Cout, H, W), jnp.float32),
                   jax.ShapeDtypeStruct((N, Cout, Ho, Wo), jnp.float32),
                   jax.ShapeDtypeStruct((N, Cout, Ho, Wo), jnp.int32)),
        grid=(N, grid_h),
        in_specs=[
            # main row tile of the padded input (channels-last)
            pl.BlockSpec((1, tile_h, Wp, Cin), lambda n, i: (n, i, 0, 0)),
            # 8-row halo block starting right after this tile (only first 2 rows used)
            pl.BlockSpec((1, 8, Wp, Cin),
                         lambda n, i: (n, (i + 1) * (tile_h // 8), 0, 0)),
            # weights / bias stay resident across the whole grid
            pl.BlockSpec((9, Cin, Cout), lambda n, i: (0, 0, 0)),
            pl.BlockSpec((1, Cout), lambda n, i: (0, 0)),
        ],
        out_specs=(
            pl.BlockSpec((1, Cout, tile_h, W), lambda n, i: (n, 0, i, 0)),
            pl.BlockSpec((1, Cout, tile_h // 2, Wo), lambda n, i: (n, 0, i, 0)),
            pl.BlockSpec((1, Cout, tile_h // 2, Wo), lambda n, i: (n, 0, i, 0)),
        ),
        scratch_shapes=[pltpu.VMEM((W, Cout), jnp.float32),   # even/odd row staging
                        pltpu.VMEM((W, Cout), jnp.float32)],
        compiler_params=pltpu.CompilerParams(
            dimension_semantics=("parallel", "parallel"),
            vmem_limit_bytes=48 * 1024 * 1024),
    )(xpad, xpad, w9, b2)

    # TODO(synk): PyTorch returns int64 pool indices; kept as int32 (x64 disabled by default).
    unpooled_shape = down.shape
    return pooled, down, indices, unpooled_shape


if __name__ == "__main__":
    N, Cin, Cout, H, W = 2, 4, 8, 32, 32

    key = jax.random.PRNGKey(0)
    kx, kw, kb = jax.random.split(key, 3)
    x = jax.random.normal(kx, (N, Cin, H, W), dtype=jnp.float32)
    w = jax.random.normal(kw, (Cout, Cin, 3, 3), dtype=jnp.float32) / (Cin * 9) ** 0.5
    b = 0.1 * jax.random.normal(kb, (Cout,), dtype=jnp.float32)

    outputs, down, indices, unpooled_shape = down_forward(x, w, b)
    jax.block_until_ready((outputs, down, indices))

    Ho, Wo = H // 2, W // 2
    assert outputs.shape == (N, Cout, Ho, Wo)
    assert down.shape == (N, Cout, H, W)
    assert indices.shape == (N, Cout, Ho, Wo)
    assert tuple(unpooled_shape) == (N, Cout, H, W)

    # conv+ReLU vs. XLA reference (kernel uses default MXU precision -> tolerance)
    ref_down = jax.nn.relu(
        jax.lax.conv_general_dilated(
            x, w, window_strides=(1, 1), padding=((1, 1), (1, 1)),
            dimension_numbers=("NCHW", "OIHW", "NCHW"),
            precision=jax.lax.Precision.HIGHEST)
        + b.reshape(1, Cout, 1, 1))
    assert jnp.allclose(down, ref_down, atol=5e-2, rtol=5e-2)

    # pooled values equal a plain 2x2 max-pool of the kernel's own `down`
    ref_pool = jax.lax.reduce_window(down, -jnp.inf, jax.lax.max,
                                     (1, 1, 2, 2), (1, 1, 2, 2), "VALID")
    assert jnp.array_equal(outputs, ref_pool)

    # gathering `down` at the returned flat indices reproduces the pooled values
    flat = down.reshape(N * Cout, H * W)
    gathered = jnp.take_along_axis(flat, indices.reshape(N * Cout, -1), axis=1)
    assert jnp.array_equal(gathered.reshape(outputs.shape), outputs)

    # argmax indices match PyTorch-style first-max-wins flat indices
    win = down.reshape(N, Cout, Ho, 2, Wo, 2).transpose(0, 1, 2, 4, 3, 5)
    win = win.reshape(N, Cout, Ho, Wo, 4)
    karg = jnp.argmax(win, axis=-1)               # first occurrence wins (as in kernel)
    rr, cc = karg // 2, karg % 2
    oh_g = jnp.arange(Ho).reshape(1, 1, Ho, 1)
    ow_g = jnp.arange(Wo).reshape(1, 1, 1, Wo)
    ref_idx = (2 * oh_g + rr) * W + (2 * ow_g + cc)
    assert jnp.array_equal(indices, ref_idx)

    print("KERNEL_OK")
</pallas_src>

<mosaic_0001>
module attributes {stable_mosaic.version = 11 : i64} {
  func.func @_down_fused_kernel(%arg0: i32, %arg1: i32, %arg2: memref<1x16x34x4xf32, #tpu.memory_space<vmem>>, %arg3: memref<1x8x34x4xf32, #tpu.memory_space<vmem>>, %arg4: memref<9x4x8xf32, #tpu.memory_space<vmem>>, %arg5: memref<1x8xf32, #tpu.memory_space<vmem>>, %arg6: memref<1x8x16x32xf32, #tpu.memory_space<vmem>>, %arg7: memref<1x8x8x16xf32, #tpu.memory_space<vmem>>, %arg8: memref<1x8x8x16xi32, #tpu.memory_space<vmem>>, %arg9: memref<32x8xf32, #tpu.memory_space<vmem>>, %arg10: memref<32x8xf32, #tpu.memory_space<vmem>>) attributes {dimension_semantics = [#tpu.dimension_semantics<parallel>, #tpu.dimension_semantics<parallel>], iteration_bounds = array<i64: 2, 2>, scalar_prefetch = 0 : i64, scratch_operands = 2 : i64, tpu.core_type = #tpu.core_type<tc>, window_params = [{transform_indices = @transform_0, window_bounds = array<i64: 1, 16, 34, 4>}, {transform_indices = @transform_1, window_bounds = array<i64: 1, 8, 34, 4>}, {pipeline_mode = #tpu.pipeline_mode<synchronous>, transform_indices = @transform_2, window_bounds = array<i64: 9, 4, 8>}, {pipeline_mode = #tpu.pipeline_mode<synchronous>, transform_indices = @transform_3, window_bounds = array<i64: 1, 8>}, {transform_indices = @transform_4, window_bounds = array<i64: 1, 8, 16, 32>}, {transform_indices = @transform_5, window_bounds = array<i64: 1, 8, 8, 16>}, {transform_indices = @transform_6, window_bounds = array<i64: 1, 8, 8, 16>}]} {
    %c0 = arith.constant 0 : index
    %c0_0 = arith.constant 0 : index
    %c0_1 = arith.constant 0 : index
    %c0_2 = arith.constant 0 : index
    %0 = vector.load %arg2[%c0, %c0_0, %c0_1, %c0_2] : memref<1x16x34x4xf32, #tpu.memory_space<vmem>>, vector<1x16x34x4xf32>
    %1 = vector.shape_cast %0 : vector<1x16x34x4xf32> to vector<16x34x4xf32>
    %c0_3 = arith.constant 0 : index
    %c0_4 = arith.constant 0 : index
    %c0_5 = arith.constant 0 : index
    %c0_6 = arith.constant 0 : index
    %2 = vector.load %arg3[%c0_3, %c0_4, %c0_5, %c0_6] : memref<1x8x34x4xf32, #tpu.memory_space<vmem>>, vector<1x8x34x4xf32>
    %3 = vector.shape_cast %2 : vector<1x8x34x4xf32> to vector<8x34x4xf32>
    %4 = tpu.concatenate %1, %3 in 0 : vector<16x34x4xf32>, vector<8x34x4xf32> -> vector<24x34x4xf32>
    %cst = arith.constant 0.000000e+00 : f32
    %5 = vector.broadcast %cst : f32 to vector<512x8xf32>
    %6 = vector.extract_strided_slice %4 {offsets = [0, 0, 0], sizes = [16, 32, 4], strides = [1, 1, 1]} : vector<24x34x4xf32> to vector<16x32x4xf32>
    %7 = vector.shape_cast %6 : vector<16x32x4xf32> to vector<512x4xf32>
    %c0_7 = arith.constant 0 : index
    %c0_8 = arith.constant 0 : index
    %c0_9 = arith.constant 0 : index
    %8 = vector.load %arg4[%c0_7, %c0_8, %c0_9] : memref<9x4x8xf32, #tpu.memory_space<vmem>>, vector<1x4x8xf32>
    %9 = vector.shape_cast %8 : vector<1x4x8xf32> to vector<4x8xf32>
    %cst_10 = arith.constant dense<0.000000e+00> : vector<512x8xf32>
    %10 = tpu.matmul %7, %9, %cst_10 {dimension_numbers = #tpu.dot_dimension_numbers<[1], [0], [0], [1], [0, 0, 1, 1], [], []>} : vector<512x4xf32>, vector<4x8xf32>, vector<512x8xf32> -> vector<512x8xf32>
    %11 = arith.addf %5, %10 : vector<512x8xf32>
    %12 = vector.extract_strided_slice %4 {offsets = [0, 1, 0], sizes = [16, 32, 4], strides = [1, 1, 1]} : vector<24x34x4xf32> to vector<16x32x4xf32>
    %13 = vector.shape_cast %12 : vector<16x32x4xf32> to vector<512x4xf32>
    %c1 = arith.constant 1 : index
    %c0_11 = arith.constant 0 : index
    %c0_12 = arith.constant 0 : index
    %14 = vector.load %arg4[%c1, %c0_11, %c0_12] : memref<9x4x8xf32, #tpu.memory_space<vmem>>, vector<1x4x8xf32>
    %15 = vector.shape_cast %14 : vector<1x4x8xf32> to vector<4x8xf32>
    %cst_13 = arith.constant dense<0.000000e+00> : vector<512x8xf32>
    %16 = tpu.matmul %13, %15, %cst_13 {dimension_numbers = #tpu.dot_dimension_numbers<[1], [0], [0], [1], [0, 0, 1, 1], [], []>} : vector<512x4xf32>, vector<4x8xf32>, vector<512x8xf32> -> vector<512x8xf32>
    %17 = arith.addf %11, %16 : vector<512x8xf32>
    %18 = vector.extract_strided_slice %4 {offsets = [0, 2, 0], sizes = [16, 32, 4], strides = [1, 1, 1]} : vector<24x34x4xf32> to vector<16x32x4xf32>
    %19 = vector.shape_cast %18 : vector<16x32x4xf32> to vector<512x4xf32>
    %c2 = arith.constant 2 : index
    %c0_14 = arith.constant 0 : index
    %c0_15 = arith.constant 0 : index
    %20 = vector.load %arg4[%c2, %c0_14, %c0_15] : memref<9x4x8xf32, #tpu.memory_space<vmem>>, vector<1x4x8xf32>
    %21 = vector.shape_cast %20 : vector<1x4x8xf32> to vector<4x8xf32>
    %cst_16 = arith.constant dense<0.000000e+00> : vector<512x8xf32>
    %22 = tpu.matmul %19, %21, %cst_16 {dimension_numbers = #tpu.dot_dimension_numbers<[1], [0], [0], [1], [0, 0, 1, 1], [], []>} : vector<512x4xf32>, vector<4x8xf32>, vector<512x8xf32> -> vector<512x8xf32>
    %23 = arith.addf %17, %22 : vector<512x8xf32>
    %24 = vector.extract_strided_slice %4 {offsets = [1, 0, 0], sizes = [16, 32, 4], strides = [1, 1, 1]} : vector<24x34x4xf32> to vector<16x32x4xf32>
    %25 = vector.shape_cast %24 : vector<16x32x4xf32> to vector<512x4xf32>
    %c3 = arith.constant 3 : index
    %c0_17 = arith.constant 0 : index
    %c0_18 = arith.constant 0 : index
    %26 = vector.load %arg4[%c3, %c0_17, %c0_18] : memref<9x4x8xf32, #tpu.memory_space<vmem>>, vector<1x4x8xf32>
    %27 = vector.shape_cast %26 : vector<1x4x8xf32> to vector<4x8xf32>
    %cst_19 = arith.constant dense<0.000000e+00> : vector<512x8xf32>
    %28 = tpu.matmul %25, %27, %cst_19 {dimension_numbers = #tpu.dot_dimension_numbers<[1], [0], [0], [1], [0, 0, 1, 1], [], []>} : vector<512x4xf32>, vector<4x8xf32>, vector<512x8xf32> -> vector<512x8xf32>
    %29 = arith.addf %23, %28 : vector<512x8xf32>
    %30 = vector.extract_strided_slice %4 {offsets = [1, 1, 0], sizes = [16, 32, 4], strides = [1, 1, 1]} : vector<24x34x4xf32> to vector<16x32x4xf32>
    %31 = vector.shape_cast %30 : vector<16x32x4xf32> to vector<512x4xf32>
    %c4 = arith.constant 4 : index
    %c0_20 = arith.constant 0 : index
    %c0_21 = arith.constant 0 : index
    %32 = vector.load %arg4[%c4, %c0_20, %c0_21] : memref<9x4x8xf32, #tpu.memory_space<vmem>>, vector<1x4x8xf32>
    %33 = vector.shape_cast %32 : vector<1x4x8xf32> to vector<4x8xf32>
    %cst_22 = arith.constant dense<0.000000e+00> : vector<512x8xf32>
    %34 = tpu.matmul %31, %33, %cst_22 {dimension_numbers = #tpu.dot_dimension_numbers<[1], [0], [0], [1], [0, 0, 1, 1], [], []>} : vector<512x4xf32>, vector<4x8xf32>, vector<512x8xf32> -> vector<512x8xf32>
    %35 = arith.addf %29, %34 : vector<512x8xf32>
    %36 = vector.extract_strided_slice %4 {offsets = [1, 2, 0], sizes = [16, 32, 4], strides = [1, 1, 1]} : vector<24x34x4xf32> to vector<16x32x4xf32>
    %37 = vector.shape_cast %36 : vector<16x32x4xf32> to vector<512x4xf32>
    %c5 = arith.constant 5 : index
    %c0_23 = arith.constant 0 : index
    %c0_24 = arith.constant 0 : index
    %38 = vector.load %arg4[%c5, %c0_23, %c0_24] : memref<9x4x8xf32, #tpu.memory_space<vmem>>, vector<1x4x8xf32>
    %39 = vector.shape_cast %38 : vector<1x4x8xf32> to vector<4x8xf32>
    %cst_25 = arith.constant dense<0.000000e+00> : vector<512x8xf32>
    %40 = tpu.matmul %37, %39, %cst_25 {dimension_numbers = #tpu.dot_dimension_numbers<[1], [0], [0], [1], [0, 0, 1, 1], [], []>} : vector<512x4xf32>, vector<4x8xf32>, vector<512x8xf32> -> vector<512x8xf32>
    %41 = arith.addf %35, %40 : vector<512x8xf32>
    %42 = vector.extract_strided_slice %4 {offsets = [2, 0, 0], sizes = [16, 32, 4], strides = [1, 1, 1]} : vector<24x34x4xf32> to vector<16x32x4xf32>
    %43 = vector.shape_cast %42 : vector<16x32x4xf32> to vector<512x4xf32>
    %c6 = arith.constant 6 : index
    %c0_26 = arith.constant 0 : index
    %c0_27 = arith.constant 0 : index
    %44 = vector.load %arg4[%c6, %c0_26, %c0_27] : memref<9x4x8xf32, #tpu.memory_space<vmem>>, vector<1x4x8xf32>
    %45 = vector.shape_cast %44 : vector<1x4x8xf32> to vector<4x8xf32>
    %cst_28 = arith.constant dense<0.000000e+00> : vector<512x8xf32>
    %46 = tpu.matmul %43, %45, %cst_28 {dimension_numbers = #tpu.dot_dimension_numbers<[1], [0], [0], [1], [0, 0, 1, 1], [], []>} : vector<512x4xf32>, vector<4x8xf32>, vector<512x8xf32> -> vector<512x8xf32>
    %47 = arith.addf %41, %46 : vector<512x8xf32>
    %48 = vector.extract_strided_slice %4 {offsets = [2, 1, 0], sizes = [16, 32, 4], strides = [1, 1, 1]} : vector<24x34x4xf32> to vector<16x32x4xf32>
    %49 = vector.shape_cast %48 : vector<16x32x4xf32> to vector<512x4xf32>
    %c7 = arith.constant 7 : index
    %c0_29 = arith.constant 0 : index
    %c0_30 = arith.constant 0 : index
    %50 = vector.load %arg4[%c7, %c0_29, %c0_30] : memref<9x4x8xf32, #tpu.memory_space<vmem>>, vector<1x4x8xf32>
    %51 = vector.shape_cast %50 : vector<1x4x8xf32> to vector<4x8xf32>
    %cst_31 = arith.constant dense<0.000000e+00> : vector<512x8xf32>
    %52 = tpu.matmul %49, %51, %cst_31 {dimension_numbers = #tpu.dot_dimension_numbers<[1], [0], [0], [1], [0, 0, 1, 1], [], []>} : vector<512x4xf32>, vector<4x8xf32>, vector<512x8xf32> -> vector<512x8xf32>
    %53 = arith.addf %47, %52 : vector<512x8xf32>
    %54 = vector.extract_strided_slice %4 {offsets = [2, 2, 0], sizes = [16, 32, 4], strides = [1, 1, 1]} : vector<24x34x4xf32> to vector<16x32x4xf32>
    %55 = vector.shape_cast %54 : vector<16x32x4xf32> to vector<512x4xf32>
    %c8 = arith.constant 8 : index
    %c0_32 = arith.constant 0 : index
    %c0_33 = arith.constant 0 : index
    %56 = vector.load %arg4[%c8, %c0_32, %c0_33] : memref<9x4x8xf32, #tpu.memory_space<vmem>>, vector<1x4x8xf32>
    %57 = vector.shape_cast %56 : vector<1x4x8xf32> to vector<4x8xf32>
    %cst_34 = arith.constant dense<0.000000e+00> : vector<512x8xf32>
    %58 = tpu.matmul %55, %57, %cst_34 {dimension_numbers = #tpu.dot_dimension_numbers<[1], [0], [0], [1], [0, 0, 1, 1], [], []>} : vector<512x4xf32>, vector<4x8xf32>, vector<512x8xf32> -> vector<512x8xf32>
    %59 = arith.addf %53, %58 : vector<512x8xf32>
    %c0_35 = arith.constant 0 : index
    %c0_36 = arith.constant 0 : index
    %60 = vector.load %arg5[%c0_35, %c0_36] : memref<1x8xf32, #tpu.memory_space<vmem>>, vector<1x8xf32>
    %61 = vector.broadcast %60 : vector<1x8xf32> to vector<512x8xf32>
    %62 = arith.addf %59, %61 : vector<512x8xf32>
    %cst_37 = arith.constant 0.000000e+00 : f32
    %63 = vector.broadcast %cst_37 : f32 to vector<512x8xf32>
    %64 = arith.maximumf %62, %63 : vector<512x8xf32>
    %65 = vector.shape_cast %64 : vector<512x8xf32> to vector<16x32x8xf32>
    %66 = tpu.iota {dimensions = array<i32: 1>} : vector<8x16xi32>
    %67 = vector.extract_strided_slice %65 {offsets = [0, 0, 0], sizes = [1, 32, 8], strides = [1, 1, 1]} : vector<16x32x8xf32> to vector<1x32x8xf32>
    %68 = vector.shape_cast %67 : vector<1x32x8xf32> to vector<32x8xf32>
    %69 = vector.extract_strided_slice %65 {offsets = [1, 0, 0], sizes = [1, 32, 8], strides = [1, 1, 1]} : vector<16x32x8xf32> to vector<1x32x8xf32>
    %70 = vector.shape_cast %69 : vector<1x32x8xf32> to vector<32x8xf32>
    %71 = tpu.transpose %68, [1, 0] : vector<32x8xf32> -> vector<8x32xf32>
    %c0_38 = arith.constant 0 : index
    %c0_39 = arith.constant 0 : index
    %c0_40 = arith.constant 0 : index
    %c0_41 = arith.constant 0 : index
    %72 = vector.load %arg6[%c0_38, %c0_39, %c0_40, %c0_41] : memref<1x8x16x32xf32, #tpu.memory_space<vmem>>, vector<1x8x1x32xf32>
    %73 = vector.shape_cast %72 : vector<1x8x1x32xf32> to vector<8x32xf32>
    %74 = vector.shape_cast %71 : vector<8x32xf32> to vector<1x8x1x32xf32>
    tpu.vector_store %arg6[%c0_38, %c0_39, %c0_40, %c0_41], %74 {strides = array<i32>} : memref<1x8x16x32xf32, #tpu.memory_space<vmem>>, vector<1x8x1x32xf32>,
    %75 = tpu.transpose %70, [1, 0] : vector<32x8xf32> -> vector<8x32xf32>
    %c0_42 = arith.constant 0 : index
    %c0_43 = arith.constant 0 : index
    %c1_44 = arith.constant 1 : index
    %c0_45 = arith.constant 0 : index
    %76 = vector.load %arg6[%c0_42, %c0_43, %c1_44, %c0_45] : memref<1x8x16x32xf32, #tpu.memory_space<vmem>>, vector<1x8x1x32xf32>
    %77 = vector.shape_cast %76 : vector<1x8x1x32xf32> to vector<8x32xf32>
    %78 = vector.shape_cast %75 : vector<8x32xf32> to vector<1x8x1x32xf32>
    tpu.vector_store %arg6[%c0_42, %c0_43, %c1_44, %c0_45], %78 {strides = array<i32>} : memref<1x8x16x32xf32, #tpu.memory_space<vmem>>, vector<1x8x1x32xf32>,
    %c0_46 = arith.constant 0 : index
    %c0_47 = arith.constant 0 : index
    %79 = vector.load %arg9[%c0_46, %c0_47] : memref<32x8xf32, #tpu.memory_space<vmem>>, vector<32x8xf32>
    tpu.vector_store %arg9[%c0_46, %c0_47], %68 {strides = array<i32>} : memref<32x8xf32, #tpu.memory_space<vmem>>, vector<32x8xf32>,
    %c0_48 = arith.constant 0 : index
    %c0_49 = arith.constant 0 : index
    %80 = vector.load %arg10[%c0_48, %c0_49] : memref<32x8xf32, #tpu.memory_space<vmem>>, vector<32x8xf32>
    tpu.vector_store %arg10[%c0_48, %c0_49], %70 {strides = array<i32>} : memref<32x8xf32, #tpu.memory_space<vmem>>, vector<32x8xf32>,
    %c0_50 = arith.constant 0 : index
    %c0_51 = arith.constant 0 : index
    %81 = tpu.strided_load %arg9[%c0_50, %c0_51] {strides = array<i32: 2, 1>} : memref<32x8xf32, #tpu.memory_space<vmem>>, vector<16x8xf32>
    %c1_52 = arith.constant 1 : index
    %c0_53 = arith.constant 0 : index
    %82 = tpu.strided_load %arg9[%c1_52, %c0_53] {strides = array<i32: 2, 1>} : memref<32x8xf32, #tpu.memory_space<vmem>>, vector<16x8xf32>
    %c0_54 = arith.constant 0 : index
    %c0_55 = arith.constant 0 : index
    %83 = tpu.strided_load %arg10[%c0_54, %c0_55] {strides = array<i32: 2, 1>} : memref<32x8xf32, #tpu.memory_space<vmem>>, vector<16x8xf32>
    %c1_56 = arith.constant 1 : index
    %c0_57 = arith.constant 0 : index
    %84 = tpu.strided_load %arg10[%c1_56, %c0_57] {strides = array<i32: 2, 1>} : memref<32x8xf32, #tpu.memory_space<vmem>>, vector<16x8xf32>
    %cst_58 = arith.constant 0.000000e+00 : f32
    %85 = vector.broadcast %cst_58 : f32 to vector<16x8xf32>
    %86 = arith.cmpf ogt, %82, %81 : vector<16x8xf32>
    %87 = arith.select %86, %82, %81 : vector<16x8xi1>, vector<16x8xf32>
    %cst_59 = arith.constant 1.000000e+00 : f32
    %88 = vector.broadcast %cst_59 : f32 to vector<16x8xf32>
    %89 = arith.select %86, %88, %85 : vector<16x8xi1>, vector<16x8xf32>
    %90 = arith.cmpf ogt, %83, %87 : vector<16x8xf32>
    %91 = arith.select %90, %83, %87 : vector<16x8xi1>, vector<16x8xf32>
    %cst_60 = arith.constant 3.200000e+01 : f32
    %92 = vector.broadcast %cst_60 : f32 to vector<16x8xf32>
    %93 = arith.select %90, %92, %89 : vector<16x8xi1>, vector<16x8xf32>
    %94 = arith.cmpf ogt, %84, %91 : vector<16x8xf32>
    %95 = arith.select %94, %84, %91 : vector<16x8xi1>, vector<16x8xf32>
    %cst_61 = arith.constant 3.300000e+01 : f32
    %96 = vector.broadcast %cst_61 : f32 to vector<16x8xf32>
    %97 = arith.select %94, %96, %93 : vector<16x8xi1>, vector<16x8xf32>
    %c16_i32 = arith.constant 16 : i32
    %98 = arith.muli %arg1, %c16_i32 : i32
    %c0_i32 = arith.constant 0 : i32
    %99 = arith.addi %98, %c0_i32 : i32
    %c32_i32 = arith.constant 32 : i32
    %100 = arith.muli %99, %c32_i32 : i32
    %c2_i32 = arith.constant 2 : i32
    %101 = vector.broadcast %c2_i32 : i32 to vector<8x16xi32>
    %102 = arith.muli %101, %66 : vector<8x16xi32>
    %103 = vector.broadcast %100 : i32 to vector<8x16xi32>
    %104 = arith.addi %103, %102 : vector<8x16xi32>
    %105 = tpu.transpose %95, [1, 0] : vector<16x8xf32> -> vector<8x16xf32>
    %c0_62 = arith.constant 0 : index
    %c0_63 = arith.constant 0 : index
    %c0_64 = arith.constant 0 : index
    %c0_65 = arith.constant 0 : index
    %106 = vector.load %arg7[%c0_62, %c0_63, %c0_64, %c0_65] : memref<1x8x8x16xf32, #tpu.memory_space<vmem>>, vector<1x8x1x16xf32>
    %107 = vector.shape_cast %106 : vector<1x8x1x16xf32> to vector<8x16xf32>
    %108 = vector.shape_cast %105 : vector<8x16xf32> to vector<1x8x1x16xf32>
    tpu.vector_store %arg7[%c0_62, %c0_63, %c0_64, %c0_65], %108 {strides = array<i32>} : memref<1x8x8x16xf32, #tpu.memory_space<vmem>>, vector<1x8x1x16xf32>,
    %109 = tpu.transpose %97, [1, 0] : vector<16x8xf32> -> vector<8x16xf32>
    %110 = arith.fptosi %109 : vector<8x16xf32> to vector<8x16xi32>
    %111 = arith.addi %104, %110 : vector<8x16xi32>
    %c0_66 = arith.constant 0 : index
    %c0_67 = arith.constant 0 : index
    %c0_68 = arith.constant 0 : index
    %c0_69 = arith.constant 0 : index
    %112 = vector.load %arg8[%c0_66, %c0_67, %c0_68, %c0_69] : memref<1x8x8x16xi32, #tpu.memory_space<vmem>>, vector<1x8x1x16xi32>
    %113 = vector.shape_cast %112 : vector<1x8x1x16xi32> to vector<8x16xi32>
    %114 = vector.shape_cast %111 : vector<8x16xi32> to vector<1x8x1x16xi32>
    tpu.vector_store %arg8[%c0_66, %c0_67, %c0_68, %c0_69], %114 {strides = array<i32>} : memref<1x8x8x16xi32, #tpu.memory_space<vmem>>, vector<1x8x1x16xi32>,
    %115 = vector.extract_strided_slice %65 {offsets = [2, 0, 0], sizes = [1, 32, 8], strides = [1, 1, 1]} : vector<16x32x8xf32> to vector<1x32x8xf32>
    %116 = vector.shape_cast %115 : vector<1x32x8xf32> to vector<32x8xf32>
    %117 = vector.extract_strided_slice %65 {offsets = [3, 0, 0], sizes = [1, 32, 8], strides = [1, 1, 1]} : vector<16x32x8xf32> to vector<1x32x8xf32>
    %118 = vector.shape_cast %117 : vector<1x32x8xf32> to vector<32x8xf32>
    %119 = tpu.transpose %116, [1, 0] : vector<32x8xf32> -> vector<8x32xf32>
    %c0_70 = arith.constant 0 : index
    %c0_71 = arith.constant 0 : index
    %c2_72 = arith.constant 2 : index
    %c0_73 = arith.constant 0 : index
    %120 = vector.load %arg6[%c0_70, %c0_71, %c2_72, %c0_73] : memref<1x8x16x32xf32, #tpu.memory_space<vmem>>, vector<1x8x1x32xf32>
    %121 = vector.shape_cast %120 : vector<1x8x1x32xf32> to vector<8x32xf32>
    %122 = vector.shape_cast %119 : vector<8x32xf32> to vector<1x8x1x32xf32>
    tpu.vector_store %arg6[%c0_70, %c0_71, %c2_72, %c0_73], %122 {strides = array<i32>} : memref<1x8x16x32xf32, #tpu.memory_space<vmem>>, vector<1x8x1x32xf32>,
    %123 = tpu.transpose %118, [1, 0] : vector<32x8xf32> -> vector<8x32xf32>
    %c0_74 = arith.constant 0 : index
    %c0_75 = arith.constant 0 : index
    %c3_76 = arith.constant 3 : index
    %c0_77 = arith.constant 0 : index
    %124 = vector.load %arg6[%c0_74, %c0_75, %c3_76, %c0_77] : memref<1x8x16x32xf32, #tpu.memory_space<vmem>>, vector<1x8x1x32xf32>
    %125 = vector.shape_cast %124 : vector<1x8x1x32xf32> to vector<8x32xf32>
    %126 = vector.shape_cast %123 : vector<8x32xf32> to vector<1x8x1x32xf32>
    tpu.vector_store %arg6[%c0_74, %c0_75, %c3_76, %c0_77], %126 {strides = array<i32>} : memref<1x8x16x32xf32, #tpu.memory_space<vmem>>, vector<1x8x1x32xf32>,
    %c0_78 = arith.constant 0 : index
    %c0_79 = arith.constant 0 : index
    %127 = vector.load %arg9[%c0_78, %c0_79] : memref<32x8xf32, #tpu.memory_space<vmem>>, vector<32x8xf32>
    tpu.vector_store %arg9[%c0_78, %c0_79], %116 {strides = array<i32>} : memref<32x8xf32, #tpu.memory_space<vmem>>, vector<32x8xf32>,
    %c0_80 = arith.constant 0 : index
    %c0_81 = arith.constant 0 : index
    %128 = vector.load %arg10[%c0_80, %c0_81] : memref<32x8xf32, #tpu.memory_space<vmem>>, vector<32x8xf32>
    tpu.vector_store %arg10[%c0_80, %c0_81], %118 {strides = array<i32>} : memref<32x8xf32, #tpu.memory_space<vmem>>, vector<32x8xf32>,
    %c0_82 = arith.constant 0 : index
    %c0_83 = arith.constant 0 : index
    %129 = tpu.strided_load %arg9[%c0_82, %c0_83] {strides = array<i32: 2, 1>} : memref<32x8xf32, #tpu.memory_space<vmem>>, vector<16x8xf32>
    %c1_84 = arith.constant 1 : index
    %c0_85 = arith.constant 0 : index
    %130 = tpu.strided_load %arg9[%c1_84, %c0_85] {strides = array<i32: 2, 1>} : memref<32x8xf32, #tpu.memory_space<vmem>>, vector<16x8xf32>
    %c0_86 = arith.constant 0 : index
    %c0_87 = arith.constant 0 : index
    %131 = tpu.strided_load %arg10[%c0_86, %c0_87] {strides = array<i32: 2, 1>} : memref<32x8xf32, #tpu.memory_space<vmem>>, vector<16x8xf32>
    %c1_88 = arith.constant 1 : index
    %c0_89 = arith.constant 0 : index
    %132 = tpu.strided_load %arg10[%c1_88, %c0_89] {strides = array<i32: 2, 1>} : memref<32x8xf32, #tpu.memory_space<vmem>>, vector<16x8xf32>
    %cst_90 = arith.constant 0.000000e+00 : f32
    %133 = vector.broadcast %cst_90 : f32 to vector<16x8xf32>
    %134 = arith.cmpf ogt, %130, %129 : vector<16x8xf32>
    %135 = arith.select %134, %130, %129 : vector<16x8xi1>, vector<16x8xf32>
    %cst_91 = arith.constant 1.000000e+00 : f32
    %136 = vector.broadcast %cst_91 : f32 to vector<16x8xf32>
    %137 = arith.select %134, %136, %133 : vector<16x8xi1>, vector<16x8xf32>
    %138 = arith.cmpf ogt, %131, %135 : vector<16x8xf32>
    %139 = arith.select %138, %131, %135 : vector<16x8xi1>, vector<16x8xf32>
    %cst_92 = arith.constant 3.200000e+01 : f32
    %140 = vector.broadcast %cst_92 : f32 to vector<16x8xf32>
    %141 = arith.select %138, %140, %137 : vector<16x8xi1>, vector<16x8xf32>
    %142 = arith.cmpf ogt, %132, %139 : vector<16x8xf32>
    %143 = arith.select %142, %132, %139 : vector<16x8xi1>, vector<16x8xf32>
    %cst_93 = arith.constant 3.300000e+01 : f32
    %144 = vector.broadcast %cst_93 : f32 to vector<16x8xf32>
    %145 = arith.select %142, %144, %141 : vector<16x8xi1>, vector<16x8xf32>
    %c16_i32_94 = arith.constant 16 : i32
    %146 = arith.muli %arg1, %c16_i32_94 : i32
    %c2_i32_95 = arith.constant 2 : i32
    %147 = arith.addi %146, %c2_i32_95 : i32
    %c32_i32_96 = arith.constant 32 : i32
    %148 = arith.muli %147, %c32_i32_96 : i32
    %c2_i32_97 = arith.constant 2 : i32
    %149 = vector.broadcast %c2_i32_97 : i32 to vector<8x16xi32>
    %150 = arith.muli %149, %66 : vector<8x16xi32>
    %151 = vector.broadcast %148 : i32 to vector<8x16xi32>
    %152 = arith.addi %151, %150 : vector<8x16xi32>
    %153 = tpu.transpose %143, [1, 0] : vector<16x8xf32> -> vector<8x16xf32>
    %c0_98 = arith.constant 0 : index
    %c0_99 = arith.constant 0 : index
    %c1_100 = arith.constant 1 : index
    %c0_101 = arith.constant 0 : index
    %154 = vector.load %arg7[%c0_98, %c0_99, %c1_100, %c0_101] : memref<1x8x8x16xf32, #tpu.memory_space<vmem>>, vector<1x8x1x16xf32>
    %155 = vector.shape_cast %154 : vector<1x8x1x16xf32> to vector<8x16xf32>
    %156 = vector.shape_cast %153 : vector<8x16xf32> to vector<1x8x1x16xf32>
    tpu.vector_store %arg7[%c0_98, %c0_99, %c1_100, %c0_101], %156 {strides = array<i32>} : memref<1x8x8x16xf32, #tpu.memory_space<vmem>>, vector<1x8x1x16xf32>,
    %157 = tpu.transpose %145, [1, 0] : vector<16x8xf32> -> vector<8x16xf32>
    %158 = arith.fptosi %157 : vector<8x16xf32> to vector<8x16xi32>
    %159 = arith.addi %152, %158 : vector<8x16xi32>
    %c0_102 = arith.constant 0 : index
    %c0_103 = arith.constant 0 : index
    %c1_104 = arith.constant 1 : index
    %c0_105 = arith.constant 0 : index
    %160 = vector.load %arg8[%c0_102, %c0_103, %c1_104, %c0_105] : memref<1x8x8x16xi32, #tpu.memory_space<vmem>>, vector<1x8x1x16xi32>
    %161 = vector.shape_cast %160 : vector<1x8x1x16xi32> to vector<8x16xi32>
    %162 = vector.shape_cast %159 : vector<8x16xi32> to vector<1x8x1x16xi32>
    tpu.vector_store %arg8[%c0_102, %c0_103, %c1_104, %c0_105], %162 {strides = array<i32>} : memref<1x8x8x16xi32, #tpu.memory_space<vmem>>, vector<1x8x1x16xi32>,
    %163 = vector.extract_strided_slice %65 {offsets = [4, 0, 0], sizes = [1, 32, 8], strides = [1, 1, 1]} : vector<16x32x8xf32> to vector<1x32x8xf32>
    %164 = vector.shape_cast %163 : vector<1x32x8xf32> to vector<32x8xf32>
    %165 = vector.extract_strided_slice %65 {offsets = [5, 0, 0], sizes = [1, 32, 8], strides = [1, 1, 1]} : vector<16x32x8xf32> to vector<1x32x8xf32>
    %166 = vector.shape_cast %165 : vector<1x32x8xf32> to vector<32x8xf32>
    %167 = tpu.transpose %164, [1, 0] : vector<32x8xf32> -> vector<8x32xf32>
    %c0_106 = arith.constant 0 : index
    %c0_107 = arith.constant 0 : index
    %c4_108 = arith.constant 4 : index
    %c0_109 = arith.constant 0 : index
    %168 = vector.load %arg6[%c0_106, %c0_107, %c4_108, %c0_109] : memref<1x8x16x32xf32, #tpu.memory_space<vmem>>, vector<1x8x1x32xf32>
    %169 = vector.shape_cast %168 : vector<1x8x1x32xf32> to vector<8x32xf32>
    %170 = vector.shape_cast %167 : vector<8x32xf32> to vector<1x8x1x32xf32>
    tpu.vector_store %arg6[%c0_106, %c0_107, %c4_108, %c0_109], %170 {strides = array<i32>} : memref<1x8x16x32xf32, #tpu.memory_space<vmem>>, vector<1x8x1x32xf32>,
    %171 = tpu.transpose %166, [1, 0] : vector<32x8xf32> -> vector<8x32xf32>
    %c0_110 = arith.constant 0 : index
    %c0_111 = arith.constant 0 : index
    %c5_112 = arith.constant 5 : index
    %c0_113 = arith.constant 0 : index
    %172 = vector.load %arg6[%c0_110, %c0_111, %c5_112, %c0_113] : memref<1x8x16x32xf32, #tpu.memory_space<vmem>>, vector<1x8x1x32xf32>
    %173 = vector.shape_cast %172 : vector<1x8x1x32xf32> to vector<8x32xf32>
    %174 = vector.shape_cast %171 : vector<8x32xf32> to vector<1x8x1x32xf32>
    tpu.vector_store %arg6[%c0_110, %c0_111, %c5_112, %c0_113], %174 {strides = array<i32>} : memref<1x8x16x32xf32, #tpu.memory_space<vmem>>, vector<1x8x1x32xf32>,
    %c0_114 = arith.constant 0 : index
    %c0_115 = arith.constant 0 : index
    %175 = vector.load %arg9[%c0_114, %c0_115] : memref<32x8xf32, #tpu.memory_space<vmem>>, vector<32x8xf32>
    tpu.vector_store %arg9[%c0_114, %c0_115], %164 {strides = array<i32>} : memref<32x8xf32, #tpu.memory_space<vmem>>, vector<32x8xf32>,
    %c0_116 = arith.constant 0 : index
    %c0_117 = arith.constant 0 : index
    %176 = vector.load %arg10[%c0_116, %c0_117] : memref<32x8xf32, #tpu.memory_space<vmem>>, vector<32x8xf32>
    tpu.vector_store %arg10[%c0_116, %c0_117], %166 {strides = array<i32>} : memref<32x8xf32, #tpu.memory_space<vmem>>, vector<32x8xf32>,
    %c0_118 = arith.constant 0 : index
    %c0_119 = arith.constant 0 : index
    %177 = tpu.strided_load %arg9[%c0_118, %c0_119] {strides = array<i32: 2, 1>} : memref<32x8xf32, #tpu.memory_space<vmem>>, vector<16x8xf32>
    %c1_120 = arith.constant 1 : index
    %c0_121 = arith.constant 0 : index
    %178 = tpu.strided_load %arg9[%c1_120, %c0_121] {strides = array<i32: 2, 1>} : memref<32x8xf32, #tpu.memory_space<vmem>>, vector<16x8xf32>
    %c0_122 = arith.constant 0 : index
    %c0_123 = arith.constant 0 : index
    %179 = tpu.strided_load %arg10[%c0_122, %c0_123] {strides = array<i32: 2, 1>} : memref<32x8xf32, #tpu.memory_space<vmem>>, vector<16x8xf32>
    %c1_124 = arith.constant 1 : index
    %c0_125 = arith.constant 0 : index
    %180 = tpu.strided_load %arg10[%c1_124, %c0_125] {strides = array<i32: 2, 1>} : memref<32x8xf32, #tpu.memory_space<vmem>>, vector<16x8xf32>
    %cst_126 = arith.constant 0.000000e+00 : f32
    %181 = vector.broadcast %cst_126 : f32 to vector<16x8xf32>
    %182 = arith.cmpf ogt, %178, %177 : vector<16x8xf32>
    %183 = arith.select %182, %178, %177 : vector<16x8xi1>, vector<16x8xf32>
    %cst_127 = arith.constant 1.000000e+00 : f32
    %184 = vector.broadcast %cst_127 : f32 to vector<16x8xf32>
    %185 = arith.select %182, %184, %181 : vector<16x8xi1>, vector<16x8xf32>
    %186 = arith.cmpf ogt, %179, %183 : vector<16x8xf32>
    %187 = arith.select %186, %179, %183 : vector<16x8xi1>, vector<16x8xf32>
    %cst_128 = arith.constant 3.200000e+01 : f32
    %188 = vector.broadcast %cst_128 : f32 to vector<16x8xf32>
    %189 = arith.select %186, %188, %185 : vector<16x8xi1>, vector<16x8xf32>
    %190 = arith.cmpf ogt, %180, %187 : vector<16x8xf32>
    %191 = arith.select %190, %180, %187 : vector<16x8xi1>, vector<16x8xf32>
    %cst_129 = arith.constant 3.300000e+01 : f32
    %192 = vector.broadcast %cst_129 : f32 to vector<16x8xf32>
    %193 = arith.select %190, %192, %189 : vector<16x8xi1>, vector<16x8xf32>
    %c16_i32_130 = arith.constant 16 : i32
    %194 = arith.muli %arg1, %c16_i32_130 : i32
    %c4_i32 = arith.constant 4 : i32
    %195 = arith.addi %194, %c4_i32 : i32
    %c32_i32_131 = arith.constant 32 : i32
    %196 = arith.muli %195, %c32_i32_131 : i32
    %c2_i32_132 = arith.constant 2 : i32
    %197 = vector.broadcast %c2_i32_132 : i32 to vector<8x16xi32>
    %198 = arith.muli %197, %66 : vector<8x16xi32>
    %199 = vector.broadcast %196 : i32 to vector<8x16xi32>
    %200 = arith.addi %199, %198 : vector<8x16xi32>
    %201 = tpu.transpose %191, [1, 0] : vector<16x8xf32> -> vector<8x16xf32>
    %c0_133 = arith.constant 0 : index
    %c0_134 = arith.constant 0 : index
    %c2_135 = arith.constant 2 : index
    %c0_136 = arith.constant 0 : index
    %202 = vector.load %arg7[%c0_133, %c0_134, %c2_135, %c0_136] : memref<1x8x8x16xf32, #tpu.memory_space<vmem>>, vector<1x8x1x16xf32>
    %203 = vector.shape_cast %202 : vector<1x8x1x16xf32> to vector<8x16xf32>
    %204 = vector.shape_cast %201 : vector<8x16xf32> to vector<1x8x1x16xf32>
    tpu.vector_store %arg7[%c0_133, %c0_134, %c2_135, %c0_136], %204 {strides = array<i32>} : memref<1x8x8x16xf32, #tpu.memory_space<vmem>>, vector<1x8x1x16xf32>,
    %205 = tpu.transpose %193, [1, 0] : vector<16x8xf32> -> vector<8x16xf32>
    %206 = arith.fptosi %205 : vector<8x16xf32> to vector<8x16xi32>
    %207 = arith.addi %200, %206 : vector<8x16xi32>
    %c0_137 = arith.constant 0 : index
    %c0_138 = arith.constant 0 : index
    %c2_139 = arith.constant 2 : index
    %c0_140 = arith.constant 0 : index
    %208 = vector.load %arg8[%c0_137, %c0_138, %c2_139, %c0_140] : memref<1x8x8x16xi32, #tpu.memory_space<vmem>>, vector<1x8x1x16xi32>
    %209 = vector.shape_cast %208 : vector<1x8x1x16xi32> to vector<8x16xi32>
    %210 = vector.shape_cast %207 : vector<8x16xi32> to vector<1x8x1x16xi32>
    tpu.vector_store %arg8[%c0_137, %c0_138, %c2_139, %c0_140], %210 {strides = array<i32>} : memref<1x8x8x16xi32, #tpu.memory_space<vmem>>, vector<1x8x1x16xi32>,
    %211 = vector.extract_strided_slice %65 {offsets = [6, 0, 0], sizes = [1, 32, 8], strides = [1, 1, 1]} : vector<16x32x8xf32> to vector<1x32x8xf32>
    %212 = vector.shape_cast %211 : vector<1x32x8xf32> to vector<32x8xf32>
    %213 = vector.extract_strided_slice %65 {offsets = [7, 0, 0], sizes = [1, 32, 8], strides = [1, 1, 1]} : vector<16x32x8xf32> to vector<1x32x8xf32>
    %214 = vector.shape_cast %213 : vector<1x32x8xf32> to vector<32x8xf32>
    %215 = tpu.transpose %212, [1, 0] : vector<32x8xf32> -> vector<8x32xf32>
    %c0_141 = arith.constant 0 : index
    %c0_142 = arith.constant 0 : index
    %c6_143 = arith.constant 6 : index
    %c0_144 = arith.constant 0 : index
    %216 = vector.load %arg6[%c0_141, %c0_142, %c6_143, %c0_144] : memref<1x8x16x32xf32, #tpu.memory_space<vmem>>, vector<1x8x1x32xf32>
    %217 = vector.shape_cast %216 : vector<1x8x1x32xf32> to vector<8x32xf32>
    %218 = vector.shape_cast %215 : vector<8x32xf32> to vector<1x8x1x32xf32>
    tpu.vector_store %arg6[%c0_141, %c0_142, %c6_143, %c0_144], %218 {strides = array<i32>} : memref<1x8x16x32xf32, #tpu.memory_space<vmem>>, vector<1x8x1x32xf32>,
    %219 = tpu.transpose %214, [1, 0] : vector<32x8xf32> -> vector<8x32xf32>
    %c0_145 = arith.constant 0 : index
    %c0_146 = arith.constant 0 : index
    %c7_147 = arith.constant 7 : index
    %c0_148 = arith.constant 0 : index
    %220 = vector.load %arg6[%c0_145, %c0_146, %c7_147, %c0_148] : memref<1x8x16x32xf32, #tpu.memory_space<vmem>>, vector<1x8x1x32xf32>
    %221 = vector.shape_cast %220 : vector<1x8x1x32xf32> to vector<8x32xf32>
    %222 = vector.shape_cast %219 : vector<8x32xf32> to vector<1x8x1x32xf32>
    tpu.vector_store %arg6[%c0_145, %c0_146, %c7_147, %c0_148], %222 {strides = array<i32>} : memref<1x8x16x32xf32, #tpu.memory_space<vmem>>, vector<1x8x1x32xf32>,
    %c0_149 = arith.constant 0 : index
    %c0_150 = arith.constant 0 : index
    %223 = vector.load %arg9[%c0_149, %c0_150] : memref<32x8xf32, #tpu.memory_space<vmem>>, vector<32x8xf32>
    tpu.vector_store %arg9[%c0_149, %c0_150], %212 {strides = array<i32>} : memref<32x8xf32, #tpu.memory_space<vmem>>, vector<32x8xf32>,
    %c0_151 = arith.constant 0 : index
    %c0_152 = arith.constant 0 : index
    %224 = vector.load %arg10[%c0_151, %c0_152] : memref<32x8xf32, #tpu.memory_space<vmem>>, vector<32x8xf32>
    tpu.vector_store %arg10[%c0_151, %c0_152], %214 {strides = array<i32>} : memref<32x8xf32, #tpu.memory_space<vmem>>, vector<32x8xf32>,
    %c0_153 = arith.constant 0 : index
    %c0_154 = arith.constant 0 : index
    %225 = tpu.strided_load %arg9[%c0_153, %c0_154] {strides = array<i32: 2, 1>} : memref<32x8xf32, #tpu.memory_space<vmem>>, vector<16x8xf32>
    %c1_155 = arith.constant 1 : index
    %c0_156 = arith.constant 0 : index
    %226 = tpu.strided_load %arg9[%c1_155, %c0_156] {strides = array<i32: 2, 1>} : memref<32x8xf32, #tpu.memory_space<vmem>>, vector<16x8xf32>
    %c0_157 = arith.constant 0 : index
    %c0_158 = arith.constant 0 : index
    %227 = tpu.strided_load %arg10[%c0_157, %c0_158] {strides = array<i32: 2, 1>} : memref<32x8xf32, #tpu.memory_space<vmem>>, vector<16x8xf32>
    %c1_159 = arith.constant 1 : index
    %c0_160 = arith.constant 0 : index
    %228 = tpu.strided_load %arg10[%c1_159, %c0_160] {strides = array<i32: 2, 1>} : memref<32x8xf32, #tpu.memory_space<vmem>>, vector<16x8xf32>
    %cst_161 = arith.constant 0.000000e+00 : f32
    %229 = vector.broadcast %cst_161 : f32 to vector<16x8xf32>
    %230 = arith.cmpf ogt, %226, %225 : vector<16x8xf32>
    %231 = arith.select %230, %226, %225 : vector<16x8xi1>, vector<16x8xf32>
    %cst_162 = arith.constant 1.000000e+00 : f32
    %232 = vector.broadcast %cst_162 : f32 to vector<16x8xf32>
    %233 = arith.select %230, %232, %229 : vector<16x8xi1>, vector<16x8xf32>
    %234 = arith.cmpf ogt, %227, %231 : vector<16x8xf32>
    %235 = arith.select %234, %227, %231 : vector<16x8xi1>, vector<16x8xf32>
    %cst_163 = arith.constant 3.200000e+01 : f32
    %236 = vector.broadcast %cst_163 : f32 to vector<16x8xf32>
    %237 = arith.select %234, %236, %233 : vector<16x8xi1>, vector<16x8xf32>
    %238 = arith.cmpf ogt, %228, %235 : vector<16x8xf32>
    %239 = arith.select %238, %228, %235 : vector<16x8xi1>, vector<16x8xf32>
    %cst_164 = arith.constant 3.300000e+01 : f32
    %240 = vector.broadcast %cst_164 : f32 to vector<16x8xf32>
    %241 = arith.select %238, %240, %237 : vector<16x8xi1>, vector<16x8xf32>
    %c16_i32_165 = arith.constant 16 : i32
    %242 = arith.muli %arg1, %c16_i32_165 : i32
    %c6_i32 = arith.constant 6 : i32
    %243 = arith.addi %242, %c6_i32 : i32
    %c32_i32_166 = arith.constant 32 : i32
    %244 = arith.muli %243, %c32_i32_166 : i32
    %c2_i32_167 = arith.constant 2 : i32
    %245 = vector.broadcast %c2_i32_167 : i32 to vector<8x16xi32>
    %246 = arith.muli %245, %66 : vector<8x16xi32>
    %247 = vector.broadcast %244 : i32 to vector<8x16xi32>
    %248 = arith.addi %247, %246 : vector<8x16xi32>
    %249 = tpu.transpose %239, [1, 0] : vector<16x8xf32> -> vector<8x16xf32>
    %c0_168 = arith.constant 0 : index
    %c0_169 = arith.constant 0 : index
    %c3_170 = arith.constant 3 : index
    %c0_171 = arith.constant 0 : index
    %250 = vector.load %arg7[%c0_168, %c0_169, %c3_170, %c0_171] : memref<1x8x8x16xf32, #tpu.memory_space<vmem>>, vector<1x8x1x16xf32>
    %251 = vector.shape_cast %250 : vector<1x8x1x16xf32> to vector<8x16xf32>
    %252 = vector.shape_cast %249 : vector<8x16xf32> to vector<1x8x1x16xf32>
    tpu.vector_store %arg7[%c0_168, %c0_169, %c3_170, %c0_171], %252 {strides = array<i32>} : memref<1x8x8x16xf32, #tpu.memory_space<vmem>>, vector<1x8x1x16xf32>,
    %253 = tpu.transpose %241, [1, 0] : vector<16x8xf32> -> vector<8x16xf32>
    %254 = arith.fptosi %253 : vector<8x16xf32> to vector<8x16xi32>
    %255 = arith.addi %248, %254 : vector<8x16xi32>
    %c0_172 = arith.constant 0 : index
    %c0_173 = arith.constant 0 : index
    %c3_174 = arith.constant 3 : index
    %c0_175 = arith.constant 0 : index
    %256 = vector.load %arg8[%c0_172, %c0_173, %c3_174, %c0_175] : memref<1x8x8x16xi32, #tpu.memory_space<vmem>>, vector<1x8x1x16xi32>
    %257 = vector.shape_cast %256 : vector<1x8x1x16xi32> to vector<8x16xi32>
    %258 = vector.shape_cast %255 : vector<8x16xi32> to vector<1x8x1x16xi32>
    tpu.vector_store %arg8[%c0_172, %c0_173, %c3_174, %c0_175], %258 {strides = array<i32>} : memref<1x8x8x16xi32, #tpu.memory_space<vmem>>, vector<1x8x1x16xi32>,
    %259 = vector.extract_strided_slice %65 {offsets = [8, 0, 0], sizes = [1, 32, 8], strides = [1, 1, 1]} : vector<16x32x8xf32> to vector<1x32x8xf32>
    %260 = vector.shape_cast %259 : vector<1x32x8xf32> to vector<32x8xf32>
    %261 = vector.extract_strided_slice %65 {offsets = [9, 0, 0], sizes = [1, 32, 8], strides = [1, 1, 1]} : vector<16x32x8xf32> to vector<1x32x8xf32>
    %262 = vector.shape_cast %261 : vector<1x32x8xf32> to vector<32x8xf32>
    %263 = tpu.transpose %260, [1, 0] : vector<32x8xf32> -> vector<8x32xf32>
    %c0_176 = arith.constant 0 : index
    %c0_177 = arith.constant 0 : index
    %c8_178 = arith.constant 8 : index
    %c0_179 = arith.constant 0 : index
    %264 = vector.load %arg6[%c0_176, %c0_177, %c8_178, %c0_179] : memref<1x8x16x32xf32, #tpu.memory_space<vmem>>, vector<1x8x1x32xf32>
    %265 = vector.shape_cast %264 : vector<1x8x1x32xf32> to vector<8x32xf32>
    %266 = vector.shape_cast %263 : vector<8x32xf32> to vector<1x8x1x32xf32>
    tpu.vector_store %arg6[%c0_176, %c0_177, %c8_178, %c0_179], %266 {strides = array<i32>} : memref<1x8x16x32xf32, #tpu.memory_space<vmem>>, vector<1x8x1x32xf32>,
    %267 = tpu.transpose %262, [1, 0] : vector<32x8xf32> -> vector<8x32xf32>
    %c0_180 = arith.constant 0 : index
    %c0_181 = arith.constant 0 : index
    %c9 = arith.constant 9 : index
    %c0_182 = arith.constant 0 : index
    %268 = vector.load %arg6[%c0_180, %c0_181, %c9, %c0_182] : memref<1x8x16x32xf32, #tpu.memory_space<vmem>>, vector<1x8x1x32xf32>
    %269 = vector.shape_cast %268 : vector<1x8x1x32xf32> to vector<8x32xf32>
    %270 = vector.shape_cast %267 : vector<8x32xf32> to vector<1x8x1x32xf32>
    tpu.vector_store %arg6[%c0_180, %c0_181, %c9, %c0_182], %270 {strides = array<i32>} : memref<1x8x16x32xf32, #tpu.memory_space<vmem>>, vector<1x8x1x32xf32>,
    %c0_183 = arith.constant 0 : index
    %c0_184 = arith.constant 0 : index
    %271 = vector.load %arg9[%c0_183, %c0_184] : memref<32x8xf32, #tpu.memory_space<vmem>>, vector<32x8xf32>
    tpu.vector_store %arg9[%c0_183, %c0_184], %260 {strides = array<i32>} : memref<32x8xf32, #tpu.memory_space<vmem>>, vector<32x8xf32>,
    %c0_185 = arith.constant 0 : index
    %c0_186 = arith.constant 0 : index
    %272 = vector.load %arg10[%c0_185, %c0_186] : memref<32x8xf32, #tpu.memory_space<vmem>>, vector<32x8xf32>
    tpu.vector_store %arg10[%c0_185, %c0_186], %262 {strides = array<i32>} : memref<32x8xf32, #tpu.memory_space<vmem>>, vector<32x8xf32>,
    %c0_187 = arith.constant 0 : index
    %c0_188 = arith.constant 0 : index
    %273 = tpu.strided_load %arg9[%c0_187, %c0_188] {strides = array<i32: 2, 1>} : memref<32x8xf32, #tpu.memory_space<vmem>>, vector<16x8xf32>
    %c1_189 = arith.constant 1 : index
    %c0_190 = arith.constant 0 : index
    %274 = tpu.strided_load %arg9[%c1_189, %c0_190] {strides = array<i32: 2, 1>} : memref<32x8xf32, #tpu.memory_space<vmem>>, vector<16x8xf32>
    %c0_191 = arith.constant 0 : index
    %c0_192 = arith.constant 0 : index
    %275 = tpu.strided_load %arg10[%c0_191, %c0_192] {strides = array<i32: 2, 1>} : memref<32x8xf32, #tpu.memory_space<vmem>>, vector<16x8xf32>
    %c1_193 = arith.constant 1 : index
    %c0_194 = arith.constant 0 : index
    %276 = tpu.strided_load %arg10[%c1_193, %c0_194] {strides = array<i32: 2, 1>} : memref<32x8xf32, #tpu.memory_space<vmem>>, vector<16x8xf32>
    %cst_195 = arith.constant 0.000000e+00 : f32
    %277 = vector.broadcast %cst_195 : f32 to vector<16x8xf32>
    %278 = arith.cmpf ogt, %274, %273 : vector<16x8xf32>
    %279 = arith.select %278, %274, %273 : vector<16x8xi1>, vector<16x8xf32>
    %cst_196 = arith.constant 1.000000e+00 : f32
    %280 = vector.broadcast %cst_196 : f32 to vector<16x8xf32>
    %281 = arith.select %278, %280, %277 : vector<16x8xi1>, vector<16x8xf32>
    %282 = arith.cmpf ogt, %275, %279 : vector<16x8xf32>
    %283 = arith.select %282, %275, %279 : vector<16x8xi1>, vector<16x8xf32>
    %cst_197 = arith.constant 3.200000e+01 : f32
    %284 = vector.broadcast %cst_197 : f32 to vector<16x8xf32>
    %285 = arith.select %282, %284, %281 : vector<16x8xi1>, vector<16x8xf32>
    %286 = arith.cmpf ogt, %276, %283 : vector<16x8xf32>
    %287 = arith.select %286, %276, %283 : vector<16x8xi1>, vector<16x8xf32>
    %cst_198 = arith.constant 3.300000e+01 : f32
    %288 = vector.broadcast %cst_198 : f32 to vector<16x8xf32>
    %289 = arith.select %286, %288, %285 : vector<16x8xi1>, vector<16x8xf32>
    %c16_i32_199 = arith.constant 16 : i32
    %290 = arith.muli %arg1, %c16_i32_199 : i32
    %c8_i32 = arith.constant 8 : i32
    %291 = arith.addi %290, %c8_i32 : i32
    %c32_i32_200 = arith.constant 32 : i32
    %292 = arith.muli %291, %c32_i32_200 : i32
    %c2_i32_201 = arith.constant 2 : i32
    %293 = vector.broadcast %c2_i32_201 : i32 to vector<8x16xi32>
    %294 = arith.muli %293, %66 : vector<8x16xi32>
    %295 = vector.broadcast %292 : i32 to vector<8x16xi32>
    %296 = arith.addi %295, %294 : vector<8x16xi32>
    %297 = tpu.transpose %287, [1, 0] : vector<16x8xf32> -> vector<8x16xf32>
    %c0_202 = arith.constant 0 : index
    %c0_203 = arith.constant 0 : index
    %c4_204 = arith.constant 4 : index
    %c0_205 = arith.constant 0 : index
    %298 = vector.load %arg7[%c0_202, %c0_203, %c4_204, %c0_205] : memref<1x8x8x16xf32, #tpu.memory_space<vmem>>, vector<1x8x1x16xf32>
    %299 = vector.shape_cast %298 : vector<1x8x1x16xf32> to vector<8x16xf32>
    %300 = vector.shape_cast %297 : vector<8x16xf32> to vector<1x8x1x16xf32>
    tpu.vector_store %arg7[%c0_202, %c0_203, %c4_204, %c0_205], %300 {strides = array<i32>} : memref<1x8x8x16xf32, #tpu.memory_space<vmem>>, vector<1x8x1x16xf32>,
    %301 = tpu.transpose %289, [1, 0] : vector<16x8xf32> -> vector<8x16xf32>
    %302 = arith.fptosi %301 : vector<8x16xf32> to vector<8x16xi32>
    %303 = arith.addi %296, %302 : vector<8x16xi32>
    %c0_206 = arith.constant 0 : index
    %c0_207 = arith.constant 0 : index
    %c4_208 = arith.constant 4 : index
    %c0_209 = arith.constant 0 : index
    %304 = vector.load %arg8[%c0_206, %c0_207, %c4_208, %c0_209] : memref<1x8x8x16xi32, #tpu.memory_space<vmem>>, vector<1x8x1x16xi32>
    %305 = vector.shape_cast %304 : vector<1x8x1x16xi32> to vector<8x16xi32>
    %306 = vector.shape_cast %303 : vector<8x16xi32> to vector<1x8x1x16xi32>
    tpu.vector_store %arg8[%c0_206, %c0_207, %c4_208, %c0_209], %306 {strides = array<i32>} : memref<1x8x8x16xi32, #tpu.memory_space<vmem>>, vector<1x8x1x16xi32>,
    %307 = vector.extract_strided_slice %65 {offsets = [10, 0, 0], sizes = [1, 32, 8], strides = [1, 1, 1]} : vector<16x32x8xf32> to vector<1x32x8xf32>
    %308 = vector.shape_cast %307 : vector<1x32x8xf32> to vector<32x8xf32>
    %309 = vector.extract_strided_slice %65 {offsets = [11, 0, 0], sizes = [1, 32, 8], strides = [1, 1, 1]} : vector<16x32x8xf32> to vector<1x32x8xf32>
    %310 = vector.shape_cast %309 : vector<1x32x8xf32> to vector<32x8xf32>
    %311 = tpu.transpose %308, [1, 0] : vector<32x8xf32> -> vector<8x32xf32>
    %c0_210 = arith.constant 0 : index
    %c0_211 = arith.constant 0 : index
    %c10 = arith.constant 10 : index
    %c0_212 = arith.constant 0 : index
    %312 = vector.load %arg6[%c0_210, %c0_211, %c10, %c0_212] : memref<1x8x16x32xf32, #tpu.memory_space<vmem>>, vector<1x8x1x32xf32>
    %313 = vector.shape_cast %312 : vector<1x8x1x32xf32> to vector<8x32xf32>
    %314 = vector.shape_cast %311 : vector<8x32xf32> to vector<1x8x1x32xf32>
    tpu.vector_store %arg6[%c0_210, %c0_211, %c10, %c0_212], %314 {strides = array<i32>} : memref<1x8x16x32xf32, #tpu.memory_space<vmem>>, vector<1x8x1x32xf32>,
    %315 = tpu.transpose %310, [1, 0] : vector<32x8xf32> -> vector<8x32xf32>
    %c0_213 = arith.constant 0 : index
    %c0_214 = arith.constant 0 : index
    %c11 = arith.constant 11 : index
    %c0_215 = arith.constant 0 : index
    %316 = vector.load %arg6[%c0_213, %c0_214, %c11, %c0_215] : memref<1x8x16x32xf32, #tpu.memory_space<vmem>>, vector<1x8x1x32xf32>
    %317 = vector.shape_cast %316 : vector<1x8x1x32xf32> to vector<8x32xf32>
    %318 = vector.shape_cast %315 : vector<8x32xf32> to vector<1x8x1x32xf32>
    tpu.vector_store %arg6[%c0_213, %c0_214, %c11, %c0_215], %318 {strides = array<i32>} : memref<1x8x16x32xf32, #tpu.memory_space<vmem>>, vector<1x8x1x32xf32>,
    %c0_216 = arith.constant 0 : index
    %c0_217 = arith.constant 0 : index
    %319 = vector.load %arg9[%c0_216, %c0_217] : memref<32x8xf32, #tpu.memory_space<vmem>>, vector<32x8xf32>
    tpu.vector_store %arg9[%c0_216, %c0_217], %308 {strides = array<i32>} : memref<32x8xf32, #tpu.memory_space<vmem>>, vector<32x8xf32>,
    %c0_218 = arith.constant 0 : index
    %c0_219 = arith.constant 0 : index
    %320 = vector.load %arg10[%c0_218, %c0_219] : memref<32x8xf32, #tpu.memory_space<vmem>>, vector<32x8xf32>
    tpu.vector_store %arg10[%c0_218, %c0_219], %310 {strides = array<i32>} : memref<32x8xf32, #tpu.memory_space<vmem>>, vector<32x8xf32>,
    %c0_220 = arith.constant 0 : index
    %c0_221 = arith.constant 0 : index
    %321 = tpu.strided_load %arg9[%c0_220, %c0_221] {strides = array<i32: 2, 1>} : memref<32x8xf32, #tpu.memory_space<vmem>>, vector<16x8xf32>
    %c1_222 = arith.constant 1 : index
    %c0_223 = arith.constant 0 : index
    %322 = tpu.strided_load %arg9[%c1_222, %c0_223] {strides = array<i32: 2, 1>} : memref<32x8xf32, #tpu.memory_space<vmem>>, vector<16x8xf32>
    %c0_224 = arith.constant 0 : index
    %c0_225 = arith.constant 0 : index
    %323 = tpu.strided_load %arg10[%c0_224, %c0_225] {strides = array<i32: 2, 1>} : memref<32x8xf32, #tpu.memory_space<vmem>>, vector<16x8xf32>
    %c1_226 = arith.constant 1 : index
    %c0_227 = arith.constant 0 : index
    %324 = tpu.strided_load %arg10[%c1_226, %c0_227] {strides = array<i32: 2, 1>} : memref<32x8xf32, #tpu.memory_space<vmem>>, vector<16x8xf32>
    %cst_228 = arith.constant 0.000000e+00 : f32
    %325 = vector.broadcast %cst_228 : f32 to vector<16x8xf32>
    %326 = arith.cmpf ogt, %322, %321 : vector<16x8xf32>
    %327 = arith.select %326, %322, %321 : vector<16x8xi1>, vector<16x8xf32>
    %cst_229 = arith.constant 1.000000e+00 : f32
    %328 = vector.broadcast %cst_229 : f32 to vector<16x8xf32>
    %329 = arith.select %326, %328, %325 : vector<16x8xi1>, vector<16x8xf32>
    %330 = arith.cmpf ogt, %323, %327 : vector<16x8xf32>
    %331 = arith.select %330, %323, %327 : vector<16x8xi1>, vector<16x8xf32>
    %cst_230 = arith.constant 3.200000e+01 : f32
    %332 = vector.broadcast %cst_230 : f32 to vector<16x8xf32>
    %333 = arith.select %330, %332, %329 : vector<16x8xi1>, vector<16x8xf32>
    %334 = arith.cmpf ogt, %324, %331 : vector<16x8xf32>
    %335 = arith.select %334, %324, %331 : vector<16x8xi1>, vector<16x8xf32>
    %cst_231 = arith.constant 3.300000e+01 : f32
    %336 = vector.broadcast %cst_231 : f32 to vector<16x8xf32>
    %337 = arith.select %334, %336, %333 : vector<16x8xi1>, vector<16x8xf32>
    %c16_i32_232 = arith.constant 16 : i32
    %338 = arith.muli %arg1, %c16_i32_232 : i32
    %c10_i32 = arith.constant 10 : i32
    %339 = arith.addi %338, %c10_i32 : i32
    %c32_i32_233 = arith.constant 32 : i32
    %340 = arith.muli %339, %c32_i32_233 : i32
    %c2_i32_234 = arith.constant 2 : i32
    %341 = vector.broadcast %c2_i32_234 : i32 to vector<8x16xi32>
    %342 = arith.muli %341, %66 : vector<8x16xi32>
    %343 = vector.broadcast %340 : i32 to vector<8x16xi32>
    %344 = arith.addi %343, %342 : vector<8x16xi32>
    %345 = tpu.transpose %335, [1, 0] : vector<16x8xf32> -> vector<8x16xf32>
    %c0_235 = arith.constant 0 : index
    %c0_236 = arith.constant 0 : index
    %c5_237 = arith.constant 5 : index
    %c0_238 = arith.constant 0 : index
    %346 = vector.load %arg7[%c0_235, %c0_236, %c5_237, %c0_238] : memref<1x8x8x16xf32, #tpu.memory_space<vmem>>, vector<1x8x1x16xf32>
    %347 = vector.shape_cast %346 : vector<1x8x1x16xf32> to vector<8x16xf32>
    %348 = vector.shape_cast %345 : vector<8x16xf32> to vector<1x8x1x16xf32>
    tpu.vector_store %arg7[%c0_235, %c0_236, %c5_237, %c0_238], %348 {strides = array<i32>} : memref<1x8x8x16xf32, #tpu.memory_space<vmem>>, vector<1x8x1x16xf32>,
    %349 = tpu.transpose %337, [1, 0] : vector<16x8xf32> -> vector<8x16xf32>
    %350 = arith.fptosi %349 : vector<8x16xf32> to vector<8x16xi32>
    %351 = arith.addi %344, %350 : vector<8x16xi32>
    %c0_239 = arith.constant 0 : index
    %c0_240 = arith.constant 0 : index
    %c5_241 = arith.constant 5 : index
    %c0_242 = arith.constant 0 : index
    %352 = vector.load %arg8[%c0_239, %c0_240, %c5_241, %c0_242] : memref<1x8x8x16xi32, #tpu.memory_space<vmem>>, vector<1x8x1x16xi32>
    %353 = vector.shape_cast %352 : vector<1x8x1x16xi32> to vector<8x16xi32>
    %354 = vector.shape_cast %351 : vector<8x16xi32> to vector<1x8x1x16xi32>
    tpu.vector_store %arg8[%c0_239, %c0_240, %c5_241, %c0_242], %354 {strides = array<i32>} : memref<1x8x8x16xi32, #tpu.memory_space<vmem>>, vector<1x8x1x16xi32>,
    %355 = vector.extract_strided_slice %65 {offsets = [12, 0, 0], sizes = [1, 32, 8], strides = [1, 1, 1]} : vector<16x32x8xf32> to vector<1x32x8xf32>
    %356 = vector.shape_cast %355 : vector<1x32x8xf32> to vector<32x8xf32>
    %357 = vector.extract_strided_slice %65 {offsets = [13, 0, 0], sizes = [1, 32, 8], strides = [1, 1, 1]} : vector<16x32x8xf32> to vector<1x32x8xf32>
    %358 = vector.shape_cast %357 : vector<1x32x8xf32> to vector<32x8xf32>
    %359 = tpu.transpose %356, [1, 0] : vector<32x8xf32> -> vector<8x32xf32>
    %c0_243 = arith.constant 0 : index
    %c0_244 = arith.constant 0 : index
    %c12 = arith.constant 12 : index
    %c0_245 = arith.constant 0 : index
    %360 = vector.load %arg6[%c0_243, %c0_244, %c12, %c0_245] : memref<1x8x16x32xf32, #tpu.memory_space<vmem>>, vector<1x8x1x32xf32>
    %361 = vector.shape_cast %360 : vector<1x8x1x32xf32> to vector<8x32xf32>
    %362 = vector.shape_cast %359 : vector<8x32xf32> to vector<1x8x1x32xf32>
    tpu.vector_store %arg6[%c0_243, %c0_244, %c12, %c0_245], %362 {strides = array<i32>} : memref<1x8x16x32xf32, #tpu.memory_space<vmem>>, vector<1x8x1x32xf32>,
    %363 = tpu.transpose %358, [1, 0] : vector<32x8xf32> -> vector<8x32xf32>
    %c0_246 = arith.constant 0 : index
    %c0_247 = arith.constant 0 : index
    %c13 = arith.constant 13 : index
    %c0_248 = arith.constant 0 : index
    %364 = vector.load %arg6[%c0_246, %c0_247, %c13, %c0_248] : memref<1x8x16x32xf32, #tpu.memory_space<vmem>>, vector<1x8x1x32xf32>
    %365 = vector.shape_cast %364 : vector<1x8x1x32xf32> to vector<8x32xf32>
    %366 = vector.shape_cast %363 : vector<8x32xf32> to vector<1x8x1x32xf32>
    tpu.vector_store %arg6[%c0_246, %c0_247, %c13, %c0_248], %366 {strides = array<i32>} : memref<1x8x16x32xf32, #tpu.memory_space<vmem>>, vector<1x8x1x32xf32>,
    %c0_249 = arith.constant 0 : index
    %c0_250 = arith.constant 0 : index
    %367 = vector.load %arg9[%c0_249, %c0_250] : memref<32x8xf32, #tpu.memory_space<vmem>>, vector<32x8xf32>
    tpu.vector_store %arg9[%c0_249, %c0_250], %356 {strides = array<i32>} : memref<32x8xf32, #tpu.memory_space<vmem>>, vector<32x8xf32>,
    %c0_251 = arith.constant 0 : index
    %c0_252 = arith.constant 0 : index
    %368 = vector.load %arg10[%c0_251, %c0_252] : memref<32x8xf32, #tpu.memory_space<vmem>>, vector<32x8xf32>
    tpu.vector_store %arg10[%c0_251, %c0_252], %358 {strides = array<i32>} : memref<32x8xf32, #tpu.memory_space<vmem>>, vector<32x8xf32>,
    %c0_253 = arith.constant 0 : index
    %c0_254 = arith.constant 0 : index
    %369 = tpu.strided_load %arg9[%c0_253, %c0_254] {strides = array<i32: 2, 1>} : memref<32x8xf32, #tpu.memory_space<vmem>>, vector<16x8xf32>
    %c1_255 = arith.constant 1 : index
    %c0_256 = arith.constant 0 : index
    %370 = tpu.strided_load %arg9[%c1_255, %c0_256] {strides = array<i32: 2, 1>} : memref<32x8xf32, #tpu.memory_space<vmem>>, vector<16x8xf32>
    %c0_257 = arith.constant 0 : index
    %c0_258 = arith.constant 0 : index
    %371 = tpu.strided_load %arg10[%c0_257, %c0_258] {strides = array<i32: 2, 1>} : memref<32x8xf32, #tpu.memory_space<vmem>>, vector<16x8xf32>
    %c1_259 = arith.constant 1 : index
    %c0_260 = arith.constant 0 : index
    %372 = tpu.strided_load %arg10[%c1_259, %c0_260] {strides = array<i32: 2, 1>} : memref<32x8xf32, #tpu.memory_space<vmem>>, vector<16x8xf32>
    %cst_261 = arith.constant 0.000000e+00 : f32
    %373 = vector.broadcast %cst_261 : f32 to vector<16x8xf32>
    %374 = arith.cmpf ogt, %370, %369 : vector<16x8xf32>
    %375 = arith.select %374, %370, %369 : vector<16x8xi1>, vector<16x8xf32>
    %cst_262 = arith.constant 1.000000e+00 : f32
    %376 = vector.broadcast %cst_262 : f32 to vector<16x8xf32>
    %377 = arith.select %374, %376, %373 : vector<16x8xi1>, vector<16x8xf32>
    %378 = arith.cmpf ogt, %371, %375 : vector<16x8xf32>
    %379 = arith.select %378, %371, %375 : vector<16x8xi1>, vector<16x8xf32>
    %cst_263 = arith.constant 3.200000e+01 : f32
    %380 = vector.broadcast %cst_263 : f32 to vector<16x8xf32>
    %381 = arith.select %378, %380, %377 : vector<16x8xi1>, vector<16x8xf32>
    %382 = arith.cmpf ogt, %372, %379 : vector<16x8xf32>
    %383 = arith.select %382, %372, %379 : vector<16x8xi1>, vector<16x8xf32>
    %cst_264 = arith.constant 3.300000e+01 : f32
    %384 = vector.broadcast %cst_264 : f32 to vector<16x8xf32>
    %385 = arith.select %382, %384, %381 : vector<16x8xi1>, vector<16x8xf32>
    %c16_i32_265 = arith.constant 16 : i32
    %386 = arith.muli %arg1, %c16_i32_265 : i32
    %c12_i32 = arith.constant 12 : i32
    %387 = arith.addi %386, %c12_i32 : i32
    %c32_i32_266 = arith.constant 32 : i32
    %388 = arith.muli %387, %c32_i32_266 : i32
    %c2_i32_267 = arith.constant 2 : i32
    %389 = vector.broadcast %c2_i32_267 : i32 to vector<8x16xi32>
    %390 = arith.muli %389, %66 : vector<8x16xi32>
    %391 = vector.broadcast %388 : i32 to vector<8x16xi32>
    %392 = arith.addi %391, %390 : vector<8x16xi32>
    %393 = tpu.transpose %383, [1, 0] : vector<16x8xf32> -> vector<8x16xf32>
    %c0_268 = arith.constant 0 : index
    %c0_269 = arith.constant 0 : index
    %c6_270 = arith.constant 6 : index
    %c0_271 = arith.constant 0 : index
    %394 = vector.load %arg7[%c0_268, %c0_269, %c6_270, %c0_271] : memref<1x8x8x16xf32, #tpu.memory_space<vmem>>, vector<1x8x1x16xf32>
    %395 = vector.shape_cast %394 : vector<1x8x1x16xf32> to vector<8x16xf32>
    %396 = vector.shape_cast %393 : vector<8x16xf32> to vector<1x8x1x16xf32>
    tpu.vector_store %arg7[%c0_268, %c0_269, %c6_270, %c0_271], %396 {strides = array<i32>} : memref<1x8x8x16xf32, #tpu.memory_space<vmem>>, vector<1x8x1x16xf32>,
    %397 = tpu.transpose %385, [1, 0] : vector<16x8xf32> -> vector<8x16xf32>
    %398 = arith.fptosi %397 : vector<8x16xf32> to vector<8x16xi32>
    %399 = arith.addi %392, %398 : vector<8x16xi32>
    %c0_272 = arith.constant 0 : index
    %c0_273 = arith.constant 0 : index
    %c6_274 = arith.constant 6 : index
    %c0_275 = arith.constant 0 : index
    %400 = vector.load %arg8[%c0_272, %c0_273, %c6_274, %c0_275] : memref<1x8x8x16xi32, #tpu.memory_space<vmem>>, vector<1x8x1x16xi32>
    %401 = vector.shape_cast %400 : vector<1x8x1x16xi32> to vector<8x16xi32>
    %402 = vector.shape_cast %399 : vector<8x16xi32> to vector<1x8x1x16xi32>
    tpu.vector_store %arg8[%c0_272, %c0_273, %c6_274, %c0_275], %402 {strides = array<i32>} : memref<1x8x8x16xi32, #tpu.memory_space<vmem>>, vector<1x8x1x16xi32>,
    %403 = vector.extract_strided_slice %65 {offsets = [14, 0, 0], sizes = [1, 32, 8], strides = [1, 1, 1]} : vector<16x32x8xf32> to vector<1x32x8xf32>
    %404 = vector.shape_cast %403 : vector<1x32x8xf32> to vector<32x8xf32>
    %405 = vector.extract_strided_slice %65 {offsets = [15, 0, 0], sizes = [1, 32, 8], strides = [1, 1, 1]} : vector<16x32x8xf32> to vector<1x32x8xf32>
    %406 = vector.shape_cast %405 : vector<1x32x8xf32> to vector<32x8xf32>
    %407 = tpu.transpose %404, [1, 0] : vector<32x8xf32> -> vector<8x32xf32>
    %c0_276 = arith.constant 0 : index
    %c0_277 = arith.constant 0 : index
    %c14 = arith.constant 14 : index
    %c0_278 = arith.constant 0 : index
    %408 = vector.load %arg6[%c0_276, %c0_277, %c14, %c0_278] : memref<1x8x16x32xf32, #tpu.memory_space<vmem>>, vector<1x8x1x32xf32>
    %409 = vector.shape_cast %408 : vector<1x8x1x32xf32> to vector<8x32xf32>
    %410 = vector.shape_cast %407 : vector<8x32xf32> to vector<1x8x1x32xf32>
    tpu.vector_store %arg6[%c0_276, %c0_277, %c14, %c0_278], %410 {strides = array<i32>} : memref<1x8x16x32xf32, #tpu.memory_space<vmem>>, vector<1x8x1x32xf32>,
    %411 = tpu.transpose %406, [1, 0] : vector<32x8xf32> -> vector<8x32xf32>
    %c0_279 = arith.constant 0 : index
    %c0_280 = arith.constant 0 : index
    %c15 = arith.constant 15 : index
    %c0_281 = arith.constant 0 : index
    %412 = vector.load %arg6[%c0_279, %c0_280, %c15, %c0_281] : memref<1x8x16x32xf32, #tpu.memory_space<vmem>>, vector<1x8x1x32xf32>
    %413 = vector.shape_cast %412 : vector<1x8x1x32xf32> to vector<8x32xf32>
    %414 = vector.shape_cast %411 : vector<8x32xf32> to vector<1x8x1x32xf32>
    tpu.vector_store %arg6[%c0_279, %c0_280, %c15, %c0_281], %414 {strides = array<i32>} : memref<1x8x16x32xf32, #tpu.memory_space<vmem>>, vector<1x8x1x32xf32>,
    %c0_282 = arith.constant 0 : index
    %c0_283 = arith.constant 0 : index
    %415 = vector.load %arg9[%c0_282, %c0_283] : memref<32x8xf32, #tpu.memory_space<vmem>>, vector<32x8xf32>
    tpu.vector_store %arg9[%c0_282, %c0_283], %404 {strides = array<i32>} : memref<32x8xf32, #tpu.memory_space<vmem>>, vector<32x8xf32>,
    %c0_284 = arith.constant 0 : index
    %c0_285 = arith.constant 0 : index
    %416 = vector.load %arg10[%c0_284, %c0_285] : memref<32x8xf32, #tpu.memory_space<vmem>>, vector<32x8xf32>
    tpu.vector_store %arg10[%c0_284, %c0_285], %406 {strides = array<i32>} : memref<32x8xf32, #tpu.memory_space<vmem>>, vector<32x8xf32>,
    %c0_286 = arith.constant 0 : index
    %c0_287 = arith.constant 0 : index
    %417 = tpu.strided_load %arg9[%c0_286, %c0_287] {strides = array<i32: 2, 1>} : memref<32x8xf32, #tpu.memory_space<vmem>>, vector<16x8xf32>
    %c1_288 = arith.constant 1 : index
    %c0_289 = arith.constant 0 : index
    %418 = tpu.strided_load %arg9[%c1_288, %c0_289] {strides = array<i32: 2, 1>} : memref<32x8xf32, #tpu.memory_space<vmem>>, vector<16x8xf32>
    %c0_290 = arith.constant 0 : index
    %c0_291 = arith.constant 0 : index
    %419 = tpu.strided_load %arg10[%c0_290, %c0_291] {strides = array<i32: 2, 1>} : memref<32x8xf32, #tpu.memory_space<vmem>>, vector<16x8xf32>
    %c1_292 = arith.constant 1 : index
    %c0_293 = arith.constant 0 : index
    %420 = tpu.strided_load %arg10[%c1_292, %c0_293] {strides = array<i32: 2, 1>} : memref<32x8xf32, #tpu.memory_space<vmem>>, vector<16x8xf32>
    %cst_294 = arith.constant 0.000000e+00 : f32
    %421 = vector.broadcast %cst_294 : f32 to vector<16x8xf32>
    %422 = arith.cmpf ogt, %418, %417 : vector<16x8xf32>
    %423 = arith.select %422, %418, %417 : vector<16x8xi1>, vector<16x8xf32>
    %cst_295 = arith.constant 1.000000e+00 : f32
    %424 = vector.broadcast %cst_295 : f32 to vector<16x8xf32>
    %425 = arith.select %422, %424, %421 : vector<16x8xi1>, vector<16x8xf32>
    %426 = arith.cmpf ogt, %419, %423 : vector<16x8xf32>
    %427 = arith.select %426, %419, %423 : vector<16x8xi1>, vector<16x8xf32>
    %cst_296 = arith.constant 3.200000e+01 : f32
    %428 = vector.broadcast %cst_296 : f32 to vector<16x8xf32>
    %429 = arith.select %426, %428, %425 : vector<16x8xi1>, vector<16x8xf32>
    %430 = arith.cmpf ogt, %420, %427 : vector<16x8xf32>
    %431 = arith.select %430, %420, %427 : vector<16x8xi1>, vector<16x8xf32>
    %cst_297 = arith.constant 3.300000e+01 : f32
    %432 = vector.broadcast %cst_297 : f32 to vector<16x8xf32>
    %433 = arith.select %430, %432, %429 : vector<16x8xi1>, vector<16x8xf32>
    %c16_i32_298 = arith.constant 16 : i32
    %434 = arith.muli %arg1, %c16_i32_298 : i32
    %c14_i32 = arith.constant 14 : i32
    %435 = arith.addi %434, %c14_i32 : i32
    %c32_i32_299 = arith.constant 32 : i32
    %436 = arith.muli %435, %c32_i32_299 : i32
    %c2_i32_300 = arith.constant 2 : i32
    %437 = vector.broadcast %c2_i32_300 : i32 to vector<8x16xi32>
    %438 = arith.muli %437, %66 : vector<8x16xi32>
    %439 = vector.broadcast %436 : i32 to vector<8x16xi32>
    %440 = arith.addi %439, %438 : vector<8x16xi32>
    %441 = tpu.transpose %431, [1, 0] : vector<16x8xf32> -> vector<8x16xf32>
    %c0_301 = arith.constant 0 : index
    %c0_302 = arith.constant 0 : index
    %c7_303 = arith.constant 7 : index
    %c0_304 = arith.constant 0 : index
    %442 = vector.load %arg7[%c0_301, %c0_302, %c7_303, %c0_304] : memref<1x8x8x16xf32, #tpu.memory_space<vmem>>, vector<1x8x1x16xf32>
    %443 = vector.shape_cast %442 : vector<1x8x1x16xf32> to vector<8x16xf32>
    %444 = vector.shape_cast %441 : vector<8x16xf32> to vector<1x8x1x16xf32>
    tpu.vector_store %arg7[%c0_301, %c0_302, %c7_303, %c0_304], %444 {strides = array<i32>} : memref<1x8x8x16xf32, #tpu.memory_space<vmem>>, vector<1x8x1x16xf32>,
    %445 = tpu.transpose %433, [1, 0] : vector<16x8xf32> -> vector<8x16xf32>
    %446 = arith.fptosi %445 : vector<8x16xf32> to vector<8x16xi32>
    %447 = arith.addi %440, %446 : vector<8x16xi32>
    %c0_305 = arith.constant 0 : index
    %c0_306 = arith.constant 0 : index
    %c7_307 = arith.constant 7 : index
    %c0_308 = arith.constant 0 : index
    %448 = vector.load %arg8[%c0_305, %c0_306, %c7_307, %c0_308] : memref<1x8x8x16xi32, #tpu.memory_space<vmem>>, vector<1x8x1x16xi32>
    %449 = vector.shape_cast %448 : vector<1x8x1x16xi32> to vector<8x16xi32>
    %450 = vector.shape_cast %447 : vector<8x16xi32> to vector<1x8x1x16xi32>
    tpu.vector_store %arg8[%c0_305, %c0_306, %c7_307, %c0_308], %450 {strides = array<i32>} : memref<1x8x8x16xi32, #tpu.memory_space<vmem>>, vector<1x8x1x16xi32>,
    return
  }
  func.func @transform_0(%arg0: i32, %arg1: i32) -> (i32, i32, i32, i32) {
    %c0_i32 = arith.constant 0 : i32
    %c0_i32_0 = arith.constant 0 : i32
    %c0_i32_1 = arith.constant 0 : i32
    return %arg0, %arg1, %c0_i32, %c0_i32_0 : i32, i32, i32, i32
  }
  func.func @transform_1(%arg0: i32, %arg1: i32) -> (i32, i32, i32, i32) {
    %c1_i32 = arith.constant 1 : i32
    %0 = arith.addi %arg1, %c1_i32 : i32
    %c2_i32 = arith.constant 2 : i32
    %1 = arith.muli %0, %c2_i32 : i32
    %c0_i32 = arith.constant 0 : i32
    %c0_i32_0 = arith.constant 0 : i32
    %c0_i32_1 = arith.constant 0 : i32
    return %arg0, %1, %c0_i32, %c0_i32_0 : i32, i32, i32, i32
  }
  func.func @transform_2(%arg0: i32, %arg1: i32) -> (i32, i32, i32) {
    %c0_i32 = arith.constant 0 : i32
    %c0_i32_0 = arith.constant 0 : i32
    %c0_i32_1 = arith.constant 0 : i32
    %c0_i32_2 = arith.constant 0 : i32
    return %c0_i32, %c0_i32_0, %c0_i32_1 : i32, i32, i32
  }
  func.func @transform_3(%arg0: i32, %arg1: i32) -> (i32, i32) {
    %c0_i32 = arith.constant 0 : i32
    %c0_i32_0 = arith.constant 0 : i32
    %c0_i32_1 = arith.constant 0 : i32
    return %c0_i32, %c0_i32_0 : i32, i32
  }
  func.func @transform_4(%arg0: i32, %arg1: i32) -> (i32, i32, i32, i32) {
    %c0_i32 = arith.constant 0 : i32
    %c0_i32_0 = arith.constant 0 : i32
    %c0_i32_1 = arith.constant 0 : i32
    return %arg0, %c0_i32, %arg1, %c0_i32_0 : i32, i32, i32, i32
  }
  func.func @transform_5(%arg0: i32, %arg1: i32) -> (i32, i32, i32, i32) {
    %c0_i32 = arith.constant 0 : i32
    %c0_i32_0 = arith.constant 0 : i32
    %c0_i32_1 = arith.constant 0 : i32
    return %arg0, %c0_i32, %arg1, %c0_i32_0 : i32, i32, i32, i32
  }
  func.func @transform_6(%arg0: i32, %arg1: i32) -> (i32, i32, i32, i32) {
    %c0_i32 = arith.constant 0 : i32
    %c0_i32_0 = arith.constant 0 : i32
    %c0_i32_1 = arith.constant 0 : i32
    return %arg0, %c0_i32, %arg1, %c0_i32_0 : i32, i32, i32, i32
  }
}

</mosaic_0001>

<bundles_post_ra>
// kernel: tpu_custom_call.1
= control target key start
LH: loop header
LB: loop body
LE: loop exit
PB: predicated region body
PF: predicated region fallthrough
CT: control target
= control target key end

     0   :  { %s10478_s0 = inlined_call_operand.vmem [shape: f32[2,40,34,4], index: 0, kind: input, shape index: {}]   ;;  %s10479_s1 = inlined_call_operand.vmem [shape: f32[2,40,34,4], index: 1, kind: input, shape index: {}]   ;;  %s10480_s2 = inlined_call_operand.vmem [shape: f32[9,4,8], index: 2, kind: input, shape index: {}]   ;;  %s10481_s3 = inlined_call_operand.vmem [shape: f32[1,8], index: 3, kind: input, shape index: {}]   ;;  %s10482_s4 = inlined_call_operand.hbm [shape: f32[2,8,32,32], index: 4, kind: output, shape index: {0}]   ;;  %s10483_s5 = inlined_call_operand.hbm [shape: f32[2,8,16,16], index: 5, kind: output, shape index: {1}]   ;;  %s10484_s6 = inlined_call_operand.hbm [shape: s32[2,8,16,16], index: 6, kind: output, shape index: {2}]  }
   0x1   :  { %10653 = sst [smem:[#allocation154_spill]] %s10478_s0 }
   0x2   :  { %10654 = sst [smem:[#allocation155_spill]] %s10479_s1 }
   0x3   :  { %10655 = sst [smem:[#allocation156_spill]] %s10480_s2 }
   0x4   :  { %10656 = sst [smem:[#allocation157_spill]] %s10481_s3 }
   0x5   :  { %10657 = sst [smem:[#allocation158_spill]] %s10482_s4 }
   0x6   :  { %12 = vsyncpa [#allocation5], 0 }
   0x7   :  { %14 = vsyncpa [#allocation5 + $0x1], 0 }
   0x8   :  { %15 = vsyncpa [#allocation7], 0 }
   0x9   :  { %17 = vsyncpa [#allocation7 + $0x1], 0  ;;  %s7234_s21 = smov 0   ;;  %s7236_s22 = smov 0  }
   0xa   :  { %s7238_s23 = smov 0   ;;  %s7240_s24 = smov 0  }
   0xb   :  { %s7242_s25 = smov 0   ;;  %s7244_s26 = smov 0  }
   0xc   :  { %s7246_s27 = smov 0   ;;  %s7248_s28 = smov 0  }
   0xd LB: > { %10658 = sst [smem:[#allocation13_spill]] %s7182_s27  ;;  %s10486_s29 = sadd.s32 4294967295, %s7186_s28   ;;  %s7186_s28 = sphi %s7248_s28, %s23_s28   ;;  %s7182_s27 = sphi %s7246_s27, %s11054_s27   ;;  %s7178_s26 = sphi %s7244_s26, %s11059_s26   ;;  %s7174_s25 = sphi %s7242_s25, %s11052_s25   ;;  %s7170_s24 = sphi %s7240_s24, %s11058_s24   ;;  %s7166_s23 = sphi %s7238_s23, %s11057_s23   ;;  %s7162_s22 = sphi %s7236_s22, %s11056_s22   ;;  %s7158_s21 = sphi %s7234_s21, %s11055_s21  }
   0xe   : > { %s10485_s30 = sadd.s32 4294967294, %s7186_s28   ;;  %s32_s7 = sadd.s32 1, %s7178_s26 }
   0xf   : > { %p33_p0 = scmp.ge.s32.totalorder %s32_s7, 2  ;;  %s35_s8 = sadd.s32 1, %s7182_s27 }
  0x10   : > { %p156_p1 = scmp.ne.s32.totalorder %s7166_s23, %s7162_s22  ;;  %p157_p2 = scmp.eq.s32.totalorder %s10486_s29, 3 }
  0x11   : > { %s11061_s7 = smov (%p33_p0, %s32_s7), 0  ;;  %s11063_s8 = smov (!%p33_p0, %s35_s8), %s7182_s27 }
  0x12   : > { %10659 = sst [smem:[#allocation14_spill]] %s11061_s7  ;;  %s142_s9 = ssub.s32 %s7178_s26, %s11061_s7 }
  0x13   : > { %p7287_p3 = por %p157_p2, %p156_p1  ;;  %p37_p4 = scmp.ge.s32.totalorder %s11063_s8, 2 }
  0x14   : > { %p162_p5 = scmp.ne.s32.totalorder %s7162_s22, %s7158_s21  ;;  %p163_p6 = scmp.eq.s32.totalorder %s10485_s30, 3 }
  0x15   : > { %p6123_p7 = scmp.ge.s32.totalorder %s7186_s28, 1  ;;  %s11065_s8 = smov (%p37_p4, %s11063_s8), 0 }
  0x16   : > { %10661 = sst [smem:[#allocation15_spill]] %s11065_s8  ;;  %p7298_p8 = por %p163_p6, %p162_p5 }
  0x17   : > { %p285_p9 = scmp.lt.s32.totalorder %s7186_s28, 5  ;;  %s141_s12 = ssub.s32 %s7182_s27, %s11065_s8 }
  0x18   : > { %s146_s13 = sadd.s32 1, %s7166_s23  ;;  %s143_s14 = sor.u32 %s142_s9, %s141_s12 }
  0x19   : > { %p286_p10 = pnand %p6123_p7, %p285_p9  ;;  %p144_p11 = scmp.eq.s32.totalorder %s143_s14, 0 }
  0x1b   : > { %s7307_s15 = scalar_select %p144_p11, %s7166_s23, %s146_s13  }
  0x1c   : > { %289 = sbr.rel (%p286_p10) target bundleno = 1621 (0x655), region = 36 }
  0x21   : > { %s10663_s2 = sld [smem:[#allocation156_spill]]  ;;  %vm831_vm0 = vcmask 1043456   ;;  %s7313_s18 = sshll.u32 %s7170_s24, 4  ;;  %vm555_vm1 = vcmask 1046528   ;;  %vm702_vm2 = vcmask 31744   ;;  %vm1384_vm3 = vcmask 1045504  }
  0x22   : > { %p353_p12 = scmp.lt.s32.totalorder %s7174_s25, 1  ;;  %p355_p13 = scmp.lt.s32.totalorder %s7313_s18, 39  ;;  %vm3942_vm4 = vcmask 64512  }
  0x23   : > { %s10664_s0 = sld [smem:[#allocation154_spill]] }
  0x24   : > { %s7326_s13 = scalar_select %p353_p12, %s7174_s25, 1 }
  0x25   : > { %s356_s19 = scalar_select %p355_p13, %s7313_s18, 39 }
  0x26   : > { %s6780_s20 = smul.u32 200, %s7326_s13  ;;  %s10877_s1 = sld [smem:[#allocation155_spill]] }
  0x27   : > { %v6132_v0 = vld [vmem:[%s10663_s2 + $0x4] sm:$0xf]  ;;  %v6263_v1 = vld [vmem:[%s10663_s2 + $0x8] sm:$0xf]  ;;  %v6329_v2 = vld [vmem:[%s10663_s2 + $0xc] sm:$0xf] }
  0x28   : > { %6776 = vmatpush.msk.msra.mxu1 %vm831_vm0, %v6132_v0  ;;  %6777 = vmatpush.msk.msra.mxu2 %vm831_vm0, %v6132_v0  ;;  %v474_v3 = vld [vmem:[%s10663_s2] sm:$0xf]  ;;  %v6395_v4 = vld [vmem:[%s10663_s2 + $0x10] sm:$0xf]  ;;  %s6779_s9 = smul.u32 5, %s356_s19  ;;  %s10942_s3 = sld [smem:[#allocation157_spill]] }
  0x29   : > { %6778 = vmatpush.msk.msra.mxu3 %vm831_vm0, %v6132_v0  ;;  %6133 = vmatpush.msk.msra.mxu0 %vm831_vm0, %v6132_v0  ;;  %s9842_s13 = sshll.u32 %s7170_s24, 9 }
  0x2a   : > { %6264 = vmatpush.msk.msrb.mxu2 %vm831_vm0, %v6263_v1  ;;  %6198 = vmatpush.msk.msrb.mxu1 %vm831_vm0, %v474_v3  ;;  %s359_s12 = sadd.s32 %s6780_s20, %s6779_s9  ;;  %s6756_s14 = sadd.s32 128, %s9842_s13 }
  0x2b   : > { %6330 = vmatpush.msk.msrb.mxu3 %vm831_vm0, %v6329_v2  ;;  %6396 = vmatpush.msk.msrb.mxu0 %vm831_vm0, %v6395_v4  ;;  %s6128_s29 = sshll.u32 %s359_s12, 3  ;;  %s6758_s16 = sadd.s32 192, %s9842_s13 }
  0x2c   : > { %s7347_s8 = scalar_lea.vmem %s10664_s0, %s6128_s29  ;;  %s6768_s29 = sadd.s32 16, %s7313_s18 }
  0x2d   : > { %v7350_v5 = vld [vmem:[%s7347_s8 + $0xa0] sm:$0xff]  ;;  %v7353_v6 = vld [vmem:[%s7347_s8 + $0xa8] sm:$0xff]  ;;  %v7362_v17 = vld [vmem:[%s7347_s8 + $0xb0] sm:$0xff]  ;;  %p373_p0 = scmp.lt.s32.totalorder %s6768_s29, 39 }
  0x2e   : > { %v424_v7 = vld [vmem:[%s7347_s8 + $0x140] sm:$0xff]  ;;  %v592_v8 = vrot.slane %v7350_v5, 1  ;;  %v593_v9 = vrot.slane %v7353_v6, 1  ;;  %v425_v10 = vld [vmem:[%s7347_s8 + $0x148] sm:$0xff]  ;;  %v426_v20 = vld [vmem:[%s7347_s8 + $0x150] sm:$0xff]  ;;  %v595_v27 = vrot.slane %v7362_v17, 1 }
  0x2f   : > { %v628_v11 = vrot.slane %v424_v7, 1  ;;  %v444_v12 = vld [vmem:[%s7347_s8 + $0x1e0] sm:$0xff]  ;;  %v445_v13 = vld [vmem:[%s7347_s8 + $0x1e8] sm:$0xff]  ;;  %v629_v14 = vrot.slane %v425_v10, 1  ;;  %v446_v23 = vld [vmem:[%s7347_s8 + $0x1f0] sm:$0xff]  ;;  %v631_v29 = vrot.slane %v426_v20, 1 }
  0x30   : > { %v664_v15 = vrot.slane %v444_v12, 1  ;;  %v665_v16 = vrot.slane %v445_v13, 1  ;;  %v7365_v18 = vld [vmem:[%s7347_s8] sm:$0xff]  ;;  %v7368_v19 = vsel %vm555_vm1, %v592_v8, %v593_v9  ;;  %v7372_v21 = vld [vmem:[%s7347_s8 + $0x8] sm:$0xff]  ;;  %v7391_v28 = vld [vmem:[%s7347_s8 + $0x10] sm:$0xff]  ;;  %v667_v31 = vrot.slane %v446_v23, 1 }
  0x31   : > { %10665 = vst [vmem:[#allocation16_spill] sm:$0xff] %v7368_v19  ;;  %v556_v22 = vrot.slane %v7365_v18, 1  ;;  %6150 = vmatmul.msk.f32.vlgmr.msra.gmra.mxu1 %vm702_vm2, %v7368_v19  ;;  %v7379_v24 = vsel %vm555_vm1, %v628_v11, %v629_v14  ;;  %v557_v26 = vrot.slane %v7372_v21, 1  ;;  %v559_v32 = vrot.slane %v7391_v28, 1  ;;  %v7406_v36 = vld [vmem:[%s7347_s8 + $0xb8] sm:$0xff]  ;;  %v7460_v60 = vld [vmem:[%s7347_s8 + $0xc8] sm:$0xff] }
  0x32   : > { %10666 = vst [vmem:[#allocation17_spill] sm:$0xff] %v7379_v24  ;;  %v7382_v25 = vsel %vm555_vm1, %v664_v15, %v665_v16  ;;  %6166 = vmatmul.msk.f32.vlgmr.msra.gmra.mxu2 %vm702_vm2, %v7379_v24  ;;  %v7397_v33 = vsel %vm555_vm1, %v593_v9, %v595_v27  ;;  %v7400_v34 = vsel %vm555_vm1, %v629_v14, %v631_v29  ;;  %v427_v37 = vld [vmem:[%s7347_s8 + $0x158] sm:$0xff]  ;;  %v597_v40 = vrot.slane %v7406_v36, 1  ;;  %v7433_v48 = vld [vmem:[%s7347_s8 + $0xc0] sm:$0x3]  ;;  %v7463_v61 = vld [vmem:[%s7347_s8 + $0xd0] sm:$0xff] }
  0x33   : > { %10667 = vst [vmem:[#allocation18_spill] sm:$0xff] %v7382_v25  ;;  %6182 = vmatmul.msk.f32.vlgmr.msra.gmra.mxu3 %vm702_vm2, %v7382_v25  ;;  %v558_v30 = vsel %vm555_vm1, %v556_v22, %v557_v26  ;;  %v7403_v35 = vsel %vm555_vm1, %v665_v16, %v667_v31  ;;  %v447_v38 = vld [vmem:[%s7347_s8 + $0x1f8] sm:$0xff]  ;;  %v560_v39 = vsel %vm555_vm1, %v557_v26, %v559_v32  ;;  %v633_v42 = vrot.slane %v427_v37, 1  ;;  %v428_v49 = vld [vmem:[%s7347_s8 + $0x160] sm:$0x3]  ;;  %v429_v62 = vld [vmem:[%s7347_s8 + $0x168] sm:$0xff] }
  0x34   : > { %6134 = vmatmul.msk.f32.vlgmr.msra.gmra.mxu0 %vm702_vm2, %v558_v30  ;;  %10668 = vst [vmem:[#allocation19_spill] sm:$0xff] %v7397_v33  ;;  %v7419_v41 = vld [vmem:[%s7347_s8 + $0x18] sm:$0xff]  ;;  %v669_v43 = vrot.slane %v447_v38, 1  ;;  %v7424_v45 = vsel %vm555_vm1, %v595_v27, %v597_v40  ;;  %v448_v50 = vld [vmem:[%s7347_s8 + $0x200] sm:$0x3]  ;;  %v599_v52 = vrot.slane %v7433_v48, 1 }
  0x35   : > { %10669 = vst [vmem:[#allocation20_spill] sm:$0xff] %v7400_v34  ;;  %v561_v44 = vrot.slane %v7419_v41, 1  ;;  %v7427_v46 = vsel %vm555_vm1, %v631_v29, %v633_v42  ;;  %v7446_v53 = vld [vmem:[%s7347_s8 + $0x20] sm:$0x3]  ;;  %v635_v54 = vrot.slane %v428_v49, 1  ;;  %v671_v55 = vrot.slane %v448_v50, 1 }
  0x36   : > { %10670 = vst [vmem:[#allocation21_spill] sm:$0xff] %v7403_v35  ;;  %v7430_v47 = vsel %vm555_vm1, %v667_v31, %v669_v43  ;;  %v563_v56 = vrot.slane %v7446_v53, 1  ;;  %v7451_v57 = vsel %vm555_vm1, %v597_v40, %v599_v52  ;;  %v430_v63 = vld [vmem:[%s7347_s8 + $0x170] sm:$0xff]  ;;  %v449_v0 = vld [vmem:[%s7347_s8 + $0x208] sm:$0xff]  ;;  %v601_v3 = vrot.slane %v7460_v60, 1  ;;  %v7497_v22 = vld [vmem:[%s7347_s8 + $0xd8] sm:$0xff] }
  0x37   : > { %10671 = vst [vmem:[#allocation22_spill] sm:$0xff] %v7424_v45  ;;  %v562_v51 = vsel %vm555_vm1, %v559_v32, %v561_v44  ;;  %v7454_v58 = vsel %vm555_vm1, %v633_v42, %v635_v54  ;;  %v7457_v59 = vsel %vm555_vm1, %v669_v43, %v671_v55  ;;  %v450_v1 = vld [vmem:[%s7347_s8 + $0x210] sm:$0xff]  ;;  %v602_v4 = vrot.slane %v7463_v61, 1  ;;  %v7479_v7 = vld [vmem:[%s7347_s8 + $0x28] sm:$0xff]  ;;  %v431_v23 = vld [vmem:[%s7347_s8 + $0x178] sm:$0xff]  ;;  %s11067_s29 = smov (!%p373_p0, %s6768_s29), 39 }
  0x38   : > { %10672 = vst [vmem:[#allocation23_spill] sm:$0xff] %v7427_v46  ;;  %v564_v2 = vsel %vm555_vm1, %v561_v44, %v563_v56  ;;  %v7482_v8 = vld [vmem:[%s7347_s8 + $0x30] sm:$0xff]  ;;  %v637_v9 = vrot.slane %v429_v62, 1  ;;  %v638_v10 = vrot.slane %v430_v63, 1  ;;  %v673_v11 = vrot.slane %v449_v0, 1  ;;  %v451_v26 = vld [vmem:[%s7347_s8 + $0x218] sm:$0xff] }
  0x39   : > { %6151 = vmatmul.msk.f32.gmra.mxu1 %vm702_vm2, %v7397_v33  ;;  %10673 = vst [vmem:[#allocation24_spill] sm:$0xff] %v7430_v47  ;;  %v674_v12 = vrot.slane %v450_v1, 1  ;;  %v565_v13 = vrot.slane %v7479_v7, 1  ;;  %v566_v14 = vrot.slane %v7482_v8, 1  ;;  %v7488_v15 = vsel %vm555_vm1, %v601_v3, %v602_v4  ;;  %v7512_v30 = vld [vmem:[%s7347_s8 + $0x38] sm:$0xff]  ;;  %v7527_v42 = vld [vmem:[%s7347_s8 + $0xe0] sm:$0xff] }
  0x3a   : > { %6167 = vmatmul.msk.f32.gmra.mxu2 %vm702_vm2, %v7400_v34  ;;  %10674 = vst [vmem:[#allocation25_spill] sm:$0xff] %v7451_v57  ;;  %v7491_v16 = vsel %vm555_vm1, %v637_v9, %v638_v10  ;;  %v604_v29 = vrot.slane %v7497_v22, 1  ;;  %v640_v31 = vrot.slane %v431_v23, 1  ;;  %v676_v32 = vrot.slane %v451_v26, 1  ;;  %v432_v43 = vld [vmem:[%s7347_s8 + $0x180] sm:$0xff]  ;;  %v7587_v26 = vld [vmem:[%s7347_s8 + $0xf0] sm:$0xff] }
  0x3b   : > { %6183 = vmatmul.msk.f32.gmra.mxu3 %vm702_vm2, %v7403_v35  ;;  %10675 = vst [vmem:[#allocation26_spill] sm:$0xff] %v7454_v58  ;;  %v7494_v20 = vsel %vm555_vm1, %v673_v11, %v674_v12  ;;  %v7504_v27 = vsel %vm555_vm1, %v565_v13, %v566_v14  ;;  %v568_v37 = vrot.slane %v7512_v30, 1  ;;  %v452_v44 = vld [vmem:[%s7347_s8 + $0x220] sm:$0xff]  ;;  %v606_v50 = vrot.slane %v7527_v42, 1  ;;  %v7557_v0 = vld [vmem:[%s7347_s8 + $0xe8] sm:$0x3] }
  0x3c   : > { %6135 = vmatmul.msk.f32.gmra.mxu0 %vm702_vm2, %v560_v39  ;;  %10676 = vst [vmem:[#allocation27_spill] sm:$0xff] %v7457_v59  ;;  %v7518_v38 = vsel %vm555_vm1, %v602_v4, %v604_v29  ;;  %v7521_v39 = vsel %vm555_vm1, %v638_v10, %v640_v31  ;;  %v7524_v40 = vsel %vm555_vm1, %v674_v12, %v676_v32  ;;  %v642_v52 = vrot.slane %v432_v43, 1  ;;  %v433_v1 = vld [vmem:[%s7347_s8 + $0x188] sm:$0x3]  ;;  %v455_v43 = vld [vmem:[%s7347_s8 + $0x238] sm:$0xff]  ;;  %v440_v34 = vld [vmem:[%s7347_s8 + $0x1c0] sm:$0xff] }
  0x3d   : > { %10677 = vst [vmem:[#allocation28_spill] sm:$0xff] %v7491_v16  ;;  %v7534_v49 = vsel %vm555_vm1, %v566_v14, %v568_v37  ;;  %v678_v54 = vrot.slane %v452_v44, 1  ;;  %v7548_v56 = vsel %vm555_vm1, %v604_v29, %v606_v50  ;;  %v608_v4 = vrot.slane %v7557_v0, 1  ;;  %v7572_v9 = vld [vmem:[%s7347_s8 + $0x48] sm:$0x3]  ;;  %v7590_v29 = vld [vmem:[%s7347_s8 + $0xf8] sm:$0xff] }
  0x3e   : > { %10678 = vst [vmem:[#allocation29_spill] sm:$0xff] %v7494_v20  ;;  %v7551_v62 = vsel %vm555_vm1, %v640_v31, %v642_v52  ;;  %v644_v10 = vrot.slane %v433_v1, 1  ;;  %v572_v12 = vrot.slane %v7572_v9, 1  ;;  %v434_v31 = vld [vmem:[%s7347_s8 + $0x190] sm:$0xff]  ;;  %v7611_v1 = vld [vmem:[%s7347_s8 + $0x58] sm:$0xff]  ;;  %v7657_v35 = vld [vmem:[%s7347_s8 + $0x108] sm:$0xff] }
  0x3f   : > { %10679 = vst [vmem:[#allocation30_spill] sm:$0xff] %v7521_v39  ;;  %v7554_v63 = vsel %vm555_vm1, %v676_v32, %v678_v54  ;;  %v7578_v13 = vsel %vm555_vm1, %v606_v50, %v608_v4  ;;  %v435_v32 = vld [vmem:[%s7347_s8 + $0x198] sm:$0xff]  ;;  %v610_v50 = vrot.slane %v7587_v26, 1  ;;  %v437_v25 = vld [vmem:[%s7347_s8 + $0x1a8] sm:$0xff]  ;;  %s6781_s18 = smul.u32 5, %s11067_s29  ;;  %s11047_s29 = sadd.s32 4294967295, %s7186_s28  }
  0x40   : > { %10680 = vst [vmem:[#allocation31_spill] sm:$0xff] %v7524_v40  ;;  %v7581_v14 = vsel %vm555_vm1, %v642_v52, %v644_v10  ;;  %v611_v52 = vrot.slane %v7590_v29, 1  ;;  %v683_v10 = vrot.slane %v455_v43, 1  ;;  %v459_v24 = vld [vmem:[%s7347_s8 + $0x258] sm:$0xff] }
  0x41   : > { %6152 = vmatmul.msk.f32.gmra.mxu1 %vm702_vm2, %v7424_v45  ;;  %10681 = vst [vmem:[#allocation32_spill] sm:$0xff] %v7551_v62  ;;  %s377_s30 = sadd.s32 %s6781_s18, %s6780_s20  ;;  %s10124_s18 = sand.u32 1, %s11047_s29  }
  0x42   : > { %6168 = vmatmul.msk.f32.gmra.mxu2 %vm702_vm2, %v7427_v46  ;;  %10682 = vst [vmem:[#allocation33_spill] sm:$0xff] %v7554_v63  ;;  %v7717_v46 = vld [vmem:[%s7347_s8 + $0x118] sm:$0xff]  ;;  %s6131_s17 = sshll.u32 %s377_s30, 3 }
  0x43   : > { %6184 = vmatmul.msk.f32.gmra.mxu3 %vm702_vm2, %v7430_v47  ;;  %10683 = vst [vmem:[#allocation34_spill] sm:$0xff] %v7557_v0  ;;  %v462_v0 = vld [vmem:[%s7347_s8 + $0x270] sm:$0xff]  ;;  %s8809_s19 = scalar_lea.vmem %s10877_s1, %s6131_s17 }
  0x44   : > { %6136 = vmatmul.msk.f32.gmra.mxu0 %vm702_vm2, %v562_v51  ;;  %v7542_v51 = vld [vmem:[%s7347_s8 + $0x40] sm:$0xff]  ;;  %10684 = vst [vmem:[#allocation35_spill] sm:$0xff] %v7581_v14 }
  0x45   : > { %v570_v55 = vrot.slane %v7542_v51, 1  ;;  %10686 = vst [vmem:[#allocation37_spill] sm:$0xff] %v7590_v29 }
  0x46   : > { %10695 = vst [vmem:[#allocation46_spill] sm:$0xff] %v7657_v35 }
  0x47   : > { %v7564_v3 = vsel %vm555_vm1, %v568_v37, %v570_v55  ;;  %v454_v37 = vld [vmem:[%s7347_s8 + $0x230] sm:$0xff]  ;;  %v7599_v44 = vsel %vm555_vm1, %v570_v55, %v572_v12  ;;  %v647_v55 = vrot.slane %v435_v32, 1  ;;  %v575_v12 = vrot.slane %v7611_v1, 1  ;;  %v436_v32 = vld [vmem:[%s7347_s8 + $0x1a0] sm:$0xff]  ;;  %10705 = vst [vmem:[#allocation56_spill] sm:$0xff] %v7717_v46 }
  0x48   : > { %v682_v4 = vrot.slane %v454_v37, 1  ;;  %v456_v37 = vld [vmem:[%s7347_s8 + $0x240] sm:$0xff] }
  0x49   : > { %6153 = vmatmul.msk.f32.gmra.mxu1 %vm702_vm2, %v7451_v57 }
  0x4a   : > { %6169 = vmatmul.msk.f32.gmra.mxu2 %vm702_vm2, %v7454_v58 }
  0x4b   : > { %6185 = vmatmul.msk.f32.gmra.mxu3 %vm702_vm2, %v7457_v59 }
  0x4c   : > { %6137 = vmatmul.msk.f32.gmra.mxu0 %vm702_vm2, %v564_v2  ;;  %v453_v2 = vld [vmem:[%s7347_s8 + $0x228] sm:$0x3] }
  0x4d   : > { %v680_v11 = vrot.slane %v453_v2, 1  ;;  %v646_v2 = vrot.slane %v434_v31, 1  ;;  %v7627_v31 = vld [vmem:[%s7347_s8 + $0x100] sm:$0xff] }
  0x4e   : > { %10690 = vst [vmem:[#allocation41_spill] sm:$0xff] %v7627_v31 }
  0x4f   : > { %v7584_v23 = vsel %vm555_vm1, %v678_v54, %v680_v11  ;;  %v7608_v54 = vld [vmem:[%s7347_s8 + $0x50] sm:$0xff] }
  0x50   : > { %10685 = vst [vmem:[#allocation36_spill] sm:$0xff] %v7584_v23  ;;  %v574_v11 = vrot.slane %v7608_v54, 1 }
  0x51   : > { %6154 = vmatmul.msk.f32.gmra.mxu1 %vm702_vm2, %v7488_v15 }
  0x52   : > { %6170 = vmatmul.msk.f32.gmra.mxu2 %vm702_vm2, %v7491_v16  ;;  %v7634_v43 = vsel %vm555_vm1, %v574_v11, %v575_v12 }
  0x53   : > { %6186 = vmatmul.msk.f32.gmra.mxu3 %vm702_vm2, %v7494_v20  ;;  %10691 = vst [vmem:[#allocation42_spill] sm:$0xff] %v7634_v43  ;;  %v685_v20 = vrot.slane %v456_v37, 1 }
  0x54   : > { %6138 = vmatmul.msk.f32.gmra.mxu0 %vm702_vm2, %v7504_v27 }
  0x59   : > { %6155 = vmatmul.msk.f32.gmra.mxu1 %vm702_vm2, %v7518_v38 }
  0x5a   : > { %6171 = vmatmul.msk.f32.gmra.mxu2 %vm702_vm2, %v7521_v39  ;;  %v438_v39 = vld [vmem:[%s7347_s8 + $0x1b0] sm:$0x3] }
  0x5b   : > { %6187 = vmatmul.msk.f32.gmra.mxu3 %vm702_vm2, %v7524_v40  ;;  %v7624_v40 = vsel %vm555_vm1, %v682_v4, %v683_v10  ;;  %v649_v4 = vrot.slane %v436_v32, 1  ;;  %v457_v32 = vld [vmem:[%s7347_s8 + $0x248] sm:$0xff] }
  0x5c   : > { %6139 = vmatmul.msk.f32.gmra.mxu0 %vm702_vm2, %v7534_v49  ;;  %10689 = vst [vmem:[#allocation40_spill] sm:$0xff] %v7624_v40 }
  0x5d   : > { %v7651_v47 = vsel %vm555_vm1, %v647_v55, %v649_v4 }
  0x5e   : > { %10693 = vst [vmem:[#allocation44_spill] sm:$0xff] %v7651_v47 }
  0x61   : > { %6156 = vmatmul.msk.f32.gmra.mxu1 %vm702_vm2, %v7548_v56 }
  0x62   : > { %6172 = vmatmul.msk.f32.gmra.mxu2 %vm702_vm2, %v7551_v62  ;;  %v7687_v62 = vld [vmem:[%s7347_s8 + $0x110] sm:$0x3] }
  0x63   : > { %6188 = vmatmul.msk.f32.gmra.mxu3 %vm702_vm2, %v7554_v63  ;;  %v7621_v63 = vsel %vm555_vm1, %v646_v2, %v647_v55  ;;  %v7642_v2 = vld [vmem:[%s7347_s8 + $0x60] sm:$0xff]  ;;  %v7672_v55 = vld [vmem:[%s7347_s8 + $0x68] sm:$0xff]  ;;  %10700 = vst [vmem:[#allocation51_spill] sm:$0xff] %v7687_v62 }
  0x64   : > { %6140 = vmatmul.msk.f32.gmra.mxu0 %vm702_vm2, %v7564_v3  ;;  %10688 = vst [vmem:[#allocation39_spill] sm:$0xff] %v7621_v63  ;;  %v577_v59 = vrot.slane %v7642_v2, 1 }
  0x66   : > { %v7664_v37 = vsel %vm555_vm1, %v575_v12, %v577_v59 }
  0x67   : > { %10696 = vst [vmem:[#allocation47_spill] sm:$0xff] %v7664_v37 }
  0x69   : > { %6157 = vmatmul.msk.f32.gmra.mxu1 %vm702_vm2, %v7578_v13 }
  0x6a   : > { %6173 = vmatmul.msk.f32.gmra.mxu2 %vm702_vm2, %v7581_v14  ;;  %v579_v14 = vrot.slane %v7672_v55, 1 }
  0x6b   : > { %6189 = vmatmul.msk.f32.gmra.mxu3 %vm702_vm2, %v7584_v23  ;;  %v7618_v23 = vsel %vm555_vm1, %v610_v50, %v611_v52  ;;  %v613_v50 = vrot.slane %v7627_v31, 1  ;;  %v696_v31 = vrot.slane %v462_v0, 1  ;;  %v463_v0 = vld [vmem:[%s7347_s8 + $0x278] sm:$0x3] }
  0x6c   : > { %6141 = vmatmul.msk.f32.gmra.mxu0 %vm702_vm2, %v7599_v44  ;;  %10687 = vst [vmem:[#allocation38_spill] sm:$0xff] %v7618_v23  ;;  %v698_v29 = vrot.slane %v463_v0, 1 }
  0x6d   : > { %v7648_v11 = vsel %vm555_vm1, %v611_v52, %v613_v50  ;;  %v615_v52 = vrot.slane %v7657_v35, 1 }
  0x6e   : > { %10692 = vst [vmem:[#allocation43_spill] sm:$0xff] %v7648_v11 }
  0x6f   : > { %v7678_v12 = vsel %vm555_vm1, %v613_v50, %v615_v52  ;;  %v7694_v50 = vsel %vm555_vm1, %v577_v59, %v579_v14 }
  0x70   : > { %10697 = vst [vmem:[#allocation48_spill] sm:$0xff] %v7678_v12 }
  0x71   : > { %6158 = vmatmul.msk.f32.gmra.mxu1 %vm702_vm2, %v7618_v23  ;;  %10701 = vst [vmem:[#allocation52_spill] sm:$0xff] %v7694_v50 }
  0x72   : > { %6174 = vmatmul.msk.f32.gmra.mxu2 %vm702_vm2, %v7621_v63  ;;  %v687_v63 = vrot.slane %v457_v32, 1  ;;  %v653_v32 = vrot.slane %v438_v39, 1  ;;  %v7720_v39 = vld [vmem:[%s7347_s8 + $0x120] sm:$0xff] }
  0x73   : > { %6190 = vmatmul.msk.f32.gmra.mxu3 %vm702_vm2, %v7624_v40  ;;  %v7654_v40 = vsel %vm555_vm1, %v683_v10, %v685_v20  ;;  %v651_v10 = vrot.slane %v437_v25, 1  ;;  %v458_v25 = vld [vmem:[%s7347_s8 + $0x250] sm:$0x3]  ;;  %10706 = vst [vmem:[#allocation57_spill] sm:$0xff] %v7720_v39 }
  0x74   : > { %6142 = vmatmul.msk.f32.gmra.mxu0 %vm702_vm2, %v7634_v43  ;;  %10694 = vst [vmem:[#allocation45_spill] sm:$0xff] %v7654_v40  ;;  %v689_v16 = vrot.slane %v458_v25, 1  ;;  %v439_v25 = vld [vmem:[%s7347_s8 + $0x1b8] sm:$0xff] }
  0x79   : > { %6159 = vmatmul.msk.f32.gmra.mxu1 %vm702_vm2, %v7648_v11  ;;  %v7833_v11 = vld [vmem:[%s7347_s8 + $0x138] sm:$0x3] }
  0x7a   : > { %6175 = vmatmul.msk.f32.gmra.mxu2 %vm702_vm2, %v7651_v47  ;;  %v7681_v47 = vsel %vm555_vm1, %v649_v4, %v651_v10  ;;  %v7702_v4 = vld [vmem:[%s7347_s8 + $0x70] sm:$0x3] }
  0x7b   : > { %6191 = vmatmul.msk.f32.gmra.mxu3 %vm702_vm2, %v7654_v40  ;;  %10698 = vst [vmem:[#allocation49_spill] sm:$0xff] %v7681_v47  ;;  %v7684_v40 = vsel %vm555_vm1, %v685_v20, %v687_v63  ;;  %v617_v20 = vrot.slane %v7687_v62, 1  ;;  %v581_v59 = vrot.slane %v7702_v4, 1  ;;  %v460_v62 = vld [vmem:[%s7347_s8 + $0x260] sm:$0xff] }
  0x7c   : > { %6143 = vmatmul.msk.f32.gmra.mxu0 %vm702_vm2, %v7664_v37  ;;  %10699 = vst [vmem:[#allocation50_spill] sm:$0xff] %v7684_v40 }
  0x7d   : > { %v7708_v58 = vsel %vm555_vm1, %v615_v52, %v617_v20  ;;  %v7729_v52 = vsel %vm555_vm1, %v579_v14, %v581_v59  ;;  %v7741_v20 = vld [vmem:[%s7347_s8 + $0x80] sm:$0xff]  ;;  %v656_v14 = vrot.slane %v440_v34, 1  ;;  %v691_v59 = vrot.slane %v459_v24, 1  ;;  %v7757_v34 = vld [vmem:[%s7347_s8 + $0x128] sm:$0xff] }
  0x7e   : > { %10702 = vst [vmem:[#allocation53_spill] sm:$0xff] %v7708_v58  ;;  %v441_v24 = vld [vmem:[%s7347_s8 + $0x1c8] sm:$0xff] }
  0x7f   : > { %10707 = vst [vmem:[#allocation58_spill] sm:$0xff] %v7729_v52 }
  0x80   : > { %10711 = vst [vmem:[#allocation62_spill] sm:$0xff] %v7757_v34 }
  0x81   : > { %6160 = vmatmul.msk.f32.gmra.mxu1 %vm702_vm2, %v7678_v12 }
  0x82   : > { %6176 = vmatmul.msk.f32.gmra.mxu2 %vm702_vm2, %v7681_v47  ;;  %v7711_v47 = vsel %vm555_vm1, %v651_v10, %v653_v32  ;;  %v7738_v10 = vld [vmem:[%s7347_s8 + $0x78] sm:$0xff]  ;;  %v655_v32 = vrot.slane %v439_v25, 1 }
  0x83   : > { %6192 = vmatmul.msk.f32.gmra.mxu3 %vm702_vm2, %v7684_v40  ;;  %10703 = vst [vmem:[#allocation54_spill] sm:$0xff] %v7711_v47  ;;  %v7714_v40 = vsel %vm555_vm1, %v687_v63, %v689_v16  ;;  %v619_v16 = vrot.slane %v7717_v46, 1  ;;  %v620_v63 = vrot.slane %v7720_v39, 1 }
  0x84   : > { %6144 = vmatmul.msk.f32.gmra.mxu0 %vm702_vm2, %v7694_v50  ;;  %10704 = vst [vmem:[#allocation55_spill] sm:$0xff] %v7714_v40  ;;  %v7751_v39 = vsel %vm555_vm1, %v655_v32, %v656_v14  ;;  %v7772_v32 = vld [vmem:[%s7347_s8 + $0x88] sm:$0xff] }
  0x85   : > { %v7748_v46 = vsel %vm555_vm1, %v619_v16, %v620_v63  ;;  %10709 = vst [vmem:[#allocation60_spill] sm:$0xff] %v7751_v39  ;;  %v622_v16 = vrot.slane %v7757_v34, 1  ;;  %v6461_v34 = vld [vmem:[%s10663_s2 + $0x14] sm:$0xf] }
  0x86   : > { %10708 = vst [vmem:[#allocation59_spill] sm:$0xff] %v7748_v46  ;;  %6462 = vmatpush.msk.msra.mxu1 %vm831_vm0, %v6461_v34  ;;  %v6659_v34 = vld [vmem:[%s10663_s2 + $0x20] sm:$0xf] }
  0x87   : > { %v7789_v12 = vsel %vm555_vm1, %v620_v63, %v622_v16  ;;  %6660 = vmatpush.msk.msra.mxu0 %vm831_vm0, %v6659_v34 }
  0x88   : > { %10713 = vst [vmem:[#allocation64_spill] sm:$0xff] %v7789_v12 }
  0x89   : > { %6161 = vmatmul.msk.f32.gmra.mxu1 %vm702_vm2, %v7708_v58  ;;  %v692_v58 = vrot.slane %v460_v62, 1  ;;  %v461_v62 = vld [vmem:[%s7347_s8 + $0x268] sm:$0xff] }
  0x8a   : > { %6177 = vmatmul.msk.f32.gmra.mxu2 %vm702_vm2, %v7711_v47  ;;  %v584_v47 = vrot.slane %v7741_v20, 1 }
  0x8b   : > { %6193 = vmatmul.msk.f32.gmra.mxu3 %vm702_vm2, %v7714_v40  ;;  %v583_v40 = vrot.slane %v7738_v10, 1  ;;  %v7754_v35 = vsel %vm555_vm1, %v691_v59, %v692_v58  ;;  %v6527_v59 = vld [vmem:[%s10663_s2 + $0x18] sm:$0xf] }
  0x8c   : > { %6145 = vmatmul.msk.f32.gmra.mxu0 %vm702_vm2, %v7729_v52  ;;  %10710 = vst [vmem:[#allocation61_spill] sm:$0xff] %v7754_v35  ;;  %6528 = vmatpush.msk.msra.mxu2 %vm831_vm0, %v6527_v59  ;;  %v7799_v59 = vld [vmem:[%s7347_s8 + $0x130] sm:$0xff] }
  0x8d   : > { %v7764_v25 = vsel %vm555_vm1, %v583_v40, %v584_v47  ;;  %v6593_v40 = vld [vmem:[%s10663_s2 + $0x1c] sm:$0xf]  ;;  %10716 = vst [vmem:[#allocation67_spill] sm:$0xff] %v7799_v59 }
  0x8e   : > { %10712 = vst [vmem:[#allocation63_spill] sm:$0xff] %v7764_v25  ;;  %6594 = vmatpush.msk.msra.mxu3 %vm831_vm0, %v6593_v40  ;;  %v442_v40 = vld [vmem:[%s7347_s8 + $0x1d0] sm:$0xff] }
  0x91   : > { %6162 = vmatmul.msk.f32.gmra.mxu1 %vm702_vm2, %v7748_v46  ;;  %v658_v46 = vrot.slane %v441_v24, 1 }
  0x92   : > { %6178 = vmatmul.msk.f32.gmra.mxu2 %vm702_vm2, %v7751_v39  ;;  %v694_v39 = vrot.slane %v461_v62, 1 }
  0x93   : > { %6194 = vmatmul.msk.f32.gmra.mxu3 %vm702_vm2, %v7754_v35  ;;  %v586_v35 = vrot.slane %v7772_v32, 1  ;;  %v7793_v24 = vsel %vm555_vm1, %v656_v14, %v658_v46  ;;  %v7814_v14 = vld [vmem:[%s7347_s8 + $0x90] sm:$0xff] }
  0x94   : > { %6146 = vmatmul.msk.f32.gmra.mxu0 %vm702_vm2, %v7764_v25  ;;  %10714 = vst [vmem:[#allocation65_spill] sm:$0xff] %v7793_v24  ;;  %v7796_v62 = vsel %vm555_vm1, %v692_v58, %v694_v39  ;;  %v624_v58 = vrot.slane %v7799_v59, 1  ;;  %v7830_v59 = vsel %vm555_vm1, %v694_v39, %v696_v31  ;;  %v7848_v39 = vld [vmem:[%s7347_s8 + $0x98] sm:$0x3] }
  0x95   : > { %10715 = vst [vmem:[#allocation66_spill] sm:$0xff] %v7796_v62  ;;  %v7806_v63 = vsel %vm555_vm1, %v584_v47, %v586_v35  ;;  %v588_v47 = vrot.slane %v7814_v14, 1 }
  0x96   : > { %10717 = vst [vmem:[#allocation68_spill] sm:$0xff] %v7806_v63 }
  0x97   : > { %10720 = vst [vmem:[#allocation71_spill] sm:$0xff] %v7830_v59  ;;  %v7840_v34 = vsel %vm555_vm1, %v586_v35, %v588_v47 }
  0x98   : > { %10721 = vst [vmem:[#allocation72_spill] sm:$0xff] %v7840_v34 }
  0x99   : > { %6163 = vmatmul.msk.f32.gmra.mxu1 %vm702_vm2, %v7789_v12  ;;  %v660_v12 = vrot.slane %v442_v40, 1  ;;  %v443_v40 = vld [vmem:[%s7347_s8 + $0x1d8] sm:$0x3] }
  0x9a   : > { %6179 = vmatmul.msk.f32.gmra.mxu2 %vm702_vm2, %v7793_v24 }
  0x9b   : > { %6195 = vmatmul.msk.f32.gmra.mxu3 %vm702_vm2, %v7796_v62  ;;  %v7824_v62 = vsel %vm555_vm1, %v622_v16, %v624_v58  ;;  %v7827_v24 = vsel %vm555_vm1, %v658_v46, %v660_v12  ;;  %v626_v46 = vrot.slane %v7833_v11, 1  ;;  %v662_v16 = vrot.slane %v443_v40, 1 }
  0x9c   : > { %6147 = vmatmul.msk.f32.gmra.mxu0 %vm702_vm2, %v7806_v63  ;;  %10718 = vst [vmem:[#allocation69_spill] sm:$0xff] %v7824_v62 }
  0x9d   : > { %10719 = vst [vmem:[#allocation70_spill] sm:$0xff] %v7827_v24  ;;  %v7854_v35 = vsel %vm555_vm1, %v624_v58, %v626_v46  ;;  %v7857_v23 = vsel %vm555_vm1, %v660_v12, %v662_v16  ;;  %v1385_v58 = vrot.slane %v7365_v18, 2  ;;  %v1386_v12 = vrot.slane %v7372_v21, 2 }
  0x9e   : > { %10722 = vst [vmem:[#allocation73_spill] sm:$0xff] %v7857_v23 }
  0xa1   : > { %6164 = vmatmul.msk.f32.gmra.mxu1 %vm702_vm2, %v7824_v62  ;;  %v590_v62 = vrot.slane %v7848_v39, 1 }
  0xa2   : > { %6180 = vmatmul.msk.f32.gmra.mxu2 %vm702_vm2, %v7827_v24  ;;  %v7860_v24 = vsel %vm555_vm1, %v696_v31, %v698_v29  ;;  %v1387_v31 = vsel %vm1384_vm3, %v1385_v58, %v1386_v12 }
  0xa3   : > { %6196 = vmatmul.msk.f32.gmra.mxu3 %vm702_vm2, %v7830_v59  ;;  %10723 = vst [vmem:[#allocation74_spill] sm:$0xff] %v7860_v24  ;;  %v7865_v40 = vsel %vm555_vm1, %v588_v47, %v590_v62  ;;  %v1388_v47 = vrot.slane %v7391_v28, 2 }
  0xa4   : > { %6148 = vmatmul.msk.f32.gmra.mxu0 %vm702_vm2, %v7840_v34  ;;  %10724 = vst [vmem:[#allocation75_spill] sm:$0xff] %v7865_v40 }
  0xa9   : > { %6165 = vmatmul.msk.f32.gmra.mxu1 %vm702_vm2, %v7854_v35 }
  0xaa   : > { %6181 = vmatmul.msk.f32.gmra.mxu2 %vm702_vm2, %v7857_v23 }
  0xab   : > { %6197 = vmatmul.msk.f32.gmra.mxu3 %vm702_vm2, %v7860_v24 }
  0xac   : > { %6149 = vmatmul.msk.f32.gmra.mxu0 %vm702_vm2, %v7865_v40 }
  0xae   : > { %v7875_v29 = vpop.f32.mrf.mxu1 }
  0xb1   : > { %6199 = vmatmul.msk.f32.vlgmr.msrb.gmra.mxu1 %vm702_vm2, %v7365_v18  ;;  %v7880_v62 = vpop.f32.mrf.mxu0  ;;  %v1389_v18 = vsel %vm1384_vm3, %v1386_v12, %v1388_v47 }
  0xb2   : > { %6265 = vmatmul.msk.f32.vlgmr.msrb.gmra.mxu2 %vm702_vm2, %v1387_v31 }
  0xb3   : > { %6331 = vmatmul.msk.f32.vlgmr.msrb.gmra.mxu3 %vm702_vm2, %v7479_v7 }
  0xb4   : > { %6397 = vmatmul.msk.f32.vlgmr.msrb.gmra.mxu0 %vm702_vm2, %v7504_v27  ;;  %v1390_v27 = vrot.slane %v7419_v41, 2 }
  0xb5   : > { %v7888_v0 = vpop.f32.mrf.mxu2 }
  0xb6   : > { %v7890_v46 = vpop.f32.mrf.mxu3  ;;  %v7892_v16 = vpop.f32.mrf.mxu1 }
  0xb7   : > { %10725 = vst [vmem:[#allocation76_spill] sm:$0xff] %v7890_v46 }
  0xb9   : > { %6200 = vmatmul.msk.f32.gmra.mxu1 %vm702_vm2, %v7372_v21  ;;  %v7897_v58 = vpop.f32.mrf.mxu0  ;;  %v1391_v21 = vsel %vm1384_vm3, %v1388_v47, %v1390_v27 }
  0xba   : > { %6266 = vmatmul.msk.f32.gmra.mxu2 %vm702_vm2, %v1389_v18 }
  0xbb   : > { %6332 = vmatmul.msk.f32.gmra.mxu3 %vm702_vm2, %v7482_v8 }
  0xbc   : > { %6398 = vmatmul.msk.f32.gmra.mxu0 %vm702_vm2, %v7534_v49  ;;  %v1392_v49 = vrot.slane %v7446_v53, 2  ;;  %v1394_v53 = vrot.slane %v7479_v7, 2 }
  0xbd   : > { %v7905_v31 = vpop.f32.mrf.mxu2 }
  0xbe   : > { %v7907_v46 = vpop.f32.mrf.mxu3  ;;  %v7909_v12 = vpop.f32.mrf.mxu1 }
  0xbf   : > { %10726 = vst [vmem:[#allocation77_spill] sm:$0xff] %v7907_v46 }
  0xc1   : > { %6201 = vmatmul.msk.f32.gmra.mxu1 %vm702_vm2, %v7391_v28  ;;  %v7914_v18 = vpop.f32.mrf.mxu0  ;;  %v1393_v28 = vsel %vm1384_vm3, %v1390_v27, %v1392_v49 }
  0xc2   : > { %6267 = vmatmul.msk.f32.gmra.mxu2 %vm702_vm2, %v1391_v21 }
  0xc3   : > { %6333 = vmatmul.msk.f32.gmra.mxu3 %vm702_vm2, %v7512_v30 }
  0xc4   : > { %6399 = vmatmul.msk.f32.gmra.mxu0 %vm702_vm2, %v7564_v3  ;;  %v1395_v3 = vrot.slane %v7482_v8, 2 }
  0xc5   : > { %v7922_v46 = vpop.f32.mrf.mxu2 }
  0xc6   : > { %v7924_v24 = vpop.f32.mrf.mxu3  ;;  %v7926_v47 = vpop.f32.mrf.mxu1 }
  0xc7   : > { %10727 = vst [vmem:[#allocation78_spill] sm:$0xff] %v7924_v24 }
  0xc9   : > { %6202 = vmatmul.msk.f32.gmra.mxu1 %vm702_vm2, %v7419_v41  ;;  %v7931_v21 = vpop.f32.mrf.mxu0  ;;  %v7947_v41 = vsel %vm1384_vm3, %v1394_v53, %v1395_v3 }
  0xca   : > { %6268 = vmatmul.msk.f32.gmra.mxu2 %vm702_vm2, %v1393_v28  ;;  %10730 = vst [vmem:[#allocation81_spill] sm:$0xff] %v7947_v41 }
  0xcb   : > { %6334 = vmatmul.msk.f32.gmra.mxu3 %vm702_vm2, %v7542_v51 }
  0xcc   : > { %6400 = vmatmul.msk.f32.gmra.mxu0 %vm702_vm2, %v7599_v44  ;;  %v1397_v44 = vrot.slane %v7512_v30, 2 }
  0xcd   : > { %v7940_v24 = vpop.f32.mrf.mxu2 }
  0xce   : > { %10728 = vst [vmem:[#allocation79_spill] sm:$0xff] %v7940_v24  ;;  %v7942_v27 = vpop.f32.mrf.mxu3  ;;  %v7944_v49 = vpop.f32.mrf.mxu1 }
  0xcf   : > { %10729 = vst [vmem:[#allocation80_spill] sm:$0xff] %v7942_v27 }
  0xd1   : > { %6203 = vmatmul.msk.f32.gmra.mxu1 %vm702_vm2, %v7479_v7  ;;  %v7951_v28 = vpop.f32.mrf.mxu0  ;;  %v7967_v7 = vsel %vm1384_vm3, %v1395_v3, %v1397_v44 }
  0xd2   : > { %6269 = vmatmul.msk.f32.gmra.mxu2 %vm702_vm2, %v7947_v41  ;;  %10733 = vst [vmem:[#allocation84_spill] sm:$0xff] %v7967_v7 }
  0xd3   : > { %6335 = vmatmul.msk.f32.gmra.mxu3 %vm702_vm2, %v7608_v54 }
  0xd4   : > { %6401 = vmatmul.msk.f32.gmra.mxu0 %vm702_vm2, %v7634_v43  ;;  %v1399_v43 = vrot.slane %v7542_v51, 2 }
  0xd5   : > { %v7960_v27 = vpop.f32.mrf.mxu2 }
  0xd6   : > { %10731 = vst [vmem:[#allocation82_spill] sm:$0xff] %v7960_v27  ;;  %v7962_v53 = vpop.f32.mrf.mxu3  ;;  %v7964_v59 = vpop.f32.mrf.mxu1 }
  0xd7   : > { %10732 = vst [vmem:[#allocation83_spill] sm:$0xff] %v7962_v53 }
  0xd9   : > { %6204 = vmatmul.msk.f32.gmra.mxu1 %vm702_vm2, %v7482_v8  ;;  %v7971_v41 = vpop.f32.mrf.mxu0  ;;  %v7987_v8 = vsel %vm1384_vm3, %v1397_v44, %v1399_v43 }
  0xda   : > { %6270 = vmatmul.msk.f32.gmra.mxu2 %vm702_vm2, %v7967_v7  ;;  %10736 = vst [vmem:[#allocation87_spill] sm:$0xff] %v7987_v8 }
  0xdb   : > { %6336 = vmatmul.msk.f32.gmra.mxu3 %vm702_vm2, %v7611_v1 }
  0xdc   : > { %6402 = vmatmul.msk.f32.gmra.mxu0 %vm702_vm2, %v7664_v37  ;;  %v1401_v37 = vrot.slane %v7572_v9, 2  ;;  %v1403_v9 = vrot.slane %v7608_v54, 2 }
  0xdd   : > { %v7980_v53 = vpop.f32.mrf.mxu2 }
  0xde   : > { %10734 = vst [vmem:[#allocation85_spill] sm:$0xff] %v7980_v53  ;;  %v7982_v3 = vpop.f32.mrf.mxu3  ;;  %v7984_v27 = vpop.f32.mrf.mxu1 }
  0xdf   : > { %10735 = vst [vmem:[#allocation86_spill] sm:$0xff] %v7982_v3 }
  0xe1   : > { %6205 = vmatmul.msk.f32.gmra.mxu1 %vm702_vm2, %v7512_v30  ;;  %v7991_v7 = vpop.f32.mrf.mxu0  ;;  %v8007_v30 = vsel %vm1384_vm3, %v1399_v43, %v1401_v37 }
  0xe2   : > { %6271 = vmatmul.msk.f32.gmra.mxu2 %vm702_vm2, %v7987_v8  ;;  %10739 = vst [vmem:[#allocation90_spill] sm:$0xff] %v8007_v30 }
  0xe3   : > { %6337 = vmatmul.msk.f32.gmra.mxu3 %vm702_vm2, %v7642_v2 }
  0xe4   : > { %6403 = vmatmul.msk.f32.gmra.mxu0 %vm702_vm2, %v7694_v50 }
  0xe5   : > { %v8000_v3 = vpop.f32.mrf.mxu2 }
  0xe6   : > { %10737 = vst [vmem:[#allocation88_spill] sm:$0xff] %v8000_v3  ;;  %v8002_v44 = vpop.f32.mrf.mxu3  ;;  %v8004_v53 = vpop.f32.mrf.mxu1 }
  0xe7   : > { %10738 = vst [vmem:[#allocation89_spill] sm:$0xff] %v8002_v44  ;;  %v1404_v44 = vrot.slane %v7611_v1, 2 }
  0xe9   : > { %6206 = vmatmul.msk.f32.gmra.mxu1 %vm702_vm2, %v7542_v51  ;;  %v8011_v8 = vpop.f32.mrf.mxu0  ;;  %v8028_v50 = vsel %vm1384_vm3, %v1403_v9, %v1404_v44 }
  0xea   : > { %6272 = vmatmul.msk.f32.gmra.mxu2 %vm702_vm2, %v8007_v30  ;;  %10742 = vst [vmem:[#allocation93_spill] sm:$0xff] %v8028_v50 }
  0xeb   : > { %6338 = vmatmul.msk.f32.gmra.mxu3 %vm702_vm2, %v7672_v55 }
  0xec   : > { %6404 = vmatmul.msk.f32.gmra.mxu0 %vm702_vm2, %v7729_v52  ;;  %v1406_v52 = vrot.slane %v7642_v2, 2 }
  0xed   : > { %v8021_v43 = vpop.f32.mrf.mxu2 }
  0xee   : > { %10740 = vst [vmem:[#allocation91_spill] sm:$0xff] %v8021_v43  ;;  %v8023_v37 = vpop.f32.mrf.mxu3  ;;  %v8025_v51 = vpop.f32.mrf.mxu1 }
  0xef   : > { %10741 = vst [vmem:[#allocation92_spill] sm:$0xff] %v8023_v37 }
  0xf1   : > { %6207 = vmatmul.msk.f32.gmra.mxu1 %vm702_vm2, %v7608_v54  ;;  %v8032_v30 = vpop.f32.mrf.mxu0  ;;  %v8048_v54 = vsel %vm1384_vm3, %v1404_v44, %v1406_v52 }
  0xf2   : > { %6273 = vmatmul.msk.f32.gmra.mxu2 %vm702_vm2, %v8028_v50  ;;  %10745 = vst [vmem:[#allocation96_spill] sm:$0xff] %v8048_v54 }
  0xf3   : > { %6339 = vmatmul.msk.f32.gmra.mxu3 %vm702_vm2, %v7738_v10 }
  0xf4   : > { %6405 = vmatmul.msk.f32.gmra.mxu0 %vm702_vm2, %v7764_v25  ;;  %v1408_v25 = vrot.slane %v7672_v55, 2 }
  0xf5   : > { %v8041_v37 = vpop.f32.mrf.mxu2 }
  0xf6   : > { %10743 = vst [vmem:[#allocation94_spill] sm:$0xff] %v8041_v37  ;;  %v8043_v9 = vpop.f32.mrf.mxu3  ;;  %v8045_v43 = vpop.f32.mrf.mxu1 }
  0xf7   : > { %10744 = vst [vmem:[#allocation95_spill] sm:$0xff] %v8043_v9 }
  0xf9   : > { %6208 = vmatmul.msk.f32.gmra.mxu1 %vm702_vm2, %v7611_v1  ;;  %v8052_v50 = vpop.f32.mrf.mxu0  ;;  %v8068_v1 = vsel %vm1384_vm3, %v1406_v52, %v1408_v25 }
  0xfa   : > { %6274 = vmatmul.msk.f32.gmra.mxu2 %vm702_vm2, %v8048_v54  ;;  %10748 = vst [vmem:[#allocation99_spill] sm:$0xff] %v8068_v1 }
  0xfb   : > { %6340 = vmatmul.msk.f32.gmra.mxu3 %vm702_vm2, %v7741_v20 }
  0xfc   : > { %6406 = vmatmul.msk.f32.gmra.mxu0 %vm702_vm2, %v7806_v63  ;;  %v1410_v63 = vrot.slane %v7702_v4, 2  ;;  %v1412_v4 = vrot.slane %v7738_v10, 2 }
  0xfd   : > { %v8061_v9 = vpop.f32.mrf.mxu2 }
  0xfe   : > { %10746 = vst [vmem:[#allocation97_spill] sm:$0xff] %v8061_v9  ;;  %v8063_v44 = vpop.f32.mrf.mxu3  ;;  %v8065_v37 = vpop.f32.mrf.mxu1 }
  0xff   : > { %10747 = vst [vmem:[#allocation98_spill] sm:$0xff] %v8063_v44 }
 0x101   : > { %6209 = vmatmul.msk.f32.gmra.mxu1 %vm702_vm2, %v7642_v2  ;;  %v8072_v54 = vpop.f32.mrf.mxu0  ;;  %v8088_v2 = vsel %vm1384_vm3, %v1408_v25, %v1410_v63 }
 0x102   : > { %6275 = vmatmul.msk.f32.gmra.mxu2 %vm702_vm2, %v8068_v1  ;;  %10751 = vst [vmem:[#allocation102_spill] sm:$0xff] %v8088_v2 }
 0x103   : > { %6341 = vmatmul.msk.f32.gmra.mxu3 %vm702_vm2, %v7772_v32 }
 0x104   : > { %6407 = vmatmul.msk.f32.gmra.mxu0 %vm702_vm2, %v7840_v34 }
 0x105   : > { %v8081_v44 = vpop.f32.mrf.mxu2 }
 0x106   : > { %10749 = vst [vmem:[#allocation100_spill] sm:$0xff] %v8081_v44  ;;  %v8083_v52 = vpop.f32.mrf.mxu3  ;;  %v8085_v9 = vpop.f32.mrf.mxu1 }
 0x107   : > { %10750 = vst [vmem:[#allocation101_spill] sm:$0xff] %v8083_v52  ;;  %v1413_v52 = vrot.slane %v7741_v20, 2 }
 0x109   : > { %6210 = vmatmul.msk.f32.gmra.mxu1 %vm702_vm2, %v7672_v55  ;;  %v8092_v1 = vpop.f32.mrf.mxu0  ;;  %v8109_v34 = vsel %vm1384_vm3, %v1412_v4, %v1413_v52 }
 0x10a   : > { %6276 = vmatmul.msk.f32.gmra.mxu2 %vm702_vm2, %v8088_v2  ;;  %10754 = vst [vmem:[#allocation105_spill] sm:$0xff] %v8109_v34 }
 0x10b   : > { %6342 = vmatmul.msk.f32.gmra.mxu3 %vm702_vm2, %v7814_v14 }
 0x10c   : > { %6408 = vmatmul.msk.f32.gmra.mxu0 %vm702_vm2, %v7865_v40  ;;  %v1415_v40 = vrot.slane %v7772_v32, 2 }
 0x10d   : > { %v8102_v25 = vpop.f32.mrf.mxu2 }
 0x10e   : > { %10752 = vst [vmem:[#allocation103_spill] sm:$0xff] %v8102_v25  ;;  %v8104_v63 = vpop.f32.mrf.mxu3  ;;  %v8106_v55 = vpop.f32.mrf.mxu1 }
 0x10f   : > { %10753 = vst [vmem:[#allocation104_spill] sm:$0xff] %v8104_v63 }
 0x111   : > { %6211 = vmatmul.msk.f32.gmra.mxu1 %vm702_vm2, %v7738_v10  ;;  %v8113_v2 = vpop.f32.mrf.mxu0  ;;  %v8129_v10 = vsel %vm1384_vm3, %v1413_v52, %v1415_v40 }
 0x112   : > { %6277 = vmatmul.msk.f32.gmra.mxu2 %vm702_vm2, %v8109_v34  ;;  %10757 = vst [vmem:[#allocation108_spill] sm:$0xff] %v8129_v10 }
 0x113   : > { %6343 = vmatmul.msk.f32.gmra.mxu3 %vm702_vm2, %v7350_v5 }
 0x114   : > { %6409 = vmatmul.msk.f32.gmra.mxu0 %vm702_vm2, %v7368_v19  ;;  %v1417_v19 = vrot.slane %v7814_v14, 2 }
 0x115   : > { %v8122_v63 = vpop.f32.mrf.mxu2 }
 0x116   : > { %10755 = vst [vmem:[#allocation106_spill] sm:$0xff] %v8122_v63  ;;  %v8124_v4 = vpop.f32.mrf.mxu3  ;;  %v8126_v25 = vpop.f32.mrf.mxu1 }
 0x117   : > { %10756 = vst [vmem:[#allocation107_spill] sm:$0xff] %v8124_v4 }
 0x119   : > { %6212 = vmatmul.msk.f32.gmra.mxu1 %vm702_vm2, %v7741_v20  ;;  %v8133_v34 = vpop.f32.mrf.mxu0  ;;  %v8149_v20 = vsel %vm1384_vm3, %v1415_v40, %v1417_v19 }
 0x11a   : > { %6278 = vmatmul.msk.f32.gmra.mxu2 %vm702_vm2, %v8129_v10  ;;  %10760 = vst [vmem:[#allocation111_spill] sm:$0xff] %v8149_v20 }
 0x11b   : > { %6344 = vmatmul.msk.f32.gmra.mxu3 %vm702_vm2, %v7353_v6 }
 0x11c   : > { %6410 = vmatmul.msk.f32.gmra.mxu0 %vm702_vm2, %v7397_v33  ;;  %v1419_v33 = vrot.slane %v7848_v39, 2  ;;  %v1421_v39 = vrot.slane %v7350_v5, 2 }
 0x11d   : > { %v8142_v4 = vpop.f32.mrf.mxu2 }
 0x11e   : > { %10758 = vst [vmem:[#allocation109_spill] sm:$0xff] %v8142_v4  ;;  %v8144_v52 = vpop.f32.mrf.mxu3  ;;  %v8146_v63 = vpop.f32.mrf.mxu1 }
 0x11f   : > { %10759 = vst [vmem:[#allocation110_spill] sm:$0xff] %v8144_v52 }
 0x121   : > { %6213 = vmatmul.msk.f32.gmra.mxu1 %vm702_vm2, %v7772_v32  ;;  %v8153_v10 = vpop.f32.mrf.mxu0  ;;  %v8169_v32 = vsel %vm1384_vm3, %v1417_v19, %v1419_v33 }
 0x122   : > { %6279 = vmatmul.msk.f32.gmra.mxu2 %vm702_vm2, %v8149_v20  ;;  %10763 = vst [vmem:[#allocation114_spill] sm:$0xff] %v8169_v32 }
 0x123   : > { %6345 = vmatmul.msk.f32.gmra.mxu3 %vm702_vm2, %v7362_v17 }
 0x124   : > { %6411 = vmatmul.msk.f32.gmra.mxu0 %vm702_vm2, %v7424_v45 }
 0x125   : > { %v8162_v52 = vpop.f32.mrf.mxu2 }
 0x126   : > { %10761 = vst [vmem:[#allocation112_spill] sm:$0xff] %v8162_v52  ;;  %v8164_v40 = vpop.f32.mrf.mxu3  ;;  %v8166_v4 = vpop.f32.mrf.mxu1 }
 0x127   : > { %10762 = vst [vmem:[#allocation113_spill] sm:$0xff] %v8164_v40  ;;  %v1422_v40 = vrot.slane %v7353_v6, 2 }
 0x129   : > { %6214 = vmatmul.msk.f32.gmra.mxu1 %vm702_vm2, %v7814_v14  ;;  %v8173_v20 = vpop.f32.mrf.mxu0  ;;  %v8188_v45 = vsel %vm1384_vm3, %v1421_v39, %v1422_v40 }
 0x12a   : > { %6280 = vmatmul.msk.f32.gmra.mxu2 %vm702_vm2, %v8169_v32  ;;  %10766 = vst [vmem:[#allocation117_spill] sm:$0xff] %v8188_v45 }
 0x12b   : > { %6346 = vmatmul.msk.f32.gmra.mxu3 %vm702_vm2, %v7406_v36 }
 0x12c   : > { %6412 = vmatmul.msk.f32.gmra.mxu0 %vm702_vm2, %v7451_v57  ;;  %v1424_v57 = vrot.slane %v7362_v17, 2 }
 0x12d   : > { %v8183_v19 = vpop.f32.mrf.mxu2 }
 0x12e   : > { %10764 = vst [vmem:[#allocation115_spill] sm:$0xff] %v8183_v19  ;;  %v8185_v33 = vpop.f32.mrf.mxu3  ;;  %v1192_v14 = vpop.f32.mrf.mxu1 }
 0x12f   : > { %10765 = vst [vmem:[#allocation116_spill] sm:$0xff] %v8185_v33  ;;  %v1193_v19 = vadd.f32 %v1192_v14, %v7880_v62  ;;  %v1426_v62 = vrot.slane %v7406_v36, 2 }
 0x131   : > { %6215 = vmatmul.msk.f32.gmra.mxu1 %vm702_vm2, %v7350_v5  ;;  %v2265_v32 = vpop.f32.mrf.mxu0  ;;  %v8201_v5 = vsel %vm1384_vm3, %v1422_v40, %v1424_v57 }
 0x132   : > { %6281 = vmatmul.msk.f32.gmra.mxu2 %vm702_vm2, %v8188_v45 }
 0x133   : > { %6347 = vmatmul.msk.f32.gmra.mxu3 %vm702_vm2, %v7460_v60 }
 0x134   : > { %6413 = vmatmul.msk.f32.gmra.mxu0 %vm702_vm2, %v7488_v15 }
 0x135   : > { %v1679_v33 = vpop.f32.mrf.mxu2 }
 0x136   : > { %v1969_v39 = vpop.f32.mrf.mxu3  ;;  %v1871_v52 = vadd.f32 %v1679_v33, %v1193_v19  ;;  %v1195_v44 = vpop.f32.mrf.mxu1 }
 0x137   : > { %v1196_v19 = vadd.f32 %v1195_v44, %v7897_v58  ;;  %v1428_v58 = vrot.slane %v7433_v48, 2  ;;  %v1430_v48 = vrot.slane %v7460_v60, 2 }
 0x138   : > { %v2161_v3 = vadd.f32 %v1969_v39, %v1871_v52 }
 0x139   : > { %6216 = vmatmul.msk.f32.gmra.mxu1 %vm702_vm2, %v7353_v6  ;;  %v2268_v45 = vpop.f32.mrf.mxu0 }
 0x13a   : > { %v8205_v24 = vadd.f32 %v2265_v32, %v2161_v3  ;;  %6282 = vmatmul.msk.f32.gmra.mxu2 %vm702_vm2, %v8201_v5  ;;  %v8216_v3 = vsel %vm1384_vm3, %v1424_v57, %v1426_v62 }
 0x13b   : > { %6348 = vmatmul.msk.f32.gmra.mxu3 %vm702_vm2, %v7463_v61 }
 0x13c   : > { %6414 = vmatmul.msk.f32.gmra.mxu0 %vm702_vm2, %v7518_v38 }
 0x13d   : > { %v1682_v52 = vpop.f32.mrf.mxu2 }
 0x13e   : > { %v1972_v40 = vpop.f32.mrf.mxu3  ;;  %v1872_v33 = vadd.f32 %v1682_v52, %v1196_v19  ;;  %v1198_v6 = vpop.f32.mrf.mxu1 }
 0x13f   : > { %v1199_v44 = vadd.f32 %v1198_v6, %v7914_v18  ;;  %v1431_v18 = vrot.slane %v7463_v61, 2 }
 0x140   : > { %v2162_v32 = vadd.f32 %v1972_v40, %v1872_v33 }
 0x141   : > { %6217 = vmatmul.msk.f32.gmra.mxu1 %vm702_vm2, %v7362_v17  ;;  %v2271_v14 = vpop.f32.mrf.mxu0 }
 0x142   : > { %v8220_v39 = vadd.f32 %v2268_v45, %v2162_v32  ;;  %6283 = vmatmul.msk.f32.gmra.mxu2 %vm702_vm2, %v8216_v3  ;;  %v8231_v45 = vsel %vm1384_vm3, %v1426_v62, %v1428_v58 }
 0x143   : > { %6349 = vmatmul.msk.f32.gmra.mxu3 %vm702_vm2, %v7497_v22 }
 0x144   : > { %10767 = vst [vmem:[#allocation118_spill] sm:$0xff] %v8220_v39  ;;  %6415 = vmatmul.msk.f32.gmra.mxu0 %vm702_vm2, %v7548_v56 }
 0x145   : > { %v1685_v57 = vpop.f32.mrf.mxu2 }
 0x146   : > { %v1975_v19 = vpop.f32.mrf.mxu3  ;;  %v1873_v52 = vadd.f32 %v1685_v57, %v1199_v44  ;;  %v1201_v17 = vpop.f32.mrf.mxu1  ;;  %v8247_v44 = vsel %vm1384_vm3, %v1430_v48, %v1431_v18 }
 0x147   : > { %v1202_v62 = vadd.f32 %v1201_v17, %v7931_v21  ;;  %v1433_v21 = vrot.slane %v7497_v22, 2 }
 0x148   : > { %v2163_v40 = vadd.f32 %v1975_v19, %v1873_v52 }
 0x149   : > { %6218 = vmatmul.msk.f32.gmra.mxu1 %vm702_vm2, %v7406_v36  ;;  %v2274_v33 = vpop.f32.mrf.mxu0 }
 0x14a   : > { %v8235_v32 = vadd.f32 %v2271_v14, %v2163_v40  ;;  %6284 = vmatmul.msk.f32.gmra.mxu2 %vm702_vm2, %v8231_v45  ;;  %v10770_v40 = vld [vmem:[#allocation38_spill] sm:$0xff] }
 0x14b   : > { %6350 = vmatmul.msk.f32.gmra.mxu3 %vm702_vm2, %v7527_v42 }
 0x14c   : > { %10768 = vst [vmem:[#allocation119_spill] sm:$0xff] %v8235_v32  ;;  %6416 = vmatmul.msk.f32.gmra.mxu0 %vm702_vm2, %v7578_v13 }
 0x14d   : > { %v1688_v6 = vpop.f32.mrf.mxu2 }
 0x14e   : > { %v1978_v36 = vpop.f32.mrf.mxu3  ;;  %v1874_v58 = vadd.f32 %v1688_v6, %v1202_v62  ;;  %v1204_v14 = vpop.f32.mrf.mxu1 }
 0x14f   : > { %v1205_v17 = vadd.f32 %v1204_v14, %v7951_v28  ;;  %v10772_v28 = vld [vmem:[#allocation37_spill] sm:$0xff]  ;;  %v1435_v14 = vrot.slane %v7527_v42, 2 }
 0x150   : > { %v2164_v57 = vadd.f32 %v1978_v36, %v1874_v58 }
 0x151   : > { %6219 = vmatmul.msk.f32.gmra.mxu1 %vm702_vm2, %v7460_v60  ;;  %v2277_v19 = vpop.f32.mrf.mxu0 }
 0x152   : > { %v8251_v52 = vadd.f32 %v2274_v33, %v2164_v57  ;;  %6285 = vmatmul.msk.f32.gmra.mxu2 %vm702_vm2, %v8247_v44  ;;  %v8262_v33 = vsel %vm1384_vm3, %v1431_v18, %v1433_v21 }
 0x153   : > { %6351 = vmatmul.msk.f32.gmra.mxu3 %vm702_vm2, %v7587_v26 }
 0x154   : > { %10769 = vst [vmem:[#allocation120_spill] sm:$0xff] %v8251_v52  ;;  %6417 = vmatmul.msk.f32.gmra.mxu0 %vm702_vm2, %v10770_v40 }
 0x155   : > { %v1691_v48 = vpop.f32.mrf.mxu2 }
 0x156   : > { %v1981_v62 = vpop.f32.mrf.mxu3  ;;  %v1875_v6 = vadd.f32 %v1691_v48, %v1205_v17  ;;  %v1207_v60 = vpop.f32.mrf.mxu1  ;;  %v10773_v48 = vld [vmem:[#allocation43_spill] sm:$0xff] }
 0x157   : > { %v1208_v17 = vadd.f32 %v1207_v60, %v7971_v41  ;;  %v10775_v41 = vld [vmem:[#allocation41_spill] sm:$0xff]  ;;  %v10776_v60 = vld [vmem:[#allocation34_spill] sm:$0xff] }
 0x158   : > { %v2165_v36 = vadd.f32 %v1981_v62, %v1875_v6  ;;  %v1437_v32 = vrot.slane %v10776_v60, 2  ;;  %v1440_v60 = vrot.slane %v10772_v28, 2 }
 0x159   : > { %6220 = vmatmul.msk.f32.gmra.mxu1 %vm702_vm2, %v7463_v61  ;;  %v2280_v58 = vpop.f32.mrf.mxu0 }
 0x15a   : > { %v8266_v57 = vadd.f32 %v2277_v19, %v2165_v36  ;;  %6286 = vmatmul.msk.f32.gmra.mxu2 %vm702_vm2, %v8262_v33  ;;  %v8277_v19 = vsel %vm1384_vm3, %v1433_v21, %v1435_v14 }
 0x15b   : > { %6352 = vmatmul.msk.f32.gmra.mxu3 %vm702_vm2, %v10772_v28 }
 0x15c   : > { %10771 = vst [vmem:[#allocation38_spill] sm:$0xff] %v8266_v57  ;;  %6418 = vmatmul.msk.f32.gmra.mxu0 %vm702_vm2, %v10773_v48 }
 0x15d   : > { %v1694_v18 = vpop.f32.mrf.mxu2 }
 0x15e   : > { %v1984_v62 = vpop.f32.mrf.mxu3  ;;  %v1876_v6 = vadd.f32 %v1694_v18, %v1208_v17  ;;  %v1210_v61 = vpop.f32.mrf.mxu1  ;;  %v10777_v18 = vld [vmem:[#allocation48_spill] sm:$0xff] }
 0x15f   : > { %v1211_v17 = vadd.f32 %v1210_v61, %v7991_v7  ;;  %v10779_v7 = vld [vmem:[#allocation46_spill] sm:$0xff]  ;;  %v1439_v61 = vrot.slane %v7587_v26, 2 }
 0x160   : > { %v2166_v36 = vadd.f32 %v1984_v62, %v1876_v6 }
 0x161   : > { %6221 = vmatmul.msk.f32.gmra.mxu1 %vm702_vm2, %v7497_v22  ;;  %v2283_v57 = vpop.f32.mrf.mxu0 }
 0x162   : > { %v8281_v52 = vadd.f32 %v2280_v58, %v2166_v36  ;;  %6287 = vmatmul.msk.f32.gmra.mxu2 %vm702_vm2, %v8277_v19  ;;  %v8292_v58 = vsel %vm1384_vm3, %v1435_v14, %v1437_v32  ;;  %v10780_v14 = vld [vmem:[#allocation53_spill] sm:$0xff] }
 0x163   : > { %6353 = vmatmul.msk.f32.gmra.mxu3 %vm702_vm2, %v10775_v41 }
 0x164   : > { %10774 = vst [vmem:[#allocation37_spill] sm:$0xff] %v8281_v52  ;;  %6419 = vmatmul.msk.f32.gmra.mxu0 %vm702_vm2, %v10777_v18 }
 0x165   : > { %v1697_v21 = vpop.f32.mrf.mxu2 }
 0x166   : > { %v1987_v62 = vpop.f32.mrf.mxu3  ;;  %v1877_v6 = vadd.f32 %v1697_v21, %v1211_v17  ;;  %v1213_v22 = vpop.f32.mrf.mxu1 }
 0x167   : > { %v1214_v32 = vadd.f32 %v1213_v22, %v8011_v8  ;;  %v10782_v8 = vld [vmem:[#allocation56_spill] sm:$0xff]  ;;  %v1442_v22 = vrot.slane %v10775_v41, 2 }
 0x168   : > { %v2167_v36 = vadd.f32 %v1987_v62, %v1877_v6  ;;  %v8308_v62 = vsel %vm1384_vm3, %v1439_v61, %v1440_v60 }
 0x169   : > { %6222 = vmatmul.msk.f32.gmra.mxu1 %vm702_vm2, %v7527_v42  ;;  %v2286_v52 = vpop.f32.mrf.mxu0 }
 0x16a   : > { %v8296_v39 = vadd.f32 %v2283_v57, %v2167_v36  ;;  %6288 = vmatmul.msk.f32.gmra.mxu2 %vm702_vm2, %v8292_v58 }
 0x16b   : > { %6354 = vmatmul.msk.f32.gmra.mxu3 %vm702_vm2, %v10779_v7 }
 0x16c   : > { %10778 = vst [vmem:[#allocation43_spill] sm:$0xff] %v8296_v39  ;;  %6420 = vmatmul.msk.f32.gmra.mxu0 %vm702_vm2, %v10780_v14 }
 0x16d   : > { %v1700_v17 = vpop.f32.mrf.mxu2 }
 0x16e   : > { %v1990_v42 = vpop.f32.mrf.mxu3  ;;  %v1878_v21 = vadd.f32 %v1700_v17, %v1214_v32  ;;  %v1216_v57 = vpop.f32.mrf.mxu1  ;;  %v10783_v17 = vld [vmem:[#allocation59_spill] sm:$0xff] }
 0x16f   : > { %v1217_v32 = vadd.f32 %v1216_v57, %v8032_v30  ;;  %v10785_v30 = vld [vmem:[#allocation57_spill] sm:$0xff]  ;;  %v1444_v57 = vrot.slane %v10779_v7, 2 }
 0x170   : > { %v2168_v6 = vadd.f32 %v1990_v42, %v1878_v21 }
 0x171   : > { %6223 = vmatmul.msk.f32.gmra.mxu1 %vm702_vm2, %v7587_v26  ;;  %v2289_v36 = vpop.f32.mrf.mxu0 }
 0x172   : > { %v8312_v39 = vadd.f32 %v2286_v52, %v2168_v6  ;;  %6289 = vmatmul.msk.f32.gmra.mxu2 %vm702_vm2, %v8308_v62  ;;  %v8323_v52 = vsel %vm1384_vm3, %v1440_v60, %v1442_v22 }
 0x173   : > { %6355 = vmatmul.msk.f32.gmra.mxu3 %vm702_vm2, %v10782_v8 }
 0x174   : > { %10781 = vst [vmem:[#allocation41_spill] sm:$0xff] %v8312_v39  ;;  %6421 = vmatmul.msk.f32.gmra.mxu0 %vm702_vm2, %v10783_v17 }
 0x175   : > { %v1703_v61 = vpop.f32.mrf.mxu2 }
 0x176   : > { %v1993_v42 = vpop.f32.mrf.mxu3  ;;  %v1879_v21 = vadd.f32 %v1703_v61, %v1217_v32  ;;  %v1219_v26 = vpop.f32.mrf.mxu1  ;;  %v10786_v61 = vld [vmem:[#allocation64_spill] sm:$0xff] }
 0x177   : > { %v1220_v32 = vadd.f32 %v1219_v26, %v8052_v50  ;;  %v10789_v50 = vld [vmem:[#allocation62_spill] sm:$0xff]  ;;  %v10790_v26 = vld [vmem:[#allocation51_spill] sm:$0xff] }
 0x178   : > { %v2169_v6 = vadd.f32 %v1993_v42, %v1879_v21 }
 0x179   : > { %6224 = vmatmul.msk.f32.gmra.mxu1 %vm702_vm2, %v10772_v28  ;;  %v2292_v39 = vpop.f32.mrf.mxu0 }
 0x17a   : > { %v8327_v14 = vadd.f32 %v2289_v36, %v2169_v6  ;;  %6290 = vmatmul.msk.f32.gmra.mxu2 %vm702_vm2, %v8323_v52  ;;  %v8338_v36 = vsel %vm1384_vm3, %v1442_v22, %v1444_v57 }
 0x17b   : > { %6356 = vmatmul.msk.f32.gmra.mxu3 %vm702_vm2, %v10785_v30  ;;  %10787 = vst [vmem:[#allocation48_spill] sm:$0xff] %v8338_v36 }
 0x17c   : > { %10784 = vst [vmem:[#allocation34_spill] sm:$0xff] %v8327_v14  ;;  %6422 = vmatmul.msk.f32.gmra.mxu0 %vm702_vm2, %v10786_v61  ;;  %v1446_v61 = vrot.slane %v10790_v26, 2  ;;  %v1449_v26 = vrot.slane %v10785_v30, 2 }
 0x17d   : > { %v1706_v60 = vpop.f32.mrf.mxu2 }
 0x17e   : > { %v1996_v42 = vpop.f32.mrf.mxu3  ;;  %v1880_v21 = vadd.f32 %v1706_v60, %v1220_v32  ;;  %v1222_v28 = vpop.f32.mrf.mxu1  ;;  %v10791_v60 = vld [vmem:[#allocation69_spill] sm:$0xff] }
 0x17f   : > { %v1223_v32 = vadd.f32 %v1222_v28, %v8072_v54  ;;  %v10793_v54 = vld [vmem:[#allocation67_spill] sm:$0xff]  ;;  %v1448_v28 = vrot.slane %v10782_v8, 2 }
 0x180   : > { %v2170_v6 = vadd.f32 %v1996_v42, %v1880_v21 }
 0x181   : > { %6225 = vmatmul.msk.f32.gmra.mxu1 %vm702_vm2, %v10775_v41  ;;  %v2295_v14 = vpop.f32.mrf.mxu0 }
 0x182   : > { %v8342_v17 = vadd.f32 %v2292_v39, %v2170_v6  ;;  %6291 = vmatmul.msk.f32.gmra.mxu2 %vm702_vm2, %v8338_v36  ;;  %v8353_v39 = vsel %vm1384_vm3, %v1444_v57, %v1446_v61 }
 0x183   : > { %6357 = vmatmul.msk.f32.gmra.mxu3 %vm702_vm2, %v10789_v50 }
 0x184   : > { %10788 = vst [vmem:[#allocation46_spill] sm:$0xff] %v8342_v17  ;;  %6423 = vmatmul.msk.f32.gmra.mxu0 %vm702_vm2, %v10791_v60 }
 0x185   : > { %v1709_v22 = vpop.f32.mrf.mxu2 }
 0x186   : > { %v1999_v42 = vpop.f32.mrf.mxu3  ;;  %v1881_v21 = vadd.f32 %v1709_v22, %v1223_v32  ;;  %v1225_v41 = vpop.f32.mrf.mxu1  ;;  %v8369_v22 = vsel %vm1384_vm3, %v1448_v28, %v1449_v26  ;;  %v10795_v28 = vld [vmem:[#allocation17_spill] sm:$0xff] }
 0x187   : > { %v1226_v57 = vadd.f32 %v1225_v41, %v8092_v1  ;;  %v6957_v1 = vld [vmem:[%s7347_s8 + $0x140] sm:$0xff]  ;;  %v1451_v41 = vrot.slane %v10789_v50, 2 }
 0x188   : > { %v2171_v6 = vadd.f32 %v1999_v42, %v1881_v21 }
 0x189   : > { %6226 = vmatmul.msk.f32.gmra.mxu1 %vm702_vm2, %v10779_v7  ;;  %v2298_v17 = vpop.f32.mrf.mxu0 }
 0x18a   : > { %v8357_v36 = vadd.f32 %v2295_v14, %v2171_v6  ;;  %6292 = vmatmul.msk.f32.gmra.mxu2 %vm702_vm2, %v8353_v39 }
 0x18b   : > { %6358 = vmatmul.msk.f32.gmra.mxu3 %vm702_vm2, %v10793_v54 }
 0x18c   : > { %10792 = vst [vmem:[#allocation56_spill] sm:$0xff] %v8357_v36  ;;  %6424 = vmatmul.msk.f32.gmra.mxu0 %vm702_vm2, %v7854_v35 }
 0x18d   : > { %v1712_v7 = vpop.f32.mrf.mxu2 }
 0x18e   : > { %v2002_v61 = vpop.f32.mrf.mxu3  ;;  %v1882_v14 = vadd.f32 %v1712_v7, %v1226_v57  ;;  %v1228_v32 = vpop.f32.mrf.mxu1 }
 0x18f   : > { %v1229_v57 = vadd.f32 %v1228_v32, %v8113_v2  ;;  %v6958_v2 = vld [vmem:[%s7347_s8 + $0x148] sm:$0xff]  ;;  %v1453_v32 = vrot.slane %v10793_v54, 2 }
 0x190   : > { %v2172_v42 = vadd.f32 %v2002_v61, %v1882_v14 }
 0x191   : > { %6227 = vmatmul.msk.f32.gmra.mxu1 %vm702_vm2, %v10782_v8  ;;  %v2301_v21 = vpop.f32.mrf.mxu0 }
 0x192   : > { %v8373_v6 = vadd.f32 %v2298_v17, %v2172_v42  ;;  %6293 = vmatmul.msk.f32.gmra.mxu2 %vm702_vm2, %v8369_v22  ;;  %v8384_v17 = vsel %vm1384_vm3, %v1449_v26, %v1451_v41  ;;  %v10797_v26 = vld [vmem:[#allocation20_spill] sm:$0xff] }
 0x193   : > { %6359 = vmatmul.msk.f32.gmra.mxu3 %vm702_vm2, %v6957_v1 }
 0x194   : > { %10794 = vst [vmem:[#allocation57_spill] sm:$0xff] %v8373_v6  ;;  %6425 = vmatmul.msk.f32.gmra.mxu0 %vm702_vm2, %v10795_v28 }
 0x195   : > { %v1715_v7 = vpop.f32.mrf.mxu2 }
 0x196   : > { %v2005_v61 = vpop.f32.mrf.mxu3  ;;  %v1883_v8 = vadd.f32 %v1715_v7, %v1229_v57  ;;  %v1231_v14 = vpop.f32.mrf.mxu1 }
 0x197   : > { %v1232_v57 = vadd.f32 %v1231_v14, %v8133_v34  ;;  %v6959_v34 = vld [vmem:[%s7347_s8 + $0x150] sm:$0xff]  ;;  %v1455_v14 = vrot.slane %v7833_v11, 2  ;;  %v6960_v11 = vld [vmem:[%s7347_s8 + $0x158] sm:$0xff] }
 0x198   : > { %v2173_v42 = vadd.f32 %v2005_v61, %v1883_v8 }
 0x199   : > { %6228 = vmatmul.msk.f32.gmra.mxu1 %vm702_vm2, %v10785_v30  ;;  %v2304_v6 = vpop.f32.mrf.mxu0 }
 0x19a   : > { %v8388_v36 = vadd.f32 %v2301_v21, %v2173_v42  ;;  %6294 = vmatmul.msk.f32.gmra.mxu2 %vm702_vm2, %v8384_v17  ;;  %v8399_v21 = vsel %vm1384_vm3, %v1451_v41, %v1453_v32  ;;  %v10799_v41 = vld [vmem:[#allocation23_spill] sm:$0xff] }
 0x19b   : > { %6360 = vmatmul.msk.f32.gmra.mxu3 %vm702_vm2, %v6958_v2 }
 0x19c   : > { %10796 = vst [vmem:[#allocation62_spill] sm:$0xff] %v8388_v36  ;;  %6426 = vmatmul.msk.f32.gmra.mxu0 %vm702_vm2, %v10797_v26 }
 0x19d   : > { %v1718_v7 = vpop.f32.mrf.mxu2 }
 0x19e   : > { %v2008_v61 = vpop.f32.mrf.mxu3  ;;  %v1884_v30 = vadd.f32 %v1718_v7, %v1232_v57  ;;  %v1234_v8 = vpop.f32.mrf.mxu1 }
 0x19f   : > { %v1235_v57 = vadd.f32 %v1234_v8, %v8153_v10  ;;  %v1457_v10 = vrot.slane %v6957_v1, 2  ;;  %v1458_v8 = vrot.slane %v6958_v2, 2 }
 0x1a0   : > { %v2174_v42 = vadd.f32 %v2008_v61, %v1884_v30 }
 0x1a1   : > { %6229 = vmatmul.msk.f32.gmra.mxu1 %vm702_vm2, %v10789_v50  ;;  %v2307_v36 = vpop.f32.mrf.mxu0 }
 0x1a2   : > { %v8403_v28 = vadd.f32 %v2304_v6, %v2174_v42  ;;  %6295 = vmatmul.msk.f32.gmra.mxu2 %vm702_vm2, %v8399_v21  ;;  %v8414_v6 = vsel %vm1384_vm3, %v1453_v32, %v1455_v14  ;;  %v10801_v32 = vld [vmem:[#allocation26_spill] sm:$0xff] }
 0x1a3   : > { %6361 = vmatmul.msk.f32.gmra.mxu3 %vm702_vm2, %v6959_v34 }
 0x1a4   : > { %10798 = vst [vmem:[#allocation51_spill] sm:$0xff] %v8403_v28  ;;  %6427 = vmatmul.msk.f32.gmra.mxu0 %vm702_vm2, %v10799_v41 }
 0x1a5   : > { %v1721_v7 = vpop.f32.mrf.mxu2 }
 0x1a6   : > { %v2011_v61 = vpop.f32.mrf.mxu3  ;;  %v1885_v50 = vadd.f32 %v1721_v7, %v1235_v57  ;;  %v1237_v30 = vpop.f32.mrf.mxu1 }
 0x1a7   : > { %v1238_v57 = vadd.f32 %v1237_v30, %v8173_v20  ;;  %v6961_v20 = vld [vmem:[%s7347_s8 + $0x168] sm:$0xff]  ;;  %v1460_v30 = vrot.slane %v6959_v34, 2 }
 0x1a8   : > { %v2175_v42 = vadd.f32 %v2011_v61, %v1885_v50 }
 0x1a9   : > { %6230 = vmatmul.msk.f32.gmra.mxu1 %vm702_vm2, %v10793_v54  ;;  %v2310_v28 = vpop.f32.mrf.mxu0 }
 0x1aa   : > { %v8418_v26 = vadd.f32 %v2307_v36, %v2175_v42  ;;  %6296 = vmatmul.msk.f32.gmra.mxu2 %vm702_vm2, %v8414_v6  ;;  %v8428_v36 = vsel %vm1384_vm3, %v1457_v10, %v1458_v8 }
 0x1ab   : > { %6362 = vmatmul.msk.f32.gmra.mxu3 %vm702_vm2, %v6960_v11 }
 0x1ac   : > { %10800 = vst [vmem:[#allocation69_spill] sm:$0xff] %v8418_v26  ;;  %6428 = vmatmul.msk.f32.gmra.mxu0 %vm702_vm2, %v10801_v32 }
 0x1ad   : > { %v1724_v14 = vpop.f32.mrf.mxu2 }
 0x1ae   : > { %v2014_v7 = vpop.f32.mrf.mxu3  ;;  %v1886_v54 = vadd.f32 %v1724_v14, %v1238_v57  ;;  %v1240_v61 = vpop.f32.mrf.mxu1  ;;  %v10803_v14 = vld [vmem:[#allocation28_spill] sm:$0xff] }
 0x1af   : > { %v1241_v57 = vadd.f32 %v1240_v61, %v7875_v29  ;;  %v6962_v29 = vld [vmem:[%s7347_s8 + $0x170] sm:$0xff]  ;;  %v1462_v61 = vrot.slane %v6960_v11, 2 }
 0x1b0   : > { %v2176_v50 = vadd.f32 %v2014_v7, %v1886_v54 }
 0x1b1   : > { %6231 = vmatmul.msk.f32.gmra.mxu1 %vm702_vm2, %v6957_v1  ;;  %v2313_v42 = vpop.f32.mrf.mxu0 }
 0x1b2   : > { %v8431_v26 = vadd.f32 %v2310_v28, %v2176_v50  ;;  %6297 = vmatmul.msk.f32.gmra.mxu2 %vm702_vm2, %v8428_v36  ;;  %v8441_v28 = vsel %vm1384_vm3, %v1458_v8, %v1460_v30 }
 0x1b3   : > { %6363 = vmatmul.msk.f32.gmra.mxu3 %vm702_vm2, %v6961_v20 }
 0x1b4   : > { %10802 = vst [vmem:[#allocation67_spill] sm:$0xff] %v8431_v26  ;;  %6429 = vmatmul.msk.f32.gmra.mxu0 %vm702_vm2, %v10803_v14 }
 0x1b5   : > { %v1727_v10 = vpop.f32.mrf.mxu2 }
 0x1b6   : > { %v2017_v7 = vpop.f32.mrf.mxu3  ;;  %v1887_v54 = vadd.f32 %v1727_v10, %v1241_v57  ;;  %v1243_v1 = vpop.f32.mrf.mxu1  ;;  %v10805_v10 = vld [vmem:[#allocation30_spill] sm:$0xff] }
 0x1b7   : > { %v1244_v57 = vadd.f32 %v1243_v1, %v7892_v16  ;;  %v6963_v16 = vld [vmem:[%s7347_s8 + $0x178] sm:$0xff]  ;;  %v6964_v1 = vld [vmem:[%s7347_s8 + $0x160] sm:$0x3] }
 0x1b8   : > { %v2177_v50 = vadd.f32 %v2017_v7, %v1887_v54 }
 0x1b9   : > { %6232 = vmatmul.msk.f32.gmra.mxu1 %vm702_vm2, %v6958_v2  ;;  %v2316_v26 = vpop.f32.mrf.mxu0 }
 0x1ba   : > { %v8444_v32 = vadd.f32 %v2313_v42, %v2177_v50  ;;  %6298 = vmatmul.msk.f32.gmra.mxu2 %vm702_vm2, %v8441_v28  ;;  %v8454_v42 = vsel %vm1384_vm3, %v1460_v30, %v1462_v61 }
 0x1bb   : > { %6364 = vmatmul.msk.f32.gmra.mxu3 %vm702_vm2, %v6962_v29  ;;  %10806 = vst [vmem:[#allocation121_spill] sm:$0xff] %v8454_v42 }
 0x1bc   : > { %10804 = vst [vmem:[#allocation23_spill] sm:$0xff] %v8444_v32  ;;  %6430 = vmatmul.msk.f32.gmra.mxu0 %vm702_vm2, %v10805_v10  ;;  %v1464_v10 = vrot.slane %v6964_v1, 2  ;;  %v1467_v1 = vrot.slane %v6962_v29, 2 }
 0x1bd   : > { %v1730_v8 = vpop.f32.mrf.mxu2 }
 0x1be   : > { %v2020_v7 = vpop.f32.mrf.mxu3  ;;  %v1888_v2 = vadd.f32 %v1730_v8, %v1244_v57  ;;  %v1246_v54 = vpop.f32.mrf.mxu1  ;;  %v10808_v8 = vld [vmem:[#allocation32_spill] sm:$0xff] }
 0x1bf   : > { %v1247_v57 = vadd.f32 %v1246_v54, %v7909_v12  ;;  %v6965_v12 = vld [vmem:[%s7347_s8 + $0x180] sm:$0xff]  ;;  %v1466_v54 = vrot.slane %v6961_v20, 2 }
 0x1c0   : > { %v2178_v50 = vadd.f32 %v2020_v7, %v1888_v2 }
 0x1c1   : > { %6233 = vmatmul.msk.f32.gmra.mxu1 %vm702_vm2, %v6959_v34  ;;  %v2319_v32 = vpop.f32.mrf.mxu0 }
 0x1c2   : > { %v8457_v14 = vadd.f32 %v2316_v26, %v2178_v50  ;;  %6299 = vmatmul.msk.f32.gmra.mxu2 %vm702_vm2, %v8454_v42  ;;  %v8468_v26 = vsel %vm1384_vm3, %v1462_v61, %v1464_v10 }
 0x1c3   : > { %6365 = vmatmul.msk.f32.gmra.mxu3 %vm702_vm2, %v6963_v16 }
 0x1c4   : > { %10807 = vst [vmem:[#allocation122_spill] sm:$0xff] %v8457_v14  ;;  %6431 = vmatmul.msk.f32.gmra.mxu0 %vm702_vm2, %v10808_v8 }
 0x1c5   : > { %v1733_v30 = vpop.f32.mrf.mxu2 }
 0x1c6   : > { %v2023_v7 = vpop.f32.mrf.mxu3  ;;  %v1889_v34 = vadd.f32 %v1733_v30, %v1247_v57  ;;  %v1249_v2 = vpop.f32.mrf.mxu1  ;;  %v10810_v30 = vld [vmem:[#allocation35_spill] sm:$0xff] }
 0x1c7   : > { %v1250_v57 = vadd.f32 %v1249_v2, %v7926_v47  ;;  %v6966_v47 = vld [vmem:[%s7347_s8 + $0x190] sm:$0xff]  ;;  %v1469_v2 = vrot.slane %v6963_v16, 2 }
 0x1c8   : > { %v2179_v50 = vadd.f32 %v2023_v7, %v1889_v34 }
 0x1c9   : > { %6234 = vmatmul.msk.f32.gmra.mxu1 %vm702_vm2, %v6960_v11  ;;  %v2322_v14 = vpop.f32.mrf.mxu0 }
 0x1ca   : > { %v8471_v42 = vadd.f32 %v2319_v32, %v2179_v50  ;;  %6300 = vmatmul.msk.f32.gmra.mxu2 %vm702_vm2, %v8468_v26  ;;  %v8481_v32 = vsel %vm1384_vm3, %v1466_v54, %v1467_v1 }
 0x1cb   : > { %6366 = vmatmul.msk.f32.gmra.mxu3 %vm702_vm2, %v6965_v12 }
 0x1cc   : > { %10809 = vst [vmem:[#allocation32_spill] sm:$0xff] %v8471_v42  ;;  %6432 = vmatmul.msk.f32.gmra.mxu0 %vm702_vm2, %v10810_v30 }
 0x1cd   : > { %v1736_v61 = vpop.f32.mrf.mxu2 }
 0x1ce   : > { %v2026_v10 = vpop.f32.mrf.mxu3  ;;  %v1890_v11 = vadd.f32 %v1736_v61, %v1250_v57  ;;  %v1252_v7 = vpop.f32.mrf.mxu1  ;;  %v10812_v61 = vld [vmem:[#allocation39_spill] sm:$0xff] }
 0x1cf   : > { %v1253_v57 = vadd.f32 %v1252_v7, %v7944_v49  ;;  %v6967_v49 = vld [vmem:[%s7347_s8 + $0x198] sm:$0xff]  ;;  %v1471_v7 = vrot.slane %v6965_v12, 2 }
 0x1d0   : > { %v2180_v34 = vadd.f32 %v2026_v10, %v1890_v11 }
 0x1d1   : > { %6235 = vmatmul.msk.f32.gmra.mxu1 %vm702_vm2, %v6961_v20  ;;  %v2325_v50 = vpop.f32.mrf.mxu0 }
 0x1d2   : > { %v8484_v42 = vadd.f32 %v2322_v14, %v2180_v34  ;;  %6301 = vmatmul.msk.f32.gmra.mxu2 %vm702_vm2, %v8481_v32  ;;  %v8494_v14 = vsel %vm1384_vm3, %v1467_v1, %v1469_v2 }
 0x1d3   : > { %6367 = vmatmul.msk.f32.gmra.mxu3 %vm702_vm2, %v6966_v47 }
 0x1d4   : > { %10811 = vst [vmem:[#allocation123_spill] sm:$0xff] %v8484_v42  ;;  %6433 = vmatmul.msk.f32.gmra.mxu0 %vm702_vm2, %v10812_v61 }
 0x1d5   : > { %v1739_v54 = vpop.f32.mrf.mxu2 }
 0x1d6   : > { %v2029_v10 = vpop.f32.mrf.mxu3  ;;  %v1891_v11 = vadd.f32 %v1739_v54, %v1253_v57  ;;  %v1255_v20 = vpop.f32.mrf.mxu1  ;;  %v10814_v54 = vld [vmem:[#allocation44_spill] sm:$0xff] }
 0x1d7   : > { %v1256_v57 = vadd.f32 %v1255_v20, %v7964_v59  ;;  %v6968_v59 = vld [vmem:[%s7347_s8 + $0x1a0] sm:$0xff]  ;;  %v6969_v20 = vld [vmem:[%s7347_s8 + $0x188] sm:$0x3] }
 0x1d8   : > { %v2181_v34 = vadd.f32 %v2029_v10, %v1891_v11 }
 0x1d9   : > { %6236 = vmatmul.msk.f32.gmra.mxu1 %vm702_vm2, %v6962_v29  ;;  %v2328_v42 = vpop.f32.mrf.mxu0 }
 0x1da   : > { %v8497_v30 = vadd.f32 %v2325_v50, %v2181_v34  ;;  %6302 = vmatmul.msk.f32.gmra.mxu2 %vm702_vm2, %v8494_v14  ;;  %v8507_v50 = vsel %vm1384_vm3, %v1469_v2, %v1471_v7 }
 0x1db   : > { %6368 = vmatmul.msk.f32.gmra.mxu3 %vm702_vm2, %v6967_v49  ;;  %10815 = vst [vmem:[#allocation125_spill] sm:$0xff] %v8507_v50 }
 0x1dc   : > { %10813 = vst [vmem:[#allocation124_spill] sm:$0xff] %v8497_v30  ;;  %6434 = vmatmul.msk.f32.gmra.mxu0 %vm702_vm2, %v10814_v54  ;;  %v1473_v54 = vrot.slane %v6969_v20, 2  ;;  %v1476_v20 = vrot.slane %v6967_v49, 2 }
 0x1dd   : > { %v1742_v1 = vpop.f32.mrf.mxu2 }
 0x1de   : > { %v2032_v10 = vpop.f32.mrf.mxu3  ;;  %v1892_v29 = vadd.f32 %v1742_v1, %v1256_v57  ;;  %v1258_v11 = vpop.f32.mrf.mxu1  ;;  %v10817_v1 = vld [vmem:[#allocation49_spill] sm:$0xff] }
 0x1df   : > { %v1259_v57 = vadd.f32 %v1258_v11, %v7984_v27  ;;  %v6970_v27 = vld [vmem:[%s7347_s8 + $0x1a8] sm:$0xff]  ;;  %v1475_v11 = vrot.slane %v6966_v47, 2 }
 0x1e0   : > { %v2182_v34 = vadd.f32 %v2032_v10, %v1892_v29 }
 0x1e1   : > { %6237 = vmatmul.msk.f32.gmra.mxu1 %vm702_vm2, %v6963_v16  ;;  %v2331_v30 = vpop.f32.mrf.mxu0 }
 0x1e2   : > { %v8510_v61 = vadd.f32 %v2328_v42, %v2182_v34  ;;  %6303 = vmatmul.msk.f32.gmra.mxu2 %vm702_vm2, %v8507_v50  ;;  %v8521_v42 = vsel %vm1384_vm3, %v1471_v7, %v1473_v54 }
 0x1e3   : > { %6369 = vmatmul.msk.f32.gmra.mxu3 %vm702_vm2, %v6968_v59 }
 0x1e4   : > { %10816 = vst [vmem:[#allocation126_spill] sm:$0xff] %v8510_v61  ;;  %6435 = vmatmul.msk.f32.gmra.mxu0 %vm702_vm2, %v10817_v1 }
 0x1e5   : > { %v1745_v2 = vpop.f32.mrf.mxu2 }
 0x1e6   : > { %v2035_v10 = vpop.f32.mrf.mxu3  ;;  %v1893_v16 = vadd.f32 %v1745_v2, %v1259_v57  ;;  %v1261_v29 = vpop.f32.mrf.mxu1  ;;  %v10819_v2 = vld [vmem:[#allocation54_spill] sm:$0xff] }
 0x1e7   : > { %v1262_v57 = vadd.f32 %v1261_v29, %v8004_v53  ;;  %v6971_v53 = vld [vmem:[%s7347_s8 + $0x1b8] sm:$0xff]  ;;  %v1478_v29 = vrot.slane %v6968_v59, 2 }
 0x1e8   : > { %v2183_v34 = vadd.f32 %v2035_v10, %v1893_v16 }
 0x1e9   : > { %6238 = vmatmul.msk.f32.gmra.mxu1 %vm702_vm2, %v6965_v12  ;;  %v2334_v61 = vpop.f32.mrf.mxu0 }
 0x1ea   : > { %v8524_v50 = vadd.f32 %v2331_v30, %v2183_v34  ;;  %6304 = vmatmul.msk.f32.gmra.mxu2 %vm702_vm2, %v8521_v42  ;;  %v8534_v30 = vsel %vm1384_vm3, %v1475_v11, %v1476_v20 }
 0x1eb   : > { %6370 = vmatmul.msk.f32.gmra.mxu3 %vm702_vm2, %v6970_v27 }
 0x1ec   : > { %10818 = vst [vmem:[#allocation49_spill] sm:$0xff] %v8524_v50  ;;  %6436 = vmatmul.msk.f32.gmra.mxu0 %vm702_vm2, %v10819_v2 }
 0x1ed   : > { %v1748_v7 = vpop.f32.mrf.mxu2 }
 0x1ee   : > { %v2038_v54 = vpop.f32.mrf.mxu3  ;;  %v1894_v12 = vadd.f32 %v1748_v7, %v1262_v57  ;;  %v1264_v10 = vpop.f32.mrf.mxu1  ;;  %v10821_v7 = vld [vmem:[#allocation60_spill] sm:$0xff] }
 0x1ef   : > { %v1265_v57 = vadd.f32 %v1264_v10, %v8025_v51  ;;  %v6972_v51 = vld [vmem:[%s7347_s8 + $0x1c0] sm:$0xff]  ;;  %v1480_v10 = vrot.slane %v6970_v27, 2 }
 0x1f0   : > { %v2184_v16 = vadd.f32 %v2038_v54, %v1894_v12 }
 0x1f1   : > { %6239 = vmatmul.msk.f32.gmra.mxu1 %vm702_vm2, %v6966_v47  ;;  %v2337_v34 = vpop.f32.mrf.mxu0 }
 0x1f2   : > { %v8537_v50 = vadd.f32 %v2334_v61, %v2184_v16  ;;  %6305 = vmatmul.msk.f32.gmra.mxu2 %vm702_vm2, %v8534_v30  ;;  %v8547_v61 = vsel %vm1384_vm3, %v1476_v20, %v1478_v29 }
 0x1f3   : > { %6371 = vmatmul.msk.f32.gmra.mxu3 %vm702_vm2, %v6971_v53 }
 0x1f4   : > { %10820 = vst [vmem:[#allocation127_spill] sm:$0xff] %v8537_v50  ;;  %6437 = vmatmul.msk.f32.gmra.mxu0 %vm702_vm2, %v10821_v7 }
 0x1f5   : > { %v1751_v11 = vpop.f32.mrf.mxu2 }
 0x1f6   : > { %v2041_v54 = vpop.f32.mrf.mxu3  ;;  %v1895_v12 = vadd.f32 %v1751_v11, %v1265_v57  ;;  %v1267_v47 = vpop.f32.mrf.mxu1  ;;  %v10823_v11 = vld [vmem:[#allocation65_spill] sm:$0xff] }
 0x1f7   : > { %v1268_v57 = vadd.f32 %v1267_v47, %v8045_v43  ;;  %v6973_v43 = vld [vmem:[%s7347_s8 + $0x1c8] sm:$0xff]  ;;  %v6974_v47 = vld [vmem:[%s7347_s8 + $0x1b0] sm:$0x3] }
 0x1f8   : > { %v2185_v16 = vadd.f32 %v2041_v54, %v1895_v12 }
 0x1f9   : > { %6240 = vmatmul.msk.f32.gmra.mxu1 %vm702_vm2, %v6967_v49  ;;  %v2340_v50 = vpop.f32.mrf.mxu0 }
 0x1fa   : > { %v8550_v2 = vadd.f32 %v2337_v34, %v2185_v16  ;;  %6306 = vmatmul.msk.f32.gmra.mxu2 %vm702_vm2, %v8547_v61  ;;  %v8560_v34 = vsel %vm1384_vm3, %v1478_v29, %v1480_v10 }
 0x1fb   : > { %6372 = vmatmul.msk.f32.gmra.mxu3 %vm702_vm2, %v6972_v51  ;;  %10824 = vst [vmem:[#allocation129_spill] sm:$0xff] %v8560_v34 }
 0x1fc   : > { %10822 = vst [vmem:[#allocation128_spill] sm:$0xff] %v8550_v2  ;;  %6438 = vmatmul.msk.f32.gmra.mxu0 %vm702_vm2, %v10823_v11  ;;  %v1482_v11 = vrot.slane %v6974_v47, 2  ;;  %v1485_v47 = vrot.slane %v6972_v51, 2 }
 0x1fd   : > { %v1754_v20 = vpop.f32.mrf.mxu2 }
 0x1fe   : > { %v2044_v54 = vpop.f32.mrf.mxu3  ;;  %v1896_v49 = vadd.f32 %v1754_v20, %v1268_v57  ;;  %v1270_v12 = vpop.f32.mrf.mxu1  ;;  %v10826_v20 = vld [vmem:[#allocation70_spill] sm:$0xff] }
 0x1ff   : > { %v1271_v57 = vadd.f32 %v1270_v12, %v8065_v37  ;;  %v6975_v37 = vld [vmem:[%s7347_s8 + $0x1d0] sm:$0xff]  ;;  %v1484_v12 = vrot.slane %v6971_v53, 2 }
 0x200   : > { %v2186_v16 = vadd.f32 %v2044_v54, %v1896_v49 }
 0x201   : > { %6241 = vmatmul.msk.f32.gmra.mxu1 %vm702_vm2, %v6968_v59  ;;  %v2343_v2 = vpop.f32.mrf.mxu0 }
 0x202   : > { %v8563_v7 = vadd.f32 %v2340_v50, %v2186_v16  ;;  %6307 = vmatmul.msk.f32.gmra.mxu2 %vm702_vm2, %v8560_v34  ;;  %v8574_v50 = vsel %vm1384_vm3, %v1480_v10, %v1482_v11 }
 0x203   : > { %6373 = vmatmul.msk.f32.gmra.mxu3 %vm702_vm2, %v6973_v43 }
 0x204   : > { %10825 = vst [vmem:[#allocation130_spill] sm:$0xff] %v8563_v7  ;;  %6439 = vmatmul.msk.f32.gmra.mxu0 %vm702_vm2, %v10826_v20 }
 0x205   : > { %v1757_v29 = vpop.f32.mrf.mxu2 }
 0x206   : > { %v2047_v54 = vpop.f32.mrf.mxu3  ;;  %v1897_v59 = vadd.f32 %v1757_v29, %v1271_v57  ;;  %v1273_v49 = vpop.f32.mrf.mxu1 }
 0x207   : > { %v1274_v57 = vadd.f32 %v1273_v49, %v8085_v9  ;;  %v6976_v9 = vld [vmem:[%s7347_s8 + $0x1e0] sm:$0xff]  ;;  %v1487_v49 = vrot.slane %v6973_v43, 2 }
 0x208   : > { %v2187_v16 = vadd.f32 %v2047_v54, %v1897_v59 }
 0x209   : > { %6242 = vmatmul.msk.f32.gmra.mxu1 %vm702_vm2, %v6970_v27  ;;  %v2346_v7 = vpop.f32.mrf.mxu0 }
 0x20a   : > { %v8577_v34 = vadd.f32 %v2343_v2, %v2187_v16  ;;  %6308 = vmatmul.msk.f32.gmra.mxu2 %vm702_vm2, %v8574_v50  ;;  %v8587_v2 = vsel %vm1384_vm3, %v1484_v12, %v1485_v47 }
 0x20b   : > { %6374 = vmatmul.msk.f32.gmra.mxu3 %vm702_vm2, %v6975_v37 }
 0x20c   : > { %10827 = vst [vmem:[#allocation70_spill] sm:$0xff] %v8577_v34  ;;  %6440 = vmatmul.msk.f32.gmra.mxu0 %vm702_vm2, %v7857_v23 }
 0x20d   : > { %v1760_v10 = vpop.f32.mrf.mxu2 }
 0x20e   : > { %v2050_v11 = vpop.f32.mrf.mxu3  ;;  %v1898_v27 = vadd.f32 %v1760_v10, %v1274_v57  ;;  %v1276_v29 = vpop.f32.mrf.mxu1  ;;  %v10829_v10 = vld [vmem:[#allocation18_spill] sm:$0xff] }
 0x20f   : > { %v1277_v57 = vadd.f32 %v1276_v29, %v8106_v55  ;;  %v6977_v55 = vld [vmem:[%s7347_s8 + $0x1e8] sm:$0xff]  ;;  %v1489_v29 = vrot.slane %v6975_v37, 2 }
 0x210   : > { %v2188_v54 = vadd.f32 %v2050_v11, %v1898_v27 }
 0x211   : > { %6243 = vmatmul.msk.f32.gmra.mxu1 %vm702_vm2, %v6971_v53  ;;  %v2349_v59 = vpop.f32.mrf.mxu0 }
 0x212   : > { %v8590_v16 = vadd.f32 %v2346_v7, %v2188_v54  ;;  %6309 = vmatmul.msk.f32.gmra.mxu2 %vm702_vm2, %v8587_v2  ;;  %v8600_v7 = vsel %vm1384_vm3, %v1485_v47, %v1487_v49 }
 0x213   : > { %6375 = vmatmul.msk.f32.gmra.mxu3 %vm702_vm2, %v6976_v9 }
 0x214   : > { %10828 = vst [vmem:[#allocation131_spill] sm:$0xff] %v8590_v16  ;;  %6441 = vmatmul.msk.f32.gmra.mxu0 %vm702_vm2, %v10829_v10 }
 0x215   : > { %v1763_v12 = vpop.f32.mrf.mxu2 }
 0x216   : > { %v2053_v11 = vpop.f32.mrf.mxu3  ;;  %v1899_v27 = vadd.f32 %v1763_v12, %v1277_v57  ;;  %v1279_v53 = vpop.f32.mrf.mxu1  ;;  %v10831_v12 = vld [vmem:[#allocation21_spill] sm:$0xff] }
 0x217   : > { %v1280_v57 = vadd.f32 %v1279_v53, %v8126_v25  ;;  %v6978_v25 = vld [vmem:[%s7347_s8 + $0x1f0] sm:$0xff]  ;;  %v6979_v53 = vld [vmem:[%s7347_s8 + $0x1d8] sm:$0x3] }
 0x218   : > { %v2189_v54 = vadd.f32 %v2053_v11, %v1899_v27 }
 0x219   : > { %6244 = vmatmul.msk.f32.gmra.mxu1 %vm702_vm2, %v6972_v51  ;;  %v2352_v16 = vpop.f32.mrf.mxu0 }
 0x21a   : > { %v8603_v34 = vadd.f32 %v2349_v59, %v2189_v54  ;;  %6310 = vmatmul.msk.f32.gmra.mxu2 %vm702_vm2, %v8600_v7  ;;  %v8613_v59 = vsel %vm1384_vm3, %v1487_v49, %v1489_v29 }
 0x21b   : > { %6376 = vmatmul.msk.f32.gmra.mxu3 %vm702_vm2, %v6977_v55 }
 0x21c   : > { %10830 = vst [vmem:[#allocation132_spill] sm:$0xff] %v8603_v34  ;;  %6442 = vmatmul.msk.f32.gmra.mxu0 %vm702_vm2, %v10831_v12  ;;  %v1491_v12 = vrot.slane %v6979_v53, 2  ;;  %v1494_v53 = vrot.slane %v6977_v55, 2 }
 0x21d   : > { %v1766_v47 = vpop.f32.mrf.mxu2 }
 0x21e   : > { %v2056_v11 = vpop.f32.mrf.mxu3  ;;  %v1900_v51 = vadd.f32 %v1766_v47, %v1280_v57  ;;  %v1282_v27 = vpop.f32.mrf.mxu1  ;;  %v10833_v47 = vld [vmem:[#allocation24_spill] sm:$0xff] }
 0x21f   : > { %v1283_v57 = vadd.f32 %v1282_v27, %v8146_v63  ;;  %v6980_v63 = vld [vmem:[%s7347_s8 + $0x1f8] sm:$0xff]  ;;  %v1493_v27 = vrot.slane %v6976_v9, 2 }
 0x220   : > { %v2190_v54 = vadd.f32 %v2056_v11, %v1900_v51 }
 0x221   : > { %6245 = vmatmul.msk.f32.gmra.mxu1 %vm702_vm2, %v6973_v43  ;;  %v2355_v34 = vpop.f32.mrf.mxu0 }
 0x222   : > { %v8616_v10 = vadd.f32 %v2352_v16, %v2190_v54  ;;  %6311 = vmatmul.msk.f32.gmra.mxu2 %vm702_vm2, %v8613_v59  ;;  %v8627_v16 = vsel %vm1384_vm3, %v1489_v29, %v1491_v12 }
 0x223   : > { %6377 = vmatmul.msk.f32.gmra.mxu3 %vm702_vm2, %v6978_v25 }
 0x224   : > { %10832 = vst [vmem:[#allocation133_spill] sm:$0xff] %v8616_v10  ;;  %6443 = vmatmul.msk.f32.gmra.mxu0 %vm702_vm2, %v10833_v47 }
 0x225   : > { %v1769_v49 = vpop.f32.mrf.mxu2 }
 0x226   : > { %v2059_v11 = vpop.f32.mrf.mxu3  ;;  %v1901_v43 = vadd.f32 %v1769_v49, %v1283_v57  ;;  %v1285_v51 = vpop.f32.mrf.mxu1  ;;  %v10835_v49 = vld [vmem:[#allocation27_spill] sm:$0xff] }
 0x227   : > { %v1286_v57 = vadd.f32 %v1285_v51, %v8166_v4  ;;  %v6981_v4 = vld [vmem:[%s7347_s8 + $0x208] sm:$0xff]  ;;  %v1496_v51 = vrot.slane %v6978_v25, 2 }
 0x228   : > { %v2191_v54 = vadd.f32 %v2059_v11, %v1901_v43 }
 0x229   : > { %6246 = vmatmul.msk.f32.gmra.mxu1 %vm702_vm2, %v6975_v37  ;;  %v2358_v10 = vpop.f32.mrf.mxu0 }
 0x22a   : > { %v8630_v23 = vadd.f32 %v2355_v34, %v2191_v54  ;;  %6312 = vmatmul.msk.f32.gmra.mxu2 %vm702_vm2, %v8627_v16  ;;  %v8640_v34 = vsel %vm1384_vm3, %v1493_v27, %v1494_v53 }
 0x22b   : > { %6378 = vmatmul.msk.f32.gmra.mxu3 %vm702_vm2, %v6980_v63 }
 0x22c   : > { %10834 = vst [vmem:[#allocation134_spill] sm:$0xff] %v8630_v23  ;;  %6444 = vmatmul.msk.f32.gmra.mxu0 %vm702_vm2, %v10835_v49 }
 0x22d   : > { %v1772_v29 = vpop.f32.mrf.mxu2 }
 0x22e   : > { %v2062_v12 = vpop.f32.mrf.mxu3  ;;  %v1902_v37 = vadd.f32 %v1772_v29, %v1286_v57  ;;  %v1288_v11 = vpop.f32.mrf.mxu1  ;;  %v10837_v29 = vld [vmem:[#allocation29_spill] sm:$0xff] }
 0x22f   : > { %v1289_v57 = vadd.f32 %v1288_v11, %v7888_v0  ;;  %v6982_v0 = vld [vmem:[%s7347_s8 + $0x210] sm:$0xff]  ;;  %v1498_v11 = vrot.slane %v6980_v63, 2 }
 0x230   : > { %v2192_v43 = vadd.f32 %v2062_v12, %v1902_v37 }
 0x231   : > { %6247 = vmatmul.msk.f32.gmra.mxu1 %vm702_vm2, %v6976_v9  ;;  %v2361_v54 = vpop.f32.mrf.mxu0 }
 0x232   : > { %v8643_v23 = vadd.f32 %v2358_v10, %v2192_v43  ;;  %6313 = vmatmul.msk.f32.gmra.mxu2 %vm702_vm2, %v8640_v34  ;;  %v8653_v10 = vsel %vm1384_vm3, %v1494_v53, %v1496_v51 }
 0x233   : > { %6379 = vmatmul.msk.f32.gmra.mxu3 %vm702_vm2, %v6981_v4  ;;  %10838 = vst [vmem:[#allocation136_spill] sm:$0xff] %v8653_v10 }
 0x234   : > { %10836 = vst [vmem:[#allocation135_spill] sm:$0xff] %v8643_v23  ;;  %6445 = vmatmul.msk.f32.gmra.mxu0 %vm702_vm2, %v10837_v29 }
 0x235   : > { %v1775_v27 = vpop.f32.mrf.mxu2 }
 0x236   : > { %v2065_v12 = vpop.f32.mrf.mxu3  ;;  %v1903_v37 = vadd.f32 %v1775_v27, %v1289_v57  ;;  %v1291_v9 = vpop.f32.mrf.mxu1  ;;  %v10840_v27 = vld [vmem:[#allocation31_spill] sm:$0xff] }
 0x237   : > { %v1292_v57 = vadd.f32 %v1291_v9, %v7905_v31  ;;  %v6983_v31 = vld [vmem:[%s7347_s8 + $0x218] sm:$0xff]  ;;  %v6984_v9 = vld [vmem:[%s7347_s8 + $0x200] sm:$0x3] }
 0x238   : > { %v2193_v43 = vadd.f32 %v2065_v12, %v1903_v37 }
 0x239   : > { %6248 = vmatmul.msk.f32.gmra.mxu1 %vm702_vm2, %v6977_v55  ;;  %v2364_v23 = vpop.f32.mrf.mxu0 }
 0x23a   : > { %v8656_v49 = vadd.f32 %v2361_v54, %v2193_v43  ;;  %6314 = vmatmul.msk.f32.gmra.mxu2 %vm702_vm2, %v8653_v10  ;;  %v8666_v54 = vsel %vm1384_vm3, %v1496_v51, %v1498_v11 }
 0x23b   : > { %6380 = vmatmul.msk.f32.gmra.mxu3 %vm702_vm2, %v6982_v0  ;;  %10841 = vst [vmem:[#allocation138_spill] sm:$0xff] %v8666_v54 }
 0x23c   : > { %10839 = vst [vmem:[#allocation137_spill] sm:$0xff] %v8656_v49  ;;  %6446 = vmatmul.msk.f32.gmra.mxu0 %vm702_vm2, %v10840_v27  ;;  %v1500_v27 = vrot.slane %v6984_v9, 2  ;;  %v1503_v9 = vrot.slane %v6982_v0, 2 }
 0x23d   : > { %v1778_v53 = vpop.f32.mrf.mxu2 }
 0x23e   : > { %v2068_v12 = vpop.f32.mrf.mxu3  ;;  %v1904_v55 = vadd.f32 %v1778_v53, %v1292_v57  ;;  %v1294_v37 = vpop.f32.mrf.mxu1  ;;  %v10843_v53 = vld [vmem:[#allocation33_spill] sm:$0xff] }
 0x23f   : > { %v1295_v57 = vadd.f32 %v1294_v37, %v7922_v46  ;;  %v6985_v46 = vld [vmem:[%s7347_s8 + $0x220] sm:$0xff]  ;;  %v1502_v37 = vrot.slane %v6981_v4, 2 }
 0x240   : > { %v2194_v43 = vadd.f32 %v2068_v12, %v1904_v55 }
 0x241   : > { %6249 = vmatmul.msk.f32.gmra.mxu1 %vm702_vm2, %v6978_v25  ;;  %v2367_v49 = vpop.f32.mrf.mxu0 }
 0x242   : > { %v8669_v29 = vadd.f32 %v2364_v23, %v2194_v43  ;;  %6315 = vmatmul.msk.f32.gmra.mxu2 %vm702_vm2, %v8666_v54  ;;  %v8680_v23 = vsel %vm1384_vm3, %v1498_v11, %v1500_v27 }
 0x243   : > { %6381 = vmatmul.msk.f32.gmra.mxu3 %vm702_vm2, %v6983_v31  ;;  %10844 = vst [vmem:[#allocation140_spill] sm:$0xff] %v8680_v23 }
 0x244   : > { %10842 = vst [vmem:[#allocation139_spill] sm:$0xff] %v8669_v29  ;;  %6447 = vmatmul.msk.f32.gmra.mxu0 %vm702_vm2, %v10843_v53  ;;  %v10847_v53 = vld [vmem:[#allocation36_spill] sm:$0xff] }
 0x245   : > { %v1781_v51 = vpop.f32.mrf.mxu2 }
 0x246   : > { %v2071_v12 = vpop.f32.mrf.mxu3  ;;  %v1905_v25 = vadd.f32 %v1781_v51, %v1295_v57  ;;  %v1297_v55 = vpop.f32.mrf.mxu1  ;;  %v10846_v57 = vld [vmem:[#allocation79_spill] sm:$0xff] }
 0x247   : > { %v1298_v51 = vadd.f32 %v1297_v55, %v10846_v57  ;;  %v6986_v55 = vld [vmem:[%s7347_s8 + $0x230] sm:$0xff]  ;;  %v1505_v57 = vrot.slane %v6983_v31, 2 }
 0x248   : > { %v2195_v43 = vadd.f32 %v2071_v12, %v1905_v25 }
 0x249   : > { %6250 = vmatmul.msk.f32.gmra.mxu1 %vm702_vm2, %v6980_v63  ;;  %v2370_v29 = vpop.f32.mrf.mxu0 }
 0x24a   : > { %v8683_v54 = vadd.f32 %v2367_v49, %v2195_v43  ;;  %6316 = vmatmul.msk.f32.gmra.mxu2 %vm702_vm2, %v8680_v23  ;;  %v8693_v49 = vsel %vm1384_vm3, %v1502_v37, %v1503_v9  ;;  %v10859_v23 = vld [vmem:[#allocation50_spill] sm:$0xff] }
 0x24b   : > { %6382 = vmatmul.msk.f32.gmra.mxu3 %vm702_vm2, %v6985_v46  ;;  %10848 = vst [vmem:[#allocation79_spill] sm:$0xff] %v8693_v49 }
 0x24c   : > { %10845 = vst [vmem:[#allocation141_spill] sm:$0xff] %v8683_v54  ;;  %6448 = vmatmul.msk.f32.gmra.mxu0 %vm702_vm2, %v10847_v53  ;;  %v10850_v53 = vld [vmem:[#allocation82_spill] sm:$0xff] }
 0x24d   : > { %v1784_v11 = vpop.f32.mrf.mxu2 }
 0x24e   : > { %v2074_v27 = vpop.f32.mrf.mxu3  ;;  %v1906_v63 = vadd.f32 %v1784_v11, %v1298_v51  ;;  %v1300_v12 = vpop.f32.mrf.mxu1  ;;  %v10851_v11 = vld [vmem:[#allocation40_spill] sm:$0xff] }
 0x24f   : > { %v1301_v51 = vadd.f32 %v1300_v12, %v10850_v53  ;;  %v6987_v53 = vld [vmem:[%s7347_s8 + $0x238] sm:$0xff]  ;;  %v1507_v12 = vrot.slane %v6985_v46, 2 }
 0x250   : > { %v2196_v25 = vadd.f32 %v2074_v27, %v1906_v63 }
 0x251   : > { %6251 = vmatmul.msk.f32.gmra.mxu1 %vm702_vm2, %v6981_v4  ;;  %v2373_v43 = vpop.f32.mrf.mxu0 }
 0x252   : > { %v8696_v54 = vadd.f32 %v2370_v29, %v2196_v25  ;;  %6317 = vmatmul.msk.f32.gmra.mxu2 %vm702_vm2, %v8693_v49  ;;  %v8706_v29 = vsel %vm1384_vm3, %v1503_v9, %v1505_v57 }
 0x253   : > { %6383 = vmatmul.msk.f32.gmra.mxu3 %vm702_vm2, %v6986_v55  ;;  %10852 = vst [vmem:[#allocation82_spill] sm:$0xff] %v8706_v29 }
 0x254   : > { %10849 = vst [vmem:[#allocation142_spill] sm:$0xff] %v8696_v54  ;;  %6449 = vmatmul.msk.f32.gmra.mxu0 %vm702_vm2, %v10851_v11  ;;  %v10855_v11 = vld [vmem:[#allocation45_spill] sm:$0xff] }
 0x255   : > { %v1787_v37 = vpop.f32.mrf.mxu2 }
 0x256   : > { %v2077_v27 = vpop.f32.mrf.mxu3  ;;  %v1907_v63 = vadd.f32 %v1787_v37, %v1301_v51  ;;  %v1303_v4 = vpop.f32.mrf.mxu1  ;;  %v10854_v51 = vld [vmem:[#allocation85_spill] sm:$0xff] }
 0x257   : > { %v1304_v37 = vadd.f32 %v1303_v4, %v10854_v51  ;;  %v6988_v4 = vld [vmem:[%s7347_s8 + $0x240] sm:$0xff]  ;;  %v6989_v51 = vld [vmem:[%s7347_s8 + $0x228] sm:$0x3] }
 0x258   : > { %v2197_v25 = vadd.f32 %v2077_v27, %v1907_v63 }
 0x259   : > { %6252 = vmatmul.msk.f32.gmra.mxu1 %vm702_vm2, %v6982_v0  ;;  %v2376_v54 = vpop.f32.mrf.mxu0 }
 0x25a   : > { %v8709_v49 = vadd.f32 %v2373_v43, %v2197_v25  ;;  %6318 = vmatmul.msk.f32.gmra.mxu2 %vm702_vm2, %v8706_v29  ;;  %v8719_v43 = vsel %vm1384_vm3, %v1505_v57, %v1507_v12 }
 0x25b   : > { %6384 = vmatmul.msk.f32.gmra.mxu3 %vm702_vm2, %v6987_v53  ;;  %10856 = vst [vmem:[#allocation85_spill] sm:$0xff] %v8719_v43 }
 0x25c   : > { %10853 = vst [vmem:[#allocation143_spill] sm:$0xff] %v8709_v49  ;;  %6450 = vmatmul.msk.f32.gmra.mxu0 %vm702_vm2, %v10855_v11  ;;  %v1509_v11 = vrot.slane %v6989_v51, 2  ;;  %v1511_v51 = vrot.slane %v6986_v55, 2 }
 0x25d   : > { %v1790_v9 = vpop.f32.mrf.mxu2 }
 0x25e   : > { %v2080_v27 = vpop.f32.mrf.mxu3  ;;  %v1908_v0 = vadd.f32 %v1790_v9, %v1304_v37  ;;  %v1306_v63 = vpop.f32.mrf.mxu1  ;;  %v10858_v37 = vld [vmem:[#allocation88_spill] sm:$0xff] }
 0x25f   : > { %v1307_v9 = vadd.f32 %v1306_v63, %v10858_v37  ;;  %v8741_v63 = vld [vmem:[%s7347_s8 + $0x248] sm:$0xff]  ;;  %v1512_v37 = vrot.slane %v6987_v53, 2 }
 0x260   : > { %v2198_v25 = vadd.f32 %v2080_v27, %v1908_v0 }
 0x261   : > { %6253 = vmatmul.msk.f32.gmra.mxu1 %vm702_vm2, %v6983_v31  ;;  %v2379_v49 = vpop.f32.mrf.mxu0 }
 0x262   : > { %v8722_v29 = vadd.f32 %v2376_v54, %v2198_v25  ;;  %6319 = vmatmul.msk.f32.gmra.mxu2 %vm702_vm2, %v8719_v43  ;;  %v8733_v54 = vsel %vm1384_vm3, %v1507_v12, %v1509_v11  ;;  %v10863_v12 = vld [vmem:[#allocation55_spill] sm:$0xff] }
 0x263   : > { %6385 = vmatmul.msk.f32.gmra.mxu3 %vm702_vm2, %v6988_v4  ;;  %10860 = vst [vmem:[#allocation88_spill] sm:$0xff] %v8733_v54 }
 0x264   : > { %10857 = vst [vmem:[#allocation144_spill] sm:$0xff] %v8722_v29  ;;  %6451 = vmatmul.msk.f32.gmra.mxu0 %vm702_vm2, %v10859_v23 }
 0x265   : > { %v1793_v57 = vpop.f32.mrf.mxu2 }
 0x266   : > { %v2083_v27 = vpop.f32.mrf.mxu3  ;;  %v1909_v31 = vadd.f32 %v1793_v57, %v1307_v9  ;;  %v1309_v0 = vpop.f32.mrf.mxu1  ;;  %v10862_v9 = vld [vmem:[#allocation91_spill] sm:$0xff] }
 0x267   : > { %v1310_v11 = vadd.f32 %v1309_v0, %v10862_v9  ;;  %v8757_v0 = vld [vmem:[%s7347_s8 + $0x258] sm:$0xff]  ;;  %v1514_v9 = vrot.slane %v6988_v4, 2 }
 0x268   : > { %v2199_v25 = vadd.f32 %v2083_v27, %v1909_v31  ;;  %v8749_v31 = vsel %vm1384_vm3, %v1511_v51, %v1512_v37  ;;  %v10867_v51 = vld [vmem:[#allocation61_spill] sm:$0xff] }
 0x269   : > { %6254 = vmatmul.msk.f32.gmra.mxu1 %vm702_vm2, %v6985_v46  ;;  %v2382_v29 = vpop.f32.mrf.mxu0  ;;  %10864 = vst [vmem:[#allocation91_spill] sm:$0xff] %v8749_v31 }
 0x26a   : > { %v8736_v43 = vadd.f32 %v2379_v49, %v2199_v25  ;;  %6320 = vmatmul.msk.f32.gmra.mxu2 %vm702_vm2, %v8733_v54 }
 0x26b   : > { %6386 = vmatmul.msk.f32.gmra.mxu3 %vm702_vm2, %v8741_v63 }
 0x26c   : > { %10861 = vst [vmem:[#allocation145_spill] sm:$0xff] %v8736_v43  ;;  %6452 = vmatmul.msk.f32.gmra.mxu0 %vm702_vm2, %v10863_v12 }
 0x26d   : > { %v1796_v46 = vpop.f32.mrf.mxu2 }
 0x26e   : > { %v2086_v49 = vpop.f32.mrf.mxu3  ;;  %v1910_v57 = vadd.f32 %v1796_v46, %v1310_v11  ;;  %v1312_v27 = vpop.f32.mrf.mxu1  ;;  %v10866_v11 = vld [vmem:[#allocation94_spill] sm:$0xff] }
 0x26f   : > { %v1313_v46 = vadd.f32 %v1312_v27, %v10866_v11  ;;  %v8774_v27 = vld [vmem:[%s7347_s8 + $0x260] sm:$0xff]  ;;  %v1516_v11 = vrot.slane %v8741_v63, 2 }
 0x270   : > { %v2200_v25 = vadd.f32 %v2086_v49, %v1910_v57 }
 0x271   : > { %6255 = vmatmul.msk.f32.gmra.mxu1 %vm702_vm2, %v6986_v55  ;;  %v2385_v43 = vpop.f32.mrf.mxu0 }
 0x272   : > { %v8752_v23 = vadd.f32 %v2382_v29, %v2200_v25  ;;  %6321 = vmatmul.msk.f32.gmra.mxu2 %vm702_vm2, %v8749_v31  ;;  %v8766_v25 = vsel %vm1384_vm3, %v1512_v37, %v1514_v9  ;;  %v10870_v37 = vld [vmem:[#allocation97_spill] sm:$0xff] }
 0x273   : > { %6387 = vmatmul.msk.f32.gmra.mxu3 %vm702_vm2, %v8757_v0  ;;  %10868 = vst [vmem:[#allocation94_spill] sm:$0xff] %v8766_v25 }
 0x274   : > { %10865 = vst [vmem:[#allocation146_spill] sm:$0xff] %v8752_v23  ;;  %6453 = vmatmul.msk.f32.gmra.mxu0 %vm702_vm2, %v10867_v51 }
 0x275   : > { %v1799_v55 = vpop.f32.mrf.mxu2 }
 0x276   : > { %v2089_v49 = vpop.f32.mrf.mxu3  ;;  %v1911_v29 = vadd.f32 %v1799_v55, %v1313_v46  ;;  %v1315_v57 = vpop.f32.mrf.mxu1  ;;  %v10871_v55 = vld [vmem:[#allocation66_spill] sm:$0xff] }
 0x277   : > { %v1316_v46 = vadd.f32 %v1315_v57, %v10870_v37  ;;  %v8791_v57 = vld [vmem:[%s7347_s8 + $0x268] sm:$0xff]  ;;  %v6994_v37 = vld [vmem:[%s7347_s8 + $0x250] sm:$0x3] }
 0x278   : > { %v2201_v23 = vadd.f32 %v2089_v49, %v1911_v29  ;;  %v8783_v29 = vsel %vm1384_vm3, %v1514_v9, %v1516_v11  ;;  %v10874_v9 = vld [vmem:[#allocation100_spill] sm:$0xff] }
 0x279   : > { %6256 = vmatmul.msk.f32.gmra.mxu1 %vm702_vm2, %v6987_v53  ;;  %v2388_v12 = vpop.f32.mrf.mxu0  ;;  %10872 = vst [vmem:[#allocation97_spill] sm:$0xff] %v8783_v29 }
 0x27a   : > { %v8769_v31 = vadd.f32 %v2385_v43, %v2201_v23  ;;  %6322 = vmatmul.msk.f32.gmra.mxu2 %vm702_vm2, %v8766_v25 }
 0x27b   : > { %6388 = vmatmul.msk.f32.gmra.mxu3 %vm702_vm2, %v8774_v27 }
 0x27c   : > { %10869 = vst [vmem:[#allocation147_spill] sm:$0xff] %v8769_v31  ;;  %6454 = vmatmul.msk.f32.gmra.mxu0 %vm702_vm2, %v10871_v55 }
 0x27d   : > { %v1802_v23 = vpop.f32.mrf.mxu2 }
 0x27e   : > { %v2092_v53 = vpop.f32.mrf.mxu3  ;;  %v1912_v43 = vadd.f32 %v1802_v23, %v1316_v46  ;;  %v1318_v49 = vpop.f32.mrf.mxu1  ;;  %v1518_v46 = vrot.slane %v6994_v37, 2 }
 0x27f   : > { %v1319_v23 = vadd.f32 %v1318_v49, %v10874_v9  ;;  %v8816_v9 = vld [vmem:[%s7347_s8 + $0x270] sm:$0xff] }
 0x280   : > { %v2202_v31 = vadd.f32 %v2092_v53, %v1912_v43  ;;  %v10875_v53 = vld [vmem:[#allocation71_spill] sm:$0xff] }
 0x281   : > { %6257 = vmatmul.msk.f32.gmra.mxu1 %vm702_vm2, %v6988_v4  ;;  %v2391_v51 = vpop.f32.mrf.mxu0 }
 0x282   : > { %v8786_v25 = vadd.f32 %v2388_v12, %v2202_v31  ;;  %6323 = vmatmul.msk.f32.gmra.mxu2 %vm702_vm2, %v8783_v29 }
 0x283   : > { %6389 = vmatmul.msk.f32.gmra.mxu3 %vm702_vm2, %v8791_v57 }
 0x284   : > { %10873 = vst [vmem:[#allocation148_spill] sm:$0xff] %v8786_v25  ;;  %6455 = vmatmul.msk.f32.gmra.mxu0 %vm702_vm2, %v10875_v53  ;;  %v8802_v25 = vsel %vm1384_vm3, %v1516_v11, %v1518_v46  ;;  %v465_v11 = vld [vmem:[%s8809_s19 + $0x8] sm:$0xff]  ;;  %v1521_v46 = vrot.slane %v8774_v27, 2 }
 0x285   : > { %v1805_v4 = vpop.f32.mrf.mxu2  ;;  %10876 = vst [vmem:[#allocation100_spill] sm:$0xff] %v8802_v25  ;;  %v2227_v53 = vrot.slane %v465_v11, 1 }
 0x286   : > { %v2095_v12 = vpop.f32.mrf.mxu3  ;;  %v1913_v31 = vadd.f32 %v1805_v4, %v1319_v23  ;;  %v1321_v43 = vpop.f32.mrf.mxu1  ;;  %v10879_v23 = vld [vmem:[#allocation103_spill] sm:$0xff] }
 0x287   : > { %v1322_v4 = vadd.f32 %v1321_v43, %v10879_v23 }
 0x288   : > { %v2203_v55 = vadd.f32 %v2095_v12, %v1913_v31  ;;  %v464_v12 = vld [vmem:[%s8809_s19] sm:$0xff]  ;;  %v10880_v31 = vld [vmem:[#allocation74_spill] sm:$0xff] }
 0x289   : > { %6258 = vmatmul.msk.f32.gmra.mxu1 %vm702_vm2, %v8741_v63  ;;  %v2394_v37 = vpop.f32.mrf.mxu0  ;;  %v1520_v63 = vrot.slane %v8757_v0, 2 }
 0x28a   : > { %v8811_v49 = vadd.f32 %v2391_v51, %v2203_v55  ;;  %6324 = vmatmul.msk.f32.gmra.mxu2 %vm702_vm2, %v8802_v25 }
 0x28b   : > { %6390 = vmatmul.msk.f32.gmra.mxu3 %vm702_vm2, %v8816_v9  ;;  %v8828_v54 = vsel %vm1384_vm3, %v1520_v63, %v1521_v46  ;;  %v10884_v63 = vld [vmem:[#allocation106_spill] sm:$0xff] }
 0x28c   : > { %10878 = vst [vmem:[#allocation149_spill] sm:$0xff] %v8811_v49  ;;  %6456 = vmatmul.msk.f32.gmra.mxu0 %vm702_vm2, %v10880_v31  ;;  %v2226_v49 = vrot.slane %v464_v12, 1 }
 0x28d   : > { %v1808_v51 = vpop.f32.mrf.mxu2  ;;  %10881 = vst [vmem:[#allocation103_spill] sm:$0xff] %v8828_v54 }
 0x28e   : > { %v2098_v55 = vpop.f32.mrf.mxu3  ;;  %v1914_v25 = vadd.f32 %v1808_v51, %v1322_v4  ;;  %v1324_v29 = vpop.f32.mrf.mxu1  ;;  %v8833_v43 = vsel %vm555_vm1, %v2226_v49, %v2227_v53  ;;  %v466_v4 = vld [vmem:[%s8809_s19 + $0x10] sm:$0xff]  ;;  %v1523_v51 = vrot.slane %v8791_v57, 2 }
 0x28f   : > { %10882 = vst [vmem:[#allocation150_spill] sm:$0xff] %v8833_v43  ;;  %v2229_v49 = vrot.slane %v466_v4, 1 }
 0x290   : > { %v2204_v47 = vadd.f32 %v2098_v55, %v1914_v25  ;;  %v1325_v25 = vadd.f32 %v1324_v29, %v10884_v63  ;;  %v467_v63 = vld [vmem:[%s8809_s19 + $0x18] sm:$0xff] }
 0x291   : > { %6259 = vmatmul.msk.f32.gmra.mxu1 %vm702_vm2, %v8757_v0  ;;  %v2397_v10 = vpop.f32.mrf.mxu0 }
 0x292   : > { %v8835_v23 = vadd.f32 %v2394_v37, %v2204_v47  ;;  %6325 = vmatmul.msk.f32.gmra.mxu2 %vm702_vm2, %v8828_v54  ;;  %v8846_v37 = vsel %vm1384_vm3, %v1521_v46, %v1523_v51  ;;  %v8851_v54 = vsel %vm555_vm1, %v2227_v53, %v2229_v49  ;;  %v10888_v46 = vld [vmem:[#allocation109_spill] sm:$0xff] }
 0x293   : > { %6391 = vmatmul.msk.f32.gmra.mxu3 %vm702_vm2, %v464_v12  ;;  %10885 = vst [vmem:[#allocation106_spill] sm:$0xff] %v8846_v37 }
 0x294   : > { %10883 = vst [vmem:[#allocation151_spill] sm:$0xff] %v8835_v23  ;;  %6457 = vmatmul.msk.f32.gmra.mxu0 %vm702_vm2, %v8833_v43 }
 0x295   : > { %v1811_v0 = vpop.f32.mrf.mxu2  ;;  %10886 = vst [vmem:[#allocation152_spill] sm:$0xff] %v8851_v54 }
 0x296   : > { %v2101_v55 = vpop.f32.mrf.mxu3  ;;  %v1915_v31 = vadd.f32 %v1811_v0, %v1325_v25  ;;  %v1327_v47 = vpop.f32.mrf.mxu1  ;;  %v1525_v25 = vrot.slane %v8816_v9, 2  ;;  %v2231_v0 = vrot.slane %v467_v63, 1 }
 0x298   : > { %v2205_v23 = vadd.f32 %v2101_v55, %v1915_v31  ;;  %v1328_v31 = vadd.f32 %v1327_v47, %v10888_v46  ;;  %v8864_v55 = vsel %vm1384_vm3, %v1523_v51, %v1525_v25  ;;  %v8869_v43 = vsel %vm555_vm1, %v2229_v49, %v2231_v0  ;;  %v468_v46 = vld [vmem:[%s8809_s19 + $0x20] sm:$0x3] }
 0x299   : > { %6260 = vmatmul.msk.f32.gmra.mxu1 %vm702_vm2, %v8774_v27  ;;  %v2400_v12 = vpop.f32.mrf.mxu0  ;;  %v10890_v51 = vld [vmem:[#allocation112_spill] sm:$0xff] }
 0x29a   : > { %v8853_v29 = vadd.f32 %v2397_v10, %v2205_v23  ;;  %6326 = vmatmul.msk.f32.gmra.mxu2 %vm702_vm2, %v8846_v37 }
 0x29b   : > { %6392 = vmatmul.msk.f32.gmra.mxu3 %vm702_vm2, %v465_v11 }
 0x29c   : > { %10887 = vst [vmem:[#allocation153_spill] sm:$0xff] %v8853_v29  ;;  %6458 = vmatmul.msk.f32.gmra.mxu0 %vm702_vm2, %v8851_v54 }
 0x29d   : > { %v1814_v27 = vpop.f32.mrf.mxu2 }
 0x29e   : > { %v2104_v53 = vpop.f32.mrf.mxu3  ;;  %v1916_v10 = vadd.f32 %v1814_v27, %v1328_v31  ;;  %v1330_v23 = vpop.f32.mrf.mxu1  ;;  %v6996_v31 = vld [vmem:[%s7347_s8 + $0x278] sm:$0x3] }
 0x29f   : > { %v1527_v27 = vrot.slane %v6996_v31, 2  ;;  %v1331_v54 = vadd.f32 %v1330_v23, %v10890_v51 }
 0x2a0   : > { %v2206_v29 = vadd.f32 %v2104_v53, %v1916_v10  ;;  %v2233_v10 = vrot.slane %v468_v46, 1 }
 0x2a1   : > { %6261 = vmatmul.msk.f32.gmra.mxu1 %vm702_vm2, %v8791_v57  ;;  %v2403_v11 = vpop.f32.mrf.mxu0 }
 0x2a2   : > { %v8871_v47 = vadd.f32 %v2400_v12, %v2206_v29  ;;  %6327 = vmatmul.msk.f32.gmra.mxu2 %vm702_vm2, %v8864_v55  ;;  %v8882_v12 = vsel %vm1384_vm3, %v1525_v25, %v1527_v27  ;;  %v8887_v31 = vsel %vm555_vm1, %v2231_v0, %v2233_v10  ;;  %v6997_v10 = vld [vmem:[%s7347_s8 + $0x50] sm:$0xff] }
 0x2a3   : > { %6393 = vmatmul.msk.f32.gmra.mxu3 %vm702_vm2, %v466_v4 }
 0x2a4   : > { %10889 = vst [vmem:[#allocation109_spill] sm:$0xff] %v8871_v47  ;;  %6459 = vmatmul.msk.f32.gmra.mxu0 %vm702_vm2, %v8869_v43  ;;  %v10908_v47 = vld [vmem:[#allocation90_spill] sm:$0xff] }
 0x2a5   : > { %v1817_v57 = vpop.f32.mrf.mxu2 }
 0x2a6   : > { %v2107_v53 = vpop.f32.mrf.mxu3  ;;  %v1917_v49 = vadd.f32 %v1817_v57, %v1331_v54  ;;  %v1333_v37 = vpop.f32.mrf.mxu1  ;;  %v10892_v54 = vld [vmem:[#allocation115_spill] sm:$0xff] }
 0x2a7   : > { %v1334_v46 = vadd.f32 %v1333_v37, %v10892_v54  ;;  %v10896_v37 = vld [vmem:[#allocation76_spill] sm:$0xff] }
 0x2a8   : > { %v2207_v29 = vadd.f32 %v2107_v53, %v1917_v49  ;;  %v10893_v53 = vld [vmem:[#allocation81_spill] sm:$0xff] }
 0x2a9   : > { %6262 = vmatmul.msk.f32.gmra.mxu1 %vm702_vm2, %v8816_v9  ;;  %v2406_v4 = vpop.f32.mrf.mxu0 }
 0x2aa   : > { %v8889_v23 = vadd.f32 %v2403_v11, %v2207_v29  ;;  %6328 = vmatmul.msk.f32.gmra.mxu2 %vm702_vm2, %v8882_v12  ;;  %v10897_v29 = vld [vmem:[#allocation93_spill] sm:$0xff] }
 0x2ab   : > { %6394 = vmatmul.msk.f32.gmra.mxu3 %vm702_vm2, %v467_v63  ;;  %v10895_v63 = vld [vmem:[#allocation42_spill] sm:$0xff] }
 0x2ac   : > { %10891 = vst [vmem:[#allocation112_spill] sm:$0xff] %v8889_v23  ;;  %6460 = vmatmul.msk.f32.gmra.mxu0 %vm702_vm2, %v8887_v31  ;;  %v10903_v23 = vld [vmem:[#allocation87_spill] sm:$0xff] }
 0x2ad   : > { %v1820_v25 = vpop.f32.mrf.mxu2 }
 0x2ae   : > { %v2110_v27 = vpop.f32.mrf.mxu3  ;;  %v1918_v9 = vadd.f32 %v1820_v25, %v1334_v46  ;;  %v1336_v51 = vpop.f32.mrf.mxu1 }
 0x2af   : > { %v1337_v49 = vadd.f32 %v1336_v51, %v10896_v37  ;;  %v10901_v51 = vld [vmem:[#allocation77_spill] sm:$0xff] }
 0x2b0   : > { %v2208_v57 = vadd.f32 %v2110_v27, %v1918_v9 }
 0x2b1   : > { %6463 = vmatmul.msk.f32.vlgmr.msra.gmra.mxu1 %vm702_vm2, %v10893_v53  ;;  %v2409_v0 = vpop.f32.mrf.mxu0  ;;  %v10898_v53 = vld [vmem:[#allocation84_spill] sm:$0xff] }
 0x2b2   : > { %v8899_v11 = vadd.f32 %v2406_v4, %v2208_v57  ;;  %6529 = vmatmul.msk.f32.vlgmr.msra.gmra.mxu2 %vm702_vm2, %v6997_v10  ;;  %v6998_v10 = vld [vmem:[%s7347_s8 + $0x58] sm:$0xff] }
 0x2b3   : > { %6595 = vmatmul.msk.f32.vlgmr.msra.gmra.mxu3 %vm702_vm2, %v10895_v63  ;;  %v10900_v63 = vld [vmem:[#allocation47_spill] sm:$0xff] }
 0x2b4   : > { %10894 = vst [vmem:[#allocation115_spill] sm:$0xff] %v8899_v11  ;;  %6661 = vmatmul.msk.f32.vlgmr.msra.gmra.mxu0 %vm702_vm2, %v10897_v29  ;;  %v10902_v11 = vld [vmem:[#allocation96_spill] sm:$0xff] }
 0x2b5   : > { %v1823_v54 = vpop.f32.mrf.mxu2 }
 0x2b6   : > { %v2113_v46 = vpop.f32.mrf.mxu3  ;;  %v1919_v25 = vadd.f32 %v1823_v54, %v1337_v49  ;;  %v1339_v27 = vpop.f32.mrf.mxu1 }
 0x2b7   : > { %v1340_v37 = vadd.f32 %v1339_v27, %v10901_v51  ;;  %v10906_v27 = vld [vmem:[#allocation78_spill] sm:$0xff] }
 0x2b8   : > { %v2209_v9 = vadd.f32 %v2113_v46, %v1919_v25 }
 0x2b9   : > { %6464 = vmatmul.msk.f32.gmra.mxu1 %vm702_vm2, %v10898_v53  ;;  %v2412_v4 = vpop.f32.mrf.mxu0 }
 0x2ba   : > { %v8910_v57 = vadd.f32 %v2409_v0, %v2209_v9  ;;  %6530 = vmatmul.msk.f32.gmra.mxu2 %vm702_vm2, %v6998_v10  ;;  %v6999_v10 = vld [vmem:[%s7347_s8 + $0x60] sm:$0xff] }
 0x2bb   : > { %6596 = vmatmul.msk.f32.gmra.mxu3 %vm702_vm2, %v10900_v63  ;;  %v10905_v63 = vld [vmem:[#allocation52_spill] sm:$0xff] }
 0x2bc   : > { %10899 = vst [vmem:[#allocation81_spill] sm:$0xff] %v8910_v57  ;;  %6662 = vmatmul.msk.f32.gmra.mxu0 %vm702_vm2, %v10902_v11  ;;  %v10907_v57 = vld [vmem:[#allocation99_spill] sm:$0xff] }
 0x2bd   : > { %v1826_v49 = vpop.f32.mrf.mxu2 }
 0x2be   : > { %v2116_v54 = vpop.f32.mrf.mxu3  ;;  %v1920_v46 = vadd.f32 %v1826_v49, %v1340_v37  ;;  %v1342_v25 = vpop.f32.mrf.mxu1 }
 0x2bf   : > { %v1343_v51 = vadd.f32 %v1342_v25, %v10906_v27  ;;  %v10911_v25 = vld [vmem:[#allocation80_spill] sm:$0xff] }
 0x2c0   : > { %v2210_v53 = vadd.f32 %v2116_v54, %v1920_v46 }
 0x2c1   : > { %6465 = vmatmul.msk.f32.gmra.mxu1 %vm702_vm2, %v10903_v23  ;;  %v2415_v0 = vpop.f32.mrf.mxu0 }
 0x2c2   : > { %v8921_v9 = vadd.f32 %v2412_v4, %v2210_v53  ;;  %6531 = vmatmul.msk.f32.gmra.mxu2 %vm702_vm2, %v6999_v10  ;;  %v7000_v10 = vld [vmem:[%s7347_s8 + $0x68] sm:$0xff] }
 0x2c3   : > { %6597 = vmatmul.msk.f32.gmra.mxu3 %vm702_vm2, %v10905_v63  ;;  %v10910_v63 = vld [vmem:[#allocation58_spill] sm:$0xff] }
 0x2c4   : > { %10904 = vst [vmem:[#allocation42_spill] sm:$0xff] %v8921_v9  ;;  %6663 = vmatmul.msk.f32.gmra.mxu0 %vm702_vm2, %v10907_v57  ;;  %v10912_v9 = vld [vmem:[#allocation102_spill] sm:$0xff] }
 0x2c5   : > { %v1829_v37 = vpop.f32.mrf.mxu2 }
 0x2c6   : > { %v2119_v49 = vpop.f32.mrf.mxu3  ;;  %v1921_v54 = vadd.f32 %v1829_v37, %v1343_v51  ;;  %v1345_v46 = vpop.f32.mrf.mxu1 }
 0x2c7   : > { %v1346_v27 = vadd.f32 %v1345_v46, %v10911_v25  ;;  %v10915_v46 = vld [vmem:[#allocation83_spill] sm:$0xff] }
 0x2c8   : > { %v2211_v23 = vadd.f32 %v2119_v49, %v1921_v54 }
 0x2c9   : > { %6466 = vmatmul.msk.f32.gmra.mxu1 %vm702_vm2, %v10908_v47  ;;  %v2418_v4 = vpop.f32.mrf.mxu0 }
 0x2ca   : > { %v8932_v53 = vadd.f32 %v2415_v0, %v2211_v23  ;;  %6532 = vmatmul.msk.f32.gmra.mxu2 %vm702_vm2, %v7000_v10  ;;  %v7001_v10 = vld [vmem:[%s7347_s8 + $0x78] sm:$0xff] }
 0x2cb   : > { %6598 = vmatmul.msk.f32.gmra.mxu3 %vm702_vm2, %v10910_v63  ;;  %v10914_v63 = vld [vmem:[#allocation63_spill] sm:$0xff] }
 0x2cc   : > { %10909 = vst [vmem:[#allocation76_spill] sm:$0xff] %v8932_v53  ;;  %6664 = vmatmul.msk.f32.gmra.mxu0 %vm702_vm2, %v10912_v9  ;;  %v10916_v53 = vld [vmem:[#allocation105_spill] sm:$0xff] }
 0x2cd   : > { %v1832_v51 = vpop.f32.mrf.mxu2 }
 0x2ce   : > { %v2122_v37 = vpop.f32.mrf.mxu3  ;;  %v1922_v49 = vadd.f32 %v1832_v51, %v1346_v27  ;;  %v1348_v54 = vpop.f32.mrf.mxu1 }
 0x2cf   : > { %v1349_v25 = vadd.f32 %v1348_v54, %v10915_v46  ;;  %v10919_v54 = vld [vmem:[#allocation86_spill] sm:$0xff] }
 0x2d0   : > { %v2212_v47 = vadd.f32 %v2122_v37, %v1922_v49 }
 0x2d1   : > { %6467 = vmatmul.msk.f32.gmra.mxu1 %vm702_vm2, %v10897_v29  ;;  %v2421_v0 = vpop.f32.mrf.mxu0 }
 0x2d2   : > { %v8943_v23 = vadd.f32 %v2418_v4, %v2212_v47  ;;  %6533 = vmatmul.msk.f32.gmra.mxu2 %vm702_vm2, %v7001_v10  ;;  %v7002_v10 = vld [vmem:[%s7347_s8 + $0x80] sm:$0xff] }
 0x2d3   : > { %6599 = vmatmul.msk.f32.gmra.mxu3 %vm702_vm2, %v10914_v63  ;;  %v10918_v63 = vld [vmem:[#allocation68_spill] sm:$0xff] }
 0x2d4   : > { %10913 = vst [vmem:[#allocation93_spill] sm:$0xff] %v8943_v23  ;;  %6665 = vmatmul.msk.f32.gmra.mxu0 %vm702_vm2, %v10916_v53  ;;  %v10920_v23 = vld [vmem:[#allocation108_spill] sm:$0xff] }
 0x2d5   : > { %v1835_v27 = vpop.f32.mrf.mxu2 }
 0x2d6   : > { %v2125_v51 = vpop.f32.mrf.mxu3  ;;  %v1923_v37 = vadd.f32 %v1835_v27, %v1349_v25  ;;  %v1351_v49 = vpop.f32.mrf.mxu1 }
 0x2d7   : > { %v1352_v46 = vadd.f32 %v1351_v49, %v10919_v54  ;;  %v10923_v49 = vld [vmem:[#allocation89_spill] sm:$0xff] }
 0x2d8   : > { %v2213_v29 = vadd.f32 %v2125_v51, %v1923_v37 }
 0x2d9   : > { %6468 = vmatmul.msk.f32.gmra.mxu1 %vm702_vm2, %v10902_v11  ;;  %v2424_v4 = vpop.f32.mrf.mxu0 }
 0x2da   : > { %v8954_v47 = vadd.f32 %v2421_v0, %v2213_v29  ;;  %6534 = vmatmul.msk.f32.gmra.mxu2 %vm702_vm2, %v7002_v10  ;;  %v7003_v10 = vld [vmem:[%s7347_s8 + $0x88] sm:$0xff] }
 0x2db   : > { %6600 = vmatmul.msk.f32.gmra.mxu3 %vm702_vm2, %v10918_v63  ;;  %v10922_v63 = vld [vmem:[#allocation72_spill] sm:$0xff] }
 0x2dc   : > { %10917 = vst [vmem:[#allocation84_spill] sm:$0xff] %v8954_v47  ;;  %6666 = vmatmul.msk.f32.gmra.mxu0 %vm702_vm2, %v10920_v23  ;;  %v10924_v47 = vld [vmem:[#allocation111_spill] sm:$0xff] }
 0x2dd   : > { %v1838_v25 = vpop.f32.mrf.mxu2 }
 0x2de   : > { %v2128_v27 = vpop.f32.mrf.mxu3  ;;  %v1924_v51 = vadd.f32 %v1838_v25, %v1352_v46  ;;  %v1354_v37 = vpop.f32.mrf.mxu1 }
 0x2df   : > { %v1355_v54 = vadd.f32 %v1354_v37, %v10923_v49  ;;  %v10927_v37 = vld [vmem:[#allocation92_spill] sm:$0xff] }
 0x2e0   : > { %v2214_v11 = vadd.f32 %v2128_v27, %v1924_v51 }
 0x2e1   : > { %6469 = vmatmul.msk.f32.gmra.mxu1 %vm702_vm2, %v10907_v57  ;;  %v2427_v0 = vpop.f32.mrf.mxu0 }
 0x2e2   : > { %v8965_v29 = vadd.f32 %v2424_v4, %v2214_v11  ;;  %6535 = vmatmul.msk.f32.gmra.mxu2 %vm702_vm2, %v7003_v10  ;;  %v7004_v10 = vld [vmem:[%s7347_s8 + $0x90] sm:$0xff] }
 0x2e3   : > { %6601 = vmatmul.msk.f32.gmra.mxu3 %vm702_vm2, %v10922_v63  ;;  %v10926_v63 = vld [vmem:[#allocation75_spill] sm:$0xff] }
 0x2e4   : > { %10921 = vst [vmem:[#allocation47_spill] sm:$0xff] %v8965_v29  ;;  %6667 = vmatmul.msk.f32.gmra.mxu0 %vm702_vm2, %v10924_v47  ;;  %v10928_v29 = vld [vmem:[#allocation114_spill] sm:$0xff] }
 0x2e5   : > { %v1841_v46 = vpop.f32.mrf.mxu2 }
 0x2e6   : > { %v2131_v25 = vpop.f32.mrf.mxu3  ;;  %v1925_v27 = vadd.f32 %v1841_v46, %v1355_v54  ;;  %v1357_v51 = vpop.f32.mrf.mxu1 }
 0x2e7   : > { %v1358_v49 = vadd.f32 %v1357_v51, %v10927_v37  ;;  %v10930_v51 = vld [vmem:[#allocation95_spill] sm:$0xff] }
 0x2e8   : > { %v2215_v57 = vadd.f32 %v2131_v25, %v1925_v27 }
 0x2e9   : > { %6470 = vmatmul.msk.f32.gmra.mxu1 %vm702_vm2, %v10912_v9  ;;  %v2430_v4 = vpop.f32.mrf.mxu0 }
 0x2ea   : > { %v8976_v11 = vadd.f32 %v2427_v0, %v2215_v57  ;;  %6536 = vmatmul.msk.f32.gmra.mxu2 %vm702_vm2, %v7004_v10  ;;  %v7005_v10 = vld [vmem:[%s7347_s8 + $0xa0] sm:$0xff] }
 0x2eb   : > { %6602 = vmatmul.msk.f32.gmra.mxu3 %vm702_vm2, %v10926_v63  ;;  %v10929_v63 = vld [vmem:[#allocation16_spill] sm:$0xff] }
 0x2ec   : > { %10925 = vst [vmem:[#allocation77_spill] sm:$0xff] %v8976_v11  ;;  %6668 = vmatmul.msk.f32.gmra.mxu0 %vm702_vm2, %v10928_v29  ;;  %v10931_v11 = vld [vmem:[#allocation117_spill] sm:$0xff] }
 0x2ed   : > { %v1844_v54 = vpop.f32.mrf.mxu2 }
 0x2ee   : > { %v2134_v46 = vpop.f32.mrf.mxu3  ;;  %v1926_v25 = vadd.f32 %v1844_v54, %v1358_v49  ;;  %v1360_v27 = vpop.f32.mrf.mxu1 }
 0x2ef   : > { %v1361_v37 = vadd.f32 %v1360_v27, %v10930_v51  ;;  %v10933_v27 = vld [vmem:[#allocation98_spill] sm:$0xff] }
 0x2f0   : > { %v2216_v9 = vadd.f32 %v2134_v46, %v1926_v25 }
 0x2f1   : > { %6471 = vmatmul.msk.f32.gmra.mxu1 %vm702_vm2, %v10916_v53  ;;  %v2433_v0 = vpop.f32.mrf.mxu0 }
 0x2f2   : > { %v8987_v57 = vadd.f32 %v2430_v4, %v2216_v9  ;;  %6537 = vmatmul.msk.f32.gmra.mxu2 %vm702_vm2, %v7005_v10  ;;  %v7006_v10 = vld [vmem:[%s7347_s8 + $0xa8] sm:$0xff] }
 0x2f3   : > { %6603 = vmatmul.msk.f32.gmra.mxu3 %vm702_vm2, %v10929_v63  ;;  %v10932_v63 = vld [vmem:[#allocation19_spill] sm:$0xff] }
 0x2f4   : > { %6669 = vmatmul.msk.f32.gmra.mxu0 %vm702_vm2, %v10931_v11 }
 0x2f5   : > { %v1847_v49 = vpop.f32.mrf.mxu2 }
 0x2f6   : > { %v2137_v54 = vpop.f32.mrf.mxu3  ;;  %v1927_v46 = vadd.f32 %v1847_v49, %v1361_v37  ;;  %v1363_v25 = vpop.f32.mrf.mxu1 }
 0x2f7   : > { %v1364_v51 = vadd.f32 %v1363_v25, %v10933_v27  ;;  %v10935_v25 = vld [vmem:[#allocation101_spill] sm:$0xff] }
 0x2f8   : > { %v2217_v53 = vadd.f32 %v2137_v54, %v1927_v46 }
 0x2f9   : > { %6472 = vmatmul.msk.f32.gmra.mxu1 %vm702_vm2, %v10920_v23  ;;  %v2436_v4 = vpop.f32.mrf.mxu0 }
 0x2fa   : > { %v8998_v9 = vadd.f32 %v2433_v0, %v2217_v53  ;;  %6538 = vmatmul.msk.f32.gmra.mxu2 %vm702_vm2, %v7006_v10  ;;  %v7007_v10 = vld [vmem:[%s7347_s8 + $0xb0] sm:$0xff] }
 0x2fb   : > { %6604 = vmatmul.msk.f32.gmra.mxu3 %vm702_vm2, %v10932_v63  ;;  %v10934_v63 = vld [vmem:[#allocation22_spill] sm:$0xff] }
 0x2fc   : > { %6670 = vmatmul.msk.f32.gmra.mxu0 %vm702_vm2, %v8201_v5 }
 0x2fd   : > { %v1850_v37 = vpop.f32.mrf.mxu2 }
 0x2fe   : > { %v2140_v49 = vpop.f32.mrf.mxu3  ;;  %v1928_v54 = vadd.f32 %v1850_v37, %v1364_v51  ;;  %v1366_v46 = vpop.f32.mrf.mxu1 }
 0x2ff   : > { %v1367_v27 = vadd.f32 %v1366_v46, %v10935_v25  ;;  %v10937_v46 = vld [vmem:[#allocation104_spill] sm:$0xff] }
 0x300   : > { %v2218_v23 = vadd.f32 %v2140_v49, %v1928_v54 }
 0x301   : > { %6473 = vmatmul.msk.f32.gmra.mxu1 %vm702_vm2, %v10924_v47  ;;  %v2439_v0 = vpop.f32.mrf.mxu0 }
 0x302   : > { %v9009_v53 = vadd.f32 %v2436_v4, %v2218_v23  ;;  %6539 = vmatmul.msk.f32.gmra.mxu2 %vm702_vm2, %v7007_v10  ;;  %v7008_v10 = vld [vmem:[%s7347_s8 + $0xb8] sm:$0xff] }
 0x303   : > { %6605 = vmatmul.msk.f32.gmra.mxu3 %vm702_vm2, %v10934_v63  ;;  %v10936_v63 = vld [vmem:[#allocation25_spill] sm:$0xff] }
 0x304   : > { %6671 = vmatmul.msk.f32.gmra.mxu0 %vm702_vm2, %v8216_v3 }
 0x305   : > { %v1853_v51 = vpop.f32.mrf.mxu2 }
 0x306   : > { %v2143_v37 = vpop.f32.mrf.mxu3  ;;  %v1929_v49 = vadd.f32 %v1853_v51, %v1367_v27  ;;  %v1369_v54 = vpop.f32.mrf.mxu1 }
 0x307   : > { %v1370_v25 = vadd.f32 %v1369_v54, %v10937_v46  ;;  %v10938_v54 = vld [vmem:[#allocation107_spill] sm:$0xff] }
 0x308   : > { %v2219_v47 = vadd.f32 %v2143_v37, %v1929_v49 }
 0x309   : > { %6474 = vmatmul.msk.f32.gmra.mxu1 %vm702_vm2, %v10928_v29  ;;  %v2442_v4 = vpop.f32.mrf.mxu0 }
 0x30a   : > { %v9020_v23 = vadd.f32 %v2439_v0, %v2219_v47  ;;  %6540 = vmatmul.msk.f32.gmra.mxu2 %vm702_vm2, %v7008_v10  ;;  %v7009_v10 = vld [vmem:[%s7347_s8 + $0xc8] sm:$0xff] }
 0x30b   : > { %6606 = vmatmul.msk.f32.gmra.mxu3 %vm702_vm2, %v10936_v63 }
 0x30c   : > { %6672 = vmatmul.msk.f32.gmra.mxu0 %vm702_vm2, %v8231_v45 }
 0x30d   : > { %v1856_v27 = vpop.f32.mrf.mxu2 }
 0x30e   : > { %v2146_v51 = vpop.f32.mrf.mxu3  ;;  %v1930_v37 = vadd.f32 %v1856_v27, %v1370_v25  ;;  %v1372_v49 = vpop.f32.mrf.mxu1 }
 0x30f   : > { %v1373_v63 = vadd.f32 %v1372_v49, %v10938_v54 }
 0x310   : > { %v2220_v29 = vadd.f32 %v2146_v51, %v1930_v37 }
 0x311   : > { %6475 = vmatmul.msk.f32.gmra.mxu1 %vm702_vm2, %v10931_v11  ;;  %v2445_v0 = vpop.f32.mrf.mxu0 }
 0x312   : > { %v9031_v47 = vadd.f32 %v2442_v4, %v2220_v29  ;;  %6541 = vmatmul.msk.f32.gmra.mxu2 %vm702_vm2, %v7009_v10  ;;  %v7010_v29 = vld [vmem:[%s7347_s8 + $0xd0] sm:$0xff] }
 0x313   : > { %6607 = vmatmul.msk.f32.gmra.mxu3 %vm702_vm2, %v7488_v15  ;;  %v10939_v15 = vld [vmem:[#allocation110_spill] sm:$0xff] }
 0x314   : > { %6673 = vmatmul.msk.f32.gmra.mxu0 %vm702_vm2, %v8247_v44 }
 0x315   : > { %v1859_v46 = vpop.f32.mrf.mxu2 }
 0x316   : > { %v2149_v25 = vpop.f32.mrf.mxu3  ;;  %v1931_v27 = vadd.f32 %v1859_v46, %v1373_v63  ;;  %v1375_v51 = vpop.f32.mrf.mxu1 }
 0x317   : > { %v1376_v49 = vadd.f32 %v1375_v51, %v10939_v15 }
 0x318   : > { %v2221_v11 = vadd.f32 %v2149_v25, %v1931_v27  ;;  %v7011_v27 = vld [vmem:[%s7347_s8 + $0xd8] sm:$0xff] }
 0x319   : > { %6476 = vmatmul.msk.f32.gmra.mxu1 %vm702_vm2, %v8201_v5  ;;  %v2448_v4 = vpop.f32.mrf.mxu0 }
 0x31a   : > { %v9042_v37 = vadd.f32 %v2445_v0, %v2221_v11  ;;  %6542 = vmatmul.msk.f32.gmra.mxu2 %vm702_vm2, %v7010_v29 }
 0x31b   : > { %6608 = vmatmul.msk.f32.gmra.mxu3 %vm702_vm2, %v7518_v38  ;;  %v10940_v38 = vld [vmem:[#allocation113_spill] sm:$0xff] }
 0x31c   : > { %6674 = vmatmul.msk.f32.gmra.mxu0 %vm702_vm2, %v8262_v33 }
 0x31d   : > { %v1862_v10 = vpop.f32.mrf.mxu2 }
 0x31e   : > { %v2152_v54 = vpop.f32.mrf.mxu3  ;;  %v1932_v63 = vadd.f32 %v1862_v10, %v1376_v49  ;;  %v1378_v46 = vpop.f32.mrf.mxu1 }
 0x31f   : > { %v1379_v51 = vadd.f32 %v1378_v46, %v10940_v38 }
 0x320   : > { %v2222_v5 = vadd.f32 %v2152_v54, %v1932_v63  ;;  %v7012_v54 = vld [vmem:[%s7347_s8 + $0xe0] sm:$0xff] }
 0x321   : > { %6477 = vmatmul.msk.f32.gmra.mxu1 %vm702_vm2, %v8216_v3  ;;  %v2451_v0 = vpop.f32.mrf.mxu0 }
 0x322   : > { %v9053_v25 = vadd.f32 %v2448_v4, %v2222_v5  ;;  %6543 = vmatmul.msk.f32.gmra.mxu2 %vm702_vm2, %v7011_v27 }
 0x323   : > { %6609 = vmatmul.msk.f32.gmra.mxu3 %vm702_vm2, %v7548_v56  ;;  %v10941_v56 = vld [vmem:[#allocation116_spill] sm:$0xff] }
 0x324   : > { %6675 = vmatmul.msk.f32.gmra.mxu0 %vm702_vm2, %v8277_v19 }
 0x325   : > { %v1865_v11 = vpop.f32.mrf.mxu2 }
 0x326   : > { %v2155_v29 = vpop.f32.mrf.mxu3  ;;  %v1933_v15 = vadd.f32 %v1865_v11, %v1379_v51  ;;  %v1381_v49 = vpop.f32.mrf.mxu1  ;;  %v7013_v11 = vld [vmem:[%s7347_s8 + $0xf0] sm:$0xff] }
 0x327   : > { %v1382_v63 = vadd.f32 %v1381_v49, %v10941_v56  ;;  %v7014_v56 = vld [vmem:[%s7347_s8 + $0xf8] sm:$0xff] }
 0x328   : > { %v2223_v3 = vadd.f32 %v2155_v29, %v1933_v15 }
 0x329   : > { %6478 = vmatmul.msk.f32.gmra.mxu1 %vm702_vm2, %v8231_v45  ;;  %v2454_v4 = vpop.f32.mrf.mxu0 }
 0x32a   : > { %v9064_v10 = vadd.f32 %v2451_v0, %v2223_v3  ;;  %6544 = vmatmul.msk.f32.gmra.mxu2 %vm702_vm2, %v7012_v54 }
 0x32b   : > { %6610 = vmatmul.msk.f32.gmra.mxu3 %vm702_vm2, %v7578_v13 }
 0x32c   : > { %6676 = vmatmul.msk.f32.gmra.mxu0 %vm702_vm2, %v8292_v58 }
 0x32d   : > { %v1868_v46 = vpop.f32.mrf.mxu2 }
 0x32e   : > { %v2158_v5 = vpop.f32.mrf.mxu3  ;;  %v1934_v27 = vadd.f32 %v1868_v46, %v1382_v63  ;;  %v2560_v38 = vpop.f32.mrf.mxu1 }
 0x32f   : > { %v2752_v13 = vadd.f32 %v2560_v38, %v8205_v24  ;;  %v10943_v24 = vld [vmem:[#allocation118_spill] sm:$0xff] }
 0x330   : > { %v2224_v45 = vadd.f32 %v2158_v5, %v1934_v27 }
 0x331   : > { %6479 = vmatmul.msk.f32.gmra.mxu1 %vm702_vm2, %v8247_v44  ;;  %v3441_v0 = vpop.f32.mrf.mxu0 }
 0x332   : > { %v9075_v51 = vadd.f32 %v2454_v4, %v2224_v45  ;;  %6545 = vmatmul.msk.f32.gmra.mxu2 %vm702_vm2, %v7013_v11  ;;  %v9087_v4 = vld [vmem:[%s10942_s3] ss:$0 sm:$0xff] }
 0x333   : > { %6611 = vmatmul.msk.f32.gmra.mxu3 %vm702_vm2, %v10770_v40 }
 0x334   : > { %6677 = vmatmul.msk.f32.gmra.mxu0 %vm702_vm2, %v8308_v62 }
 0x335   : > { %v2850_v29 = vpop.f32.mrf.mxu2 }
 0x336   : > { %v3146_v15 = vpop.f32.mrf.mxu3  ;;  %v3042_v49 = vadd.f32 %v2850_v29, %v2752_v13  ;;  %v2563_v3 = vpop.f32.mrf.mxu1  ;;  %v7015_v13 = vld [vmem:[%s7347_s8 + $0x100] sm:$0xff]  ;;  %v10944_v29 = vld [vmem:[#allocation119_spill] sm:$0xff] }
 0x337   : > { %v2753_v63 = vadd.f32 %v2563_v3, %v10943_v24  ;;  %v10945_v3 = vld [vmem:[#allocation48_spill] sm:$0xff] }
 0x338   : > { %v3338_v44 = vadd.f32 %v3146_v15, %v3042_v49 }
 0x339   : > { %6480 = vmatmul.msk.f32.gmra.mxu1 %vm702_vm2, %v8262_v33  ;;  %v3444_v54 = vpop.f32.mrf.mxu0 }
 0x33a   : > { %v3633_v40 = vadd.f32 %v3441_v0, %v3338_v44  ;;  %6546 = vmatmul.msk.f32.gmra.mxu2 %vm702_vm2, %v7014_v56 }
 0x33b   : > { %6612 = vmatmul.msk.f32.gmra.mxu3 %vm702_vm2, %v10773_v48 }
 0x33c   : > { %v3701_v46 = vadd.f32 %v9087_v4, %v3633_v40  ;;  %6678 = vmatmul.msk.f32.gmra.mxu0 %vm702_vm2, %v8323_v52 }
 0x33d   : > { %v2853_v5 = vpop.f32.mrf.mxu2 }
 0x33e   : > { %v3149_v27 = vpop.f32.mrf.mxu3  ;;  %v3043_v33 = vadd.f32 %v2853_v5, %v2753_v63  ;;  %v2566_v38 = vpop.f32.mrf.mxu1  ;;  %v3765_v45 = vmax.f32 %v3701_v46, 0.0  ;;  %v7016_v46 = vld [vmem:[%s7347_s8 + $0x108] sm:$0xff] }
 0x33f   : > { %v2754_v15 = vadd.f32 %v2566_v38, %v10944_v29  ;;  %v10946_v5 = vld [vmem:[#allocation53_spill] sm:$0xff] }
 0x340   : > { %v3339_v0 = vadd.f32 %v3149_v27, %v3043_v33  ;;  %3831 = vxpose.xlu0.b32.start [1/4] (short) (narrow) %v3765_v45, 8  ;;  %3943 = vst.msk [vmem:[#allocation2] sm:$0xff] %vm3942_vm4, %v3765_v45  ;;  %v10947_v27 = vld [vmem:[#allocation120_spill] sm:$0xff] }
 0x341   : > { %6481 = vmatmul.msk.f32.gmra.mxu1 %vm702_vm2, %v8277_v19  ;;  %v3447_v48 = vpop.f32.mrf.mxu0 }
 0x342   : > { %v3634_v11 = vadd.f32 %v3444_v54, %v3339_v0  ;;  %6547 = vmatmul.msk.f32.gmra.mxu2 %vm702_vm2, %v7015_v13 }
 0x343   : > { %6613 = vmatmul.msk.f32.gmra.mxu3 %vm702_vm2, %v10777_v18 }
 0x344   : > { %v3702_v49 = vadd.f32 %v9087_v4, %v3634_v11  ;;  %6679 = vmatmul.msk.f32.gmra.mxu0 %vm702_vm2, %v10945_v3 }
 0x345   : > { %v2856_v44 = vpop.f32.mrf.mxu2 }
 0x346   : > { %v3152_v40 = vpop.f32.mrf.mxu3  ;;  %v3044_v56 = vadd.f32 %v2856_v44, %v2754_v15  ;;  %v2569_v19 = vpop.f32.mrf.mxu1  ;;  %v3766_v24 = vmax.f32 %v3702_v49, 0.0  ;;  %v7017_v49 = vld [vmem:[%s7347_s8 + $0x118] sm:$0xff] }
 0x347   : > { %v2755_v33 = vadd.f32 %v2569_v19, %v10947_v27  ;;  %v10948_v44 = vld [vmem:[#allocation59_spill] sm:$0xff] }
 0x348   : > { %v3340_v54 = vadd.f32 %v3152_v40, %v3044_v56  ;;  %3832 = vxpose.xlu0.b32.cont [2/4] (short) (narrow) %v3766_v24, 8  ;;  %3944 = vst.msk [vmem:[#allocation2 + $0x8] sm:$0xff] %vm3942_vm4, %v3766_v24  ;;  %v10949_v40 = vld [vmem:[#allocation38_spill] sm:$0xff] }
 0x349   : > { %6482 = vmatmul.msk.f32.gmra.mxu1 %vm702_vm2, %v8292_v58  ;;  %v3450_v18 = vpop.f32.mrf.mxu0 }
 0x34a   : > { %v3635_v63 = vadd.f32 %v3447_v48, %v3340_v54  ;;  %6548 = vmatmul.msk.f32.gmra.mxu2 %vm702_vm2, %v7016_v46 }
 0x34b   : > { %6614 = vmatmul.msk.f32.gmra.mxu3 %vm702_vm2, %v10946_v5 }
 0x34c   : > { %v3703_v38 = vadd.f32 %v9087_v4, %v3635_v63  ;;  %6680 = vmatmul.msk.f32.gmra.mxu0 %vm702_vm2, %v8353_v39 }
 0x34d   : > { %v2859_v45 = vpop.f32.mrf.mxu2 }
 0x34e   : > { %v3155_v0 = vpop.f32.mrf.mxu3  ;;  %v3045_v11 = vadd.f32 %v2859_v45, %v2755_v33  ;;  %v2572_v58 = vpop.f32.mrf.mxu1  ;;  %v3767_v13 = vmax.f32 %v3703_v38, 0.0  ;;  %v7018_v33 = vld [vmem:[%s7347_s8 + $0x120] sm:$0xff]  ;;  %v10951_v45 = vld [vmem:[#allocation37_spill] sm:$0xff] }
 0x34f   : > { %v2756_v56 = vadd.f32 %v2572_v58, %v10949_v40  ;;  %v10950_v38 = vld [vmem:[#allocation64_spill] sm:$0xff]  ;;  %v7019_v40 = vld [vmem:[%s7347_s8 + $0x128] sm:$0xff] }
 0x350   : > { %v3341_v48 = vadd.f32 %v3155_v0, %v3045_v11  ;;  %3833 = vxpose.xlu0.b32.cont [3/4] (short) (narrow) %v3767_v13, 8  ;;  %3945 = vst.msk [vmem:[#allocation2 + $0x10] sm:$0xff] %vm3942_vm4, %v3767_v13 }
 0x351   : > { %6483 = vmatmul.msk.f32.gmra.mxu1 %vm702_vm2, %v8308_v62  ;;  %v3453_v29 = vpop.f32.mrf.mxu0 }
 0x352   : > { %v3636_v15 = vadd.f32 %v3450_v18, %v3341_v48  ;;  %6549 = vmatmul.msk.f32.gmra.mxu2 %vm702_vm2, %v7017_v49 }
 0x353   : > { %6615 = vmatmul.msk.f32.gmra.mxu3 %vm702_vm2, %v10948_v44 }
 0x354   : > { %v3704_v19 = vadd.f32 %v9087_v4, %v3636_v15  ;;  %6681 = vmatmul.msk.f32.gmra.mxu0 %vm702_vm2, %v8369_v22 }
 0x355   : > { %v2862_v24 = vpop.f32.mrf.mxu2 }
 0x356   : > { %v3158_v54 = vpop.f32.mrf.mxu3  ;;  %v3046_v63 = vadd.f32 %v2862_v24, %v2756_v56  ;;  %v2575_v62 = vpop.f32.mrf.mxu1  ;;  %v3768_v46 = vmax.f32 %v3704_v19, 0.0  ;;  %v10952_v56 = vld [vmem:[#allocation43_spill] sm:$0xff] }
 0x357   : > { %v2757_v0 = vadd.f32 %v2575_v62, %v10951_v45  ;;  %v10953_v45 = vld [vmem:[#allocation41_spill] sm:$0xff] }
 0x358   : > { %v3342_v18 = vadd.f32 %v3158_v54, %v3046_v63  ;;  %3834 = vxpose.xlu0.b32.end [4/4] (short) (narrow) %v3768_v46, 8  ;;  %3946 = vst.msk [vmem:[#allocation2 + $0x18] sm:$0xff] %vm3942_vm4, %v3768_v46 }
 0x359   : > { %6484 = vmatmul.msk.f32.gmra.mxu1 %vm702_vm2, %v8323_v52  ;;  %v3456_v5 = vpop.f32.mrf.mxu0 }
 0x35a   : > { %v3637_v27 = vadd.f32 %v3453_v29, %v3342_v18  ;;  %6550 = vmatmul.msk.f32.gmra.mxu2 %vm702_vm2, %v7018_v33 }
 0x35b   : > { %6616 = vmatmul.msk.f32.gmra.mxu3 %vm702_vm2, %v10950_v38  ;;  %v7020_v38 = vld [vmem:[%s7347_s8 + $0x130] sm:$0xff] }
 0x35c   : > { %v3705_v11 = vadd.f32 %v9087_v4, %v3637_v27  ;;  %6682 = vmatmul.msk.f32.gmra.mxu0 %vm702_vm2, %v8384_v17  ;;  %v3955_v27 = vld [vmem:[#allocation2 + $0x1] ss:$2 sm:$0xff] }
 0x35d   : > { %v2865_v58 = vpop.f32.mrf.mxu2 }
 0x35e   : > { %v3161_v13 = vpop.f32.mrf.mxu3  ;;  %v3047_v48 = vadd.f32 %v2865_v58, %v2757_v0  ;;  %v2578_v52 = vpop.f32.mrf.mxu1  ;;  %v3769_v15 = vmax.f32 %v3705_v11, 0.0 }
 0x35f   : > { %v2758_v19 = vadd.f32 %v2578_v52, %v10952_v56 }
 0x360   : > { %v3343_v29 = vadd.f32 %v3161_v13, %v3047_v48  ;;  %3887 = vxpose.xlu1.b32.start [1/4] (short) (narrow) %v3769_v15, 8  ;;  %3947 = vst.msk [vmem:[#allocation3] sm:$0xff] %vm3942_vm4, %v3769_v15 }
 0x361   : > { %6485 = vmatmul.msk.f32.gmra.mxu1 %vm702_vm2, %v10945_v3  ;;  %v3459_v49 = vpop.f32.mrf.mxu0 }
 0x362   : > { %v3638_v44 = vadd.f32 %v3456_v5, %v3343_v29  ;;  %6551 = vmatmul.msk.f32.gmra.mxu2 %vm702_vm2, %v7019_v40  ;;  %v3951_v5 = vld [vmem:[#allocation2] ss:$2 sm:$0xff] }
 0x363   : > { %6617 = vmatmul.msk.f32.gmra.mxu3 %vm702_vm2, %v10791_v60  ;;  %vm3965_vm5 = vcmp.gt.f32.partialorder %v3955_v27, %v3951_v5 }
 0x364   : > { %v3706_v24 = vadd.f32 %v9087_v4, %v3638_v44  ;;  %6683 = vmatmul.msk.f32.gmra.mxu0 %vm702_vm2, %v8399_v21  ;;  %v3967_v29 = vsel %vm3965_vm5, %v3955_v27, %v3951_v5 }
 0x365   : > { %v2868_v54 = vpop.f32.mrf.mxu2 }
 0x366   : > { %v3164_v63 = vpop.f32.mrf.mxu3  ;;  %v3048_v62 = vadd.f32 %v2868_v54, %v2758_v19  ;;  %v2581_v3 = vpop.f32.mrf.mxu1  ;;  %v3770_v46 = vmax.f32 %v3706_v24, 0.0 }
 0x367   : > { %v2759_v0 = vadd.f32 %v2581_v3, %v10953_v45 }
 0x368   : > { %v3344_v18 = vadd.f32 %v3164_v63, %v3048_v62  ;;  %3888 = vxpose.xlu1.b32.cont [2/4] (short) (narrow) %v3770_v46, 8  ;;  %3948 = vst.msk [vmem:[#allocation3 + $0x8] sm:$0xff] %vm3942_vm4, %v3770_v46  ;;  %v7021_v63 = vld [vmem:[%s7347_s8 + $0x140] sm:$0xff]  ;;  %v10954_v62 = vld [vmem:[#allocation17_spill] sm:$0xff] }
 0x369   : > { %6486 = vmatmul.msk.f32.gmra.mxu1 %vm702_vm2, %v8353_v39  ;;  %v3462_v60 = vpop.f32.mrf.mxu0 }
 0x36a   : > { %v3639_v33 = vadd.f32 %v3459_v49, %v3344_v18  ;;  %6552 = vmatmul.msk.f32.gmra.mxu2 %vm702_vm2, %v7020_v38  ;;  %v10955_v18 = vld [vmem:[#allocation34_spill] sm:$0xff] }
 0x36b   : > { %6618 = vmatmul.msk.f32.gmra.mxu3 %vm702_vm2, %v7854_v35  ;;  %v7188_v35 = vmov 0.0  }
 0x36c   : > { %v3707_v11 = vadd.f32 %v9087_v4, %v3639_v33  ;;  %6684 = vmatmul.msk.f32.gmra.mxu0 %vm702_vm2, %v8414_v6  ;;  %v3969_v44 = vsel %vm3965_vm5, 1.0, %v7188_v35 }
 0x36d   : > { %v2871_v58 = vpop.f32.mrf.mxu2 }
 0x36e   : > { %v3167_v13 = vpop.f32.mrf.mxu3  ;;  %v3049_v48 = vadd.f32 %v2871_v58, %v2759_v0  ;;  %v2584_v39 = vpop.f32.mrf.mxu1  ;;  %v3771_v52 = vmax.f32 %v3707_v11, 0.0  ;;  %v3953_v11 = vld [vmem:[#allocation2 + $0x10] ss:$2 sm:$0xff]  ;;  %v3957_v58 = vld [vmem:[#allocation2 + $0x11] ss:$2 sm:$0xff] }
 0x36f   : > { %v3958_v15 = vld [vmem:[#allocation3] ss:$2 sm:$0xff]  ;;  %v3962_v40 = vld [vmem:[#allocation3 + $0x1] ss:$2 sm:$0xff]  ;;  %v2760_v5 = vadd.f32 %v2584_v39, %v10955_v18  ;;  %vm3966_vm8 = vcmp.gt.f32.partialorder %v3957_v58, %v3953_v11 }
 0x370   : > { %v3345_v49 = vadd.f32 %v3167_v13, %v3049_v48  ;;  %3889 = vxpose.xlu1.b32.cont [3/4] (short) (narrow) %v3771_v52, 8  ;;  %3949 = vst.msk [vmem:[#allocation3 + $0x10] sm:$0xff] %vm3942_vm4, %v3771_v52  ;;  %vm3971_vm6 = vcmp.gt.f32.partialorder %v3958_v15, %v3967_v29  ;;  %v7022_v39 = vld [vmem:[%s7347_s8 + $0x148] sm:$0xff]  ;;  %v10956_v52 = vld [vmem:[#allocation20_spill] sm:$0xff] }
 0x371   : > { %6487 = vmatmul.msk.f32.gmra.mxu1 %vm702_vm2, %v8369_v22  ;;  %v3973_v56 = vsel %vm3971_vm6, %v3958_v15, %v3967_v29  ;;  %v3465_v19 = vpop.f32.mrf.mxu0  ;;  %v3975_v24 = vsel %vm3971_vm6, 32.0, %v3969_v44  ;;  %v10957_v15 = vld [vmem:[#allocation46_spill] sm:$0xff] }
 0x372   : > { %v3640_v54 = vadd.f32 %v3462_v60, %v3345_v49  ;;  %6553 = vmatmul.msk.f32.gmra.mxu2 %vm702_vm2, %v7021_v63  ;;  %vm3977_vm7 = vcmp.gt.f32.partialorder %v3962_v40, %v3973_v56 }
 0x373   : > { %6619 = vmatmul.msk.f32.gmra.mxu3 %vm702_vm2, %v10954_v62  ;;  %v3979_v3 = vsel %vm3977_vm7, %v3962_v40, %v3973_v56  ;;  %v9173_v46 = vsel %vm3977_vm7, 33.0, %v3975_v24  ;;  %v3970_v62 = vsel %vm3966_vm8, 1.0, %v7188_v35 }
 0x374   : > { %3987 = vxpose.xlu2.b32.start [1/2] (short) (narrow) %v3979_v3, 8  ;;  %v3708_v22 = vadd.f32 %v9087_v4, %v3640_v54  ;;  %6685 = vmatmul.msk.f32.gmra.mxu0 %vm702_vm2, %v8428_v36  ;;  %v3968_v54 = vsel %vm3966_vm8, %v3957_v58, %v3953_v11 }
 0x375   : > { %v2874_v27 = vpop.f32.mrf.mxu2 }
 0x376   : > { %v3170_v60 = vpop.f32.mrf.mxu3  ;;  %v3050_v33 = vadd.f32 %v2874_v27, %v2760_v5  ;;  %v2587_v38 = vpop.f32.mrf.mxu1  ;;  %v3772_v45 = vmax.f32 %v3708_v22, 0.0 }
 0x377   : > { %v2761_v29 = vadd.f32 %v2587_v38, %v10957_v15 }
 0x378   : > { %v3346_v0 = vadd.f32 %v3170_v60, %v3050_v33  ;;  %3890 = vxpose.xlu1.b32.end [4/4] (short) (narrow) %v3772_v45, 8  ;;  %3950 = vst.msk [vmem:[#allocation3 + $0x18] sm:$0xff] %vm3942_vm4, %v3772_v45  ;;  %v7023_v60 = vld [vmem:[%s7347_s8 + $0x150] sm:$0xff]  ;;  %v10958_v45 = vld [vmem:[#allocation56_spill] sm:$0xff] }
 0x379   : > { %6488 = vmatmul.msk.f32.gmra.mxu1 %vm702_vm2, %v8384_v17  ;;  %v3468_v13 = vpop.f32.mrf.mxu0 }
 0x37a   : > { %v3641_v48 = vadd.f32 %v3465_v19, %v3346_v0  ;;  %6554 = vmatmul.msk.f32.gmra.mxu2 %vm702_vm2, %v7022_v39 }
 0x37b   : > { %6620 = vmatmul.msk.f32.gmra.mxu3 %vm702_vm2, %v10956_v52 }
 0x37c   : > { %v3709_v49 = vadd.f32 %v9087_v4, %v3641_v48  ;;  %6686 = vmatmul.msk.f32.gmra.mxu0 %vm702_vm2, %v8441_v28 }
 0x37d   : > { %v2877_v44 = vpop.f32.mrf.mxu2 }
 0x37e   : > { %v3173_v40 = vpop.f32.mrf.mxu3  ;;  %v3051_v56 = vadd.f32 %v2877_v44, %v2761_v29  ;;  %v2590_v17 = vpop.f32.mrf.mxu1  ;;  %v3773_v19 = vmax.f32 %v3709_v49, 0.0  ;;  %v7024_v49 = vld [vmem:[%s7347_s8 + $0x158] sm:$0xff]  ;;  %v10960_v44 = vld [vmem:[#allocation26_spill] sm:$0xff] }
 0x37f   : > { %v3960_v24 = vld [vmem:[#allocation3 + $0x10] ss:$2 sm:$0xff]  ;;  %v3964_v3 = vld [vmem:[#allocation3 + $0x11] ss:$2 sm:$0xff]  ;;  %v2762_v0 = vadd.f32 %v2590_v17, %v10958_v45 }
 0x380   : > { %v3347_v63 = vadd.f32 %v3173_v40, %v3051_v56  ;;  %4092 = vxpose.xlu0.b32.start [1/4] (short) (narrow) %v3773_v19, 8  ;;  %4202 = vst.msk [vmem:[#allocation2] sm:$0xff] %vm3942_vm4, %v3773_v19  ;;  %vm3972_vm9 = vcmp.gt.f32.partialorder %v3960_v24, %v3968_v54  ;;  %v10961_v40 = vld [vmem:[#allocation57_spill] sm:$0xff] }
 0x381   : > { %6489 = vmatmul.msk.f32.gmra.mxu1 %vm702_vm2, %v8399_v21  ;;  %v3974_v18 = vsel %vm3972_vm9, %v3960_v24, %v3968_v54  ;;  %v3976_v5 = vsel %vm3972_vm9, 32.0, %v3970_v62  ;;  %v3471_v22 = vpop.f32.mrf.mxu0  ;;  %v10959_v21 = vld [vmem:[#allocation121_spill] sm:$0xff] }
 0x382   : > { %v3642_v27 = vadd.f32 %v3468_v13, %v3347_v63  ;;  %6555 = vmatmul.msk.f32.gmra.mxu2 %vm702_vm2, %v7023_v60  ;;  %vm3978_vm10 = vcmp.gt.f32.partialorder %v3964_v3, %v3974_v18 }
 0x383   : > { %6621 = vmatmul.msk.f32.gmra.mxu3 %vm702_vm2, %v10799_v41  ;;  %v3980_v33 = vsel %vm3978_vm10, %v3964_v3, %v3974_v18  ;;  %v9198_v38 = vsel %vm3978_vm10, 33.0, %v3976_v5  ;;  %v7025_v5 = vld [vmem:[%s7347_s8 + $0x168] sm:$0xff] }
 0x384   : > { %v3710_v11 = vadd.f32 %v9087_v4, %v3642_v27  ;;  %3988 = vxpose.xlu2.b32.end [2/2] (short) (narrow) %v3980_v33, 8  ;;  %6687 = vmatmul.msk.f32.gmra.mxu0 %vm702_vm2, %v10959_v21  ;;  %v10963_v27 = vld [vmem:[#allocation62_spill] sm:$0xff] }
 0x385   : > { %v2880_v58 = vpop.f32.mrf.mxu2 }
 0x386   : > { %v3176_v13 = vpop.f32.mrf.mxu3  ;;  %v3052_v48 = vadd.f32 %v2880_v58, %v2762_v0  ;;  %v2593_v39 = vpop.f32.mrf.mxu1  ;;  %v3774_v52 = vmax.f32 %v3710_v11, 0.0 }
 0x387   : > { %v2763_v56 = vadd.f32 %v2593_v39, %v10961_v40 }
 0x388   : > { %v3348_v15 = vadd.f32 %v3176_v13, %v3052_v48  ;;  %4093 = vxpose.xlu0.b32.cont [2/4] (short) (narrow) %v3774_v52, 8  ;;  %4203 = vst.msk [vmem:[#allocation2 + $0x8] sm:$0xff] %vm3942_vm4, %v3774_v52  ;;  %v7026_v52 = vld [vmem:[%s7347_s8 + $0x170] sm:$0xff] }
 0x389   : > { %6490 = vmatmul.msk.f32.gmra.mxu1 %vm702_vm2, %v8414_v6  ;;  %v3474_v41 = vpop.f32.mrf.mxu0 }
 0x38a   : > { %v3643_v29 = vadd.f32 %v3471_v22, %v3348_v15  ;;  %6556 = vmatmul.msk.f32.gmra.mxu2 %vm702_vm2, %v7024_v49  ;;  %v10962_v22 = vld [vmem:[#allocation28_spill] sm:$0xff]  ;;  %v10964_v15 = vld [vmem:[#allocation30_spill] sm:$0xff] }
 0x38b   : > { %6622 = vmatmul.msk.f32.gmra.mxu3 %vm702_vm2, %v10960_v44 }
 0x38c   : > { %v3711_v17 = vadd.f32 %v9087_v4, %v3643_v29  ;;  %6688 = vmatmul.msk.f32.gmra.mxu0 %vm702_vm2, %v8468_v26 }
 0x38d   : > { %v2883_v19 = vpop.f32.mrf.mxu2 }
 0x38e   : > { %v3179_v24 = vpop.f32.mrf.mxu3  ;;  %v3053_v54 = vadd.f32 %v2883_v19, %v2763_v56  ;;  %v2596_v6 = vpop.f32.mrf.mxu1  ;;  %v3775_v63 = vmax.f32 %v3711_v17, 0.0 }
 0x38f   : > { %v2764_v60 = vadd.f32 %v2596_v6, %v10963_v27  ;;  %v7027_v6 = vld [vmem:[%s7347_s8 + $0x178] sm:$0xff] }
 0x390   : > { %v3349_v62 = vadd.f32 %v3179_v24, %v3053_v54  ;;  %4094 = vxpose.xlu0.b32.cont [3/4] (short) (narrow) %v3775_v63, 8  ;;  %4204 = vst.msk [vmem:[#allocation2 + $0x10] sm:$0xff] %vm3942_vm4, %v3775_v63  ;;  %v10966_v63 = vld [vmem:[#allocation69_spill] sm:$0xff] }
 0x391   : > { %6491 = vmatmul.msk.f32.gmra.mxu1 %vm702_vm2, %v8428_v36  ;;  %v3477_v3 = vpop.f32.mrf.mxu0 }
 0x392   : > { %v3644_v18 = vadd.f32 %v3474_v41, %v3349_v62  ;;  %6557 = vmatmul.msk.f32.gmra.mxu2 %vm702_vm2, %v7025_v5  ;;  %v10965_v41 = vld [vmem:[#allocation51_spill] sm:$0xff] }
 0x393   : > { %6623 = vmatmul.msk.f32.gmra.mxu3 %vm702_vm2, %v10962_v22 }
 0x394   : > { %v3712_v33 = vadd.f32 %v9087_v4, %v3644_v18  ;;  %6689 = vmatmul.msk.f32.gmra.mxu0 %vm702_vm2, %v8481_v32  ;;  %v10967_v18 = vld [vmem:[#allocation125_spill] sm:$0xff] }
 0x395   : > { %v2886_v45 = vpop.f32.mrf.mxu2 }
 0x396   : > { %v3182_v0 = vpop.f32.mrf.mxu3  ;;  %v3054_v11 = vadd.f32 %v2886_v45, %v2764_v60  ;;  %v2599_v36 = vpop.f32.mrf.mxu1  ;;  %v3776_v58 = vmax.f32 %v3712_v33, 0.0  ;;  %v4210_v45 = vld [vmem:[#allocation2] ss:$2 sm:$0xff] }
 0x397   : > { %v2765_v29 = vadd.f32 %v2599_v36, %v10965_v41  ;;  %v7028_v36 = vld [vmem:[%s7347_s8 + $0x180] sm:$0xff] }
 0x398   : > { %v3350_v13 = vadd.f32 %v3182_v0, %v3054_v11  ;;  %4095 = vxpose.xlu0.b32.end [4/4] (short) (narrow) %v3776_v58, 8  ;;  %4205 = vst.msk [vmem:[#allocation2 + $0x18] sm:$0xff] %vm3942_vm4, %v3776_v58  ;;  %v4212_v0 = vld [vmem:[#allocation2 + $0x1] ss:$2 sm:$0xff]  ;;  %v10968_v58 = vld [vmem:[#allocation35_spill] sm:$0xff] }
 0x399   : > { %6492 = vmatmul.msk.f32.gmra.mxu1 %vm702_vm2, %v8441_v28  ;;  %v3480_v48 = vpop.f32.mrf.mxu0  ;;  %vm4218_vm11 = vcmp.gt.f32.partialorder %v4212_v0, %v4210_v45 }
 0x39a   : > { %v3645_v39 = vadd.f32 %v3477_v3, %v3350_v13  ;;  %6558 = vmatmul.msk.f32.gmra.mxu2 %vm702_vm2, %v7026_v52  ;;  %v10969_v13 = vld [vmem:[#allocation67_spill] sm:$0xff] }
 0x39b   : > { %6624 = vmatmul.msk.f32.gmra.mxu3 %vm702_vm2, %v10964_v15 }
 0x39c   : > { %v3713_v49 = vadd.f32 %v9087_v4, %v3645_v39  ;;  %6690 = vmatmul.msk.f32.gmra.mxu0 %vm702_vm2, %v8494_v14 }
 0x39d   : > { %v2889_v44 = vpop.f32.mrf.mxu2 }
 0x39e   : > { %v3185_v40 = vpop.f32.mrf.mxu3  ;;  %v3055_v56 = vadd.f32 %v2889_v44, %v2765_v29  ;;  %v2602_v28 = vpop.f32.mrf.mxu1  ;;  %v3777_v17 = vmax.f32 %v3713_v49, 0.0  ;;  %v4220_v44 = vsel %vm4218_vm11, %v4212_v0, %v4210_v45 }
 0x39f   : > { %v2766_v62 = vadd.f32 %v2602_v28, %v10966_v63  ;;  %v10970_v63 = vld [vmem:[#allocation39_spill] sm:$0xff] }
 0x3a0   : > { %v3351_v19 = vadd.f32 %v3185_v40, %v3055_v56  ;;  %4147 = vxpose.xlu1.b32.start [1/4] (short) (narrow) %v3777_v17, 8  ;;  %4206 = vst.msk [vmem:[#allocation3] sm:$0xff] %vm3942_vm4, %v3777_v17  ;;  %v4222_v56 = vsel %vm4218_vm11, 1.0, %v7188_v35 }
 0x3a1   : > { %6493 = vmatmul.msk.f32.gmra.mxu1 %vm702_vm2, %v10959_v21  ;;  %v3483_v24 = vpop.f32.mrf.mxu0 }
 0x3a2   : > { %v3646_v54 = vadd.f32 %v3480_v48, %v3351_v19  ;;  %6559 = vmatmul.msk.f32.gmra.mxu2 %vm702_vm2, %v7027_v6  ;;  %v7029_v6 = vld [vmem:[%s7347_s8 + $0x190] sm:$0xff] }
 0x3a3   : > { %6625 = vmatmul.msk.f32.gmra.mxu3 %vm702_vm2, %v10808_v8 }
 0x3a4   : > { %v3714_v3 = vadd.f32 %v9087_v4, %v3646_v54  ;;  %6691 = vmatmul.msk.f32.gmra.mxu0 %vm702_vm2, %v10967_v18 }
 0x3a5   : > { %v2892_v5 = vpop.f32.mrf.mxu2 }
 0x3a6   : > { %v3188_v22 = vpop.f32.mrf.mxu3  ;;  %v3056_v27 = vadd.f32 %v2892_v5, %v2766_v62  ;;  %v2605_v21 = vpop.f32.mrf.mxu1  ;;  %v3778_v60 = vmax.f32 %v3714_v3, 0.0  ;;  %v10971_v3 = vld [vmem:[#allocation23_spill] sm:$0xff] }
 0x3a7   : > { %v2767_v48 = vadd.f32 %v2605_v21, %v10969_v13  ;;  %v10972_v13 = vld [vmem:[#allocation44_spill] sm:$0xff] }
 0x3a8   : > { %v3352_v33 = vadd.f32 %v3188_v22, %v3056_v27  ;;  %4148 = vxpose.xlu1.b32.cont [2/4] (short) (narrow) %v3778_v60, 8  ;;  %4207 = vst.msk [vmem:[#allocation3 + $0x8] sm:$0xff] %vm3942_vm4, %v3778_v60 }
 0x3a9   : > { %6494 = vmatmul.msk.f32.gmra.mxu1 %vm702_vm2, %v8468_v26  ;;  %v3486_v8 = vpop.f32.mrf.mxu0 }
 0x3aa   : > { %v3647_v11 = vadd.f32 %v3483_v24, %v3352_v33  ;;  %6560 = vmatmul.msk.f32.gmra.mxu2 %vm702_vm2, %v7028_v36 }
 0x3ab   : > { %6626 = vmatmul.msk.f32.gmra.mxu3 %vm702_vm2, %v10968_v58  ;;  %v7030_v58 = vld [vmem:[%s7347_s8 + $0x198] sm:$0xff] }
 0x3ac   : > { %v3715_v39 = vadd.f32 %v9087_v4, %v3647_v11  ;;  %6692 = vmatmul.msk.f32.gmra.mxu0 %vm702_vm2, %v8521_v42  ;;  %v4213_v11 = vld [vmem:[#allocation2 + $0x11] ss:$2 sm:$0xff] }
 0x3ad   : > { %v2895_v52 = vpop.f32.mrf.mxu2 }
 0x3ae   : > { %v3191_v15 = vpop.f32.mrf.mxu3  ;;  %v3057_v41 = vadd.f32 %v2895_v52, %v2767_v48  ;;  %v2608_v26 = vpop.f32.mrf.mxu1  ;;  %v3779_v29 = vmax.f32 %v3715_v39, 0.0  ;;  %v10973_v48 = vld [vmem:[#allocation122_spill] sm:$0xff] }
 0x3af   : > { %v4214_v49 = vld [vmem:[#allocation3] ss:$2 sm:$0xff]  ;;  %v9261_v28 = vld [vmem:[#allocation3 + $0x1] ss:$2 sm:$0xff] }
 0x3b0   : > { %v3353_v40 = vadd.f32 %v3191_v15, %v3057_v41  ;;  %4149 = vxpose.xlu1.b32.cont [3/4] (short) (narrow) %v3779_v29, 8  ;;  %4208 = vst.msk [vmem:[#allocation3 + $0x10] sm:$0xff] %vm3942_vm4, %v3779_v29  ;;  %vm4224_vm12 = vcmp.gt.f32.partialorder %v4214_v49, %v4220_v44 }
 0x3b1   : > { %6495 = vmatmul.msk.f32.gmra.mxu1 %vm702_vm2, %v8481_v32  ;;  %v9265_v17 = vsel %vm4224_vm12, %v4214_v49, %v4220_v44  ;;  %v4228_v19 = vsel %vm4224_vm12, 32.0, %v4222_v56  ;;  %v3489_v24 = vpop.f32.mrf.mxu0  ;;  %v2768_v32 = vadd.f32 %v2608_v26, %v10971_v3 }
 0x3b2   : > { %v3648_v54 = vadd.f32 %v3486_v8, %v3353_v40  ;;  %6561 = vmatmul.msk.f32.gmra.mxu2 %vm702_vm2, %v7029_v6  ;;  %vm4230_vm13 = vcmp.gt.f32.partialorder %v9261_v28, %v9265_v17  ;;  %v4211_v8 = vld [vmem:[#allocation2 + $0x10] ss:$2 sm:$0xff] }
 0x3b3   : > { %6627 = vmatmul.msk.f32.gmra.mxu3 %vm702_vm2, %v10970_v63  ;;  %v4234_v62 = vsel %vm4230_vm13, 33.0, %v4228_v19  ;;  %vm4219_vm14 = vcmp.gt.f32.partialorder %v4213_v11, %v4211_v8 }
 0x3b4   : > { %v3716_v5 = vadd.f32 %v9087_v4, %v3648_v54  ;;  %v6920_v22 = vpack.i.bf16 %v4234_v62, %v9173_v46  ;;  %6693 = vmatmul.msk.f32.gmra.mxu0 %vm702_vm2, %v8534_v30  ;;  %v4221_v44 = vsel %vm4219_vm14, %v4213_v11, %v4211_v8  ;;  %v4223_v56 = vsel %vm4219_vm14, 1.0, %v7188_v35  ;;  %v7031_v62 = vld [vmem:[%s7347_s8 + $0x1a0] sm:$0xff]  ;;  %v7032_v11 = vld [vmem:[%s7347_s8 + $0x1a8] sm:$0xff] }
 0x3b5   : > { %v2898_v27 = vpop.f32.mrf.mxu2 }
 0x3b6   : > { %v3194_v21 = vpop.f32.mrf.mxu3  ;;  %v3058_v60 = vadd.f32 %v2898_v27, %v2768_v32  ;;  %6921 = vxpose.xlu2.b32.start [1/2] (short) (narrow) %v6920_v22, 8  ;;  %v2611_v33 = vpop.f32.mrf.mxu1  ;;  %v3780_v45 = vmax.f32 %v3716_v5, 0.0  ;;  %v10974_v32 = vld [vmem:[#allocation32_spill] sm:$0xff]  ;;  %v10975_v27 = vld [vmem:[#allocation129_spill] sm:$0xff] }
 0x3b7   : > { %v2769_v39 = vadd.f32 %v2611_v33, %v10973_v48 }
 0x3b8   : > { %v3354_v0 = vadd.f32 %v3194_v21, %v3058_v60  ;;  %4150 = vxpose.xlu1.b32.end [4/4] (short) (narrow) %v3780_v45, 8  ;;  %4209 = vst.msk [vmem:[#allocation3 + $0x18] sm:$0xff] %vm3942_vm4, %v3780_v45 }
 0x3b9   : > { %6496 = vmatmul.msk.f32.gmra.mxu1 %vm702_vm2, %v8494_v14  ;;  %v3492_v46 = vpop.f32.mrf.mxu0 }
 0x3ba   : > { %v3649_v36 = vadd.f32 %v3489_v24, %v3354_v0  ;;  %6562 = vmatmul.msk.f32.gmra.mxu2 %vm702_vm2, %v7030_v58 }
 0x3bb   : > { %6628 = vmatmul.msk.f32.gmra.mxu3 %vm702_vm2, %v10972_v13 }
 0x3bc   : > { %6694 = vmatmul.msk.f32.gmra.mxu0 %vm702_vm2, %v8547_v61  ;;  %v9292_v52 = vadd.f32 %v9087_v4, %v3649_v36  ;;  %v10977_v36 = vld [vmem:[#allocation123_spill] sm:$0xff] }
 0x3bd   : > { %v2901_v15 = vpop.f32.mrf.mxu2 }
 0x3be   : > { %v3197_v41 = vpop.f32.mrf.mxu3  ;;  %v3059_v14 = vadd.f32 %v2901_v15, %v2769_v39  ;;  %v2614_v26 = vpop.f32.mrf.mxu1  ;;  %v3781_v29 = vmax.f32 %v9292_v52, 0.0 }
 0x3bf   : > { %v4215_v49 = vld [vmem:[#allocation3 + $0x10] ss:$2 sm:$0xff]  ;;  %v4217_v19 = vld [vmem:[#allocation3 + $0x11] ss:$2 sm:$0xff]  ;;  %v2770_v5 = vadd.f32 %v2614_v26, %v10974_v32 }
 0x3c0   : > { %v3355_v40 = vadd.f32 %v3197_v41, %v3059_v14  ;;  %vm4225_vm15 = vcmp.gt.f32.partialorder %v4215_v49, %v4221_v44  ;;  %4455 = vst.msk [vmem:[#allocation2] sm:$0xff] %vm3942_vm4, %v3781_v29 }
 0x3c1   : > { %6497 = vmatmul.msk.f32.gmra.mxu1 %vm702_vm2, %v10967_v18  ;;  %v4227_v24 = vsel %vm4225_vm15, %v4215_v49, %v4221_v44  ;;  %v4229_v54 = vsel %vm4225_vm15, 32.0, %v4223_v56  ;;  %v3495_v6 = vpop.f32.mrf.mxu0 }
 0x3c2   : > { %v3650_v63 = vadd.f32 %v3492_v46, %v3355_v40  ;;  %6563 = vmatmul.msk.f32.gmra.mxu2 %vm702_vm2, %v7031_v62  ;;  %vm4231_vm0 = vcmp.gt.f32.partialorder %v4217_v19, %v4227_v24  ;;  %v10976_v46 = vld [vmem:[#allocation54_spill] sm:$0xff]  ;;  %v7033_v40 = vld [vmem:[%s7347_s8 + $0x1b8] sm:$0xff] }
 0x3c3   : > { %6629 = vmatmul.msk.f32.gmra.mxu3 %vm702_vm2, %v10817_v1  ;;  %v4235_v3 = vsel %vm4231_vm0, 33.0, %v4229_v54 }
 0x3c4   : > { %v9308_v22 = vadd.f32 %v9087_v4, %v3650_v63  ;;  %v6922_v18 = vpack.i.bf16 %v4235_v3, %v9198_v38  ;;  %6695 = vmatmul.msk.f32.gmra.mxu0 %vm702_vm2, %v10975_v27 }
 0x3c5   : > { %v2904_v21 = vpop.f32.mrf.mxu2 }
 0x3c6   : > { %v3200_v60 = vpop.f32.mrf.mxu3  ;;  %v3060_v33 = vadd.f32 %v2904_v21, %v2770_v5  ;;  %6923 = vxpose.xlu2.b32.end [2/2] (short) (narrow) %v6922_v18, 8  ;;  %v2617_v45 = vpop.f32.mrf.mxu1  ;;  %v3782_v1 = vmax.f32 %v9308_v22, 0.0  ;;  %v10984_v22 = vld [vmem:[#allocation127_spill] sm:$0xff] }
 0x3c7   : > { %v2771_v58 = vadd.f32 %v2617_v45, %v10977_v36 }
 0x3c8   : > { %v3356_v0 = vadd.f32 %v3200_v60, %v3060_v33  ;;  %4456 = vst.msk [vmem:[#allocation2 + $0x8] sm:$0xff] %vm3942_vm4, %v3782_v1  ;;  %v7034_v60 = vld [vmem:[%s7347_s8 + $0x1c0] sm:$0xff] }
 0x3c9   : > { %6498 = vmatmul.msk.f32.gmra.mxu1 %vm702_vm2, %v8521_v42  ;;  %v3498_v8 = vpop.f32.mrf.mxu0  ;;  %v4232_v42 = vsel %vm4230_vm13, %v9261_v28, %v9265_v17  ;;  %v10978_v28 = vld [vmem:[#allocation60_spill] sm:$0xff] }
 0x3ca   : > { %v3651_v38 = vadd.f32 %v3495_v6, %v3356_v0  ;;  %6564 = vmatmul.msk.f32.gmra.mxu2 %vm702_vm2, %v7032_v11  ;;  %v10979_v17 = vld [vmem:[#allocation124_spill] sm:$0xff] }
 0x3cb   : > { %6630 = vmatmul.msk.f32.gmra.mxu3 %vm702_vm2, %v10976_v46 }
 0x3cc   : > { %v9325_v13 = vadd.f32 %v9087_v4, %v3651_v38  ;;  %6696 = vmatmul.msk.f32.gmra.mxu0 %vm702_vm2, %v8574_v50 }
 0x3cd   : > { %v2907_v48 = vpop.f32.mrf.mxu2 }
 0x3ce   : > { %v3203_v39 = vpop.f32.mrf.mxu3  ;;  %v3061_v15 = vadd.f32 %v2907_v48, %v2771_v58  ;;  %4241 = vxpose.xlu2.b32.start [1/2] (short) (narrow) %v4232_v42, 8  ;;  %v2620_v41 = vpop.f32.mrf.mxu1  ;;  %v3783_v14 = vmax.f32 %v9325_v13, 0.0  ;;  %v7035_v48 = vld [vmem:[%s7347_s8 + $0x1c8] sm:$0xff] }
 0x3cf   : > { %v2772_v56 = vadd.f32 %v2620_v41, %v10979_v17  ;;  %v10982_v42 = vld [vmem:[#allocation49_spill] sm:$0xff]  ;;  %v7036_v17 = vld [vmem:[%s7347_s8 + $0x1d0] sm:$0xff] }
 0x3d0   : > { %v3357_v26 = vadd.f32 %v3203_v39, %v3061_v15  ;;  %4457 = vst.msk [vmem:[#allocation2 + $0x10] sm:$0xff] %vm3942_vm4, %v3783_v14 }
 0x3d1   : > { %6499 = vmatmul.msk.f32.gmra.mxu1 %vm702_vm2, %v8534_v30  ;;  %v3501_v49 = vpop.f32.mrf.mxu0  ;;  %v4233_v30 = vsel %vm4231_vm0, %v4217_v19, %v4227_v24  ;;  %v10980_v19 = vld [vmem:[#allocation65_spill] sm:$0xff]  ;;  %v10981_v24 = vld [vmem:[#allocation126_spill] sm:$0xff] }
 0x3d2   : > { %v3652_v44 = vadd.f32 %v3498_v8, %v3357_v26  ;;  %6565 = vmatmul.msk.f32.gmra.mxu2 %vm702_vm2, %v7033_v40  ;;  %v4465_v40 = vld [vmem:[#allocation2 + $0x1] ss:$2 sm:$0xff] }
 0x3d3   : > { %6631 = vmatmul.msk.f32.gmra.mxu3 %vm702_vm2, %v10978_v28 }
 0x3d4   : > { %v9346_v54 = vadd.f32 %v9087_v4, %v3652_v44  ;;  %6697 = vmatmul.msk.f32.gmra.mxu0 %vm702_vm2, %v8587_v2  ;;  %v4463_v44 = vld [vmem:[#allocation2] ss:$2 sm:$0xff] }
 0x3d5   : > { %v2910_v6 = vpop.f32.mrf.mxu2  ;;  %vm4471_vm5 = vcmp.gt.f32.partialorder %v4465_v40, %v4463_v44 }
 0x3d6   : > { %v3206_v63 = vpop.f32.mrf.mxu3  ;;  %v3062_v62 = vadd.f32 %v2910_v6, %v2772_v56  ;;  %4242 = vxpose.xlu2.b32.end [2/2] (short) (narrow) %v4233_v30, 8  ;;  %v2623_v3 = vpop.f32.mrf.mxu1  ;;  %v3784_v32 = vmax.f32 %v9346_v54, 0.0  ;;  %v10983_v56 = vld [vmem:[#allocation73_spill] sm:$0xff]  ;;  %v10988_v54 = vld [vmem:[#allocation130_spill] sm:$0xff] }
 0x3d7   : > { %v2773_v33 = vadd.f32 %v2623_v3, %v10981_v24 }
 0x3d8   : > { %v3358_v5 = vadd.f32 %v3206_v63, %v3062_v62  ;;  %4458 = vst.msk [vmem:[#allocation2 + $0x18] sm:$0xff] %vm3942_vm4, %v3784_v32 }
 0x3d9   : > { %6500 = vmatmul.msk.f32.gmra.mxu1 %vm702_vm2, %v8547_v61  ;;  %v3504_v18 = vpop.f32.mrf.mxu0 }
 0x3da   : > { %v3653_v21 = vadd.f32 %v3501_v49, %v3358_v5  ;;  %6566 = vmatmul.msk.f32.gmra.mxu2 %vm702_vm2, %v7034_v60  ;;  %v4475_v60 = vsel %vm4471_vm5, 1.0, %v7188_v35 }
 0x3db   : > { %6632 = vmatmul.msk.f32.gmra.mxu3 %vm702_vm2, %v10980_v19 }
 0x3dc   : > { %v3721_v45 = vadd.f32 %v9087_v4, %v3653_v21  ;;  %6698 = vmatmul.msk.f32.gmra.mxu0 %vm702_vm2, %v8600_v7 }
 0x3dd   : > { %v2913_v0 = vpop.f32.mrf.mxu2 }
 0x3de   : > { %v3209_v8 = vpop.f32.mrf.mxu3  ;;  %v3063_v38 = vadd.f32 %v2913_v0, %v2773_v33  ;;  %4345 = vxpose.xlu2.b32.start [1/4] (short) (narrow) %v3781_v29, 8  ;;  %v2626_v61 = vpop.f32.mrf.mxu1  ;;  %v3785_v11 = vmax.f32 %v3721_v45, 0.0  ;;  %v7037_v45 = vld [vmem:[%s7347_s8 + $0x1e0] sm:$0xff]  ;;  %v10985_v0 = vld [vmem:[#allocation18_spill] sm:$0xff] }
 0x3df   : > { %v2774_v52 = vadd.f32 %v2626_v61, %v10982_v42  ;;  %v10986_v61 = vld [vmem:[#allocation128_spill] sm:$0xff] }
 0x3e0   : > { %v3359_v46 = vadd.f32 %v3209_v8, %v3063_v38  ;;  %4400 = vxpose.xlu0.b32.start [1/4] (short) (narrow) %v3785_v11, 8  ;;  %4459 = vst.msk [vmem:[#allocation3] sm:$0xff] %vm3942_vm4, %v3785_v11 }
 0x3e1   : > { %6501 = vmatmul.msk.f32.gmra.mxu1 %vm702_vm2, %v10975_v27  ;;  %v3507_v36 = vpop.f32.mrf.mxu0 }
 0x3e2   : > { %v3654_v58 = vadd.f32 %v3504_v18, %v3359_v46  ;;  %6567 = vmatmul.msk.f32.gmra.mxu2 %vm702_vm2, %v7035_v48  ;;  %v4473_v18 = vsel %vm4471_vm5, %v4465_v40, %v4463_v44 }
 0x3e3   : > { %6633 = vmatmul.msk.f32.gmra.mxu3 %vm702_vm2, %v10826_v20 }
 0x3e4   : > { %v3722_v29 = vadd.f32 %v9087_v4, %v3654_v58  ;;  %6699 = vmatmul.msk.f32.gmra.mxu0 %vm702_vm2, %v8613_v59 }
 0x3e5   : > { %v2916_v39 = vpop.f32.mrf.mxu2 }
 0x3e6   : > { %v3212_v15 = vpop.f32.mrf.mxu3  ;;  %v3064_v41 = vadd.f32 %v2916_v39, %v2774_v52  ;;  %4346 = vxpose.xlu2.b32.cont [2/4] (short) (narrow) %v3782_v1, 8  ;;  %v2629_v27 = vpop.f32.mrf.mxu1  ;;  %v3786_v26 = vmax.f32 %v3722_v29, 0.0  ;;  %v4464_v39 = vld [vmem:[#allocation2 + $0x10] ss:$2 sm:$0xff] }
 0x3e7   : > { %v2775_v1 = vadd.f32 %v2629_v27, %v10984_v22  ;;  %v7038_v27 = vld [vmem:[%s7347_s8 + $0x1e8] sm:$0xff] }
 0x3e8   : > { %v3360_v49 = vadd.f32 %v3212_v15, %v3064_v41  ;;  %4401 = vxpose.xlu0.b32.cont [2/4] (short) (narrow) %v3786_v26, 8  ;;  %4460 = vst.msk [vmem:[#allocation3 + $0x8] sm:$0xff] %vm3942_vm4, %v3786_v26  ;;  %v4466_v15 = vld [vmem:[#allocation2 + $0x11] ss:$2 sm:$0xff]  ;;  %v10987_v26 = vld [vmem:[#allocation21_spill] sm:$0xff] }
 0x3e9   : > { %6502 = vmatmul.msk.f32.gmra.mxu1 %vm702_vm2, %v8574_v50  ;;  %v3510_v20 = vpop.f32.mrf.mxu0  ;;  %vm4472_vm8 = vcmp.gt.f32.partialorder %v4466_v15, %v4464_v39 }
 0x3ea   : > { %v3655_v28 = vadd.f32 %v3507_v36, %v3360_v49  ;;  %6568 = vmatmul.msk.f32.gmra.mxu2 %vm702_vm2, %v7036_v17  ;;  %v4474_v22 = vsel %vm4472_vm8, %v4466_v15, %v4464_v39 }
 0x3eb   : > { %6634 = vmatmul.msk.f32.gmra.mxu3 %vm702_vm2, %v10983_v56 }
 0x3ec   : > { %v3723_v6 = vadd.f32 %v9087_v4, %v3655_v28  ;;  %6700 = vmatmul.msk.f32.gmra.mxu0 %vm702_vm2, %v8627_v16 }
 0x3ed   : > { %v2919_v30 = vpop.f32.mrf.mxu2 }
 0x3ee   : > { %v3215_v50 = vpop.f32.mrf.mxu3  ;;  %v3065_v63 = vadd.f32 %v2919_v30, %v2775_v1  ;;  %4347 = vxpose.xlu2.b32.cont [3/4] (short) (narrow) %v3783_v14, 8  ;;  %v2632_v62 = vpop.f32.mrf.mxu1  ;;  %v3787_v3 = vmax.f32 %v3723_v6, 0.0  ;;  %v4476_v6 = vsel %vm4472_vm8, 1.0, %v7188_v35 }
 0x3ef   : > { %v4467_v5 = vld [vmem:[#allocation3] ss:$2 sm:$0xff]  ;;  %v4469_v19 = vld [vmem:[#allocation3 + $0x1] ss:$2 sm:$0xff]  ;;  %v2776_v11 = vadd.f32 %v2632_v62, %v10986_v61 }
 0x3f0   : > { %v3361_v21 = vadd.f32 %v3215_v50, %v3065_v63  ;;  %4402 = vxpose.xlu0.b32.cont [3/4] (short) (narrow) %v3787_v3, 8  ;;  %4461 = vst.msk [vmem:[#allocation3 + $0x10] sm:$0xff] %vm3942_vm4, %v3787_v3  ;;  %vm4477_vm6 = vcmp.gt.f32.partialorder %v4467_v5, %v4473_v18 }
 0x3f1   : > { %6503 = vmatmul.msk.f32.gmra.mxu1 %vm702_vm2, %v8587_v2  ;;  %v4479_v24 = vsel %vm4477_vm6, %v4467_v5, %v4473_v18  ;;  %v3513_v33 = vpop.f32.mrf.mxu0  ;;  %v4481_v13 = vsel %vm4477_vm6, 32.0, %v4475_v60  ;;  %v7039_v5 = vld [vmem:[%s7347_s8 + $0x1f0] sm:$0xff]  ;;  %v10990_v18 = vld [vmem:[#allocation24_spill] sm:$0xff] }
 0x3f2   : > { %v3656_v14 = vadd.f32 %v3510_v20, %v3361_v21  ;;  %6569 = vmatmul.msk.f32.gmra.mxu2 %vm702_vm2, %v7037_v45  ;;  %vm4483_vm7 = vcmp.gt.f32.partialorder %v4469_v19, %v4479_v24  ;;  %v10989_v20 = vld [vmem:[#allocation136_spill] sm:$0xff] }
 0x3f3   : > { %6635 = vmatmul.msk.f32.gmra.mxu3 %vm702_vm2, %v10985_v0  ;;  %v4485_v8 = vsel %vm4483_vm7, %v4469_v19, %v4479_v24  ;;  %v9401_v38 = vsel %vm4483_vm7, 33.0, %v4481_v13  ;;  %v10991_v19 = vld [vmem:[#allocation70_spill] sm:$0xff] }
 0x3f4   : > { %v3724_v46 = vadd.f32 %v9087_v4, %v3656_v14  ;;  %4493 = vxpose.xlu1.b32.start [1/2] (short) (narrow) %v4485_v8, 8  ;;  %6701 = vmatmul.msk.f32.gmra.mxu0 %vm702_vm2, %v8640_v34 }
 0x3f5   : > { %v2922_v2 = vpop.f32.mrf.mxu2 }
 0x3f6   : > { %v3218_v36 = vpop.f32.mrf.mxu3  ;;  %v3066_v58 = vadd.f32 %v2922_v2, %v2776_v11  ;;  %4348 = vxpose.xlu2.b32.end [4/4] (short) (narrow) %v3784_v32, 8  ;;  %v2635_v48 = vpop.f32.mrf.mxu1  ;;  %v3788_v42 = vmax.f32 %v3724_v46, 0.0  ;;  %v7040_v2 = vld [vmem:[%s7347_s8 + $0x1f8] sm:$0xff] }
 0x3f7   : > { %v2777_v32 = vadd.f32 %v2635_v48, %v10988_v54  ;;  %v9445_v48 = vld [vmem:[%s10942_s3] ss:$0 sm:$0xff] }
 0x3f8   : > { %v3362_v52 = vadd.f32 %v3218_v36, %v3066_v58  ;;  %4403 = vxpose.xlu0.b32.end [4/4] (short) (narrow) %v3788_v42, 8  ;;  %4462 = vst.msk [vmem:[#allocation3 + $0x18] sm:$0xff] %vm3942_vm4, %v3788_v42  ;;  %v10994_v36 = vld [vmem:[#allocation131_spill] sm:$0xff] }
 0x3f9   : > { %6504 = vmatmul.msk.f32.gmra.mxu1 %vm702_vm2, %v8600_v7  ;;  %v3516_v29 = vpop.f32.mrf.mxu0 }
 0x3fa   : > { %v3657_v41 = vadd.f32 %v3513_v33, %v3362_v52  ;;  %6570 = vmatmul.msk.f32.gmra.mxu2 %vm702_vm2, %v7038_v27  ;;  %v10992_v33 = vld [vmem:[#allocation138_spill] sm:$0xff]  ;;  %v10995_v52 = vld [vmem:[#allocation140_spill] sm:$0xff] }
 0x3fb   : > { %6636 = vmatmul.msk.f32.gmra.mxu3 %vm702_vm2, %v10987_v26 }
 0x3fc   : > { %v3725_v49 = vadd.f32 %v9087_v4, %v3657_v41  ;;  %6702 = vmatmul.msk.f32.gmra.mxu0 %vm702_vm2, %v10989_v20 }
 0x3fd   : > { %v2925_v44 = vpop.f32.mrf.mxu2 }
 0x3fe   : > { %v3221_v7 = vpop.f32.mrf.mxu3  ;;  %v3067_v40 = vadd.f32 %v2925_v44, %v2777_v32  ;;  %v2638_v28 = vpop.f32.mrf.mxu1  ;;  %v3789_v17 = vmax.f32 %v3725_v49, 0.0  ;;  %v7042_v32 = vld [vmem:[%s7347_s8 + $0x208] sm:$0xff]  ;;  %v10997_v44 = vld [vmem:[#allocation132_spill] sm:$0xff] }
 0x3ff   : > { %v4468_v56 = vld [vmem:[#allocation3 + $0x10] ss:$2 sm:$0xff]  ;;  %v4470_v30 = vld [vmem:[#allocation3 + $0x11] ss:$2 sm:$0xff]  ;;  %v2778_v24 = vadd.f32 %v2638_v28, %v10991_v19  ;;  %v10996_v49 = vld [vmem:[#allocation29_spill] sm:$0xff] }
 0x400   : > { %v3363_v1 = vadd.f32 %v3221_v7, %v3067_v40  ;;  %4707 = vst.msk [vmem:[#allocation2] sm:$0xff] %vm3942_vm4, %v3789_v17  ;;  %4597 = vxpose.xlu2.b32.start [1/4] (short) (narrow) %v3789_v17, 8  ;;  %vm4478_vm9 = vcmp.gt.f32.partialorder %v4468_v56, %v4474_v22  ;;  %v10998_v28 = vld [vmem:[#allocation79_spill] sm:$0xff] }
 0x401   : > { %6505 = vmatmul.msk.f32.gmra.mxu1 %vm702_vm2, %v8613_v59  ;;  %v4480_v50 = vsel %vm4478_vm9, %v4468_v56, %v4474_v22  ;;  %v3519_v63 = vpop.f32.mrf.mxu0  ;;  %v4482_v62 = vsel %vm4478_vm9, 32.0, %v4476_v6 }
 0x402   : > { %v3658_v3 = vadd.f32 %v3516_v29, %v3363_v1  ;;  %6571 = vmatmul.msk.f32.gmra.mxu2 %vm702_vm2, %v7039_v5  ;;  %vm4484_vm10 = vcmp.gt.f32.partialorder %v4470_v30, %v4480_v50 }
 0x403   : > { %6637 = vmatmul.msk.f32.gmra.mxu3 %vm702_vm2, %v10990_v18  ;;  %v4486_v21 = vsel %vm4484_vm10, %v4470_v30, %v4480_v50  ;;  %v9428_v60 = vsel %vm4484_vm10, 33.0, %v4482_v62  ;;  %v10999_v62 = vld [vmem:[#allocation31_spill] sm:$0xff] }
 0x404   : > { %v3726_v59 = vadd.f32 %v9087_v4, %v3658_v3  ;;  %4494 = vxpose.xlu1.b32.end [2/2] (short) (narrow) %v4486_v21, 8  ;;  %6703 = vmatmul.msk.f32.gmra.mxu0 %vm702_vm2, %v10992_v33  ;;  %v10993_v4 = vld [vmem:[#allocation27_spill] sm:$0xff]  ;;  %v11000_v3 = vld [vmem:[#allocation133_spill] sm:$0xff]  ;;  %v11001_v21 = vld [vmem:[#allocation82_spill] sm:$0xff] }
 0x405   : > { %v2928_v13 = vpop.f32.mrf.mxu2 }
 0x406   : > { %v3224_v14 = vpop.f32.mrf.mxu3  ;;  %v3068_v45 = vadd.f32 %v2928_v13, %v2778_v24  ;;  %v2641_v0 = vpop.f32.mrf.mxu1  ;;  %v3790_v8 = vmax.f32 %v3726_v59, 0.0 }
 0x407   : > { %v2779_v58 = vadd.f32 %v2641_v0, %v10994_v36 }
 0x408   : > { %v3364_v61 = vadd.f32 %v3224_v14, %v3068_v45  ;;  %4708 = vst.msk [vmem:[#allocation2 + $0x8] sm:$0xff] %vm3942_vm4, %v3790_v8  ;;  %4598 = vxpose.xlu2.b32.cont [2/4] (short) (narrow) %v3790_v8, 8  ;;  %v7044_v8 = vld [vmem:[%s7347_s8 + $0x218] sm:$0xff] }
 0x409   : > { %6506 = vmatmul.msk.f32.gmra.mxu1 %vm702_vm2, %v8627_v16  ;;  %v3522_v11 = vpop.f32.mrf.mxu0 }
 0x40a   : > { %v3659_v46 = vadd.f32 %v3519_v63, %v3364_v61  ;;  %6572 = vmatmul.msk.f32.gmra.mxu2 %vm702_vm2, %v7040_v2  ;;  %v7043_v63 = vld [vmem:[%s7347_s8 + $0x210] sm:$0xff]  ;;  %v11002_v61 = vld [vmem:[#allocation33_spill] sm:$0xff] }
 0x40b   : > { %6638 = vmatmul.msk.f32.gmra.mxu3 %vm702_vm2, %v10993_v4  ;;  %v11004_v4 = vld [vmem:[#allocation85_spill] sm:$0xff] }
 0x40c   : > { %v3727_v42 = vadd.f32 %v9445_v48, %v3659_v46  ;;  %6704 = vmatmul.msk.f32.gmra.mxu0 %vm702_vm2, %v10995_v52 }
 0x40d   : > { %v2931_v16 = vpop.f32.mrf.mxu2 }
 0x40e   : > { %v3227_v29 = vpop.f32.mrf.mxu3  ;;  %v3069_v39 = vadd.f32 %v2931_v16, %v2779_v58  ;;  %v2644_v15 = vpop.f32.mrf.mxu1  ;;  %v3791_v41 = vmax.f32 %v3727_v42, 0.0 }
 0x40f   : > { %v2780_v7 = vadd.f32 %v2644_v15, %v10997_v44  ;;  %v4715_v15 = vld [vmem:[#allocation2] ss:$2 sm:$0xff] }
 0x410   : > { %v3365_v27 = vadd.f32 %v3227_v29, %v3069_v39  ;;  %4709 = vst.msk [vmem:[#allocation2 + $0x10] sm:$0xff] %vm3942_vm4, %v3791_v41  ;;  %4599 = vxpose.xlu2.b32.cont [3/4] (short) (narrow) %v3791_v41, 8  ;;  %v4717_v41 = vld [vmem:[#allocation2 + $0x1] ss:$2 sm:$0xff] }
 0x411   : > { %6507 = vmatmul.msk.f32.gmra.mxu1 %vm702_vm2, %v8640_v34  ;;  %v3525_v26 = vpop.f32.mrf.mxu0  ;;  %vm4723_vm11 = vcmp.gt.f32.partialorder %v4717_v41, %v4715_v15 }
 0x412   : > { %v3660_v54 = vadd.f32 %v3522_v11, %v3365_v27  ;;  %6573 = vmatmul.msk.f32.gmra.mxu2 %vm702_vm2, %v7042_v32  ;;  %v11003_v11 = vld [vmem:[#allocation134_spill] sm:$0xff]  ;;  %v11006_v32 = vld [vmem:[#allocation135_spill] sm:$0xff] }
 0x413   : > { %6639 = vmatmul.msk.f32.gmra.mxu3 %vm702_vm2, %v10996_v49 }
 0x414   : > { %v3728_v40 = vadd.f32 %v9445_v48, %v3660_v54  ;;  %6705 = vmatmul.msk.f32.gmra.mxu0 %vm702_vm2, %v10998_v28  ;;  %v11005_v54 = vld [vmem:[#allocation36_spill] sm:$0xff] }
 0x415   : > { %v2934_v17 = vpop.f32.mrf.mxu2 }
 0x416   : > { %v3230_v56 = vpop.f32.mrf.mxu3  ;;  %v3070_v22 = vadd.f32 %v2934_v17, %v2780_v7  ;;  %v2647_v34 = vpop.f32.mrf.mxu1  ;;  %v3792_v1 = vmax.f32 %v3728_v40, 0.0  ;;  %v11007_v7 = vld [vmem:[#allocation88_spill] sm:$0xff] }
 0x417   : > { %v2781_v5 = vadd.f32 %v2647_v34, %v11000_v3 }
 0x418   : > { %v3366_v6 = vadd.f32 %v3230_v56, %v3070_v22  ;;  %4710 = vst.msk [vmem:[#allocation2 + $0x18] sm:$0xff] %vm3942_vm4, %v3792_v1  ;;  %4600 = vxpose.xlu2.b32.end [4/4] (short) (narrow) %v3792_v1, 8  ;;  %v4725_v1 = vsel %vm4723_vm11, %v4717_v41, %v4715_v15 }
 0x419   : > { %6508 = vmatmul.msk.f32.gmra.mxu1 %vm702_vm2, %v10989_v20  ;;  %v3528_v30 = vpop.f32.mrf.mxu0 }
 0x41a   : > { %v3661_v50 = vadd.f32 %v3525_v26, %v3366_v6  ;;  %6574 = vmatmul.msk.f32.gmra.mxu2 %vm702_vm2, %v7043_v63  ;;  %v7045_v26 = vld [vmem:[%s7347_s8 + $0x220] sm:$0xff] }
 0x41b   : > { %6640 = vmatmul.msk.f32.gmra.mxu3 %vm702_vm2, %v10999_v62 }
 0x41c   : > { %v3729_v18 = vadd.f32 %v9445_v48, %v3661_v50  ;;  %6706 = vmatmul.msk.f32.gmra.mxu0 %vm702_vm2, %v11001_v21 }
 0x41d   : > { %v2937_v19 = vpop.f32.mrf.mxu2 }
 0x41e   : > { %v3233_v24 = vpop.f32.mrf.mxu3  ;;  %v3071_v59 = vadd.f32 %v2937_v19, %v2781_v5  ;;  %v2650_v20 = vpop.f32.mrf.mxu1  ;;  %v3793_v13 = vmax.f32 %v3729_v18, 0.0  ;;  %v7046_v18 = vld [vmem:[%s7347_s8 + $0x230] sm:$0xff]  ;;  %v11008_v19 = vld [vmem:[#allocation40_spill] sm:$0xff] }
 0x41f   : > { %v2782_v46 = vadd.f32 %v2650_v20, %v11003_v11 }
 0x420   : > { %v3367_v14 = vadd.f32 %v3233_v24, %v3071_v59  ;;  %4652 = vxpose.xlu0.b32.start [1/4] (short) (narrow) %v3793_v13, 8  ;;  %4711 = vst.msk [vmem:[#allocation3] sm:$0xff] %vm3942_vm4, %v3793_v13  ;;  %v11009_v24 = vld [vmem:[#allocation137_spill] sm:$0xff] }
 0x421   : > { %6509 = vmatmul.msk.f32.gmra.mxu1 %vm702_vm2, %v10992_v33  ;;  %v3531_v45 = vpop.f32.mrf.mxu0 }
 0x422   : > { %v3662_v0 = vadd.f32 %v3528_v30, %v3367_v14  ;;  %6575 = vmatmul.msk.f32.gmra.mxu2 %vm702_vm2, %v7044_v8  ;;  %v4727_v30 = vsel %vm4723_vm11, 1.0, %v7188_v35  ;;  %v11010_v14 = vld [vmem:[#allocation91_spill] sm:$0xff] }
 0x423   : > { %6641 = vmatmul.msk.f32.gmra.mxu3 %vm702_vm2, %v11002_v61 }
 0x424   : > { %v3730_v2 = vadd.f32 %v9445_v48, %v3662_v0  ;;  %6707 = vmatmul.msk.f32.gmra.mxu0 %vm702_vm2, %v11004_v4 }
 0x425   : > { %v2940_v36 = vpop.f32.mrf.mxu2 }
 0x426   : > { %v3236_v58 = vpop.f32.mrf.mxu3  ;;  %v3072_v42 = vadd.f32 %v2940_v36, %v2782_v46  ;;  %v2653_v33 = vpop.f32.mrf.mxu1  ;;  %v3794_v16 = vmax.f32 %v3730_v2, 0.0  ;;  %v4716_v36 = vld [vmem:[#allocation2 + $0x10] ss:$2 sm:$0xff] }
 0x427   : > { %v2783_v49 = vadd.f32 %v2653_v33, %v11006_v32  ;;  %v11011_v33 = vld [vmem:[#allocation45_spill] sm:$0xff] }
 0x428   : > { %v3368_v29 = vadd.f32 %v3236_v58, %v3072_v42  ;;  %4653 = vxpose.xlu0.b32.cont [2/4] (short) (narrow) %v3794_v16, 8  ;;  %4712 = vst.msk [vmem:[#allocation3 + $0x8] sm:$0xff] %vm3942_vm4, %v3794_v16  ;;  %v7047_v42 = vld [vmem:[%s7347_s8 + $0x238] sm:$0xff] }
 0x429   : > { %6510 = vmatmul.msk.f32.gmra.mxu1 %vm702_vm2, %v10995_v52  ;;  %v3534_v39 = vpop.f32.mrf.mxu0  ;;  %v11012_v16 = vld [vmem:[#allocation139_spill] sm:$0xff] }
 0x42a   : > { %v3663_v27 = vadd.f32 %v3531_v45, %v3368_v29  ;;  %6576 = vmatmul.msk.f32.gmra.mxu2 %vm702_vm2, %v7045_v26 }
 0x42b   : > { %6642 = vmatmul.msk.f32.gmra.mxu3 %vm702_vm2, %v11005_v54 }
 0x42c   : > { %v3731_v44 = vadd.f32 %v9445_v48, %v3663_v27  ;;  %6708 = vmatmul.msk.f32.gmra.mxu0 %vm702_vm2, %v11007_v7 }
 0x42d   : > { %v2943_v40 = vpop.f32.mrf.mxu2 }
 0x42e   : > { %v3239_v52 = vpop.f32.mrf.mxu3  ;;  %v3073_v17 = vadd.f32 %v2943_v40, %v2783_v49  ;;  %v2656_v56 = vpop.f32.mrf.mxu1  ;;  %v3795_v22 = vmax.f32 %v3731_v44, 0.0 }
 0x42f   : > { %v4719_v34 = vld [vmem:[#allocation3] ss:$2 sm:$0xff]  ;;  %v9498_v50 = vld [vmem:[#allocation3 + $0x1] ss:$2 sm:$0xff]  ;;  %v2784_v59 = vadd.f32 %v2656_v56, %v11009_v24 }
 0x430   : > { %v3369_v6 = vadd.f32 %v3239_v52, %v3073_v17  ;;  %4654 = vxpose.xlu0.b32.cont [3/4] (short) (narrow) %v3795_v22, 8  ;;  %4713 = vst.msk [vmem:[#allocation3 + $0x10] sm:$0xff] %vm3942_vm4, %v3795_v22  ;;  %vm4729_vm12 = vcmp.gt.f32.partialorder %v4719_v34, %v4725_v1 }
 0x431   : > { %6511 = vmatmul.msk.f32.gmra.mxu1 %vm702_vm2, %v10998_v28  ;;  %v9500_v63 = vsel %vm4729_vm12, %v4719_v34, %v4725_v1  ;;  %v4733_v62 = vsel %vm4729_vm12, 32.0, %v4727_v30  ;;  %v3537_v3 = vpop.f32.mrf.mxu0  ;;  %v7048_v1 = vld [vmem:[%s7347_s8 + $0x240] sm:$0xff] }
 0x432   : > { %v3664_v5 = vadd.f32 %v3534_v39, %v3369_v6  ;;  %6577 = vmatmul.msk.f32.gmra.mxu2 %vm702_vm2, %v7046_v18  ;;  %vm4735_vm13 = vcmp.gt.f32.partialorder %v9498_v50, %v9500_v63  ;;  %v11013_v39 = vld [vmem:[#allocation94_spill] sm:$0xff]  ;;  %v11016_v18 = vld [vmem:[#allocation97_spill] sm:$0xff] }
 0x433   : > { %6643 = vmatmul.msk.f32.gmra.mxu3 %vm702_vm2, %v11008_v19  ;;  %v4739_v28 = vsel %vm4735_vm13, 33.0, %v4733_v62  ;;  %v11014_v6 = vld [vmem:[#allocation50_spill] sm:$0xff]  ;;  %v11015_v62 = vld [vmem:[#allocation141_spill] sm:$0xff] }
 0x434   : > { %v3732_v20 = vadd.f32 %v9445_v48, %v3664_v5  ;;  %v6929_v13 = vpack.i.bf16 %v4739_v28, %v9401_v38  ;;  %6709 = vmatmul.msk.f32.gmra.mxu0 %vm702_vm2, %v11010_v14  ;;  %v4718_v38 = vld [vmem:[#allocation2 + $0x11] ss:$2 sm:$0xff] }
 0x435   : > { %v2946_v45 = vpop.f32.mrf.mxu2  ;;  %vm4724_vm14 = vcmp.gt.f32.partialorder %v4718_v38, %v4716_v36 }
 0x436   : > { %v3242_v0 = vpop.f32.mrf.mxu3  ;;  %v3074_v8 = vadd.f32 %v2946_v45, %v2784_v59  ;;  %6930 = vxpose.xlu1.b32.start [1/2] (short) (narrow) %v6929_v13, 8  ;;  %v2659_v61 = vpop.f32.mrf.mxu1  ;;  %v3796_v11 = vmax.f32 %v3732_v20, 0.0  ;;  %v4726_v49 = vsel %vm4724_vm14, %v4718_v38, %v4716_v36  ;;  %v4728_v40 = vsel %vm4724_vm14, 1.0, %v7188_v35 }
 0x437   : > { %v2785_v29 = vadd.f32 %v2659_v61, %v11012_v16  ;;  %v11018_v61 = vld [vmem:[#allocation142_spill] sm:$0xff] }
 0x438   : > { %v3370_v46 = vadd.f32 %v3242_v0, %v3074_v8  ;;  %4655 = vxpose.xlu0.b32.end [4/4] (short) (narrow) %v3796_v11, 8  ;;  %4714 = vst.msk [vmem:[#allocation3 + $0x18] sm:$0xff] %vm3942_vm4, %v3796_v11  ;;  %v7049_v0 = vld [vmem:[%s7347_s8 + $0x248] sm:$0xff]  ;;  %v11017_v8 = vld [vmem:[#allocation55_spill] sm:$0xff] }
 0x439   : > { %6512 = vmatmul.msk.f32.gmra.mxu1 %vm702_vm2, %v11001_v21  ;;  %v3540_v2 = vpop.f32.mrf.mxu0 }
 0x43a   : > { %v3665_v58 = vadd.f32 %v3537_v3, %v3370_v46  ;;  %6578 = vmatmul.msk.f32.gmra.mxu2 %vm702_vm2, %v7047_v42 }
 0x43b   : > { %6644 = vmatmul.msk.f32.gmra.mxu3 %vm702_vm2, %v11011_v33 }
 0x43c   : > { %6710 = vmatmul.msk.f32.gmra.mxu0 %vm702_vm2, %v11013_v39  ;;  %v9527_v15 = vadd.f32 %v9445_v48, %v3665_v58 }
 0x43d   : > { %v2949_v21 = vpop.f32.mrf.mxu2 }
 0x43e   : > { %v3245_v41 = vpop.f32.mrf.mxu3  ;;  %v3075_v27 = vadd.f32 %v2949_v21, %v2785_v29  ;;  %v2662_v26 = vpop.f32.mrf.mxu1  ;;  %v3797_v54 = vmax.f32 %v9527_v15, 0.0 }
 0x43f   : > { %v4720_v32 = vld [vmem:[#allocation3 + $0x10] ss:$2 sm:$0xff]  ;;  %v4722_v52 = vld [vmem:[#allocation3 + $0x11] ss:$2 sm:$0xff]  ;;  %v2786_v3 = vadd.f32 %v2662_v26, %v11015_v62 }
 0x440   : > { %v3371_v44 = vadd.f32 %v3245_v41, %v3075_v27  ;;  %vm4730_vm15 = vcmp.gt.f32.partialorder %v4720_v32, %v4726_v49  ;;  %4959 = vst.msk [vmem:[#allocation2] sm:$0xff] %vm3942_vm4, %v3797_v54  ;;  %v7050_v41 = vld [vmem:[%s7347_s8 + $0x258] sm:$0xff] }
 0x441   : > { %6513 = vmatmul.msk.f32.gmra.mxu1 %vm702_vm2, %v11004_v4  ;;  %v4732_v17 = vsel %vm4730_vm15, %v4720_v32, %v4726_v49  ;;  %v4734_v56 = vsel %vm4730_vm15, 32.0, %v4728_v40  ;;  %v3543_v22 = vpop.f32.mrf.mxu0  ;;  %v11022_v32 = vld [vmem:[#allocation103_spill] sm:$0xff] }
 0x442   : > { %v3666_v34 = vadd.f32 %v3540_v2, %v3371_v44  ;;  %6579 = vmatmul.msk.f32.gmra.mxu2 %vm702_vm2, %v7048_v1  ;;  %vm4736_vm0 = vcmp.gt.f32.partialorder %v4722_v52, %v4732_v17  ;;  %v11019_v2 = vld [vmem:[#allocation100_spill] sm:$0xff] }
 0x443   : > { %6645 = vmatmul.msk.f32.gmra.mxu3 %vm702_vm2, %v11014_v6  ;;  %v4740_v30 = vsel %vm4736_vm0, 33.0, %v4734_v56 }
 0x444   : > { %v9543_v5 = vadd.f32 %v9445_v48, %v3666_v34  ;;  %v6931_v4 = vpack.i.bf16 %v4740_v30, %v9428_v60  ;;  %6711 = vmatmul.msk.f32.gmra.mxu0 %vm702_vm2, %v11016_v18  ;;  %v7051_v30 = vld [vmem:[%s7347_s8 + $0x260] sm:$0xff] }
 0x445   : > { %v2952_v19 = vpop.f32.mrf.mxu2 }
 0x446   : > { %v3248_v28 = vpop.f32.mrf.mxu3  ;;  %v3076_v24 = vadd.f32 %v2952_v19, %v2786_v3  ;;  %6932 = vxpose.xlu1.b32.end [2/2] (short) (narrow) %v6931_v4, 8  ;;  %v2665_v59 = vpop.f32.mrf.mxu1  ;;  %v3798_v20 = vmax.f32 %v9543_v5, 0.0  ;;  %v11025_v4 = vld [vmem:[#allocation106_spill] sm:$0xff] }
 0x447   : > { %v2787_v11 = vadd.f32 %v2665_v59, %v11018_v61  ;;  %v11027_v61 = vld [vmem:[#allocation145_spill] sm:$0xff]  ;;  %v11028_v5 = vld [vmem:[#allocation74_spill] sm:$0xff] }
 0x448   : > { %v3372_v13 = vadd.f32 %v3248_v28, %v3076_v24  ;;  %4960 = vst.msk [vmem:[#allocation2 + $0x8] sm:$0xff] %vm3942_vm4, %v3798_v20 }
 0x449   : > { %6514 = vmatmul.msk.f32.gmra.mxu1 %vm702_vm2, %v11007_v7  ;;  %v3546_v45 = vpop.f32.mrf.mxu0  ;;  %v4737_v7 = vsel %vm4735_vm13, %v9498_v50, %v9500_v63  ;;  %v11020_v50 = vld [vmem:[#allocation61_spill] sm:$0xff]  ;;  %v11021_v63 = vld [vmem:[#allocation143_spill] sm:$0xff] }
 0x44a   : > { %v3667_v60 = vadd.f32 %v3543_v22, %v3372_v13  ;;  %6580 = vmatmul.msk.f32.gmra.mxu2 %vm702_vm2, %v7049_v0  ;;  %v7052_v0 = vld [vmem:[%s7347_s8 + $0x268] sm:$0xff] }
 0x44b   : > { %6646 = vmatmul.msk.f32.gmra.mxu3 %vm702_vm2, %v11017_v8  ;;  %v11026_v8 = vld [vmem:[#allocation71_spill] sm:$0xff] }
 0x44c   : > { %v9560_v46 = vadd.f32 %v9445_v48, %v3667_v60  ;;  %6712 = vmatmul.msk.f32.gmra.mxu0 %vm702_vm2, %v11019_v2 }
 0x44d   : > { %v2955_v36 = vpop.f32.mrf.mxu2 }
 0x44e   : > { %v3251_v38 = vpop.f32.mrf.mxu3  ;;  %v3077_v58 = vadd.f32 %v2955_v36, %v2787_v11  ;;  %4745 = vxpose.xlu1.b32.start [1/2] (short) (narrow) %v4737_v7, 8  ;;  %v2668_v42 = vpop.f32.mrf.mxu1  ;;  %v3799_v33 = vmax.f32 %v9560_v46, 0.0 }
 0x44f   : > { %v2788_v27 = vadd.f32 %v2668_v42, %v11021_v63 }
 0x450   : > { %v3373_v16 = vadd.f32 %v3251_v38, %v3077_v58  ;;  %4961 = vst.msk [vmem:[#allocation2 + $0x10] sm:$0xff] %vm3942_vm4, %v3799_v33 }
 0x451   : > { %6515 = vmatmul.msk.f32.gmra.mxu1 %vm702_vm2, %v11010_v14  ;;  %v3549_v29 = vpop.f32.mrf.mxu0  ;;  %v4738_v14 = vsel %vm4736_vm0, %v4722_v52, %v4732_v17  ;;  %v11023_v52 = vld [vmem:[#allocation66_spill] sm:$0xff]  ;;  %v11024_v17 = vld [vmem:[#allocation144_spill] sm:$0xff] }
 0x452   : > { %v3668_v21 = vadd.f32 %v3546_v45, %v3373_v16  ;;  %6581 = vmatmul.msk.f32.gmra.mxu2 %vm702_vm2, %v7050_v41  ;;  %v4967_v16 = vld [vmem:[#allocation2] ss:$2 sm:$0xff]  ;;  %v7053_v41 = vld [vmem:[%s7347_s8 + $0x270] sm:$0xff]  ;;  %s9773_s8 = sand.u32 1, %s7162_s22  }
 0x453   : > { %6647 = vmatmul.msk.f32.gmra.mxu3 %vm702_vm2, %v11020_v50  ;;  %s6125_s30 = sshll.u32 %s9773_s8, 6  ;;  %s6124_s20 = sshll.u32 %s9773_s8, 7 }
 0x454   : > { %v9581_v26 = vadd.f32 %v9445_v48, %v3668_v21  ;;  %6713 = vmatmul.msk.f32.gmra.mxu0 %vm702_vm2, %v11022_v32  ;;  %s9836_s17 = scalar_lea.vmem [#allocation6], %s6125_s30  ;;  %s9864_s9 = scalar_lea.vmem [#allocation4], %s6124_s20 }
 0x455   : > { %v2958_v49 = vpop.f32.mrf.mxu2  ;;  %s9890_s12 = scalar_lea.vmem [#allocation8], %s6125_s30  ;;  %s6760_s30 = sadd.s32 256, %s9842_s13 }
 0x456   : > { %v3254_v44 = vpop.f32.mrf.mxu3  ;;  %v3078_v40 = vadd.f32 %v2958_v49, %v2788_v27  ;;  %4746 = vxpose.xlu1.b32.end [2/2] (short) (narrow) %v4738_v14, 8  ;;  %v2671_v56 = vpop.f32.mrf.mxu1  ;;  %v3800_v22 = vmax.f32 %v9581_v26, 0.0  ;;  %v7054_v27 = vld [vmem:[%s8809_s19] sm:$0xff]  ;;  %v7055_v49 = vld [vmem:[%s8809_s19 + $0x8] sm:$0xff]  ;;  %s6762_s20 = sadd.s32 320, %s9842_s13 }
 0x457   : > { %v2789_v62 = vadd.f32 %v2671_v56, %v11024_v17  ;;  %v2522_v14 = vrot.slane %v7055_v49, 2  ;;  %v11032_v26 = vld [vmem:[#allocation152_spill] sm:$0xff] }
 0x458   : > { %v3374_v34 = vadd.f32 %v3254_v44, %v3078_v40  ;;  %4962 = vst.msk [vmem:[#allocation2 + $0x18] sm:$0xff] %vm3942_vm4, %v3800_v22 }
 0x459   : > { %6516 = vmatmul.msk.f32.gmra.mxu1 %vm702_vm2, %v11013_v39  ;;  %v3552_v1 = vpop.f32.mrf.mxu0 }
 0x45a   : > { %v3669_v6 = vadd.f32 %v3549_v29, %v3374_v34  ;;  %6582 = vmatmul.msk.f32.gmra.mxu2 %vm702_vm2, %v7051_v30  ;;  %v4969_v29 = vld [vmem:[#allocation2 + $0x1] ss:$2 sm:$0xff] }
 0x45b   : > { %6648 = vmatmul.msk.f32.gmra.mxu3 %vm702_vm2, %v11023_v52  ;;  %vm4975_vm5 = vcmp.gt.f32.partialorder %v4969_v29, %v4967_v16 }
 0x45c   : > { %v3737_v3 = vadd.f32 %v9445_v48, %v3669_v6  ;;  %6714 = vmatmul.msk.f32.gmra.mxu0 %vm702_vm2, %v11025_v4  ;;  %v4977_v30 = vsel %vm4975_vm5, %v4969_v29, %v4967_v16 }
 0x45d   : > { %v2961_v19 = vpop.f32.mrf.mxu2 }
 0x45e   : > { %v3257_v28 = vpop.f32.mrf.mxu3  ;;  %v3079_v24 = vadd.f32 %v2961_v19, %v2789_v62  ;;  %4849 = vxpose.xlu1.b32.start [1/4] (short) (narrow) %v3797_v54, 8  ;;  %v2674_v39 = vpop.f32.mrf.mxu1  ;;  %v3801_v59 = vmax.f32 %v3737_v3, 0.0 }
 0x45f   : > { %v2790_v15 = vadd.f32 %v2674_v39, %v11027_v61 }
 0x460   : > { %v3375_v13 = vadd.f32 %v3257_v28, %v3079_v24  ;;  %4904 = vxpose.xlu2.b32.start [1/4] (short) (narrow) %v3801_v59, 8  ;;  %4963 = vst.msk [vmem:[#allocation3] sm:$0xff] %vm3942_vm4, %v3801_v59  ;;  %v11030_v28 = vld [vmem:[#allocation150_spill] sm:$0xff]  ;;  %v11031_v59 = vld [vmem:[#allocation147_spill] sm:$0xff] }
 0x461   : > { %6517 = vmatmul.msk.f32.gmra.mxu1 %vm702_vm2, %v11016_v18  ;;  %v3555_v45 = vpop.f32.mrf.mxu0 }
 0x462   : > { %v3670_v60 = vadd.f32 %v3552_v1, %v3375_v13  ;;  %6583 = vmatmul.msk.f32.gmra.mxu2 %vm702_vm2, %v7052_v0 }
 0x463   : > { %6649 = vmatmul.msk.f32.gmra.mxu3 %vm702_vm2, %v11026_v8 }
 0x464   : > { %v3738_v54 = vadd.f32 %v9445_v48, %v3670_v60  ;;  %6715 = vmatmul.msk.f32.gmra.mxu0 %vm702_vm2, %v8864_v55  ;;  %v7056_v60 = vld [vmem:[%s8809_s19 + $0x10] sm:$0xff] }
 0x465   : > { %v2964_v11 = vpop.f32.mrf.mxu2  ;;  %v2524_v0 = vrot.slane %v7056_v60, 2 }
 0x466   : > { %v3260_v36 = vpop.f32.mrf.mxu3  ;;  %v3080_v7 = vadd.f32 %v2964_v11, %v2790_v15  ;;  %4850 = vxpose.xlu1.b32.cont [2/4] (short) (narrow) %v3798_v20, 8  ;;  %v2677_v18 = vpop.f32.mrf.mxu1  ;;  %v3802_v38 = vmax.f32 %v3738_v54, 0.0  ;;  %v11029_v20 = vld [vmem:[#allocation146_spill] sm:$0xff] }
 0x467   : > { %v2791_v50 = vadd.f32 %v2677_v18, %v11029_v20  ;;  %v9655_v18 = vsel %vm1384_vm3, %v2522_v14, %v2524_v0 }
 0x468   : > { %v3376_v58 = vadd.f32 %v3260_v36, %v3080_v7  ;;  %4905 = vxpose.xlu2.b32.cont [2/4] (short) (narrow) %v3802_v38, 8  ;;  %4964 = vst.msk [vmem:[#allocation3 + $0x8] sm:$0xff] %vm3942_vm4, %v3802_v38  ;;  %v4968_v38 = vld [vmem:[#allocation2 + $0x10] ss:$2 sm:$0xff] }
 0x469   : > { %6518 = vmatmul.msk.f32.gmra.mxu1 %vm702_vm2, %v11019_v2  ;;  %v3558_v42 = vpop.f32.mrf.mxu0  ;;  %v2521_v2 = vrot.slane %v7054_v27, 2 }
 0x46a   : > { %v3671_v21 = vadd.f32 %v3555_v45, %v3376_v58  ;;  %6584 = vmatmul.msk.f32.gmra.mxu2 %vm702_vm2, %v7053_v41  ;;  %v4970_v58 = vld [vmem:[#allocation2 + $0x11] ss:$2 sm:$0xff] }
 0x46b   : > { %6650 = vmatmul.msk.f32.gmra.mxu3 %vm702_vm2, %v11028_v5  ;;  %v9635_v46 = vsel %vm1384_vm3, %v2521_v2, %v2522_v14  ;;  %vm4976_vm8 = vcmp.gt.f32.partialorder %v4970_v58, %v4968_v38 }
 0x46c   : > { %v3739_v63 = vadd.f32 %v9445_v48, %v3671_v21  ;;  %6716 = vmatmul.msk.f32.gmra.mxu0 %vm702_vm2, %v8882_v12  ;;  %v4978_v2 = vsel %vm4976_vm8, %v4970_v58, %v4968_v38  ;;  %v4980_v14 = vsel %vm4976_vm8, 1.0, %v7188_v35 }
 0x46d   : > { %v2967_v44 = vpop.f32.mrf.mxu2 }
 0x46e   : > { %v3263_v40 = vpop.f32.mrf.mxu3  ;;  %v3081_v56 = vadd.f32 %v2967_v44, %v2791_v50  ;;  %4851 = vxpose.xlu1.b32.cont [3/4] (short) (narrow) %v3799_v33, 8  ;;  %v2680_v34 = vpop.f32.mrf.mxu1  ;;  %v3803_v1 = vmax.f32 %v3739_v63, 0.0  ;;  %v4979_v33 = vsel %vm4975_vm5, 1.0, %v7188_v35 }
 0x46f   : > { %v4971_v6 = vld [vmem:[#allocation3] ss:$2 sm:$0xff]  ;;  %v4973_v17 = vld [vmem:[#allocation3 + $0x1] ss:$2 sm:$0xff]  ;;  %v2792_v13 = vadd.f32 %v2680_v34, %v11031_v59 }
 0x470   : > { %v3377_v52 = vadd.f32 %v3263_v40, %v3081_v56  ;;  %4906 = vxpose.xlu2.b32.cont [3/4] (short) (narrow) %v3803_v1, 8  ;;  %4965 = vst.msk [vmem:[#allocation3 + $0x10] sm:$0xff] %vm3942_vm4, %v3803_v1  ;;  %vm4981_vm6 = vcmp.gt.f32.partialorder %v4971_v6, %v4977_v30 }
 0x471   : > { %6519 = vmatmul.msk.f32.gmra.mxu1 %vm702_vm2, %v11022_v32  ;;  %v4983_v62 = vsel %vm4981_vm6, %v4971_v6, %v4977_v30  ;;  %v3561_v3 = vpop.f32.mrf.mxu0  ;;  %v4985_v24 = vsel %vm4981_vm6, 32.0, %v4979_v33 }
 0x472   : > { %v3672_v19 = vadd.f32 %v3558_v42, %v3377_v52  ;;  %6585 = vmatmul.msk.f32.gmra.mxu2 %vm702_vm2, %v7054_v27  ;;  %vm4987_vm7 = vcmp.gt.f32.partialorder %v4973_v17, %v4983_v62 }
 0x473   : > { %6651 = vmatmul.msk.f32.gmra.mxu3 %vm702_vm2, %v11030_v28  ;;  %v4989_v39 = vsel %vm4987_vm7, %v4973_v17, %v4983_v62  ;;  %v9642_v32 = vsel %vm4987_vm7, 33.0, %v4985_v24 }
 0x474   : > { %v3740_v45 = vadd.f32 %v9445_v48, %v3672_v19  ;;  %4997 = vxpose.xlu0.b32.start [1/2] (short) (narrow) %v4989_v39, 8  ;;  %6717 = vmatmul.msk.f32.gmra.mxu0 %vm702_vm2, %v9635_v46  ;;  %v7058_v19 = vld [vmem:[%s8809_s19 + $0x20] sm:$0x3] }
 0x475   : > { %v2970_v8 = vpop.f32.mrf.mxu2  ;;  %v2528_v28 = vrot.slane %v7058_v19, 2 }
 0x476   : > { %v3266_v61 = vpop.f32.mrf.mxu3  ;;  %v3082_v15 = vadd.f32 %v2970_v8, %v2792_v13  ;;  %4852 = vxpose.xlu1.b32.end [4/4] (short) (narrow) %v3800_v22, 8  ;;  %v2683_v54 = vpop.f32.mrf.mxu1  ;;  %v3804_v11 = vmax.f32 %v3740_v45, 0.0  ;;  %v11033_v22 = vld [vmem:[#allocation148_spill] sm:$0xff]  ;;  %v469_v13 = vld [vmem:[%s8809_s19 + $0x28] sm:$0xff]  ;;  %v470_v45 = vld [vmem:[%s8809_s19 + $0x30] sm:$0xff] }
 0x477   : > { %v2793_v16 = vadd.f32 %v2683_v54, %v11033_v22  ;;  %v11035_v54 = vld [vmem:[#allocation151_spill] sm:$0xff]  ;;  %v3402_v38 = vrot.slane %v469_v13, 2  ;;  %v3403_v58 = vrot.slane %v470_v45, 2 }
 0x478   : > { %v3378_v36 = vadd.f32 %v3266_v61, %v3082_v15  ;;  %4907 = vxpose.xlu2.b32.end [4/4] (short) (narrow) %v3804_v11, 8  ;;  %4966 = vst.msk [vmem:[#allocation3 + $0x18] sm:$0xff] %vm3942_vm4, %v3804_v11  ;;  %v3107_v61 = vrot.slane %v469_v13, 1  ;;  %v3108_v15 = vrot.slane %v470_v45, 1 }
 0x479   : > { %6520 = vmatmul.msk.f32.gmra.mxu1 %vm702_vm2, %v11025_v4  ;;  %v3564_v7 = vpop.f32.mrf.mxu0  ;;  %v7057_v4 = vld [vmem:[%s8809_s19 + $0x18] sm:$0xff] }
 0x47a   : > { %v3673_v42 = vadd.f32 %v3561_v3, %v3378_v36  ;;  %6586 = vmatmul.msk.f32.gmra.mxu2 %vm702_vm2, %v7055_v49  ;;  %v2526_v21 = vrot.slane %v7057_v4, 2 }
 0x47b   : > { %6652 = vmatmul.msk.f32.gmra.mxu3 %vm702_vm2, %v11032_v26 }
 0x47c   : > { %v3741_v29 = vadd.f32 %v9445_v48, %v3673_v42  ;;  %6718 = vmatmul.msk.f32.gmra.mxu0 %vm702_vm2, %v9655_v18  ;;  %v9670_v34 = vsel %vm1384_vm3, %v2524_v0, %v2526_v21  ;;  %v9688_v0 = vsel %vm1384_vm3, %v2526_v21, %v2528_v28  ;;  %v3404_v21 = vsel %vm1384_vm3, %v3402_v38, %v3403_v58 }
 0x47d   : > { %v2973_v41 = vpop.f32.mrf.mxu2 }
 0x47e   : > { %v3269_v5 = vpop.f32.mrf.mxu3  ;;  %v3083_v20 = vadd.f32 %v2973_v41, %v2793_v16  ;;  %v2686_v50 = vpop.f32.mrf.mxu1  ;;  %v3805_v63 = vmax.f32 %v3741_v29, 0.0  ;;  %v3109_v16 = vsel %vm555_vm1, %v3107_v61, %v3108_v15  ;;  %v471_v29 = vld [vmem:[%s8809_s19 + $0x38] sm:$0xff] }
 0x47f   : > { %v4972_v27 = vld [vmem:[#allocation3 + $0x10] ss:$2 sm:$0xff]  ;;  %v4974_v44 = vld [vmem:[#allocation3 + $0x11] ss:$2 sm:$0xff] }
 0x480   : > { %v3379_v49 = vadd.f32 %v3269_v5, %v3083_v20  ;;  %5101 = vxpose.xlu1.b32.start [1/4] (short) (narrow) %v3805_v63, 8  ;;  %5211 = vst.msk [vmem:[#allocation2] sm:$0xff] %vm3942_vm4, %v3805_v63  ;;  %vm4982_vm9 = vcmp.gt.f32.partialorder %v4972_v27, %v4978_v2  ;;  %v3110_v5 = vrot.slane %v471_v29, 1  ;;  %v11036_v20 = vld [vmem:[#allocation153_spill] sm:$0xff] }
 0x481   : > { %6521 = vmatmul.msk.f32.gmra.mxu1 %vm702_vm2, %v8864_v55  ;;  %v4984_v40 = vsel %vm4982_vm9, %v4972_v27, %v4978_v2  ;;  %v3567_v56 = vpop.f32.mrf.mxu0  ;;  %v4986_v1 = vsel %vm4982_vm9, 32.0, %v4980_v14  ;;  %v11034_v55 = vld [vmem:[#allocation149_spill] sm:$0xff] }
 0x482   : > { %v3674_v6 = vadd.f32 %v3564_v7, %v3379_v49  ;;  %6587 = vmatmul.msk.f32.gmra.mxu2 %vm702_vm2, %v7056_v60  ;;  %vm4988_vm10 = vcmp.gt.f32.partialorder %v4974_v44, %v4984_v40  ;;  %v2794_v17 = vadd.f32 %v2686_v50, %v11034_v55  ;;  %v3405_v49 = vrot.slane %v471_v29, 2 }
 0x483   : > { %6653 = vmatmul.msk.f32.gmra.mxu3 %vm702_vm2, %v8869_v43  ;;  %v4990_v30 = vsel %vm4988_vm10, %v4974_v44, %v4984_v40  ;;  %v9675_v52 = vsel %vm4988_vm10, 33.0, %v4986_v1  ;;  %v3111_v40 = vsel %vm555_vm1, %v3108_v15, %v3110_v5  ;;  %v472_v1 = vld [vmem:[%s8809_s19 + $0x40] sm:$0xff] }
 0x484   : > { %v3742_v62 = vadd.f32 %v9445_v48, %v3674_v6  ;;  %4998 = vxpose.xlu0.b32.end [2/2] (short) (narrow) %v4990_v30, 8  ;;  %6719 = vmatmul.msk.f32.gmra.mxu0 %vm702_vm2, %v9670_v34  ;;  %v3406_v30 = vsel %vm1384_vm3, %v3403_v58, %v3405_v49 }
 0x485   : > { %v2976_v3 = vpop.f32.mrf.mxu2 }
 0x486   : > { %v3272_v33 = vpop.f32.mrf.mxu3  ;;  %v3806_v24 = vmax.f32 %v3742_v62, 0.0  ;;  %v3084_v43 = vadd.f32 %v2976_v3, %v2794_v17  ;;  %v2689_v39 = vpop.f32.mrf.mxu1  ;;  %v3112_v17 = vrot.slane %v472_v1, 1  ;;  %v11037_v62 = vld [vmem:[#allocation109_spill] sm:$0xff] }
 0x487   : > { %v2795_v11 = vadd.f32 %v2689_v39, %v11035_v54  ;;  %v11038_v54 = vld [vmem:[#allocation112_spill] sm:$0xff] }
 0x488   : > { %5212 = vst.msk [vmem:[#allocation2 + $0x8] sm:$0xff] %vm3942_vm4, %v3806_v24  ;;  %v3380_v59 = vadd.f32 %v3272_v33, %v3084_v43  ;;  %5102 = vxpose.xlu1.b32.cont [2/4] (short) (narrow) %v3806_v24, 8  ;;  %v3407_v24 = vrot.slane %v472_v1, 2 }
 0x489   : > { %6522 = vmatmul.msk.f32.gmra.mxu1 %vm702_vm2, %v8882_v12  ;;  %v3570_v60 = vpop.f32.mrf.mxu0 }
 0x48a   : > { %v3675_v8 = vadd.f32 %v3567_v56, %v3380_v59  ;;  %6588 = vmatmul.msk.f32.gmra.mxu2 %vm702_vm2, %v7057_v4  ;;  %v3113_v59 = vsel %vm555_vm1, %v3110_v5, %v3112_v17 }
 0x48b   : > { %6654 = vmatmul.msk.f32.gmra.mxu3 %vm702_vm2, %v8887_v31 }
 0x48c   : > { %v3743_v36 = vadd.f32 %v9445_v48, %v3675_v8  ;;  %6720 = vmatmul.msk.f32.gmra.mxu0 %vm702_vm2, %v9688_v0  ;;  %v3408_v8 = vsel %vm1384_vm3, %v3405_v49, %v3407_v24 }
 0x48d   : > { %v2979_v12 = vpop.f32.mrf.mxu2 }
 0x48e   : > { %v3275_v7 = vpop.f32.mrf.mxu3  ;;  %v3807_v42 = vmax.f32 %v3743_v36, 0.0  ;;  %v3085_v26 = vadd.f32 %v2979_v12, %v2795_v11  ;;  %v2692_v22 = vpop.f32.mrf.mxu1 }
 0x48f   : > { %v2796_v50 = vadd.f32 %v2692_v22, %v11036_v20 }
 0x490   : > { %5213 = vst.msk [vmem:[#allocation2 + $0x10] sm:$0xff] %vm3942_vm4, %v3807_v42  ;;  %v3381_v31 = vadd.f32 %v3275_v7, %v3085_v26  ;;  %5103 = vxpose.xlu1.b32.cont [3/4] (short) (narrow) %v3807_v42, 8 }
 0x491   : > { %6523 = vmatmul.msk.f32.gmra.mxu1 %vm702_vm2, %v9635_v46  ;;  %v3573_v4 = vpop.f32.mrf.mxu0 }
 0x492   : > { %v3676_v41 = vadd.f32 %v3570_v60, %v3381_v31  ;;  %6589 = vmatmul.msk.f32.gmra.mxu2 %vm702_vm2, %v469_v13 }
 0x493   : > { %6655 = vmatmul.msk.f32.gmra.mxu3 %vm702_vm2, %v3109_v16 }
 0x494   : > { %v3744_v63 = vadd.f32 %v9445_v48, %v3676_v41  ;;  %6721 = vmatmul.msk.f32.gmra.mxu0 %vm702_vm2, %v3404_v21  ;;  %v11039_v41 = vld [vmem:[#allocation115_spill] sm:$0xff] }
 0x495   : > { %v2982_v27 = vpop.f32.mrf.mxu2 }
 0x496   : > { %v3278_v2 = vpop.f32.mrf.mxu3  ;;  %v3808_v46 = vmax.f32 %v3744_v63, 0.0  ;;  %v3086_v14 = vadd.f32 %v2982_v27, %v2796_v50  ;;  %v2695_v44 = vpop.f32.mrf.mxu1 }
 0x497   : > { %v2797_v3 = vadd.f32 %v2695_v44, %v11037_v62 }
 0x498   : > { %5214 = vst.msk [vmem:[#allocation2 + $0x18] sm:$0xff] %vm3942_vm4, %v3808_v46  ;;  %v3382_v56 = vadd.f32 %v3278_v2, %v3086_v14  ;;  %5104 = vxpose.xlu1.b32.end [4/4] (short) (narrow) %v3808_v46, 8 }
 0x499   : > { %6524 = vmatmul.msk.f32.gmra.mxu1 %vm702_vm2, %v9655_v18  ;;  %v3576_v6 = vpop.f32.mrf.mxu0 }
 0x49a   : > { %v3677_v55 = vadd.f32 %v3573_v4, %v3382_v56  ;;  %6590 = vmatmul.msk.f32.gmra.mxu2 %vm702_vm2, %v470_v45  ;;  %v473_v45 = vld [vmem:[%s8809_s19 + $0x48] sm:$0x3]  ;;  %s6754_s19 = sadd.s32 64, %s9842_s13 }
 0x49b   : > { %6656 = vmatmul.msk.f32.gmra.mxu3 %vm702_vm2, %v3111_v40  ;;  %v3114_v15 = vrot.slane %v473_v45, 1  ;;  %v3409_v38 = vrot.slane %v473_v45, 2  ;;  %v5221_v4 = vld [vmem:[#allocation2 + $0x1] ss:$2 sm:$0xff] }
 0x49c   : > { %v3745_v33 = vadd.f32 %v9445_v48, %v3677_v55  ;;  %6722 = vmatmul.msk.f32.gmra.mxu0 %vm702_vm2, %v3406_v30 }
 0x49d   : > { %v2985_v19 = vpop.f32.mrf.mxu2  ;;  %v3115_v26 = vsel %vm555_vm1, %v3112_v17, %v3114_v15  ;;  %v3410_v31 = vsel %vm1384_vm3, %v3407_v24, %v3409_v38  ;;  %v11040_v17 = vld [vmem:[#allocation81_spill] sm:$0xff] }
 0x49e   : > { %v3281_v28 = vpop.f32.mrf.mxu3  ;;  %v3087_v18 = vadd.f32 %v2985_v19, %v2797_v3  ;;  %v2698_v43 = vpop.f32.mrf.mxu1  ;;  %v3809_v39 = vmax.f32 %v3745_v33, 0.0 }
 0x49f   : > { %v2798_v11 = vadd.f32 %v2698_v43, %v11038_v54  ;;  %v5222_v45 = vld [vmem:[#allocation2 + $0x11] ss:$2 sm:$0xff] }
 0x4a0   : > { %v3383_v13 = vadd.f32 %v3281_v28, %v3087_v18  ;;  %5156 = vxpose.xlu2.b32.start [1/4] (short) (narrow) %v3809_v39, 8  ;;  %5215 = vst.msk [vmem:[#allocation3] sm:$0xff] %vm3942_vm4, %v3809_v39 }
 0x4a1   : > { %6525 = vmatmul.msk.f32.gmra.mxu1 %vm702_vm2, %v9670_v34  ;;  %v3579_v60 = vpop.f32.mrf.mxu0 }
 0x4a2   : > { %v3678_v61 = vadd.f32 %v3576_v6, %v3383_v13  ;;  %6591 = vmatmul.msk.f32.gmra.mxu2 %vm702_vm2, %v471_v29  ;;  %v5219_v29 = vld [vmem:[#allocation2] ss:$2 sm:$0xff]  ;;  %v5220_v13 = vld [vmem:[#allocation2 + $0x10] ss:$2 sm:$0xff] }
 0x4a3   : > { %6657 = vmatmul.msk.f32.gmra.mxu3 %vm702_vm2, %v3113_v59  ;;  %vm5227_vm1 = vcmp.gt.f32.partialorder %v5221_v4, %v5219_v29  ;;  %vm5228_vm11 = vcmp.gt.f32.partialorder %v5222_v45, %v5220_v13 }
 0x4a4   : > { %v3746_v36 = vadd.f32 %v9445_v48, %v3678_v61  ;;  %6723 = vmatmul.msk.f32.gmra.mxu0 %vm702_vm2, %v3408_v8  ;;  %v5229_v46 = vsel %vm5227_vm1, %v5221_v4, %v5219_v29  ;;  %v5231_v44 = vsel %vm5227_vm1, 1.0, %v7188_v35  ;;  %v11041_v8 = vld [vmem:[#allocation42_spill] sm:$0xff]  ;;  %v5230_v38 = vsel %vm5228_vm11, %v5222_v45, %v5220_v13  ;;  %v11042_v4 = vld [vmem:[#allocation76_spill] sm:$0xff] }
 0x4a5   : > { %v2988_v12 = vpop.f32.mrf.mxu2  ;;  %vm4034_vm1 = vcmask 122880  }
 0x4a6   : > { %v3284_v7 = vpop.f32.mrf.mxu3  ;;  %v3810_v58 = vmax.f32 %v3746_v36, 0.0  ;;  %v3088_v34 = vadd.f32 %v2988_v12, %v2798_v11  ;;  %v2701_v42 = vpop.f32.mrf.mxu1 }
 0x4a7   : > { %v2799_v5 = vadd.f32 %v2701_v42, %v11039_v41 }
 0x4a8   : > { %5216 = vst.msk [vmem:[#allocation3 + $0x8] sm:$0xff] %vm3942_vm4, %v3810_v58  ;;  %v3384_v22 = vadd.f32 %v3284_v7, %v3088_v34  ;;  %5157 = vxpose.xlu2.b32.cont [2/4] (short) (narrow) %v3810_v58, 8  ;;  %v5232_v34 = vsel %vm5228_vm11, 1.0, %v7188_v35 }
 0x4a9   : > { %6526 = vmatmul.msk.f32.gmra.mxu1 %vm702_vm2, %v9688_v0  ;;  %v3582_v16 = vpop.f32.mrf.mxu0 }
 0x4aa   : > { %v3679_v21 = vadd.f32 %v3579_v60, %v3384_v22  ;;  %6592 = vmatmul.msk.f32.gmra.mxu2 %vm702_vm2, %v472_v1 }
 0x4ab   : > { %6658 = vmatmul.msk.f32.gmra.mxu3 %vm702_vm2, %v3115_v26 }
 0x4ac   : > { %v3747_v20 = vadd.f32 %v9445_v48, %v3679_v21  ;;  %6724 = vmatmul.msk.f32.gmra.mxu0 %vm702_vm2, %v3410_v31 }
 0x4ad   : > { %v2991_v50 = vpop.f32.mrf.mxu2 }
 0x4ae   : > { %v3287_v63 = vpop.f32.mrf.mxu3  ;;  %v3811_v0 = vmax.f32 %v3747_v20, 0.0  ;;  %v3089_v27 = vadd.f32 %v2991_v50, %v2799_v5  ;;  %v2704_v2 = vpop.f32.mrf.mxu1 }
 0x4af   : > { %v5223_v49 = vld [vmem:[#allocation3] ss:$2 sm:$0xff]  ;;  %v5225_v40 = vld [vmem:[#allocation3 + $0x1] ss:$2 sm:$0xff]  ;;  %v2800_v62 = vadd.f32 %v2704_v2, %v11040_v17 }
 0x4b0   : > { %5217 = vst.msk [vmem:[#allocation3 + $0x10] sm:$0xff] %vm3942_vm4, %v3811_v0  ;;  %v3385_v14 = vadd.f32 %v3287_v63, %v3089_v27  ;;  %5158 = vxpose.xlu2.b32.cont [3/4] (short) (narrow) %v3811_v0, 8  ;;  %vm5233_vm3 = vcmp.gt.f32.partialorder %v5223_v49, %v5229_v46 }
 0x4b1   : > { %v5235_v56 = vsel %vm5233_vm3, %v5223_v49, %v5229_v46  ;;  %v5237_v1 = vsel %vm5233_vm3, 32.0, %v5231_v44  ;;  %v3585_v6 = vpop.f32.mrf.mxu0 }
 0x4b2   : > { %v3680_v30 = vadd.f32 %v3582_v16, %v3385_v14  ;;  %vm5239_vm2 = vcmp.gt.f32.partialorder %v5225_v40, %v5235_v56  ;;  %v11043_v14 = vld [vmem:[#allocation93_spill] sm:$0xff] }
 0x4b3   : > { %v5243_v55 = vsel %vm5239_vm2, 33.0, %v5237_v1 }
 0x4b4   : > { %v3748_v3 = vadd.f32 %v9445_v48, %v3680_v30  ;;  %v6938_v33 = vpack.i.bf16 %v5243_v55, %v9642_v32  ;;  %v5241_v30 = vsel %vm5239_vm2, %v5225_v40, %v5235_v56 }
 0x4b5   : > { %v2994_v19 = vpop.f32.mrf.mxu2 }
 0x4b6   : > { %v3290_v28 = vpop.f32.mrf.mxu3  ;;  %v3812_v24 = vmax.f32 %v3748_v3, 0.0  ;;  %v3090_v18 = vadd.f32 %v2994_v19, %v2800_v62  ;;  %6939 = vxpose.xlu0.b32.start [1/2] (short) (narrow) %v6938_v33, 8  ;;  %v2707_v43 = vpop.f32.mrf.mxu1 }
 0x4b7   : > { %v2801_v61 = vadd.f32 %v2707_v43, %v11041_v8 }
 0x4b8   : > { %5218 = vst.msk [vmem:[#allocation3 + $0x18] sm:$0xff] %vm3942_vm4, %v3812_v24  ;;  %v3386_v39 = vadd.f32 %v3290_v28, %v3090_v18  ;;  %5159 = vxpose.xlu2.b32.end [4/4] (short) (narrow) %v3812_v24, 8  ;;  %v11044_v28 = vld [vmem:[#allocation84_spill] sm:$0xff] }
 0x4b9   : > { %v3588_v59 = vpop.f32.mrf.mxu0 }
 0x4ba   : > { %v3681_v60 = vadd.f32 %v3585_v6, %v3386_v39 }
 0x4bc   : > { %v9749_v15 = vadd.f32 %v9445_v48, %v3681_v60 }
 0x4bd   : > { %v2997_v32 = vpop.f32.mrf.mxu2 }
 0x4be   : > { %v3293_v54 = vpop.f32.mrf.mxu3  ;;  %v3091_v11 = vadd.f32 %v2997_v32, %v2801_v61  ;;  %v2710_v36 = vpop.f32.mrf.mxu1  ;;  %v3813_v12 = vmax.f32 %v9749_v15, 0.0  ;;  %v9779_v15 = vld [vmem:[%s10942_s3] ss:$0 sm:$0xff] }
 0x4bf   : > { %v5224_v7 = vld [vmem:[#allocation3 + $0x10] ss:$2 sm:$0xff]  ;;  %v5226_v42 = vld [vmem:[#allocation3 + $0x11] ss:$2 sm:$0xff]  ;;  %v2802_v21 = vadd.f32 %v2710_v36, %v11042_v4 }
 0x4c0   : > { %v3387_v58 = vadd.f32 %v3293_v54, %v3091_v11  ;;  %vm5234_vm12 = vcmp.gt.f32.partialorder %v5224_v7, %v5230_v38  ;;  %5463 = vst.msk [vmem:[#allocation2] sm:$0xff] %vm3942_vm4, %v3813_v12 }
 0x4c1   : > { %v5236_v26 = vsel %vm5234_vm12, %v5224_v7, %v5230_v38  ;;  %v5238_v22 = vsel %vm5234_vm12, 32.0, %v5232_v34  ;;  %v3591_v16 = vpop.f32.mrf.mxu0 }
 0x4c2   : > { %v3682_v31 = vadd.f32 %v3588_v59, %v3387_v58  ;;  %vm5240_vm13 = vcmp.gt.f32.partialorder %v5226_v42, %v5236_v26 }
 0x4c3   : > { %v5244_v29 = vsel %vm5240_vm13, 33.0, %v5238_v22  ;;  %v5242_v39 = vsel %vm5240_vm13, %v5226_v42, %v5236_v26  ;;  %v11046_v26 = vld [vmem:[#allocation77_spill] sm:$0xff] }
 0x4c4   : > { %v3750_v41 = vadd.f32 %v9445_v48, %v3682_v31  ;;  %v6940_v5 = vpack.i.bf16 %v5244_v29, %v9675_v52 }
 0x4c5   : > { %v3000_v20 = vpop.f32.mrf.mxu2 }
 0x4c6   : > { %v3296_v50 = vpop.f32.mrf.mxu3  ;;  %v3814_v63 = vmax.f32 %v3750_v41, 0.0  ;;  %v3092_v0 = vadd.f32 %v3000_v20, %v2802_v21  ;;  %6941 = vxpose.xlu0.b32.end [2/2] (short) (narrow) %v6940_v5, 8  ;;  %v2713_v27 = vpop.f32.mrf.mxu1 }
 0x4c7   : > { %v2803_v44 = vadd.f32 %v2713_v27, %v11043_v14 }
 0x4c8   : > { %5464 = vst.msk [vmem:[#allocation2 + $0x8] sm:$0xff] %vm3942_vm4, %v3814_v63  ;;  %v3388_v2 = vadd.f32 %v3296_v50, %v3092_v0 }
 0x4c9   : > { %v3594_v49 = vpop.f32.mrf.mxu0 }
 0x4ca   : > { %v3683_v46 = vadd.f32 %v3591_v16, %v3388_v2 }
 0x4cc   : > { %v3751_v1 = vadd.f32 %v9445_v48, %v3683_v46 }
 0x4cd   : > { %v3003_v6 = vpop.f32.mrf.mxu2 }
 0x4ce   : > { %v3299_v55 = vpop.f32.mrf.mxu3  ;;  %v3815_v52 = vmax.f32 %v3751_v1, 0.0  ;;  %v3093_v17 = vadd.f32 %v3003_v6, %v2803_v44  ;;  %5249 = vxpose.xlu0.b32.start [1/2] (short) (narrow) %v5241_v30, 8  ;;  %v2716_v62 = vpop.f32.mrf.mxu1 }
 0x4cf   : > { %v2804_v24 = vadd.f32 %v2716_v62, %v11044_v28  ;;  %v5471_v20 = vld [vmem:[#allocation2] ss:$2 sm:$0xff]  ;;  %v5473_v50 = vld [vmem:[#allocation2 + $0x1] ss:$2 sm:$0xff] }
 0x4d0   : > { %5465 = vst.msk [vmem:[#allocation2 + $0x10] sm:$0xff] %vm3942_vm4, %v3815_v52  ;;  %v3389_v3 = vadd.f32 %v3299_v55, %v3093_v17  ;;  %vm5479_vm14 = vcmp.gt.f32.partialorder %v5473_v50, %v5471_v20 }
 0x4d1   : > { %v3597_v33 = vpop.f32.mrf.mxu0  ;;  %v5481_v6 = vsel %vm5479_vm14, %v5473_v50, %v5471_v20  ;;  %v5483_v55 = vsel %vm5479_vm14, 1.0, %v7188_v35 }
 0x4d2   : > { %v3684_v19 = vadd.f32 %v3594_v49, %v3389_v3 }
 0x4d4   : > { %v9765_v18 = vadd.f32 %v9445_v48, %v3684_v19  ;;  %v11045_v48 = vld [vmem:[#allocation47_spill] sm:$0xff] }
 0x4d5   : > { %v3006_v43 = vpop.f32.mrf.mxu2 }
 0x4d6   : > { %v3302_v40 = vpop.f32.mrf.mxu3  ;;  %v3816_v56 = vmax.f32 %v9765_v18, 0.0  ;;  %v3094_v59 = vadd.f32 %v3006_v43, %v2804_v24  ;;  %5250 = vxpose.xlu0.b32.end [2/2] (short) (narrow) %v5242_v39, 8  ;;  %v2719_v13 = vpop.f32.mrf.mxu1 }
 0x4d7   : > { %v2805_v61 = vadd.f32 %v2719_v13, %v11045_v48 }
 0x4d8   : > { %5466 = vst.msk [vmem:[#allocation2 + $0x18] sm:$0xff] %vm3942_vm4, %v3816_v56  ;;  %v3390_v45 = vadd.f32 %v3302_v40, %v3094_v59 }
 0x4d9   : > { %v3600_v60 = vpop.f32.mrf.mxu0 }
 0x4da   : > { %v3685_v8 = vadd.f32 %v3597_v33, %v3390_v45 }
 0x4dc   : > { %v3753_v32 = vadd.f32 %v9779_v15, %v3685_v8 }
 0x4dd   : > { %v3009_v54 = vpop.f32.mrf.mxu2 }
 0x4de   : > { %v3305_v11 = vpop.f32.mrf.mxu3  ;;  %v3095_v36 = vadd.f32 %v3009_v54, %v2805_v61  ;;  %5353 = vxpose.xlu0.b32.start [1/4] (short) (narrow) %v3813_v12, 8  ;;  %v2722_v7 = vpop.f32.mrf.mxu1  ;;  %v3817_v38 = vmax.f32 %v3753_v32, 0.0 }
 0x4df   : > { %v2806_v22 = vadd.f32 %v2722_v7, %v11046_v26  ;;  %v5472_v8 = vld [vmem:[#allocation2 + $0x10] ss:$2 sm:$0xff]  ;;  %v5474_v48 = vld [vmem:[#allocation2 + $0x11] ss:$2 sm:$0xff] }
 0x4e0   : > { %v3391_v58 = vadd.f32 %v3305_v11, %v3095_v36  ;;  %5408 = vxpose.xlu1.b32.start [1/4] (short) (narrow) %v3817_v38, 8  ;;  %5467 = vst.msk [vmem:[#allocation3] sm:$0xff] %vm3942_vm4, %v3817_v38  ;;  %vm5480_vm5 = vcmp.gt.f32.partialorder %v5474_v48, %v5472_v8 }
 0x4e1   : > { %v3603_v34 = vpop.f32.mrf.mxu0  ;;  %v5482_v38 = vsel %vm5480_vm5, %v5474_v48, %v5472_v8 }
 0x4e2   : > { %v3686_v42 = vadd.f32 %v3600_v60, %v3391_v58 }
 0x4e4   : > { %v3754_v16 = vadd.f32 %v9779_v15, %v3686_v42 }
 0x4e5   : > { %v3012_v31 = vpop.f32.mrf.mxu2 }
 0x4e6   : > { %v3308_v29 = vpop.f32.mrf.mxu3  ;;  %v3818_v4 = vmax.f32 %v3754_v16, 0.0  ;;  %v3096_v21 = vadd.f32 %v3012_v31, %v2806_v22  ;;  %5354 = vxpose.xlu0.b32.cont [2/4] (short) (narrow) %v3814_v63, 8  ;;  %v2725_v41 = vpop.f32.mrf.mxu1 }
 0x4e7   : > { %v2807_v27 = vadd.f32 %v2725_v41, %v8987_v57 }
 0x4e8   : > { %5468 = vst.msk [vmem:[#allocation3 + $0x8] sm:$0xff] %vm3942_vm4, %v3818_v4  ;;  %v3392_v12 = vadd.f32 %v3308_v29, %v3096_v21  ;;  %5409 = vxpose.xlu1.b32.cont [2/4] (short) (narrow) %v3818_v4, 8 }
 0x4e9   : > { %v3606_v5 = vpop.f32.mrf.mxu0 }
 0x4ea   : > { %v3687_v0 = vadd.f32 %v3603_v34, %v3392_v12  ;;  %v5484_v34 = vsel %vm5480_vm5, 1.0, %v7188_v35 }
 0x4ec   : > { %v3755_v2 = vadd.f32 %v9779_v15, %v3687_v0 }
 0x4ed   : > { %v3015_v49 = vpop.f32.mrf.mxu2 }
 0x4ee   : > { %v3311_v46 = vpop.f32.mrf.mxu3  ;;  %v3819_v14 = vmax.f32 %v3755_v2, 0.0  ;;  %v3097_v44 = vadd.f32 %v3015_v49, %v2807_v27  ;;  %5355 = vxpose.xlu0.b32.cont [3/4] (short) (narrow) %v3815_v52, 8  ;;  %v2728_v63 = vpop.f32.mrf.mxu1 }
 0x4ef   : > { %v5475_v1 = vld [vmem:[#allocation3] ss:$2 sm:$0xff]  ;;  %v5477_v17 = vld [vmem:[#allocation3 + $0x1] ss:$2 sm:$0xff]  ;;  %v2808_v52 = vadd.f32 %v2728_v63, %v8998_v9 }
 0x4f0   : > { %5469 = vst.msk [vmem:[#allocation3 + $0x10] sm:$0xff] %vm3942_vm4, %v3819_v14  ;;  %v3393_v30 = vadd.f32 %v3311_v46, %v3097_v44  ;;  %5410 = vxpose.xlu1.b32.cont [3/4] (short) (narrow) %v3819_v14, 8  ;;  %vm5485_vm15 = vcmp.gt.f32.partialorder %v5475_v1, %v5481_v6 }
 0x4f1   : > { %v5487_v57 = vsel %vm5485_vm15, %v5475_v1, %v5481_v6  ;;  %v3609_v62 = vpop.f32.mrf.mxu0  ;;  %v5489_v3 = vsel %vm5485_vm15, 32.0, %v5483_v55 }
 0x4f2   : > { %v3688_v33 = vadd.f32 %v3606_v5, %v3393_v30  ;;  %vm5491_vm0 = vcmp.gt.f32.partialorder %v5477_v17, %v5487_v57 }
 0x4f3   : > { %v5493_v19 = vsel %vm5491_vm0, %v5477_v17, %v5487_v57  ;;  %v9790_v28 = vsel %vm5491_vm0, 33.0, %v5489_v3 }
 0x4f4   : > { %v3756_v24 = vadd.f32 %v9779_v15, %v3688_v33  ;;  %5501 = vxpose.xlu2.b32.start [1/2] (short) (narrow) %v5493_v19, 8 }
 0x4f5   : > { %v3018_v43 = vpop.f32.mrf.mxu2 }
 0x4f6   : > { %v3314_v39 = vpop.f32.mrf.mxu3  ;;  %v3820_v40 = vmax.f32 %v3756_v24, 0.0  ;;  %v3098_v59 = vadd.f32 %v3018_v43, %v2808_v52  ;;  %5356 = vxpose.xlu0.b32.end [4/4] (short) (narrow) %v3816_v56, 8  ;;  %v2731_v13 = vpop.f32.mrf.mxu1 }
 0x4f7   : > { %v2809_v9 = vadd.f32 %v2731_v13, %v9009_v53 }
 0x4f8   : > { %5470 = vst.msk [vmem:[#allocation3 + $0x18] sm:$0xff] %vm3942_vm4, %v3820_v40  ;;  %v3394_v45 = vadd.f32 %v3314_v39, %v3098_v59  ;;  %5411 = vxpose.xlu1.b32.end [4/4] (short) (narrow) %v3820_v40, 8 }
 0x4f9   : > { %v3612_v60 = vpop.f32.mrf.mxu0 }
 0x4fa   : > { %v3689_v61 = vadd.f32 %v3609_v62, %v3394_v45 }
 0x4fc   : > { %v3757_v32 = vadd.f32 %v9779_v15, %v3689_v61 }
 0x4fd   : > { %v3021_v54 = vpop.f32.mrf.mxu2 }
 0x4fe   : > { %v3317_v11 = vpop.f32.mrf.mxu3  ;;  %v3099_v36 = vadd.f32 %v3021_v54, %v2809_v9  ;;  %v2734_v7 = vpop.f32.mrf.mxu1  ;;  %v3821_v18 = vmax.f32 %v3757_v32, 0.0 }
 0x4ff   : > { %v5476_v56 = vld [vmem:[#allocation3 + $0x10] ss:$2 sm:$0xff]  ;;  %v5478_v42 = vld [vmem:[#allocation3 + $0x11] ss:$2 sm:$0xff]  ;;  %v2810_v4 = vadd.f32 %v2734_v7, %v9020_v23 }
 0x500   : > { %v3395_v58 = vadd.f32 %v3317_v11, %v3099_v36  ;;  %5605 = vxpose.xlu0.b32.start [1/4] (short) (narrow) %v3821_v18, 8  ;;  %5715 = vst.msk [vmem:[#allocation2] sm:$0xff] %vm3942_vm4, %v3821_v18  ;;  %vm5486_vm6 = vcmp.gt.f32.partialorder %v5476_v56, %v5482_v38 }
 0x501   : > { %v5488_v26 = vsel %vm5486_vm6, %v5476_v56, %v5482_v38  ;;  %v3615_v53 = vpop.f32.mrf.mxu0  ;;  %v5490_v22 = vsel %vm5486_vm6, 32.0, %v5484_v34 }
 0x502   : > { %v3690_v16 = vadd.f32 %v3612_v60, %v3395_v58  ;;  %vm5492_vm7 = vcmp.gt.f32.partialorder %v5478_v42, %v5488_v26 }
 0x503   : > { %v5494_v31 = vsel %vm5492_vm7, %v5478_v42, %v5488_v26  ;;  %v9801_v29 = vsel %vm5492_vm7, 33.0, %v5490_v22 }
 0x504   : > { %v3758_v21 = vadd.f32 %v9779_v15, %v3690_v16  ;;  %5502 = vxpose.xlu2.b32.end [2/2] (short) (narrow) %v5494_v31, 8 }
 0x505   : > { %v3024_v41 = vpop.f32.mrf.mxu2 }
 0x506   : > { %v3320_v12 = vpop.f32.mrf.mxu3  ;;  %v3822_v5 = vmax.f32 %v3758_v21, 0.0  ;;  %v3100_v20 = vadd.f32 %v3024_v41, %v2810_v4  ;;  %v2737_v50 = vpop.f32.mrf.mxu1 }
 0x507   : > { %v2811_v49 = vadd.f32 %v2737_v50, %v9031_v47 }
 0x508   : > { %5716 = vst.msk [vmem:[#allocation2 + $0x8] sm:$0xff] %vm3942_vm4, %v3822_v5  ;;  %v3396_v0 = vadd.f32 %v3320_v12, %v3100_v20  ;;  %5606 = vxpose.xlu0.b32.cont [2/4] (short) (narrow) %v3822_v5, 8 }
 0x509   : > { %v3618_v27 = vpop.f32.mrf.mxu0 }
 0x50a   : > { %v3691_v2 = vadd.f32 %v3615_v53, %v3396_v0 }
 0x50c   : > { %v3759_v46 = vadd.f32 %v9779_v15, %v3691_v2 }
 0x50d   : > { %v3027_v14 = vpop.f32.mrf.mxu2 }
 0x50e   : > { %v3323_v23 = vpop.f32.mrf.mxu3  ;;  %v3823_v44 = vmax.f32 %v3759_v46, 0.0  ;;  %v3101_v63 = vadd.f32 %v3027_v14, %v2811_v49  ;;  %v2740_v1 = vpop.f32.mrf.mxu1 }
 0x50f   : > { %v2812_v17 = vadd.f32 %v2740_v1, %v9042_v37  ;;  %v5723_v56 = vld [vmem:[#allocation2] ss:$2 sm:$0xff]  ;;  %v5725_v38 = vld [vmem:[#allocation2 + $0x1] ss:$2 sm:$0xff]  ;;  %v4003_v14 = vpop.trf.xlu2 }
 0x510   : > { %5717 = vst.msk [vmem:[#allocation2 + $0x10] sm:$0xff] %vm3942_vm4, %v3823_v44  ;;  %v3397_v6 = vadd.f32 %v3323_v23, %v3101_v63  ;;  %5607 = vxpose.xlu0.b32.cont [3/4] (short) (narrow) %v3823_v44, 8  ;;  %vm5731_vm8 = vcmp.gt.f32.partialorder %v5725_v38, %v5723_v56  ;;  %v3829_v23 = vlaneseq  ;;  %v4020_v44 = vrot.slane %v4003_v14, 1 }
 0x511   : > { %v3621_v30 = vpop.f32.mrf.mxu0  ;;  %v5733_v4 = vsel %vm5731_vm8, %v5725_v38, %v5723_v56  ;;  %v5735_v41 = vsel %vm5731_vm8, 1.0, %v7188_v35  ;;  %v4021_v63 = vrot.slane %v4003_v14, 2  ;;  %v4022_v1 = vrot.slane %v4003_v14, 3  ;;  %4035 = vst.msk [vmem:[%s9836_s17] sm:$0x1] %vm4034_vm1, %v4003_v14 }
 0x512   : > { %v3692_v55 = vadd.f32 %v3618_v27, %v3397_v6  ;;  %4036 = vst.msk [vmem:[%s9836_s17 + $0x8] sm:$0x1] %vm4034_vm1, %v4020_v44  ;;  %v4025_v6 = vrot.slane %v4003_v14, 6 }
 0x513   : > { %4037 = vst.msk [vmem:[%s9836_s17 + $0x10] sm:$0x1] %vm4034_vm1, %v4021_v63 }
 0x514   : > { %v3760_v57 = vadd.f32 %v9779_v15, %v3692_v55  ;;  %v3847_v55 = vpop.trf.xlu0  ;;  %4038 = vst.msk [vmem:[%s9836_s17 + $0x18] sm:$0x1] %vm4034_vm1, %v4022_v1 }
 0x515   : > { %v3030_v62 = vpop.f32.mrf.mxu2  ;;  %4041 = vst.msk [vmem:[%s9836_s17 + $0x30] sm:$0x1] %vm4034_vm1, %v4025_v6 }
 0x516   : > { %v3326_v3 = vpop.f32.mrf.mxu3  ;;  %v3824_v47 = vmax.f32 %v3760_v57, 0.0  ;;  %v3102_v33 = vadd.f32 %v3030_v62, %v2812_v17  ;;  %v2743_v19 = vpop.f32.mrf.mxu1  ;;  %v4026_v17 = vrot.slane %v4003_v14, 7 }
 0x517   : > { %v2813_v39 = vadd.f32 %v2743_v19, %v9053_v25  ;;  %v4239_v19 = vstv %s6754_s19  ;;  %s6764_s19 = sadd.s32 384, %s9842_s13 }
 0x518   : > { %5718 = vst.msk [vmem:[#allocation2 + $0x18] sm:$0xff] %vm3942_vm4, %v3824_v47  ;;  %v3398_v52 = vadd.f32 %v3326_v3, %v3102_v33  ;;  %5608 = vxpose.xlu0.b32.end [4/4] (short) (narrow) %v3824_v47, 8  ;;  %v3985_v3 = vstv %s9842_s13  ;;  %v3864_v47 = vrot.slane %v3847_v55, 1 }
 0x519   : > { %v3624_v43 = vpop.f32.mrf.mxu0  ;;  %4042 = vst.msk [vmem:[%s9836_s17 + $0x38] sm:$0x1] %vm4034_vm1, %v4026_v17 }
 0x51a   : > { %v3693_v24 = vadd.f32 %v3621_v30, %v3398_v52  ;;  %v3830_v30 = vand.u32 127, %v3829_v23  ;;  %v6924_v52 = vpop.trf.xlu2 }
 0x51c   : > { %v3761_v40 = vadd.f32 %v9779_v15, %v3693_v24  ;;  %v9860_v33 = vmul.u32 2, %v3830_v30  ;;  %v3865_v24 = vrot.slane %v3847_v55, 2 }
 0x51d   : > { %v3033_v59 = vpop.f32.mrf.mxu2 }
 0x51e   : > { %v3329_v13 = vpop.f32.mrf.mxu3  ;;  %v3103_v37 = vadd.f32 %v3033_v59, %v2813_v39  ;;  %v3825_v45 = vmax.f32 %v3761_v40, 0.0  ;;  %v2746_v60 = vpop.f32.mrf.mxu1  ;;  %v6928_v40 = vunpack.i.h.bf16 %v6924_v52  ;;  %v6925_v59 = vunpack.i.l.bf16 %v6924_v52 }
 0x51f   : > { %v2814_v61 = vadd.f32 %v2746_v60, %v9064_v10  ;;  %v5724_v2 = vld [vmem:[#allocation2 + $0x10] ss:$2 sm:$0xff]  ;;  %v5726_v46 = vld [vmem:[#allocation2 + $0x11] ss:$2 sm:$0xff] }
 0x520   : > { %v3399_v8 = vadd.f32 %v3329_v13, %v3103_v37  ;;  %5660 = vxpose.xlu1.b32.start [1/4] (short) (narrow) %v3825_v45, 8  ;;  %5719 = vst.msk [vmem:[#allocation3] sm:$0xff] %vm3942_vm4, %v3825_v45  ;;  %vm5732_vm3 = vcmp.gt.f32.partialorder %v5726_v46, %v5724_v2  ;;  %v3868_v13 = vrot.slane %v3847_v55, 5  ;;  %v3869_v37 = vrot.slane %v3847_v55, 6 }
 0x521   : > { %v3627_v32 = vpop.f32.mrf.mxu0  ;;  %v5734_v57 = vsel %vm5732_vm3, %v5726_v46, %v5724_v2  ;;  %v5736_v62 = vsel %vm5732_vm3, 1.0, %v7188_v35  ;;  %v3867_v35 = vrot.slane %v3847_v55, 4  ;;  %vm6787_vm11 = vcmp.lt.s32.totalorder %v6928_v40, 0 }
 0x522   : > { %v3694_v48 = vadd.f32 %v3624_v43, %v3399_v8  ;;  %v3866_v43 = vrot.slane %v3847_v55, 3  ;;  %vm6782_vm13 = vcmp.lt.s32.totalorder %v6925_v59, 0  ;;  %v4257_v63 = vpop.trf.xlu2 }
 0x523   : > { %v4276_v6 = vrot.slane %v4257_v63, 3  ;;  %v4277_v30 = vrot.slane %v4257_v63, 4  ;;  %4288 = vst.msk [vmem:[%s9836_s17 + $0x1] sm:$0x1] %vm4034_vm1, %v4257_v63  ;;  %v4279_v17 = vrot.slane %v4257_v63, 6 }
 0x524   : > { %v3762_v9 = vadd.f32 %v9779_v15, %v3694_v48  ;;  %v6788_v48 = vceil.f32 %v6928_v40 }
 0x525   : > { %v3036_v54 = vpop.f32.mrf.mxu2  ;;  %4291 = vst.msk [vmem:[%s9836_s17 + $0x19] sm:$0x1] %vm4034_vm1, %v4276_v6 }
 0x526   : > { %v3332_v11 = vpop.f32.mrf.mxu3  ;;  %v3826_v25 = vmax.f32 %v3762_v9, 0.0  ;;  %v3104_v36 = vadd.f32 %v3036_v54, %v2814_v61  ;;  %v2749_v18 = vpop.f32.mrf.mxu1  ;;  %v6789_v61 = vfloor.f32 %v6928_v40  ;;  %v6783_v9 = vceil.f32 %v6925_v59  ;;  %4292 = vst.msk [vmem:[%s9836_s17 + $0x21] sm:$0x1] %vm4034_vm1, %v4277_v30 }
 0x527   : > { %v2815_v34 = vadd.f32 %v2749_v18, %v9075_v51  ;;  %v4240_v54 = vadd.s32 %v4239_v19, %v9860_v33  ;;  %4294 = vst.msk [vmem:[%s9836_s17 + $0x31] sm:$0x1] %vm4034_vm1, %v4279_v17 }
 0x528   : > { %5720 = vst.msk [vmem:[#allocation3 + $0x8] sm:$0xff] %vm3942_vm4, %v3826_v25  ;;  %v3400_v7 = vadd.f32 %v3332_v11, %v3104_v36  ;;  %5661 = vxpose.xlu1.b32.cont [2/4] (short) (narrow) %v3826_v25, 8  ;;  %v6784_v11 = vfloor.f32 %v6925_v59  ;;  %v3870_v25 = vrot.slane %v3847_v55, 7  ;;  %v6790_v18 = vsel %vm6787_vm11, %v6788_v48, %v6789_v61 }
 0x529   : > { %v3630_v16 = vpop.f32.mrf.mxu0  ;;  %v6791_v56 = vcvt.f32.s32 %v6790_v18 }
 0x52a   : > { %v3695_v58 = vadd.f32 %v3627_v32, %v3400_v7  ;;  %v3986_v7 = vadd.s32 %v3985_v3, %v9860_v33  ;;  %v6785_v38 = vsel %vm6782_vm13, %v6783_v9, %v6784_v11 }
 0x52c   : > { %v3763_v42 = vadd.f32 %v9779_v15, %v3695_v58  ;;  %v3903_v58 = vpop.trf.xlu1 }
 0x52d   : > { %v3039_v10 = vpop.f32.mrf.mxu2  ;;  %v3920_v2 = vrot.slane %v3903_v58, 1  ;;  %v3922_v46 = vrot.slane %v3903_v58, 3  ;;  %v3924_v23 = vrot.slane %v3903_v58, 5  ;;  %v3925_v44 = vrot.slane %v3903_v58, 6 }
 0x52e   : > { %v3335_v26 = vpop.f32.mrf.mxu3  ;;  %v3827_v53 = vmax.f32 %v3763_v42, 0.0  ;;  %v3105_v22 = vadd.f32 %v3039_v10, %v2815_v34  ;;  %v6786_v34 = vcvt.f32.s32 %v6785_v38  ;;  %v4329_v42 = vadd.s32 %v6791_v56, %v4240_v54 }
 0x52f   : > { %v5727_v31 = vld [vmem:[#allocation3] ss:$2 sm:$0xff]  ;;  %v9822_v12 = vld [vmem:[#allocation3 + $0x1] ss:$2 sm:$0xff]  ;;  %v3926_v1 = vrot.slane %v3903_v58, 7 }
 0x530   : > { %5721 = vst.msk [vmem:[#allocation3 + $0x10] sm:$0xff] %vm3942_vm4, %v3827_v53  ;;  %v3401_v21 = vadd.f32 %v3335_v26, %v3105_v22  ;;  %5662 = vxpose.xlu1.b32.cont [3/4] (short) (narrow) %v3827_v53, 8  ;;  %vm5737_vm9 = vcmp.gt.f32.partialorder %v5727_v31, %v5733_v4  ;;  %v4076_v10 = vadd.s32 %v6786_v34, %v3986_v7 }
 0x531   : > { %v9824_v51 = vsel %vm5737_vm9, %v5727_v31, %v5733_v4  ;;  %v5741_v5 = vsel %vm5737_vm9, 32.0, %v5735_v41  ;;  %4337 = vst.msk [vmem:[%s9890_s12 + $0x1] sm:$0x1] %vm4034_vm1, %v4329_v42 }
 0x532   : > { %v3696_v20 = vadd.f32 %v3630_v16, %v3401_v21  ;;  %vm5743_vm10 = vcmp.gt.f32.partialorder %v9822_v12, %v9824_v51  ;;  %v4077_v26 = vrot.slane %v4076_v10, 1  ;;  %4084 = vst.msk [vmem:[%s9890_s12] sm:$0x1] %vm4034_vm1, %v4076_v10  ;;  %v4078_v53 = vrot.slane %v4076_v10, 2 }
 0x533   : > { %v5747_v50 = vsel %vm5743_vm10, 33.0, %v5741_v5  ;;  %v4079_v22 = vrot.slane %v4076_v10, 3  ;;  %v4080_v16 = vrot.slane %v4076_v10, 4  ;;  %v4081_v31 = vrot.slane %v4076_v10, 5 }
 0x534   : > { %v3764_v0 = vadd.f32 %v9779_v15, %v3696_v20  ;;  %v6947_v27 = vpack.i.bf16 %v5747_v50, %v9790_v28  ;;  %v4023_v15 = vrot.slane %v4003_v14, 4  ;;  %v4024_v28 = vrot.slane %v4003_v14, 5  ;;  %4085 = vst.msk [vmem:[%s9890_s12 + $0x8] sm:$0x1] %vm4034_vm1, %v4077_v26 }
 0x535   : > { %v5745_v4 = vsel %vm5743_vm10, %v9822_v12, %v9824_v51  ;;  %v4082_v21 = vrot.slane %v4076_v10, 6  ;;  %4086 = vst.msk [vmem:[%s9890_s12 + $0x10] sm:$0x1] %vm4034_vm1, %v4078_v53  ;;  %v4083_v41 = vrot.slane %v4076_v10, 7  ;;  %v4331_v5 = vrot.slane %v4329_v42, 2 }
 0x536   : > { %v3828_v49 = vmax.f32 %v3764_v0, 0.0  ;;  %6948 = vxpose.xlu2.b32.start [1/2] (short) (narrow) %v6947_v27, 8  ;;  %4039 = vst.msk [vmem:[%s9836_s17 + $0x20] sm:$0x1] %vm4034_vm1, %v4023_v15  ;;  %v4332_v20 = vrot.slane %v4329_v42, 3  ;;  %v4333_v50 = vrot.slane %v4329_v42, 4 }
 0x537   : > { %4040 = vst.msk [vmem:[%s9836_s17 + $0x28] sm:$0x1] %vm4034_vm1, %v4024_v28  ;;  %v4334_v12 = vrot.slane %v4329_v42, 5  ;;  %v4335_v51 = vrot.slane %v4329_v42, 6  ;;  %v4336_v0 = vrot.slane %v4329_v42, 7  ;;  %v3923_v14 = vrot.slane %v3903_v58, 4 }
 0x538   : > { %5722 = vst.msk [vmem:[#allocation3 + $0x18] sm:$0xff] %vm3942_vm4, %v3828_v49  ;;  %5663 = vxpose.xlu1.b32.end [4/4] (short) (narrow) %v3828_v49, 8  ;;  %vm3878_vm4 = vcmask 253952   ;;  %v3921_v49 = vrot.slane %v3903_v58, 2  ;;  %v4274_v15 = vrot.slane %v4257_v63, 1  ;;  %v4275_v28 = vrot.slane %v4257_v63, 2 }
 0x539   : > { %3879 = vst.msk [vmem:[%s9864_s9] sm:$0x1] %vm3878_vm4, %v3847_v55  ;;  %v4278_v55 = vrot.slane %v4257_v63, 5 }
 0x53a   : > { %3880 = vst.msk [vmem:[%s9864_s9 + $0x10] sm:$0x1] %vm3878_vm4, %v3864_v47 }
 0x53b   : > { %3881 = vst.msk [vmem:[%s9864_s9 + $0x20] sm:$0x1] %vm3878_vm4, %v3865_v24 }
 0x53c   : > { %3882 = vst.msk [vmem:[%s9864_s9 + $0x30] sm:$0x1] %vm3878_vm4, %v3866_v43 }
 0x53d   : > { %3883 = vst.msk [vmem:[%s9864_s9 + $0x40] sm:$0x1] %vm3878_vm4, %v3867_v35 }
 0x53e   : > { %3884 = vst.msk [vmem:[%s9864_s9 + $0x50] sm:$0x1] %vm3878_vm4, %v3868_v13 }
 0x53f   : > { %v5728_v39 = vld [vmem:[#allocation3 + $0x10] ss:$2 sm:$0xff]  ;;  %v5730_v45 = vld [vmem:[#allocation3 + $0x11] ss:$2 sm:$0xff]  ;;  %3885 = vst.msk [vmem:[%s9864_s9 + $0x60] sm:$0x1] %vm3878_vm4, %v3869_v37 }
 0x540   : > { %vm5738_vm2 = vcmp.gt.f32.partialorder %v5728_v39, %v5734_v57  ;;  %3886 = vst.msk [vmem:[%s9864_s9 + $0x70] sm:$0x1] %vm3878_vm4, %v3870_v25 }
 0x541   : > { %v5740_v60 = vsel %vm5738_vm2, %v5728_v39, %v5734_v57  ;;  %v5742_v8 = vsel %vm5738_vm2, 32.0, %v5736_v62  ;;  %3934 = vst.msk [vmem:[%s9864_s9 + $0x1] sm:$0x1] %vm3878_vm4, %v3903_v58  ;;  %v4108_v57 = vpop.trf.xlu0  ;;  %v4280_v62 = vrot.slane %v4257_v63, 7  ;;  %v4163_v39 = vpop.trf.xlu1 }
 0x542   : > { %vm5744_vm12 = vcmp.gt.f32.partialorder %v5730_v45, %v5740_v60  ;;  %4087 = vst.msk [vmem:[%s9890_s12 + $0x18] sm:$0x1] %vm4034_vm1, %v4079_v22  ;;  %v4125_v3 = vrot.slane %v4108_v57, 1  ;;  %v4126_v47 = vrot.slane %v4108_v57, 2  ;;  %v4127_v19 = vrot.slane %v4108_v57, 3 }
 0x543   : > { %v5748_v32 = vsel %vm5744_vm12, 33.0, %v5742_v8  ;;  %4088 = vst.msk [vmem:[%s9890_s12 + $0x20] sm:$0x1] %vm4034_vm1, %v4080_v16  ;;  %v5746_v27 = vsel %vm5744_vm12, %v5730_v45, %v5740_v60  ;;  %v4128_v52 = vrot.slane %v4108_v57, 4  ;;  %v4129_v24 = vrot.slane %v4108_v57, 5  ;;  %v4361_v8 = vpop.trf.xlu2 }
 0x544   : > { %v6949_v36 = vpack.i.bf16 %v5748_v32, %v9801_v29  ;;  %v4330_v29 = vrot.slane %v4329_v42, 1  ;;  %4089 = vst.msk [vmem:[%s9890_s12 + $0x28] sm:$0x1] %vm4034_vm1, %v4081_v31  ;;  %v4130_v43 = vrot.slane %v4108_v57, 6  ;;  %v4131_v40 = vrot.slane %v4108_v57, 7 }
 0x545   : > { %4090 = vst.msk [vmem:[%s9890_s12 + $0x30] sm:$0x1] %vm4034_vm1, %v4082_v21  ;;  %v4180_v59 = vrot.slane %v4163_v39, 1  ;;  %v4181_v35 = vrot.slane %v4163_v39, 2  ;;  %v4182_v13 = vrot.slane %v4163_v39, 3  ;;  %v4183_v37 = vrot.slane %v4163_v39, 4 }
 0x546   : > { %6950 = vxpose.xlu2.b32.end [2/2] (short) (narrow) %v6949_v36, 8  ;;  %4338 = vst.msk [vmem:[%s9890_s12 + $0x9] sm:$0x1] %vm4034_vm1, %v4330_v29  ;;  %v4184_v45 = vrot.slane %v4163_v39, 5  ;;  %v4185_v60 = vrot.slane %v4163_v39, 6  ;;  %v4186_v48 = vrot.slane %v4163_v39, 7 }
 0x547   : > { %4091 = vst.msk [vmem:[%s9890_s12 + $0x38] sm:$0x1] %vm4034_vm1, %v4083_v41  ;;  %v4378_v61 = vrot.slane %v4361_v8, 1  ;;  %v4379_v32 = vrot.slane %v4361_v8, 2  ;;  %v4380_v54 = vrot.slane %v4361_v8, 3  ;;  %v4381_v11 = vrot.slane %v4361_v8, 4 }
 0x548   : > { %4339 = vst.msk [vmem:[%s9890_s12 + $0x11] sm:$0x1] %vm4034_vm1, %v4331_v5  ;;  %v4382_v25 = vrot.slane %v4361_v8, 5  ;;  %v4383_v36 = vrot.slane %v4361_v8, 6  ;;  %v4384_v18 = vrot.slane %v4361_v8, 7 }
 0x549   : > { %4340 = vst.msk [vmem:[%s9890_s12 + $0x19] sm:$0x1] %vm4034_vm1, %v4332_v20  ;;  %v4509_v9 = vpop.trf.xlu1  ;;  %v4416_v7 = vpop.trf.xlu0 }
 0x54a   : > { %4341 = vst.msk [vmem:[%s9890_s12 + $0x21] sm:$0x1] %vm4034_vm1, %v4333_v50  ;;  %v4433_v56 = vrot.slane %v4416_v7, 1  ;;  %v4434_v38 = vrot.slane %v4416_v7, 2  ;;  %v4435_v58 = vrot.slane %v4416_v7, 3  ;;  %v4436_v42 = vrot.slane %v4416_v7, 4 }
 0x54b   : > { %4342 = vst.msk [vmem:[%s9890_s12 + $0x29] sm:$0x1] %vm4034_vm1, %v4334_v12  ;;  %v4437_v10 = vrot.slane %v4416_v7, 5  ;;  %v4438_v29 = vrot.slane %v4416_v7, 6  ;;  %v4439_v26 = vrot.slane %v4416_v7, 7  ;;  %v4526_v53 = vrot.slane %v4509_v9, 1  ;;  %v4613_v41 = vpop.trf.xlu2 }
 0x54c   : > { %4343 = vst.msk [vmem:[%s9890_s12 + $0x31] sm:$0x1] %vm4034_vm1, %v4335_v51  ;;  %v4527_v22 = vrot.slane %v4509_v9, 2  ;;  %v4528_v16 = vrot.slane %v4509_v9, 3  ;;  %v4529_v31 = vrot.slane %v4509_v9, 4  ;;  %v4531_v21 = vrot.slane %v4509_v9, 6 }
 0x54d   : > { %4344 = vst.msk [vmem:[%s9890_s12 + $0x39] sm:$0x1] %vm4034_vm1, %v4336_v0  ;;  %v4532_v20 = vrot.slane %v4509_v9, 7  ;;  %v4630_v50 = vrot.slane %v4613_v41, 1  ;;  %v4631_v12 = vrot.slane %v4613_v41, 2 }
 0x54e   : > { %5753 = vxpose.xlu2.b32.start [1/2] (short) (narrow) %v5745_v4, 8  ;;  %3935 = vst.msk [vmem:[%s9864_s9 + $0x11] sm:$0x1] %vm3878_vm4, %v3920_v2  ;;  %v4530_v4 = vrot.slane %v4509_v9, 5  ;;  %v4633_v2 = vrot.slane %v4613_v41, 4 }
 0x54f   : > { %3936 = vst.msk [vmem:[%s9864_s9 + $0x21] sm:$0x1] %vm3878_vm4, %v3921_v49  ;;  %v4634_v49 = vrot.slane %v4613_v41, 5 }
 0x550   : > { %3937 = vst.msk [vmem:[%s9864_s9 + $0x31] sm:$0x1] %vm3878_vm4, %v3922_v46  ;;  %v4635_v46 = vrot.slane %v4613_v41, 6 }
 0x551   : > { %3938 = vst.msk [vmem:[%s9864_s9 + $0x41] sm:$0x1] %vm3878_vm4, %v3923_v14  ;;  %v6933_v34 = vpop.trf.xlu1  ;;  %v4668_v14 = vpop.trf.xlu0 }
 0x552   : > { %3939 = vst.msk [vmem:[%s9864_s9 + $0x51] sm:$0x1] %vm3878_vm4, %v3924_v23  ;;  %v6934_v5 = vunpack.i.l.bf16 %v6933_v34  ;;  %v4491_v23 = vstv %s6756_s14  ;;  %v4686_v30 = vrot.slane %v4668_v14, 2  ;;  %s6766_s14 = sadd.s32 448, %s9842_s13  ;;  %s5858_s13 = scalar_lea.sflag [#allocation5], %s9773_s8 }
 0x553   : > { %3940 = vst.msk [vmem:[%s9864_s9 + $0x61] sm:$0x1] %vm3878_vm4, %v3925_v44  ;;  %v6937_v44 = vunpack.i.h.bf16 %v6933_v34 }
 0x554   : > { %3941 = vst.msk [vmem:[%s9864_s9 + $0x71] sm:$0x1] %vm3878_vm4, %v3926_v1  ;;  %v6793_v51 = vceil.f32 %v6934_v5  ;;  %v6794_v0 = vfloor.f32 %v6934_v5  ;;  %vm6792_vm14 = vcmp.lt.s32.totalorder %v6934_v5, 0  ;;  %v4636_v1 = vrot.slane %v4613_v41, 7 }
 0x555   : > { %4289 = vst.msk [vmem:[%s9836_s17 + $0x9] sm:$0x1] %vm4034_vm1, %v4274_v15  ;;  %v4685_v15 = vrot.slane %v4668_v14, 1  ;;  %v6799_v17 = vfloor.f32 %v6937_v44  ;;  %vm6797_vm15 = vcmp.lt.s32.totalorder %v6937_v44, 0 }
 0x556   : > { %5754 = vxpose.xlu2.b32.end [2/2] (short) (narrow) %v5746_v27, 8  ;;  %4290 = vst.msk [vmem:[%s9836_s17 + $0x11] sm:$0x1] %vm4034_vm1, %v4275_v28  ;;  %v4632_v27 = vrot.slane %v4613_v41, 3  ;;  %v6795_v63 = vsel %vm6792_vm14, %v6793_v51, %v6794_v0  ;;  %v4492_v28 = vadd.s32 %v4491_v23, %v9860_v33  ;;  %v4995_v23 = vstv %s6760_s30 }
 0x557   : > { %4293 = vst.msk [vmem:[%s9836_s17 + $0x29] sm:$0x1] %vm4034_vm1, %v4278_v55  ;;  %v6796_v6 = vcvt.f32.s32 %v6795_v63  ;;  %v6798_v55 = vceil.f32 %v6937_v44 }
 0x558   : > { %4295 = vst.msk [vmem:[%s9836_s17 + $0x39] sm:$0x1] %vm4034_vm1, %v4280_v62  ;;  %v4688_v62 = vrot.slane %v4668_v14, 4 }
 0x559   : > { %4139 = vst.msk [vmem:[%s9864_s9 + $0x2] sm:$0x1] %vm3878_vm4, %v4108_v57  ;;  %v4687_v57 = vrot.slane %v4668_v14, 3 }
 0x55a   : > { %4140 = vst.msk [vmem:[%s9864_s9 + $0x12] sm:$0x1] %vm3878_vm4, %v4125_v3  ;;  %v4689_v3 = vrot.slane %v4668_v14, 5 }
 0x55b   : > { %4141 = vst.msk [vmem:[%s9864_s9 + $0x22] sm:$0x1] %vm3878_vm4, %v4126_v47  ;;  %v4581_v47 = vadd.s32 %v6796_v6, %v4492_v28  ;;  %v4996_v28 = vadd.s32 %v4995_v23, %v9860_v33  ;;  %v5499_v23 = vstv %s6764_s19 }
 0x55c   : > { %4142 = vst.msk [vmem:[%s9864_s9 + $0x32] sm:$0x1] %vm3878_vm4, %v4127_v19  ;;  %v4690_v19 = vrot.slane %v4668_v14, 6 }
 0x55d   : > { %4143 = vst.msk [vmem:[%s9864_s9 + $0x42] sm:$0x1] %vm3878_vm4, %v4128_v52  ;;  %v4743_v52 = vstv %s6758_s16 }
 0x55e   : > { %4144 = vst.msk [vmem:[%s9864_s9 + $0x52] sm:$0x1] %vm3878_vm4, %v4129_v24  ;;  %v6800_v24 = vsel %vm6797_vm15, %v6798_v55, %v6799_v17 }
 0x55f   : > { %4145 = vst.msk [vmem:[%s9864_s9 + $0x62] sm:$0x1] %vm3878_vm4, %v4130_v43  ;;  %v4691_v43 = vrot.slane %v4668_v14, 7 }
 0x560   : > { %4146 = vst.msk [vmem:[%s9864_s9 + $0x72] sm:$0x1] %vm3878_vm4, %v4131_v40  ;;  %v6801_v40 = vcvt.f32.s32 %v6800_v24 }
 0x561   : > { %4194 = vst.msk [vmem:[%s9864_s9 + $0x3] sm:$0x1] %vm3878_vm4, %v4163_v39  ;;  %v4744_v39 = vadd.s32 %v4743_v52, %v9860_v33  ;;  %v5247_v52 = vstv %s6762_s20 }
 0x562   : > { %4195 = vst.msk [vmem:[%s9864_s9 + $0x13] sm:$0x1] %vm3878_vm4, %v4180_v59  ;;  %v4582_v59 = vrot.slane %v4581_v47, 1 }
 0x563   : > { %4196 = vst.msk [vmem:[%s9864_s9 + $0x23] sm:$0x1] %vm3878_vm4, %v4181_v35  ;;  %v4583_v35 = vrot.slane %v4581_v47, 2 }
 0x564   : > { %4197 = vst.msk [vmem:[%s9864_s9 + $0x33] sm:$0x1] %vm3878_vm4, %v4182_v13  ;;  %v4584_v13 = vrot.slane %v4581_v47, 3 }
 0x565   : > { %4198 = vst.msk [vmem:[%s9864_s9 + $0x43] sm:$0x1] %vm3878_vm4, %v4183_v37  ;;  %v4585_v37 = vrot.slane %v4581_v47, 4 }
 0x566   : > { %4199 = vst.msk [vmem:[%s9864_s9 + $0x53] sm:$0x1] %vm3878_vm4, %v4184_v45  ;;  %v4833_v45 = vadd.s32 %v6801_v40, %v4744_v39  ;;  %v5248_v39 = vadd.s32 %v5247_v52, %v9860_v33  ;;  %v5751_v52 = vstv %s6766_s14 }
 0x567   : > { %4200 = vst.msk [vmem:[%s9864_s9 + $0x63] sm:$0x1] %vm3878_vm4, %v4185_v60  ;;  %v4586_v60 = vrot.slane %v4581_v47, 5 }
 0x568   : > { %4201 = vst.msk [vmem:[%s9864_s9 + $0x73] sm:$0x1] %vm3878_vm4, %v4186_v48  ;;  %v4588_v48 = vrot.slane %v4581_v47, 7 }
 0x569   : > { %4392 = vst.msk [vmem:[%s9864_s9 + $0x4] sm:$0x1] %vm3878_vm4, %v4361_v8  ;;  %v4587_v8 = vrot.slane %v4581_v47, 6 }
 0x56a   : > { %4393 = vst.msk [vmem:[%s9864_s9 + $0x14] sm:$0x1] %vm3878_vm4, %v4378_v61  ;;  %v4834_v61 = vrot.slane %v4833_v45, 1 }
 0x56b   : > { %4394 = vst.msk [vmem:[%s9864_s9 + $0x24] sm:$0x1] %vm3878_vm4, %v4379_v32  ;;  %v4835_v32 = vrot.slane %v4833_v45, 2 }
 0x56c   : > { %4395 = vst.msk [vmem:[%s9864_s9 + $0x34] sm:$0x1] %vm3878_vm4, %v4380_v54  ;;  %v4836_v54 = vrot.slane %v4833_v45, 3 }
 0x56d   : > { %4396 = vst.msk [vmem:[%s9864_s9 + $0x44] sm:$0x1] %vm3878_vm4, %v4381_v11  ;;  %v4837_v11 = vrot.slane %v4833_v45, 4 }
 0x56e   : > { %4397 = vst.msk [vmem:[%s9864_s9 + $0x54] sm:$0x1] %vm3878_vm4, %v4382_v25  ;;  %v4838_v25 = vrot.slane %v4833_v45, 5 }
 0x56f   : > { %4398 = vst.msk [vmem:[%s9864_s9 + $0x64] sm:$0x1] %vm3878_vm4, %v4383_v36  ;;  %v4839_v36 = vrot.slane %v4833_v45, 6 }
 0x570   : > { %4399 = vst.msk [vmem:[%s9864_s9 + $0x74] sm:$0x1] %vm3878_vm4, %v4384_v18  ;;  %v4840_v18 = vrot.slane %v4833_v45, 7 }
 0x571   : > { %4447 = vst.msk [vmem:[%s9864_s9 + $0x5] sm:$0x1] %vm3878_vm4, %v4416_v7  ;;  %v4920_v7 = vpop.trf.xlu2 }
 0x572   : > { %4448 = vst.msk [vmem:[%s9864_s9 + $0x15] sm:$0x1] %vm3878_vm4, %v4433_v56  ;;  %v4937_v56 = vrot.slane %v4920_v7, 1 }
 0x573   : > { %4449 = vst.msk [vmem:[%s9864_s9 + $0x25] sm:$0x1] %vm3878_vm4, %v4434_v38  ;;  %v4938_v38 = vrot.slane %v4920_v7, 2 }
 0x574   : > { %4450 = vst.msk [vmem:[%s9864_s9 + $0x35] sm:$0x1] %vm3878_vm4, %v4435_v58  ;;  %v4939_v58 = vrot.slane %v4920_v7, 3 }
 0x575   : > { %4451 = vst.msk [vmem:[%s9864_s9 + $0x45] sm:$0x1] %vm3878_vm4, %v4436_v42  ;;  %v4940_v42 = vrot.slane %v4920_v7, 4 }
 0x576   : > { %4452 = vst.msk [vmem:[%s9864_s9 + $0x55] sm:$0x1] %vm3878_vm4, %v4437_v10  ;;  %v4941_v10 = vrot.slane %v4920_v7, 5 }
 0x577   : > { %4453 = vst.msk [vmem:[%s9864_s9 + $0x65] sm:$0x1] %vm3878_vm4, %v4438_v29  ;;  %v4942_v29 = vrot.slane %v4920_v7, 6 }
 0x578   : > { %4454 = vst.msk [vmem:[%s9864_s9 + $0x75] sm:$0x1] %vm3878_vm4, %v4439_v26  ;;  %v4943_v26 = vrot.slane %v4920_v7, 7 }
 0x579   : > { %4540 = vst.msk [vmem:[%s9836_s17 + $0x2] sm:$0x1] %vm4034_vm1, %v4509_v9  ;;  %v5013_v9 = vpop.trf.xlu0 }
 0x57a   : > { %4541 = vst.msk [vmem:[%s9836_s17 + $0xa] sm:$0x1] %vm4034_vm1, %v4526_v53  ;;  %v5030_v53 = vrot.slane %v5013_v9, 1 }
 0x57b   : > { %4542 = vst.msk [vmem:[%s9836_s17 + $0x12] sm:$0x1] %vm4034_vm1, %v4527_v22  ;;  %v5031_v22 = vrot.slane %v5013_v9, 2 }
 0x57c   : > { %4543 = vst.msk [vmem:[%s9836_s17 + $0x1a] sm:$0x1] %vm4034_vm1, %v4528_v16  ;;  %v5032_v16 = vrot.slane %v5013_v9, 3 }
 0x57d   : > { %4544 = vst.msk [vmem:[%s9836_s17 + $0x22] sm:$0x1] %vm4034_vm1, %v4529_v31  ;;  %v5033_v31 = vrot.slane %v5013_v9, 4 }
 0x57e   : > { %4545 = vst.msk [vmem:[%s9836_s17 + $0x2a] sm:$0x1] %vm4034_vm1, %v4530_v4  ;;  %v5034_v4 = vrot.slane %v5013_v9, 5 }
 0x57f   : > { %4546 = vst.msk [vmem:[%s9836_s17 + $0x32] sm:$0x1] %vm4034_vm1, %v4531_v21  ;;  %v5035_v21 = vrot.slane %v5013_v9, 6 }
 0x580   : > { %4547 = vst.msk [vmem:[%s9836_s17 + $0x3a] sm:$0x1] %vm4034_vm1, %v4532_v20  ;;  %v5036_v20 = vrot.slane %v5013_v9, 7 }
 0x581   : > { %4644 = vst.msk [vmem:[%s9864_s9 + $0x6] sm:$0x1] %vm3878_vm4, %v4613_v41  ;;  %v6942_v34 = vpop.trf.xlu0  ;;  %v4761_v41 = vpop.trf.xlu1 }
 0x582   : > { %4645 = vst.msk [vmem:[%s9864_s9 + $0x16] sm:$0x1] %vm3878_vm4, %v4630_v50  ;;  %v6943_v5 = vunpack.i.l.bf16 %v6942_v34  ;;  %v4778_v50 = vrot.slane %v4761_v41, 1  ;;  %v6946_v44 = vunpack.i.h.bf16 %v6942_v34 }
 0x583   : > { %4646 = vst.msk [vmem:[%s9864_s9 + $0x26] sm:$0x1] %vm3878_vm4, %v4631_v12  ;;  %v4779_v12 = vrot.slane %v4761_v41, 2 }
 0x584   : > { %4647 = vst.msk [vmem:[%s9864_s9 + $0x36] sm:$0x1] %vm3878_vm4, %v4632_v27  ;;  %v6803_v51 = vceil.f32 %v6943_v5  ;;  %v6804_v0 = vfloor.f32 %v6943_v5  ;;  %v4780_v27 = vrot.slane %v4761_v41, 3  ;;  %vm6802_vm0 = vcmp.lt.s32.totalorder %v6943_v5, 0 }
 0x585   : > { %4648 = vst.msk [vmem:[%s9864_s9 + $0x46] sm:$0x1] %vm3878_vm4, %v4633_v2  ;;  %v4781_v2 = vrot.slane %v4761_v41, 4  ;;  %v6808_v55 = vceil.f32 %v6946_v44  ;;  %v6809_v17 = vfloor.f32 %v6946_v44  ;;  %vm6807_vm5 = vcmp.lt.s32.totalorder %v6946_v44, 0 }
 0x586   : > { %4649 = vst.msk [vmem:[%s9864_s9 + $0x56] sm:$0x1] %vm3878_vm4, %v4634_v49  ;;  %v4782_v49 = vrot.slane %v4761_v41, 5  ;;  %v6805_v63 = vsel %vm6802_vm0, %v6803_v51, %v6804_v0 }
 0x587   : > { %4650 = vst.msk [vmem:[%s9864_s9 + $0x66] sm:$0x1] %vm3878_vm4, %v4635_v46  ;;  %v4783_v46 = vrot.slane %v4761_v41, 6  ;;  %v6806_v6 = vcvt.f32.s32 %v6805_v63  ;;  %v6810_v24 = vsel %vm6807_vm5, %v6808_v55, %v6809_v17 }
 0x588   : > { %4651 = vst.msk [vmem:[%s9864_s9 + $0x76] sm:$0x1] %vm3878_vm4, %v4636_v1  ;;  %v4784_v1 = vrot.slane %v4761_v41, 7  ;;  %v6811_v40 = vcvt.f32.s32 %v6810_v24 }
 0x589   : > { %4699 = vst.msk [vmem:[%s9864_s9 + $0x7] sm:$0x1] %vm3878_vm4, %v4668_v14  ;;  %v5172_v14 = vpop.trf.xlu2 }
 0x58a   : > { %4700 = vst.msk [vmem:[%s9864_s9 + $0x17] sm:$0x1] %vm3878_vm4, %v4685_v15  ;;  %v5189_v15 = vrot.slane %v5172_v14, 1 }
 0x58b   : > { %4701 = vst.msk [vmem:[%s9864_s9 + $0x27] sm:$0x1] %vm3878_vm4, %v4686_v30  ;;  %v5190_v30 = vrot.slane %v5172_v14, 2 }
 0x58c   : > { %4702 = vst.msk [vmem:[%s9864_s9 + $0x37] sm:$0x1] %vm3878_vm4, %v4687_v57  ;;  %v5191_v57 = vrot.slane %v5172_v14, 3 }
 0x58d   : > { %4703 = vst.msk [vmem:[%s9864_s9 + $0x47] sm:$0x1] %vm3878_vm4, %v4688_v62  ;;  %v5192_v62 = vrot.slane %v5172_v14, 4 }
 0x58e   : > { %4704 = vst.msk [vmem:[%s9864_s9 + $0x57] sm:$0x1] %vm3878_vm4, %v4689_v3  ;;  %v5193_v3 = vrot.slane %v5172_v14, 5 }
 0x58f   : > { %4705 = vst.msk [vmem:[%s9864_s9 + $0x67] sm:$0x1] %vm3878_vm4, %v4690_v19  ;;  %v5194_v19 = vrot.slane %v5172_v14, 6 }
 0x590   : > { %4706 = vst.msk [vmem:[%s9864_s9 + $0x77] sm:$0x1] %vm3878_vm4, %v4691_v43  ;;  %v5195_v43 = vrot.slane %v5172_v14, 7 }
 0x591   : > { %4589 = vst.msk [vmem:[%s9890_s12 + $0x2] sm:$0x1] %vm4034_vm1, %v4581_v47  ;;  %v5085_v47 = vadd.s32 %v6806_v6, %v4996_v28  ;;  %v5500_v28 = vadd.s32 %v5499_v23, %v9860_v33 }
 0x592   : > { %4590 = vst.msk [vmem:[%s9890_s12 + $0xa] sm:$0x1] %vm4034_vm1, %v4582_v59 }
 0x593   : > { %4591 = vst.msk [vmem:[%s9890_s12 + $0x12] sm:$0x1] %vm4034_vm1, %v4583_v35  ;;  %v5086_v59 = vrot.slane %v5085_v47, 1  ;;  %v5087_v35 = vrot.slane %v5085_v47, 2 }
 0x594   : > { %4592 = vst.msk [vmem:[%s9890_s12 + $0x1a] sm:$0x1] %vm4034_vm1, %v4584_v13  ;;  %v5088_v13 = vrot.slane %v5085_v47, 3 }
 0x595   : > { %4593 = vst.msk [vmem:[%s9890_s12 + $0x22] sm:$0x1] %vm4034_vm1, %v4585_v37  ;;  %v5089_v37 = vrot.slane %v5085_v47, 4 }
 0x596   : > { %4594 = vst.msk [vmem:[%s9890_s12 + $0x2a] sm:$0x1] %vm4034_vm1, %v4586_v60  ;;  %v5090_v60 = vrot.slane %v5085_v47, 5 }
 0x597   : > { %4595 = vst.msk [vmem:[%s9890_s12 + $0x32] sm:$0x1] %vm4034_vm1, %v4587_v8  ;;  %v5091_v8 = vrot.slane %v5085_v47, 6 }
 0x598   : > { %4596 = vst.msk [vmem:[%s9890_s12 + $0x3a] sm:$0x1] %vm4034_vm1, %v4588_v48  ;;  %v5092_v48 = vrot.slane %v5085_v47, 7 }
 0x599   : > { %4841 = vst.msk [vmem:[%s9890_s12 + $0x3] sm:$0x1] %vm4034_vm1, %v4833_v45  ;;  %v5337_v45 = vadd.s32 %v6811_v40, %v5248_v39  ;;  %v5752_v39 = vadd.s32 %v5751_v52, %v9860_v33 }
 0x59a   : > { %4842 = vst.msk [vmem:[%s9890_s12 + $0xb] sm:$0x1] %vm4034_vm1, %v4834_v61 }
 0x59b   : > { %4843 = vst.msk [vmem:[%s9890_s12 + $0x13] sm:$0x1] %vm4034_vm1, %v4835_v32  ;;  %v5338_v61 = vrot.slane %v5337_v45, 1  ;;  %v5339_v32 = vrot.slane %v5337_v45, 2 }
 0x59c   : > { %4844 = vst.msk [vmem:[%s9890_s12 + $0x1b] sm:$0x1] %vm4034_vm1, %v4836_v54  ;;  %v5340_v54 = vrot.slane %v5337_v45, 3 }
 0x59d   : > { %4845 = vst.msk [vmem:[%s9890_s12 + $0x23] sm:$0x1] %vm4034_vm1, %v4837_v11  ;;  %v5341_v11 = vrot.slane %v5337_v45, 4 }
 0x59e   : > { %4846 = vst.msk [vmem:[%s9890_s12 + $0x2b] sm:$0x1] %vm4034_vm1, %v4838_v25  ;;  %v5342_v25 = vrot.slane %v5337_v45, 5 }
 0x59f   : > { %4847 = vst.msk [vmem:[%s9890_s12 + $0x33] sm:$0x1] %vm4034_vm1, %v4839_v36  ;;  %v5343_v36 = vrot.slane %v5337_v45, 6 }
 0x5a0   : > { %4848 = vst.msk [vmem:[%s9890_s12 + $0x3b] sm:$0x1] %vm4034_vm1, %v4840_v18  ;;  %v5344_v18 = vrot.slane %v5337_v45, 7 }
 0x5a1   : > { %4951 = vst.msk [vmem:[%s9864_s9 + $0x9] sm:$0x1] %vm3878_vm4, %v4920_v7  ;;  %v4865_v7 = vpop.trf.xlu1 }
 0x5a2   : > { %4952 = vst.msk [vmem:[%s9864_s9 + $0x19] sm:$0x1] %vm3878_vm4, %v4937_v56  ;;  %v4882_v56 = vrot.slane %v4865_v7, 1 }
 0x5a3   : > { %4953 = vst.msk [vmem:[%s9864_s9 + $0x29] sm:$0x1] %vm3878_vm4, %v4938_v38  ;;  %v4883_v38 = vrot.slane %v4865_v7, 2 }
 0x5a4   : > { %4954 = vst.msk [vmem:[%s9864_s9 + $0x39] sm:$0x1] %vm3878_vm4, %v4939_v58  ;;  %v4884_v58 = vrot.slane %v4865_v7, 3 }
 0x5a5   : > { %4955 = vst.msk [vmem:[%s9864_s9 + $0x49] sm:$0x1] %vm3878_vm4, %v4940_v42  ;;  %v4885_v42 = vrot.slane %v4865_v7, 4 }
 0x5a6   : > { %4956 = vst.msk [vmem:[%s9864_s9 + $0x59] sm:$0x1] %vm3878_vm4, %v4941_v10  ;;  %v4886_v10 = vrot.slane %v4865_v7, 5 }
 0x5a7   : > { %4957 = vst.msk [vmem:[%s9864_s9 + $0x69] sm:$0x1] %vm3878_vm4, %v4942_v29  ;;  %v4887_v29 = vrot.slane %v4865_v7, 6 }
 0x5a8   : > { %4958 = vst.msk [vmem:[%s9864_s9 + $0x79] sm:$0x1] %vm3878_vm4, %v4943_v26  ;;  %v4888_v26 = vrot.slane %v4865_v7, 7 }
 0x5a9   : > { %5044 = vst.msk [vmem:[%s9836_s17 + $0x4] sm:$0x1] %vm4034_vm1, %v5013_v9  ;;  %v5517_v9 = vpop.trf.xlu2 }
 0x5aa   : > { %5045 = vst.msk [vmem:[%s9836_s17 + $0xc] sm:$0x1] %vm4034_vm1, %v5030_v53  ;;  %v5534_v53 = vrot.slane %v5517_v9, 1 }
 0x5ab   : > { %5046 = vst.msk [vmem:[%s9836_s17 + $0x14] sm:$0x1] %vm4034_vm1, %v5031_v22  ;;  %v5535_v22 = vrot.slane %v5517_v9, 2 }
 0x5ac   : > { %5047 = vst.msk [vmem:[%s9836_s17 + $0x1c] sm:$0x1] %vm4034_vm1, %v5032_v16  ;;  %v5536_v16 = vrot.slane %v5517_v9, 3 }
 0x5ad   : > { %5048 = vst.msk [vmem:[%s9836_s17 + $0x24] sm:$0x1] %vm4034_vm1, %v5033_v31  ;;  %v5537_v31 = vrot.slane %v5517_v9, 4 }
 0x5ae   : > { %5049 = vst.msk [vmem:[%s9836_s17 + $0x2c] sm:$0x1] %vm4034_vm1, %v5034_v4  ;;  %v5538_v4 = vrot.slane %v5517_v9, 5 }
 0x5af   : > { %5050 = vst.msk [vmem:[%s9836_s17 + $0x34] sm:$0x1] %vm4034_vm1, %v5035_v21  ;;  %v5539_v21 = vrot.slane %v5517_v9, 6 }
 0x5b0   : > { %5051 = vst.msk [vmem:[%s9836_s17 + $0x3c] sm:$0x1] %vm4034_vm1, %v5036_v20  ;;  %v5540_v20 = vrot.slane %v5517_v9, 7 }
 0x5b1   : > { %4792 = vst.msk [vmem:[%s9836_s17 + $0x3] sm:$0x1] %vm4034_vm1, %v4761_v41  ;;  %v5265_v41 = vpop.trf.xlu0 }
 0x5b2   : > { %4793 = vst.msk [vmem:[%s9836_s17 + $0xb] sm:$0x1] %vm4034_vm1, %v4778_v50  ;;  %v5282_v50 = vrot.slane %v5265_v41, 1 }
 0x5b3   : > { %4794 = vst.msk [vmem:[%s9836_s17 + $0x13] sm:$0x1] %vm4034_vm1, %v4779_v12  ;;  %v5283_v12 = vrot.slane %v5265_v41, 2 }
 0x5b4   : > { %4795 = vst.msk [vmem:[%s9836_s17 + $0x1b] sm:$0x1] %vm4034_vm1, %v4780_v27  ;;  %v5284_v27 = vrot.slane %v5265_v41, 3 }
 0x5b5   : > { %4796 = vst.msk [vmem:[%s9836_s17 + $0x23] sm:$0x1] %vm4034_vm1, %v4781_v2  ;;  %v5285_v2 = vrot.slane %v5265_v41, 4 }
 0x5b6   : > { %4797 = vst.msk [vmem:[%s9836_s17 + $0x2b] sm:$0x1] %vm4034_vm1, %v4782_v49  ;;  %v5286_v49 = vrot.slane %v5265_v41, 5 }
 0x5b7   : > { %4798 = vst.msk [vmem:[%s9836_s17 + $0x33] sm:$0x1] %vm4034_vm1, %v4783_v46  ;;  %v5287_v46 = vrot.slane %v5265_v41, 6 }
 0x5b8   : > { %4799 = vst.msk [vmem:[%s9836_s17 + $0x3b] sm:$0x1] %vm4034_vm1, %v4784_v1  ;;  %v5288_v1 = vrot.slane %v5265_v41, 7 }
 0x5b9   : > { %5203 = vst.msk [vmem:[%s9864_s9 + $0xb] sm:$0x1] %vm3878_vm4, %v5172_v14  ;;  %v5117_v14 = vpop.trf.xlu1 }
 0x5ba   : > { %5204 = vst.msk [vmem:[%s9864_s9 + $0x1b] sm:$0x1] %vm3878_vm4, %v5189_v15  ;;  %v5134_v15 = vrot.slane %v5117_v14, 1 }
 0x5bb   : > { %5205 = vst.msk [vmem:[%s9864_s9 + $0x2b] sm:$0x1] %vm3878_vm4, %v5190_v30  ;;  %v5135_v30 = vrot.slane %v5117_v14, 2 }
 0x5bc   : > { %5206 = vst.msk [vmem:[%s9864_s9 + $0x3b] sm:$0x1] %vm3878_vm4, %v5191_v57  ;;  %v5136_v57 = vrot.slane %v5117_v14, 3 }
 0x5bd   : > { %5207 = vst.msk [vmem:[%s9864_s9 + $0x4b] sm:$0x1] %vm3878_vm4, %v5192_v62  ;;  %v5137_v62 = vrot.slane %v5117_v14, 4 }
 0x5be   : > { %5208 = vst.msk [vmem:[%s9864_s9 + $0x5b] sm:$0x1] %vm3878_vm4, %v5193_v3  ;;  %v5138_v3 = vrot.slane %v5117_v14, 5 }
 0x5bf   : > { %5209 = vst.msk [vmem:[%s9864_s9 + $0x6b] sm:$0x1] %vm3878_vm4, %v5194_v19  ;;  %v5139_v19 = vrot.slane %v5117_v14, 6 }
 0x5c0   : > { %5210 = vst.msk [vmem:[%s9864_s9 + $0x7b] sm:$0x1] %vm3878_vm4, %v5195_v43  ;;  %v5140_v43 = vrot.slane %v5117_v14, 7 }
 0x5c1   : > { %5093 = vst.msk [vmem:[%s9890_s12 + $0x4] sm:$0x1] %vm4034_vm1, %v5085_v47 }
 0x5c2   : > { %5094 = vst.msk [vmem:[%s9890_s12 + $0xc] sm:$0x1] %vm4034_vm1, %v5086_v59 }
 0x5c3   : > { %5095 = vst.msk [vmem:[%s9890_s12 + $0x14] sm:$0x1] %vm4034_vm1, %v5087_v35 }
 0x5c4   : > { %5096 = vst.msk [vmem:[%s9890_s12 + $0x1c] sm:$0x1] %vm4034_vm1, %v5088_v13 }
 0x5c5   : > { %5097 = vst.msk [vmem:[%s9890_s12 + $0x24] sm:$0x1] %vm4034_vm1, %v5089_v37 }
 0x5c6   : > { %5098 = vst.msk [vmem:[%s9890_s12 + $0x2c] sm:$0x1] %vm4034_vm1, %v5090_v60 }
 0x5c7   : > { %5099 = vst.msk [vmem:[%s9890_s12 + $0x34] sm:$0x1] %vm4034_vm1, %v5091_v8 }
 0x5c8   : > { %5100 = vst.msk [vmem:[%s9890_s12 + $0x3c] sm:$0x1] %vm4034_vm1, %v5092_v48 }
 0x5c9   : > { %5345 = vst.msk [vmem:[%s9890_s12 + $0x5] sm:$0x1] %vm4034_vm1, %v5337_v45 }
 0x5ca   : > { %5346 = vst.msk [vmem:[%s9890_s12 + $0xd] sm:$0x1] %vm4034_vm1, %v5338_v61 }
 0x5cb   : > { %5347 = vst.msk [vmem:[%s9890_s12 + $0x15] sm:$0x1] %vm4034_vm1, %v5339_v32 }
 0x5cc   : > { %5348 = vst.msk [vmem:[%s9890_s12 + $0x1d] sm:$0x1] %vm4034_vm1, %v5340_v54 }
 0x5cd   : > { %5349 = vst.msk [vmem:[%s9890_s12 + $0x25] sm:$0x1] %vm4034_vm1, %v5341_v11 }
 0x5ce   : > { %5350 = vst.msk [vmem:[%s9890_s12 + $0x2d] sm:$0x1] %vm4034_vm1, %v5342_v25  ;;  %v5369_v25 = vpop.trf.xlu0 }
 0x5cf   : > { %5351 = vst.msk [vmem:[%s9890_s12 + $0x35] sm:$0x1] %vm4034_vm1, %v5343_v36 }
 0x5d0   : > { %5352 = vst.msk [vmem:[%s9890_s12 + $0x3d] sm:$0x1] %vm4034_vm1, %v5344_v18  ;;  %v5387_v18 = vrot.slane %v5369_v25, 2 }
 0x5d1   : > { %4896 = vst.msk [vmem:[%s9864_s9 + $0x8] sm:$0x1] %vm3878_vm4, %v4865_v7  ;;  %v5386_v7 = vrot.slane %v5369_v25, 1 }
 0x5d2   : > { %4897 = vst.msk [vmem:[%s9864_s9 + $0x18] sm:$0x1] %vm3878_vm4, %v4882_v56  ;;  %v5388_v56 = vrot.slane %v5369_v25, 3 }
 0x5d3   : > { %4898 = vst.msk [vmem:[%s9864_s9 + $0x28] sm:$0x1] %vm3878_vm4, %v4883_v38  ;;  %v5389_v38 = vrot.slane %v5369_v25, 4 }
 0x5d4   : > { %4899 = vst.msk [vmem:[%s9864_s9 + $0x38] sm:$0x1] %vm3878_vm4, %v4884_v58  ;;  %v5390_v58 = vrot.slane %v5369_v25, 5 }
 0x5d5   : > { %4900 = vst.msk [vmem:[%s9864_s9 + $0x48] sm:$0x1] %vm3878_vm4, %v4885_v42  ;;  %v5424_v42 = vpop.trf.xlu1 }
 0x5d6   : > { %4901 = vst.msk [vmem:[%s9864_s9 + $0x58] sm:$0x1] %vm3878_vm4, %v4886_v10  ;;  %v5392_v10 = vrot.slane %v5369_v25, 7 }
 0x5d7   : > { %v6951_v34 = vpop.trf.xlu2  ;;  %4902 = vst.msk [vmem:[%s9864_s9 + $0x68] sm:$0x1] %vm3878_vm4, %v4887_v29  ;;  %v5441_v29 = vrot.slane %v5424_v42, 1 }
 0x5d8   : > { %4903 = vst.msk [vmem:[%s9864_s9 + $0x78] sm:$0x1] %vm3878_vm4, %v4888_v26  ;;  %v6952_v5 = vunpack.i.l.bf16 %v6951_v34  ;;  %v6955_v44 = vunpack.i.h.bf16 %v6951_v34  ;;  %v5391_v34 = vrot.slane %v5369_v25, 6  ;;  %v5442_v26 = vrot.slane %v5424_v42, 2 }
 0x5d9   : > { %5548 = vst.msk [vmem:[%s9836_s17 + $0x6] sm:$0x1] %vm4034_vm1, %v5517_v9 }
 0x5da   : > { %5549 = vst.msk [vmem:[%s9836_s17 + $0xe] sm:$0x1] %vm4034_vm1, %v5534_v53  ;;  %v6813_v51 = vceil.f32 %v6952_v5  ;;  %v6814_v0 = vfloor.f32 %v6952_v5  ;;  %vm6812_vm6 = vcmp.lt.s32.totalorder %v6952_v5, 0  ;;  %v6818_v55 = vceil.f32 %v6955_v44 }
 0x5db   : > { %5550 = vst.msk [vmem:[%s9836_s17 + $0x16] sm:$0x1] %vm4034_vm1, %v5535_v22  ;;  %v6819_v17 = vfloor.f32 %v6955_v44  ;;  %vm6817_vm7 = vcmp.lt.s32.totalorder %v6955_v44, 0  ;;  %v5443_v53 = vrot.slane %v5424_v42, 3  ;;  %v5444_v22 = vrot.slane %v5424_v42, 4 }
 0x5dc   : > { %5551 = vst.msk [vmem:[%s9836_s17 + $0x1e] sm:$0x1] %vm4034_vm1, %v5536_v16  ;;  %v6815_v63 = vsel %vm6812_vm6, %v6813_v51, %v6814_v0  ;;  %v5445_v16 = vrot.slane %v5424_v42, 5 }
 0x5dd   : > { %5552 = vst.msk [vmem:[%s9836_s17 + $0x26] sm:$0x1] %vm4034_vm1, %v5537_v31  ;;  %v6816_v6 = vcvt.f32.s32 %v6815_v63  ;;  %v6820_v24 = vsel %vm6817_vm7, %v6818_v55, %v6819_v17  ;;  %v5446_v31 = vrot.slane %v5424_v42, 6  ;;  %v5676_v0 = vpop.trf.xlu1 }
 0x5de   : > { %5553 = vst.msk [vmem:[%s9836_s17 + $0x2e] sm:$0x1] %vm4034_vm1, %v5538_v4  ;;  %v6821_v40 = vcvt.f32.s32 %v6820_v24  ;;  %v5621_v4 = vpop.trf.xlu0  ;;  %v5697_v23 = vrot.slane %v5676_v0, 5  ;;  %v5698_v44 = vrot.slane %v5676_v0, 6 }
 0x5df   : > { %5554 = vst.msk [vmem:[%s9836_s17 + $0x36] sm:$0x1] %vm4034_vm1, %v5539_v21  ;;  %v5589_v47 = vadd.s32 %v6816_v6, %v5500_v28  ;;  %v5447_v21 = vrot.slane %v5424_v42, 7  ;;  %v5639_v5 = vrot.slane %v5621_v4, 2  ;;  %v5643_v51 = vrot.slane %v5621_v4, 6 }
 0x5e0   : > { %5555 = vst.msk [vmem:[%s9836_s17 + $0x3e] sm:$0x1] %vm4034_vm1, %v5540_v20  ;;  %v5841_v45 = vadd.s32 %v6821_v40, %v5752_v39  ;;  %v5640_v20 = vrot.slane %v5621_v4, 3 }
 0x5e1   : > { %5296 = vst.msk [vmem:[%s9836_s17 + $0x5] sm:$0x1] %vm4034_vm1, %v5265_v41  ;;  %v5590_v59 = vrot.slane %v5589_v47, 1  ;;  %v5591_v35 = vrot.slane %v5589_v47, 2  ;;  %v5592_v13 = vrot.slane %v5589_v47, 3  ;;  %v5593_v37 = vrot.slane %v5589_v47, 4 }
 0x5e2   : > { %5297 = vst.msk [vmem:[%s9836_s17 + $0xd] sm:$0x1] %vm4034_vm1, %v5282_v50  ;;  %v5594_v60 = vrot.slane %v5589_v47, 5  ;;  %v5595_v33 = vrot.slane %v5589_v47, 6  ;;  %v5596_v8 = vrot.slane %v5589_v47, 7  ;;  %v5842_v48 = vrot.slane %v5841_v45, 1 }
 0x5e3   : > { %5298 = vst.msk [vmem:[%s9836_s17 + $0x15] sm:$0x1] %vm4034_vm1, %v5283_v12  ;;  %v5843_v61 = vrot.slane %v5841_v45, 2  ;;  %v5844_v9 = vrot.slane %v5841_v45, 3  ;;  %v5845_v32 = vrot.slane %v5841_v45, 4  ;;  %v5846_v54 = vrot.slane %v5841_v45, 5 }
 0x5e4   : > { %5299 = vst.msk [vmem:[%s9836_s17 + $0x1d] sm:$0x1] %vm4034_vm1, %v5284_v27  ;;  %v5847_v11 = vrot.slane %v5841_v45, 6  ;;  %v5848_v36 = vrot.slane %v5841_v45, 7  ;;  %v5638_v41 = vrot.slane %v5621_v4, 1  ;;  %v5641_v50 = vrot.slane %v5621_v4, 4 }
 0x5e5   : > { %5300 = vst.msk [vmem:[%s9836_s17 + $0x25] sm:$0x1] %vm4034_vm1, %v5285_v2  ;;  %v5642_v12 = vrot.slane %v5621_v4, 5  ;;  %v5644_v27 = vrot.slane %v5621_v4, 7  ;;  %v5693_v2 = vrot.slane %v5676_v0, 1 }
 0x5e6   : > { %5301 = vst.msk [vmem:[%s9836_s17 + $0x2d] sm:$0x1] %vm4034_vm1, %v5286_v49  ;;  %v5694_v49 = vrot.slane %v5676_v0, 2 }
 0x5e7   : > { %5302 = vst.msk [vmem:[%s9836_s17 + $0x35] sm:$0x1] %vm4034_vm1, %v5287_v46  ;;  %v5695_v46 = vrot.slane %v5676_v0, 3  ;;  %v5769_v63 = vpop.trf.xlu2 }
 0x5e8   : > { %5303 = vst.msk [vmem:[%s9836_s17 + $0x3d] sm:$0x1] %vm4034_vm1, %v5288_v1  ;;  %v5699_v1 = vrot.slane %v5676_v0, 7  ;;  %v5787_v28 = vrot.slane %v5769_v63, 2  ;;  %v5788_v6 = vrot.slane %v5769_v63, 3  ;;  %v5790_v55 = vrot.slane %v5769_v63, 5 }
 0x5e9   : > { %5148 = vst.msk [vmem:[%s9864_s9 + $0xa] sm:$0x1] %vm3878_vm4, %v5117_v14  ;;  %v5696_v14 = vrot.slane %v5676_v0, 4  ;;  %v5791_v17 = vrot.slane %v5769_v63, 6 }
 0x5ea   : > { %5149 = vst.msk [vmem:[%s9864_s9 + $0x1a] sm:$0x1] %vm3878_vm4, %v5134_v15  ;;  %v5786_v15 = vrot.slane %v5769_v63, 1 }
 0x5eb   : > { %5150 = vst.msk [vmem:[%s9864_s9 + $0x2a] sm:$0x1] %vm3878_vm4, %v5135_v30  ;;  %v5789_v30 = vrot.slane %v5769_v63, 4 }
 0x5ec   : > { %5151 = vst.msk [vmem:[%s9864_s9 + $0x3a] sm:$0x1] %vm3878_vm4, %v5136_v57  ;;  %v5792_v57 = vrot.slane %v5769_v63, 7 }
 0x5ed   : > { %5152 = vst.msk [vmem:[%s9864_s9 + $0x4a] sm:$0x1] %vm3878_vm4, %v5137_v62 }
 0x5ee   : > { %5153 = vst.msk [vmem:[%s9864_s9 + $0x5a] sm:$0x1] %vm3878_vm4, %v5138_v3 }
 0x5ef   : > { %5154 = vst.msk [vmem:[%s9864_s9 + $0x6a] sm:$0x1] %vm3878_vm4, %v5139_v19 }
 0x5f0   : > { %5155 = vst.msk [vmem:[%s9864_s9 + $0x7a] sm:$0x1] %vm3878_vm4, %v5140_v43 }
 0x5f1   : > { %5597 = vst.msk [vmem:[%s9890_s12 + $0x6] sm:$0x1] %vm4034_vm1, %v5589_v47 }
 0x5f2   : > { %5598 = vst.msk [vmem:[%s9890_s12 + $0xe] sm:$0x1] %vm4034_vm1, %v5590_v59 }
 0x5f3   : > { %5599 = vst.msk [vmem:[%s9890_s12 + $0x16] sm:$0x1] %vm4034_vm1, %v5591_v35 }
 0x5f4   : > { %5600 = vst.msk [vmem:[%s9890_s12 + $0x1e] sm:$0x1] %vm4034_vm1, %v5592_v13 }
 0x5f5   : > { %5601 = vst.msk [vmem:[%s9890_s12 + $0x26] sm:$0x1] %vm4034_vm1, %v5593_v37 }
 0x5f6   : > { %5602 = vst.msk [vmem:[%s9890_s12 + $0x2e] sm:$0x1] %vm4034_vm1, %v5594_v60 }
 0x5f7   : > { %5603 = vst.msk [vmem:[%s9890_s12 + $0x36] sm:$0x1] %vm4034_vm1, %v5595_v33 }
 0x5f8   : > { %5604 = vst.msk [vmem:[%s9890_s12 + $0x3e] sm:$0x1] %vm4034_vm1, %v5596_v8 }
 0x5f9   : > { %5849 = vst.msk [vmem:[%s9890_s12 + $0x7] sm:$0x1] %vm4034_vm1, %v5841_v45 }
 0x5fa   : > { %5850 = vst.msk [vmem:[%s9890_s12 + $0xf] sm:$0x1] %vm4034_vm1, %v5842_v48 }
 0x5fb   : > { %5851 = vst.msk [vmem:[%s9890_s12 + $0x17] sm:$0x1] %vm4034_vm1, %v5843_v61 }
 0x5fc   : > { %5852 = vst.msk [vmem:[%s9890_s12 + $0x1f] sm:$0x1] %vm4034_vm1, %v5844_v9 }
 0x5fd   : > { %5853 = vst.msk [vmem:[%s9890_s12 + $0x27] sm:$0x1] %vm4034_vm1, %v5845_v32 }
 0x5fe   : > { %5854 = vst.msk [vmem:[%s9890_s12 + $0x2f] sm:$0x1] %vm4034_vm1, %v5846_v54 }
 0x5ff   : > { %5855 = vst.msk [vmem:[%s9890_s12 + $0x37] sm:$0x1] %vm4034_vm1, %v5847_v11 }
 0x600   : > { %5856 = vst.msk [vmem:[%s9890_s12 + $0x3f] sm:$0x1] %vm4034_vm1, %v5848_v36 }
 0x601   : > { %5400 = vst.msk [vmem:[%s9864_s9 + $0xc] sm:$0x1] %vm3878_vm4, %v5369_v25 }
 0x602   : > { %5401 = vst.msk [vmem:[%s9864_s9 + $0x1c] sm:$0x1] %vm3878_vm4, %v5386_v7 }
 0x603   : > { %5402 = vst.msk [vmem:[%s9864_s9 + $0x2c] sm:$0x1] %vm3878_vm4, %v5387_v18 }
 0x604   : > { %5403 = vst.msk [vmem:[%s9864_s9 + $0x3c] sm:$0x1] %vm3878_vm4, %v5388_v56 }
 0x605   : > { %5404 = vst.msk [vmem:[%s9864_s9 + $0x4c] sm:$0x1] %vm3878_vm4, %v5389_v38 }
 0x606   : > { %5405 = vst.msk [vmem:[%s9864_s9 + $0x5c] sm:$0x1] %vm3878_vm4, %v5390_v58 }
 0x607   : > { %5406 = vst.msk [vmem:[%s9864_s9 + $0x6c] sm:$0x1] %vm3878_vm4, %v5391_v34 }
 0x608   : > { %5407 = vst.msk [vmem:[%s9864_s9 + $0x7c] sm:$0x1] %vm3878_vm4, %v5392_v10 }
 0x609   : > { %5455 = vst.msk [vmem:[%s9864_s9 + $0xd] sm:$0x1] %vm3878_vm4, %v5424_v42 }
 0x60a   : > { %5456 = vst.msk [vmem:[%s9864_s9 + $0x1d] sm:$0x1] %vm3878_vm4, %v5441_v29 }
 0x60b   : > { %5457 = vst.msk [vmem:[%s9864_s9 + $0x2d] sm:$0x1] %vm3878_vm4, %v5442_v26 }
 0x60c   : > { %5458 = vst.msk [vmem:[%s9864_s9 + $0x3d] sm:$0x1] %vm3878_vm4, %v5443_v53 }
 0x60d   : > { %5459 = vst.msk [vmem:[%s9864_s9 + $0x4d] sm:$0x1] %vm3878_vm4, %v5444_v22 }
 0x60e   : > { %5460 = vst.msk [vmem:[%s9864_s9 + $0x5d] sm:$0x1] %vm3878_vm4, %v5445_v16 }
 0x60f   : > { %5461 = vst.msk [vmem:[%s9864_s9 + $0x6d] sm:$0x1] %vm3878_vm4, %v5446_v31 }
 0x610   : > { %5462 = vst.msk [vmem:[%s9864_s9 + $0x7d] sm:$0x1] %vm3878_vm4, %v5447_v21 }
 0x611   : > { %5652 = vst.msk [vmem:[%s9864_s9 + $0xe] sm:$0x1] %vm3878_vm4, %v5621_v4 }
 0x612   : > { %5653 = vst.msk [vmem:[%s9864_s9 + $0x1e] sm:$0x1] %vm3878_vm4, %v5638_v41 }
 0x613   : > { %5654 = vst.msk [vmem:[%s9864_s9 + $0x2e] sm:$0x1] %vm3878_vm4, %v5639_v5 }
 0x614   : > { %5655 = vst.msk [vmem:[%s9864_s9 + $0x3e] sm:$0x1] %vm3878_vm4, %v5640_v20 }
 0x615   : > { %5656 = vst.msk [vmem:[%s9864_s9 + $0x4e] sm:$0x1] %vm3878_vm4, %v5641_v50 }
 0x616   : > { %5657 = vst.msk [vmem:[%s9864_s9 + $0x5e] sm:$0x1] %vm3878_vm4, %v5642_v12 }
 0x617   : > { %5658 = vst.msk [vmem:[%s9864_s9 + $0x6e] sm:$0x1] %vm3878_vm4, %v5643_v51 }
 0x618   : > { %5659 = vst.msk [vmem:[%s9864_s9 + $0x7e] sm:$0x1] %vm3878_vm4, %v5644_v27 }
 0x619   : > { %5707 = vst.msk [vmem:[%s9864_s9 + $0xf] sm:$0x1] %vm3878_vm4, %v5676_v0 }
 0x61a   : > { %5708 = vst.msk [vmem:[%s9864_s9 + $0x1f] sm:$0x1] %vm3878_vm4, %v5693_v2 }
 0x61b   : > { %5709 = vst.msk [vmem:[%s9864_s9 + $0x2f] sm:$0x1] %vm3878_vm4, %v5694_v49 }
 0x61c   : > { %5710 = vst.msk [vmem:[%s9864_s9 + $0x3f] sm:$0x1] %vm3878_vm4, %v5695_v46 }
 0x61d   : > { %5711 = vst.msk [vmem:[%s9864_s9 + $0x4f] sm:$0x1] %vm3878_vm4, %v5696_v14 }
 0x61e   : > { %5712 = vst.msk [vmem:[%s9864_s9 + $0x5f] sm:$0x1] %vm3878_vm4, %v5697_v23 }
 0x61f   : > { %5713 = vst.msk [vmem:[%s9864_s9 + $0x6f] sm:$0x1] %vm3878_vm4, %v5698_v44 }
 0x620   : > { %5714 = vst.msk [vmem:[%s9864_s9 + $0x7f] sm:$0x1] %vm3878_vm4, %v5699_v1 }
 0x621   : > { %5800 = vst.msk [vmem:[%s9836_s17 + $0x7] sm:$0x1] %vm4034_vm1, %v5769_v63 }
 0x622   : > { %5801 = vst.msk [vmem:[%s9836_s17 + $0xf] sm:$0x1] %vm4034_vm1, %v5786_v15 }
 0x623   : > { %5802 = vst.msk [vmem:[%s9836_s17 + $0x17] sm:$0x1] %vm4034_vm1, %v5787_v28 }
 0x624   : > { %5803 = vst.msk [vmem:[%s9836_s17 + $0x1f] sm:$0x1] %vm4034_vm1, %v5788_v6 }
 0x625   : > { %5804 = vst.msk [vmem:[%s9836_s17 + $0x27] sm:$0x1] %vm4034_vm1, %v5789_v30 }
 0x626   : > { %5805 = vst.msk [vmem:[%s9836_s17 + $0x2f] sm:$0x1] %vm4034_vm1, %v5790_v55 }
 0x627   : > { %5806 = vst.msk [vmem:[%s9836_s17 + $0x37] sm:$0x1] %vm4034_vm1, %v5791_v17 }
 0x628   : > { %5807 = vst.msk [vmem:[%s9836_s17 + $0x3f] sm:$0x1] %vm4034_vm1, %v5792_v57 }
 0x629   : > { %s6737_s29 = sshll.u32 %s7170_s24, 1  ;;  %s6738_s30 = sshll.u32 %s7174_s25, 5 }
 0x62a   : > { %s5879_s20 = sadd.s32 %s6738_s30, %s6737_s29  ;;  %s5892_s19 = sshll.u32 %s9864_s9, 4  ;;  %s5893_s19 = int_to_ptr.vmem [resolvable:$true] %s5892_s19 }
 0x62b   : > { %s6739_s14 = sshll.u32 %s5879_s20, 3  ;;  %s11048_s4 = sld [smem:[#allocation158_spill]] }
 0x62c   : > { %s7189_s2 = smov 256   ;;  %s7190_s3 = smov 512  }
 0x62d   : > { %6822 = sst [smem:[#allocation10]] (%p7287_p3), %s7189_s2  ;;  %s7191_s7 = smov 2  }
 0x62e   : > { %6823 = sst [smem:[#allocation10 + $0x1]] (%p7287_p3), %s7190_s3  ;;  %s7192_s9 = smov 128  }
 0x62f   : > { %6824 = sst [smem:[#allocation10 + $0x2]] (%p7287_p3), %s7191_s7  ;;  %s7193_s29 = smov 8  }
 0x630   : > { %6825 = sst [smem:[#allocation10 + $0x3]] (%p7287_p3), %s7192_s9  ;;  %s7194_s0 = smov [#allocation9]  }
 0x631   : > { %s5881_s8 = scalar_lea.hbm %s11048_s4, %s6739_s14  ;;  %6826 = sst [smem:[#allocation10 + $0x4]] (%p7287_p3), %s7192_s9 }
 0x632   : > { %s5894_s16 = sshll.u32 %s5881_s8, 4  ;;  %6827 = sst [smem:[#allocation10 + $0x5]] (%p7287_p3), %s7193_s29  ;;  %s5895_s16 = int_to_ptr.hbm [resolvable:$true] %s5894_s16 }
 0x633   : > { %s7195_s1 = smov 0   ;;  %s6740_s2 = sshll.u32 %s7174_s25, 4 }
 0x634   : > { %6828 = dma.general (%p7287_p3), %s5893_s19, 2048, %s5895_s16, %s5858_s13, %s7194_s0, [#allocation10], %s7195_s1, 0  }
 0x635   : > { %s5923_s3 = sshll.u32 %s9836_s17, 4  ;;  %s5920_s30 = sadd.s32 %s7170_s24, %s6740_s2  ;;  %s5924_s3 = int_to_ptr.vmem [resolvable:$true] %s5923_s3 }
 0x636   : > { %s6741_s7 = sshll.u32 %s5920_s30, 3  ;;  %s7080_s17 = scalar_lea.hbm %s10483_s5, 256 }
 0x637   : > { %s5922_s8 = scalar_lea.hbm %s10483_s5, %s6741_s7  ;;  %s5940_s27 = scalar_lea.hbm %s10484_s6, %s6741_s7 }
 0x638   : > { %s5925_s9 = sshll.u32 %s5922_s8, 4  ;;  %s5926_s9 = int_to_ptr.hbm [resolvable:$true] %s5925_s9 }
 0x639   : > { %s7074_s13 = sshra.s32 %s5926_s9, 4  ;;  %s7075_s13 = int_to_ptr.hbm [resolvable:$true] %s7074_s13 }
 0x63a   : > { %s7076_s16 = scalar_lea.hbm %s7075_s13, 64  ;;  %p7081_p5 = scmp.lt.s32.totalorder %s7075_s13, %s10483_s5 }
 0x63b   : > { %p7077_p1 = scmp.ne.s32.totalorder %s7075_s13, %s7076_s16  ;;  %p7082_p6 = scmp.lt.s32.totalorder %s7080_s17, %s7076_s16 }
 0x63d   : > { %p7078_p2 = pnand %p7077_p1, %p7287_p3  ;;  %p7083_p7 = por %p7082_p6, %p7081_p5 }
 0x63f   : > { %p7079_p4 = pneg %p7078_p2 }
 0x641   : > { %p7084_p9 = pnand %p7083_p7, %p7079_p4 }
 0x643   : > { %7087 = shalt.err (!%p7084_p9)
}
 0x644   : > { %s7196_s4 = smov 128   ;;  %s7197_s1 = smov 256  }
 0x645   : > { %s7198_s2 = smov 8   ;;  %s11049_s30 = scalar_lea.sflag [#allocation7], %s10124_s18 }
 0x646   : > { %6829 = dma.vmem_to_hbm [thread:$0]  (%p7287_p3), %s5924_s3, 1024, %s5926_s9, %s11049_s30, %s7196_s4, %s7197_s1, %s7198_s2  }
 0x647   : > { %s5943_s7 = sshll.u32 %s5940_s27, 4  ;;  %s5941_s20 = sshll.u32 %s9890_s12, 4  ;;  %s5942_s20 = int_to_ptr.vmem [resolvable:$true] %s5941_s20  ;;  %s5944_s7 = int_to_ptr.hbm [resolvable:$true] %s5943_s7 }
 0x648   : > { %s7102_s14 = sshra.s32 %s5944_s7, 4  ;;  %s7108_s16 = scalar_lea.hbm %s10484_s6, 256  ;;  %s7103_s14 = int_to_ptr.hbm [resolvable:$true] %s7102_s14 }
 0x649   : > { %s7104_s8 = scalar_lea.hbm %s7103_s14, 64  ;;  %p7109_p13 = scmp.lt.s32.totalorder %s7103_s14, %s10484_s6 }
 0x64a   : > { %p7105_p10 = scmp.ne.s32.totalorder %s7103_s14, %s7104_s8  ;;  %p7110_p0 = scmp.lt.s32.totalorder %s7108_s16, %s7104_s8 }
 0x64c   : > { %p7106_p11 = pnand %p7105_p10, %p7287_p3  ;;  %p7111_p1 = por %p7110_p0, %p7109_p13 }
 0x64e   : > { %p7107_p12 = pneg %p7106_p11 }
 0x650   : > { %p7112_p2 = pnand %p7111_p1, %p7107_p12 }
 0x652   : > { %7115 = shalt.err (!%p7112_p2)
}
 0x653   : > { %s11050_s27 = smov %s11049_s30 }
 0x654   : > { %6830 = dma.vmem_to_hbm [thread:$0]  (%p7287_p3), %s5942_s20, 1024, %s5944_s7, %s11050_s27, %s7196_s4, %s7197_s1, %s7198_s2  }
 0x655 PF: > { %p6844_p4 = scmp.ge.s32.totalorder %s7186_s28, 2  ;;  %s5958_s12 = sand.u32 1, %s7158_s21  }
 0x656   : > { %s5959_s3 = scalar_lea.sflag [#allocation5], %s5958_s12 }
 0x657   : > { %p6835_p5 = pnand %p6844_p4, %p7298_p8 }
 0x659   : > { %p6836_p6 = pneg %p6835_p5 }
 0x65b   : > { %7149 = dma.done.wait (%p6836_p6), %s5959_s3, 2048  }
 0x65c   : > { %7151 = vsyncadd (%p6836_p6), %s5959_s3, 4294965248  ;;  %s11051_s9 = sadd.s32 4294967294, %s7186_s28  }
 0x65d   : > { %s5968_s17 = sand.u32 1, %s11051_s9  }
 0x65e   : > { %s5969_s19 = scalar_lea.sflag [#allocation7], %s5968_s17 }
 0x65f   : > { %7153 = dma.done.wait (%p6836_p6), %s5969_s19, 2048  }
 0x660   : > { %7155 = vsyncadd (%p6836_p6), %s5969_s19, 4294965248  ;;  %s23_s28 = sadd.s32 1, %s7186_s28   ;;  %s11052_s25 = sld [smem:[#allocation13_spill]] }
 0x661   : > { %p20_p3 = scmp.ge.s32.totalorder %s23_s28, 6   ;;  %s11053_s10 = sld [smem:[#allocation14_spill]] }
 0x662   : > { %s11054_s27 = sld [smem:[#allocation15_spill]]  ;;  %s11055_s21 = smov %s7162_s22 }
 0x663   : > { %s11056_s22 = smov %s7166_s23  ;;  %s11057_s23 = smov %s7307_s15 }
 0x664   : > { %s11058_s24 = smov %s7178_s26  ;;  %22 = sbr.rel (!%p20_p3) target bundleno = 13 (0xd), region = 125 }
 0x667   : > { %s11059_s26 = smov %s11053_s10 }
 0x669   :  { %5985 = vsyncpa [#allocation5], 1 }
 0x66a   :  { %5987 = vsyncpa [#allocation5 + $0x1], 1 }
 0x66b   :  { %5988 = vsyncpa [#allocation7], 1 }
 0x66c   :  { %5990 = vsyncpa [#allocation7 + $0x1], 1 }

</bundles_post_ra>
